<compile_context>
chip_gen: v7x
topology: tpu7x:2x2x1
jax: 0.10.0
libtpu: 0.0.40
codegen_flags: <defaults>
</compile_context>

<pallas_src>
import functools

import jax
import jax.numpy as jnp
from jax import lax
from jax.experimental import pallas as pl
from jax.experimental.pallas import tpu as pltpu

CHANNEL = 32
KSIZE = 7
PAD = 3


def _conv_relu_kernel(x_ref, w_ref, b_ref, o_ref, *, H, WC):
    # x_ref: (1, H+6, W*C)   row-padded, lane-dense activation (one batch elem)
    # w_ref: (7, W*C, W*C)   banded weights (kw taps + W zero-padding folded in)
    # b_ref: (1, W*C)        bias replicated per output column
    # o_ref: (1, H, W*C)     lane-dense output slab
    #
    # Bias-initialised f32 accumulator: (H, W*C) = (16, 512) -> only 8 vregs.
    acc = jnp.broadcast_to(b_ref[...], (H, WC)).astype(jnp.float32)

    # 7 big MXU dots (K = W*C = 512, N = W*C = 512), clean accumulation chain.
    # The only data movement per tap is one contiguous 6-row-halo band load.
    for kh in range(KSIZE):
        band = x_ref[0, kh:kh + H, :]                      # (H, W*C)
        acc = acc + jnp.dot(band, w_ref[kh],
                            preferred_element_type=jnp.float32)

    # ReLU + full-width (lane-dense, unmasked) store.
    o_ref[...] = jnp.maximum(acc, 0.0)[None].astype(o_ref.dtype)


def _build_banded_weights(w_hwio, W):
    """(7, 7, Ci, Co) HWIO weights -> (7, W*Ci, W*Co) banded (Toeplitz) weights.

    big[kh, u*Ci + ci, w*Co + co] = w_hwio[kh, kw, ci, co] with u = w + kw - PAD,
    and zero wherever u falls outside [0, W) -- i.e. the conv's W zero-padding is
    folded into the weights, so the kernel needs no kw shifts and no W padding.
    """
    KH, KW, Ci, Co = w_hwio.shape
    big = jnp.zeros((KH, W * Ci, W * Co), w_hwio.dtype)
    for w in range(W):
        for kw in range(KW):
            u = w + kw - PAD
            if 0 <= u < W:
                big = big.at[:, u * Ci:(u + 1) * Ci,
                             w * Co:(w + 1) * Co].set(w_hwio[:, kw])
    return big


@jax.jit
def repeatblock_forward(x_nchw, w_oihw, bias):
    """Pallas implementation of Repeatblock.forward.

    x_nchw: (N, 32, H, W) float32   (PyTorch NCHW convention)
    w_oihw: (32, 32, 7, 7) float32  (PyTorch Conv2d weight layout)
    bias:   (32,) float32
    returns (N, 32, H, W) float32
    """
    N, C, H, W = x_nchw.shape
    assert C == CHANNEL
    WC = W * C
    Hp = H + 2 * PAD

    # Glue (would be hoisted/kept resident across repeats of the block):
    # NCHW -> NHWC -> lane-dense (N, H, W*C); pad only the 3-row H halo
    # (W padding lives inside the banded weights).
    x_flat = jnp.transpose(x_nchw, (0, 2, 3, 1)).reshape(N, H, WC)
    x_flat = jnp.pad(x_flat, ((0, 0), (PAD, PAD), (0, 0)))        # (N, Hp, W*C)

    w_hwio = jnp.transpose(w_oihw, (2, 3, 1, 0))                  # (7, 7, Ci, Co)
    w_band = _build_banded_weights(w_hwio, W)                     # (7, W*C, W*C)
    b_flat = jnp.tile(bias, (W,)).reshape(1, WC)                  # bias[o] at w*C+o

    kernel = functools.partial(_conv_relu_kernel, H=H, WC=WC)

    out_flat = pl.pallas_call(
        kernel,
        out_shape=jax.ShapeDtypeStruct((N, H, WC), jnp.float32),
        grid_spec=pltpu.PrefetchScalarGridSpec(
            num_scalar_prefetch=0,
            grid=(N,),
            in_specs=[
                pl.BlockSpec((1, Hp, WC), lambda n: (n, 0, 0)),
                pl.BlockSpec((KSIZE, WC, WC), lambda n: (0, 0, 0)),  # resident
                pl.BlockSpec((1, WC), lambda n: (0, 0)),
            ],
            out_specs=pl.BlockSpec((1, H, WC), lambda n: (n, 0, 0)),
        ),
        compiler_params=pltpu.CompilerParams(
            dimension_semantics=("parallel",),        # batch axis across TCs (v7x)
            vmem_limit_bytes=32 * 1024 * 1024,        # headroom for resident weights
        ),
    )(x_flat, w_band, b_flat)

    # Back to the module's NCHW interface.
    return jnp.transpose(out_flat.reshape(N, H, W, C), (0, 3, 1, 2))


def _reference_forward(x_nchw, w_oihw, bias):
    # Pure-JAX reference (XLA conv) for a correctness check.
    out = lax.conv_general_dilated(
        x_nchw, w_oihw,
        window_strides=(1, 1),
        padding=((PAD, PAD), (PAD, PAD)),
        dimension_numbers=("NCHW", "OIHW", "NCHW"),
    )
    out = out + bias.reshape(1, -1, 1, 1)
    return jnp.maximum(out, 0.0)


if __name__ == "__main__":
    key = jax.random.PRNGKey(0)
    kx, kw, kb = jax.random.split(key, 3)

    # Small shapes consistent with the module: batch=2, channel=32 (fixed by
    # Repeatblock.__init__), spatial=16.
    N, C, H, W = 2, CHANNEL, 16, 16
    x = jax.random.normal(kx, (N, C, H, W), dtype=jnp.float32)

    # Deterministic parameter init (PyTorch Conv2d-like uniform fan-in scaling).
    fan_in = C * KSIZE * KSIZE
    bound = 1.0 / jnp.sqrt(jnp.float32(fan_in))
    w = jax.random.uniform(kw, (C, C, KSIZE, KSIZE), jnp.float32, -bound, bound)
    b = jax.random.uniform(kb, (C,), jnp.float32, -bound, bound)

    out = jax.block_until_ready(repeatblock_forward(x, w, b))
    ref = jax.block_until_ready(_reference_forward(x, w, b))

    assert out.shape == (N, C, H, W)
    err = float(jnp.max(jnp.abs(out - ref)))
    assert jnp.allclose(out, ref, atol=1e-3, rtol=1e-3), f"max abs err = {err}"

    print("KERNEL_OK")
</pallas_src>

<mosaic_0001>
module attributes {stable_mosaic.version = 11 : i64} {
  func.func @_conv_relu_kernel(%arg0: i32, %arg1: memref<1x22x512xf32, #tpu.memory_space<vmem>>, %arg2: memref<7x512x512xf32, #tpu.memory_space<vmem>>, %arg3: memref<1x512xf32, #tpu.memory_space<vmem>>, %arg4: memref<1x16x512xf32, #tpu.memory_space<vmem>>) attributes {dimension_semantics = [#tpu.dimension_semantics<parallel>], iteration_bounds = array<i64: 2>, scalar_prefetch = 0 : i64, scratch_operands = 0 : i64, tpu.core_type = #tpu.core_type<tc>, window_params = [{transform_indices = @transform_0, window_bounds = array<i64: 1, 22, 512>}, {pipeline_mode = #tpu.pipeline_mode<synchronous>, transform_indices = @transform_1, window_bounds = array<i64: 7, 512, 512>}, {pipeline_mode = #tpu.pipeline_mode<synchronous>, transform_indices = @transform_2, window_bounds = array<i64: 1, 512>}, {transform_indices = @transform_3, window_bounds = array<i64: 1, 16, 512>}]} {
    %c0 = arith.constant 0 : index
    %c0_0 = arith.constant 0 : index
    %0 = vector.load %arg3[%c0, %c0_0] : memref<1x512xf32, #tpu.memory_space<vmem>>, vector<1x512xf32>
    %1 = vector.shape_cast %0 : vector<1x512xf32> to vector<1x512xf32>
    %2 = vector.broadcast %1 : vector<1x512xf32> to vector<16x512xf32>
    %c0_1 = arith.constant 0 : index
    %c0_2 = arith.constant 0 : index
    %c0_3 = arith.constant 0 : index
    %3 = vector.load %arg1[%c0_1, %c0_2, %c0_3] : memref<1x22x512xf32, #tpu.memory_space<vmem>>, vector<1x16x512xf32>
    %4 = vector.shape_cast %3 : vector<1x16x512xf32> to vector<16x512xf32>
    %c0_4 = arith.constant 0 : index
    %c0_5 = arith.constant 0 : index
    %c0_6 = arith.constant 0 : index
    %5 = vector.load %arg2[%c0_4, %c0_5, %c0_6] : memref<7x512x512xf32, #tpu.memory_space<vmem>>, vector<1x512x512xf32>
    %6 = vector.shape_cast %5 : vector<1x512x512xf32> to vector<512x512xf32>
    %cst = arith.constant dense<0.000000e+00> : vector<16x512xf32>
    %7 = tpu.matmul %4, %6, %cst {dimension_numbers = #tpu.dot_dimension_numbers<[1], [0], [0], [1], [0, 0, 1, 1], [], []>} : vector<16x512xf32>, vector<512x512xf32>, vector<16x512xf32> -> vector<16x512xf32>
    %8 = arith.addf %2, %7 : vector<16x512xf32>
    %c0_7 = arith.constant 0 : index
    %c1 = arith.constant 1 : index
    %c0_8 = arith.constant 0 : index
    %9 = vector.load %arg1[%c0_7, %c1, %c0_8] : memref<1x22x512xf32, #tpu.memory_space<vmem>>, vector<1x16x512xf32>
    %10 = vector.shape_cast %9 : vector<1x16x512xf32> to vector<16x512xf32>
    %c1_9 = arith.constant 1 : index
    %c0_10 = arith.constant 0 : index
    %c0_11 = arith.constant 0 : index
    %11 = vector.load %arg2[%c1_9, %c0_10, %c0_11] : memref<7x512x512xf32, #tpu.memory_space<vmem>>, vector<1x512x512xf32>
    %12 = vector.shape_cast %11 : vector<1x512x512xf32> to vector<512x512xf32>
    %cst_12 = arith.constant dense<0.000000e+00> : vector<16x512xf32>
    %13 = tpu.matmul %10, %12, %cst_12 {dimension_numbers = #tpu.dot_dimension_numbers<[1], [0], [0], [1], [0, 0, 1, 1], [], []>} : vector<16x512xf32>, vector<512x512xf32>, vector<16x512xf32> -> vector<16x512xf32>
    %14 = arith.addf %8, %13 : vector<16x512xf32>
    %c0_13 = arith.constant 0 : index
    %c2 = arith.constant 2 : index
    %c0_14 = arith.constant 0 : index
    %15 = vector.load %arg1[%c0_13, %c2, %c0_14] : memref<1x22x512xf32, #tpu.memory_space<vmem>>, vector<1x16x512xf32>
    %16 = vector.shape_cast %15 : vector<1x16x512xf32> to vector<16x512xf32>
    %c2_15 = arith.constant 2 : index
    %c0_16 = arith.constant 0 : index
    %c0_17 = arith.constant 0 : index
    %17 = vector.load %arg2[%c2_15, %c0_16, %c0_17] : memref<7x512x512xf32, #tpu.memory_space<vmem>>, vector<1x512x512xf32>
    %18 = vector.shape_cast %17 : vector<1x512x512xf32> to vector<512x512xf32>
    %cst_18 = arith.constant dense<0.000000e+00> : vector<16x512xf32>
    %19 = tpu.matmul %16, %18, %cst_18 {dimension_numbers = #tpu.dot_dimension_numbers<[1], [0], [0], [1], [0, 0, 1, 1], [], []>} : vector<16x512xf32>, vector<512x512xf32>, vector<16x512xf32> -> vector<16x512xf32>
    %20 = arith.addf %14, %19 : vector<16x512xf32>
    %c0_19 = arith.constant 0 : index
    %c3 = arith.constant 3 : index
    %c0_20 = arith.constant 0 : index
    %21 = vector.load %arg1[%c0_19, %c3, %c0_20] : memref<1x22x512xf32, #tpu.memory_space<vmem>>, vector<1x16x512xf32>
    %22 = vector.shape_cast %21 : vector<1x16x512xf32> to vector<16x512xf32>
    %c3_21 = arith.constant 3 : index
    %c0_22 = arith.constant 0 : index
    %c0_23 = arith.constant 0 : index
    %23 = vector.load %arg2[%c3_21, %c0_22, %c0_23] : memref<7x512x512xf32, #tpu.memory_space<vmem>>, vector<1x512x512xf32>
    %24 = vector.shape_cast %23 : vector<1x512x512xf32> to vector<512x512xf32>
    %cst_24 = arith.constant dense<0.000000e+00> : vector<16x512xf32>
    %25 = tpu.matmul %22, %24, %cst_24 {dimension_numbers = #tpu.dot_dimension_numbers<[1], [0], [0], [1], [0, 0, 1, 1], [], []>} : vector<16x512xf32>, vector<512x512xf32>, vector<16x512xf32> -> vector<16x512xf32>
    %26 = arith.addf %20, %25 : vector<16x512xf32>
    %c0_25 = arith.constant 0 : index
    %c4 = arith.constant 4 : index
    %c0_26 = arith.constant 0 : index
    %27 = vector.load %arg1[%c0_25, %c4, %c0_26] : memref<1x22x512xf32, #tpu.memory_space<vmem>>, vector<1x16x512xf32>
    %28 = vector.shape_cast %27 : vector<1x16x512xf32> to vector<16x512xf32>
    %c4_27 = arith.constant 4 : index
    %c0_28 = arith.constant 0 : index
    %c0_29 = arith.constant 0 : index
    %29 = vector.load %arg2[%c4_27, %c0_28, %c0_29] : memref<7x512x512xf32, #tpu.memory_space<vmem>>, vector<1x512x512xf32>
    %30 = vector.shape_cast %29 : vector<1x512x512xf32> to vector<512x512xf32>
    %cst_30 = arith.constant dense<0.000000e+00> : vector<16x512xf32>
    %31 = tpu.matmul %28, %30, %cst_30 {dimension_numbers = #tpu.dot_dimension_numbers<[1], [0], [0], [1], [0, 0, 1, 1], [], []>} : vector<16x512xf32>, vector<512x512xf32>, vector<16x512xf32> -> vector<16x512xf32>
    %32 = arith.addf %26, %31 : vector<16x512xf32>
    %c0_31 = arith.constant 0 : index
    %c5 = arith.constant 5 : index
    %c0_32 = arith.constant 0 : index
    %33 = vector.load %arg1[%c0_31, %c5, %c0_32] : memref<1x22x512xf32, #tpu.memory_space<vmem>>, vector<1x16x512xf32>
    %34 = vector.shape_cast %33 : vector<1x16x512xf32> to vector<16x512xf32>
    %c5_33 = arith.constant 5 : index
    %c0_34 = arith.constant 0 : index
    %c0_35 = arith.constant 0 : index
    %35 = vector.load %arg2[%c5_33, %c0_34, %c0_35] : memref<7x512x512xf32, #tpu.memory_space<vmem>>, vector<1x512x512xf32>
    %36 = vector.shape_cast %35 : vector<1x512x512xf32> to vector<512x512xf32>
    %cst_36 = arith.constant dense<0.000000e+00> : vector<16x512xf32>
    %37 = tpu.matmul %34, %36, %cst_36 {dimension_numbers = #tpu.dot_dimension_numbers<[1], [0], [0], [1], [0, 0, 1, 1], [], []>} : vector<16x512xf32>, vector<512x512xf32>, vector<16x512xf32> -> vector<16x512xf32>
    %38 = arith.addf %32, %37 : vector<16x512xf32>
    %c0_37 = arith.constant 0 : index
    %c6 = arith.constant 6 : index
    %c0_38 = arith.constant 0 : index
    %39 = vector.load %arg1[%c0_37, %c6, %c0_38] : memref<1x22x512xf32, #tpu.memory_space<vmem>>, vector<1x16x512xf32>
    %40 = vector.shape_cast %39 : vector<1x16x512xf32> to vector<16x512xf32>
    %c6_39 = arith.constant 6 : index
    %c0_40 = arith.constant 0 : index
    %c0_41 = arith.constant 0 : index
    %41 = vector.load %arg2[%c6_39, %c0_40, %c0_41] : memref<7x512x512xf32, #tpu.memory_space<vmem>>, vector<1x512x512xf32>
    %42 = vector.shape_cast %41 : vector<1x512x512xf32> to vector<512x512xf32>
    %cst_42 = arith.constant dense<0.000000e+00> : vector<16x512xf32>
    %43 = tpu.matmul %40, %42, %cst_42 {dimension_numbers = #tpu.dot_dimension_numbers<[1], [0], [0], [1], [0, 0, 1, 1], [], []>} : vector<16x512xf32>, vector<512x512xf32>, vector<16x512xf32> -> vector<16x512xf32>
    %44 = arith.addf %38, %43 : vector<16x512xf32>
    %cst_43 = arith.constant 0.000000e+00 : f32
    %45 = vector.broadcast %cst_43 : f32 to vector<16x512xf32>
    %46 = arith.maximumf %44, %45 : vector<16x512xf32>
    %47 = vector.shape_cast %46 : vector<16x512xf32> to vector<1x16x512xf32>
    %c0_44 = arith.constant 0 : index
    %c0_45 = arith.constant 0 : index
    %c0_46 = arith.constant 0 : index
    %48 = vector.load %arg4[%c0_44, %c0_45, %c0_46] : memref<1x16x512xf32, #tpu.memory_space<vmem>>, vector<1x16x512xf32>
    tpu.vector_store %arg4[%c0_44, %c0_45, %c0_46], %47 {strides = array<i32>} : memref<1x16x512xf32, #tpu.memory_space<vmem>>, vector<1x16x512xf32>,
    return
  }
  func.func @transform_0(%arg0: i32) -> (i32, i32, i32) {
    %c0_i32 = arith.constant 0 : i32
    %c0_i32_0 = arith.constant 0 : i32
    %c0_i32_1 = arith.constant 0 : i32
    return %arg0, %c0_i32, %c0_i32_0 : i32, i32, i32
  }
  func.func @transform_1(%arg0: i32) -> (i32, i32, i32) {
    %c0_i32 = arith.constant 0 : i32
    %c0_i32_0 = arith.constant 0 : i32
    %c0_i32_1 = arith.constant 0 : i32
    %c0_i32_2 = arith.constant 0 : i32
    return %c0_i32, %c0_i32_0, %c0_i32_1 : i32, i32, i32
  }
  func.func @transform_2(%arg0: i32) -> (i32, i32) {
    %c0_i32 = arith.constant 0 : i32
    %c0_i32_0 = arith.constant 0 : i32
    %c0_i32_1 = arith.constant 0 : i32
    return %c0_i32, %c0_i32_0 : i32, i32
  }
  func.func @transform_3(%arg0: i32) -> (i32, i32, i32) {
    %c0_i32 = arith.constant 0 : i32
    %c0_i32_0 = arith.constant 0 : i32
    %c0_i32_1 = arith.constant 0 : i32
    return %arg0, %c0_i32, %c0_i32_0 : i32, i32, i32
  }
}

</mosaic_0001>

<bundles_post_ra>
// kernel: tile.8
= control target key start
LH: loop header
LB: loop body
LE: loop exit
PB: predicated region body
PF: predicated region fallthrough
CT: control target
= control target key end

     0   :  { %s28_s0 = inlined_call_operand.vmem [shape: f32[32], index: 0, kind: input, shape index: {}]   ;;  %s29_s1 = inlined_call_operand.vmem [shape: f32[16,32], index: 1, kind: output, shape index: {}]  }
   0x1   :  { %v4_v0 = vld [vmem:[%s28_s0] ss:$0 sm:$0xff] }
   0x2   :  { %5 = vst [vmem:[%s29_s1] sm:$0xff] %v4_v0  ;;  %8 = vst [vmem:[%s29_s1 + $0x8] sm:$0xff] %v4_v0 }

// kernel: tile.9
= control target key start
LH: loop header
LB: loop body
LE: loop exit
PB: predicated region body
PF: predicated region fallthrough
CT: control target
= control target key end

     0   :  { %s57_s8 = smov 96   ;;  %vm3_vm0 = vcmask 261120   ;;  %s59_s15 = smov 64   ;;  %vm9_vm1 = vcmask 1048320   ;;  %vm15_vm2 = vcmask 785920   ;;  %vm21_vm3 = vcmask 523520   ;;  %s94_s0 = inlined_call_operand.vmem [shape: f32[16,32], index: 0, kind: input, shape index: {}]   ;;  %s95_s1 = inlined_call_operand.vmem [shape: f32[1,512], index: 1, kind: output, shape index: {}]  }
   0x1   :  { %v48_v0 = vld [vmem:[%s94_s0 + $0x3] ss:$4 sm:$0xf]   ;;  %v49_v1 = vld [vmem:[%s94_s0 + $0x2] ss:$4 sm:$0xf]  }
   0x2   :  { %7 = vrot.lane.b32.xlu0 %v48_v0, %s57_s8  ;;  %v50_v2 = vld [vmem:[%s94_s0 + $0x1] ss:$4 sm:$0xf]   ;;  %v2_v3 = vld [vmem:[%s94_s0] ss:$4 sm:$0xf]  }
   0x3   :  { %s58_s0 = smov 32   ;;  %4 = vst.msk [vmem:[#allocation0] ss:$8 sm:$0xf] %vm3_vm0, %v2_v3  }
   0x4   :  { %19 = vrot.lane.b32.xlu1 %v50_v2, %s58_s0 }
   0x6   :  { %13 = vrot.lane.b32.xlu0 %v49_v1, %s59_s15 }
  0x74   :  { %v8_v4 = vpop.permute.xlu0 %7  }
  0x75   :  { %10 = vst.msk [vmem:[#allocation0] ss:$8 sm:$0xf] %vm9_vm1, %v8_v4  }
  0x76   :  { %v20_v5 = vpop.permute.xlu1 %19  }
  0x78   :  { %v14_v6 = vpop.permute.xlu0 %13  }
  0x79   :  { %16 = vst.msk [vmem:[#allocation0] ss:$8 sm:$0xf] %vm15_vm2, %v14_v6  }
  0x7a   :  { %22 = vst.msk [vmem:[#allocation0] ss:$8 sm:$0xf] %vm21_vm3, %v20_v5  }
  0x81   :  { %v26_v7 = vld [vmem:[#allocation0] sm:$0x1]  ;;  %v30_v8 = vld [vmem:[#allocation0 + $0x8] sm:$0x1]  ;;  %v35_v9 = vld [vmem:[#allocation0 + $0x10] sm:$0x1] }
  0x82   :  { %28 = vst [vmem:[%s95_s1] sm:$0x1] %v26_v7  ;;  %51 = vst [vmem:[%s95_s1 + $0x1] sm:$0x1] %v30_v8  ;;  %v41_v10 = vld [vmem:[#allocation0 + $0x18] sm:$0x1] }
  0x83   :  { %52 = vst [vmem:[%s95_s1 + $0x2] sm:$0x1] %v35_v9  ;;  %53 = vst [vmem:[%s95_s1 + $0x3] sm:$0x1] %v41_v10 }

// kernel: repeatblock_forward.1
= control target key start
LH: loop header
LB: loop body
LE: loop exit
PB: predicated region body
PF: predicated region fallthrough
CT: control target
= control target key end

     0   :  { %s8069_s12 = smov 0   ;;  %s13699_s0 = inlined_call_operand.vmem [shape: f32[2,22,512], index: 0, kind: input, shape index: {}]   ;;  %s13700_s1 = inlined_call_operand.vmem [shape: f32[7,512,512], index: 1, kind: input, shape index: {}]   ;;  %s13701_s2 = inlined_call_operand.vmem [shape: f32[1,512], index: 2, kind: input, shape index: {}]   ;;  %s13702_s3 = inlined_call_operand.vmem [shape: f32[2,16,512], index: 3, kind: output, shape index: {}]  }
   0x1 LB: > { %s4560_s13 = sadd.s32 4294967295, %s8047_s12   ;;  %p4564_p0 = scmp.ge.s32.totalorder %s8047_s12, 1  ;;  %s8047_s12 = sphi %s8069_s12, %s13_s12  }
   0x2   : > { %p137_p1 = scmp.lt.s32.totalorder %s8047_s12, 3 }
   0x4   : > { %p138_p2 = pnand %p4564_p0, %p137_p1 }
   0x5   : > { %v202_v0 = vld [vmem:[%s13700_s1 + $0x8] sm:$0xff] (!%p138_p2)  ;;  %v204_v2 = vld [vmem:[%s13700_s1 + $0x18] sm:$0xff] (!%p138_p2)  ;;  %v201_v5 = vld [vmem:[%s13700_s1] sm:$0xff] (!%p138_p2)  ;;  %p8283_p3 = scmp.lt.s32.totalorder (!%p138_p2), %s4560_s13, 1  ;;  %vm1054_vm0 = vcmask (!%p138_p2), 1046528   ;;  %vm1672_vm1 = vcmask (!%p138_p2), 1045504  }
   0x6   : > { %141 = sbr.rel (%p138_p2) target bundleno = 1128 (0x468), region = 32  ;;  %v206_v1 = vld [vmem:[%s13700_s1 + $0x28] sm:$0xff] (!%p138_p2)  ;;  %v208_v4 = vld [vmem:[%s13700_s1 + $0x38] sm:$0xff] (!%p138_p2)  ;;  %v205_v6 = vld [vmem:[%s13700_s1 + $0x20] sm:$0xff] (!%p138_p2)  ;;  %vm2290_vm2 = vcmask (!%p138_p2), 1044480   ;;  %vm2908_vm3 = vcmask (!%p138_p2), 1043456  }
   0x7   : > { %v6107_v3 = vpack.c.bf16 (!%p138_p2), %v206_v1, %v202_v0  ;;  %v6235_v7 = vpack.c.bf16 (!%p138_p2), %v208_v4, %v204_v2  ;;  %v6109_v8 = vpack.c.bf16 (!%p138_p2), %v205_v6, %v201_v5  ;;  %v203_v9 = vld [vmem:[%s13700_s1 + $0x10] sm:$0xff] (!%p138_p2)  ;;  %v210_v11 = vld [vmem:[%s13700_s1 + $0x48] sm:$0xff] (!%p138_p2)  ;;  %v212_v14 = vld [vmem:[%s13700_s1 + $0x58] sm:$0xff] (!%p138_p2)  ;;  %vm3526_vm4 = vcmask (!%p138_p2), 1042432  }
   0x8   : > { %v207_v10 = vld [vmem:[%s13700_s1 + $0x30] sm:$0xff] (!%p138_p2)  ;;  %v214_v13 = vld [vmem:[%s13700_s1 + $0x68] sm:$0xff] (!%p138_p2)  ;;  %v216_v15 = vld [vmem:[%s13700_s1 + $0x78] sm:$0xff] (!%p138_p2)  ;;  %vm4144_vm5 = vcmask (!%p138_p2), 1041408  }
   0x9   : > { %6108 = vmatprep.subr.bf16.mxu0 (!%p138_p2), %v6107_v3  ;;  %v6237_v12 = vpack.c.bf16 (!%p138_p2), %v207_v10, %v203_v9  ;;  %6236 = vmatprep.subr.bf16.mxu1 (!%p138_p2), %v6235_v7  ;;  %v6111_v16 = vpack.c.bf16 (!%p138_p2), %v214_v13, %v210_v11  ;;  %v6239_v17 = vpack.c.bf16 (!%p138_p2), %v216_v15, %v212_v14  ;;  %v209_v18 = vld [vmem:[%s13700_s1 + $0x40] sm:$0xff] (!%p138_p2)  ;;  %v211_v20 = vld [vmem:[%s13700_s1 + $0x50] sm:$0xff] (!%p138_p2)  ;;  %v218_v23 = vld [vmem:[%s13700_s1 + $0x88] sm:$0xff] (!%p138_p2) }
   0xa   : > { %6110 = vmatpush1.bf16.msra.mxu0 (!%p138_p2), %v6109_v8  ;;  %v213_v19 = vld [vmem:[%s13700_s1 + $0x60] sm:$0xff] (!%p138_p2)  ;;  %v215_v22 = vld [vmem:[%s13700_s1 + $0x70] sm:$0xff] (!%p138_p2)  ;;  %v222_v24 = vld [vmem:[%s13700_s1 + $0xa8] sm:$0xff] (!%p138_p2) }
   0xb   : > { %6238 = vmatpush1.bf16.msra.mxu1 (!%p138_p2), %v6237_v12  ;;  %v6113_v21 = vpack.c.bf16 (!%p138_p2), %v213_v19, %v209_v18  ;;  %6112 = vmatprep.subr.bf16.mxu0 (!%p138_p2), %v6111_v16  ;;  %v6241_v25 = vpack.c.bf16 (!%p138_p2), %v215_v22, %v211_v20  ;;  %v6115_v26 = vpack.c.bf16 (!%p138_p2), %v222_v24, %v218_v23  ;;  %v220_v27 = vld [vmem:[%s13700_s1 + $0x98] sm:$0xff] (!%p138_p2)  ;;  %v217_v29 = vld [vmem:[%s13700_s1 + $0x80] sm:$0xff] (!%p138_p2)  ;;  %v219_v32 = vld [vmem:[%s13700_s1 + $0x90] sm:$0xff] (!%p138_p2) }
   0xc   : > { %6240 = vmatprep.subr.bf16.mxu1 (!%p138_p2), %v6239_v17  ;;  %v224_v28 = vld [vmem:[%s13700_s1 + $0xb8] sm:$0xff] (!%p138_p2)  ;;  %v221_v31 = vld [vmem:[%s13700_s1 + $0xa0] sm:$0xff] (!%p138_p2)  ;;  %v223_v33 = vld [vmem:[%s13700_s1 + $0xb0] sm:$0xff] (!%p138_p2) }
   0xd   : > { %v6243_v30 = vpack.c.bf16 %v224_v28, %v220_v27  ;;  %v6117_v34 = vpack.c.bf16 %v221_v31, %v217_v29  ;;  %v226_v35 = vld [vmem:[%s13700_s1 + $0xc8] sm:$0xff]  ;;  %v228_v37 = vld [vmem:[%s13700_s1 + $0xd8] sm:$0xff]  ;;  %v6245_v38 = vpack.c.bf16 %v223_v33, %v219_v32  ;;  %v225_v41 = vld [vmem:[%s13700_s1 + $0xc0] sm:$0xff]  ;;  %s13705_s13 = smov (!%p8283_p3, %s4560_s13), 1 }
   0xe   : > { %6114 = vmatpush1.bf16.msra.mxu0 %v6113_v21  ;;  %v230_v36 = vld [vmem:[%s13700_s1 + $0xe8] sm:$0xff]  ;;  %v232_v40 = vld [vmem:[%s13700_s1 + $0xf8] sm:$0xff]  ;;  %v229_v42 = vld [vmem:[%s13700_s1 + $0xe0] sm:$0xff]  ;;  %s8011_s6 = smul.u32 96, %s13705_s13  ;;  %s6106_s20 = sshll.u32 %s13705_s13, 6 }
   0xf   : > { %6242 = vmatpush1.bf16.msra.mxu1 %v6241_v25  ;;  %6116 = vmatprep.subr.bf16.mxu0 %v6115_v26  ;;  %v6119_v39 = vpack.c.bf16 %v230_v36, %v226_v35  ;;  %v6247_v43 = vpack.c.bf16 %v232_v40, %v228_v37  ;;  %v227_v44 = vld [vmem:[%s13700_s1 + $0xd0] sm:$0xff]  ;;  %v234_v46 = vld [vmem:[%s13700_s1 + $0x108] sm:$0xff]  ;;  %v236_v48 = vld [vmem:[%s13700_s1 + $0x118] sm:$0xff]  ;;  %v6121_v50 = vpack.c.bf16 %v229_v42, %v225_v41  ;;  %s170_s23 = scalar_lea.vmem %s13702_s3, %s6106_s20 }
  0x10   : > { %6244 = vmatprep.subr.bf16.mxu1 %v6243_v30  ;;  %v231_v45 = vld [vmem:[%s13700_s1 + $0xf0] sm:$0xff]  ;;  %v238_v47 = vld [vmem:[%s13700_s1 + $0x128] sm:$0xff]  ;;  %v240_v49 = vld [vmem:[%s13700_s1 + $0x138] sm:$0xff]  ;;  %s8369_s27 = scalar_lea.vmem %s13699_s0, %s8011_s6 }
  0x11   : > { %v6249_v51 = vpack.c.bf16 %v231_v45, %v227_v44  ;;  %v6123_v52 = vpack.c.bf16 %v238_v47, %v234_v46  ;;  %v233_v53 = vld [vmem:[%s13700_s1 + $0x100] sm:$0xff]  ;;  %v235_v55 = vld [vmem:[%s13700_s1 + $0x110] sm:$0xff]  ;;  %v6251_v56 = vpack.c.bf16 %v240_v49, %v236_v48  ;;  %v242_v58 = vld [vmem:[%s13700_s1 + $0x148] sm:$0xff] }
  0x12   : > { %6118 = vmatpush1.bf16.msra.mxu0 %v6117_v34  ;;  %v237_v54 = vld [vmem:[%s13700_s1 + $0x120] sm:$0xff]  ;;  %v239_v57 = vld [vmem:[%s13700_s1 + $0x130] sm:$0xff]  ;;  %v246_v59 = vld [vmem:[%s13700_s1 + $0x168] sm:$0xff] }
  0x13   : > { %6246 = vmatpush1.bf16.msra.mxu1 %v6245_v38  ;;  %6120 = vmatprep.subr.bf16.mxu0 %v6119_v39  ;;  %v244_v60 = vld [vmem:[%s13700_s1 + $0x158] sm:$0xff]  ;;  %v6125_v62 = vpack.c.bf16 %v237_v54, %v233_v53  ;;  %v6253_v63 = vpack.c.bf16 %v239_v57, %v235_v55  ;;  %v6127_v0 = vpack.c.bf16 %v246_v59, %v242_v58  ;;  %v241_v1 = vld [vmem:[%s13700_s1 + $0x140] sm:$0xff]  ;;  %v243_v3 = vld [vmem:[%s13700_s1 + $0x150] sm:$0xff] }
  0x14   : > { %6248 = vmatprep.subr.bf16.mxu1 %v6247_v43  ;;  %v248_v61 = vld [vmem:[%s13700_s1 + $0x178] sm:$0xff]  ;;  %v245_v2 = vld [vmem:[%s13700_s1 + $0x160] sm:$0xff]  ;;  %v247_v5 = vld [vmem:[%s13700_s1 + $0x170] sm:$0xff] }
  0x15   : > { %v6255_v4 = vpack.c.bf16 %v248_v61, %v244_v60  ;;  %v250_v6 = vld [vmem:[%s13700_s1 + $0x188] sm:$0xff]  ;;  %v252_v8 = vld [vmem:[%s13700_s1 + $0x198] sm:$0xff]  ;;  %v6129_v10 = vpack.c.bf16 %v245_v2, %v241_v1  ;;  %v6257_v11 = vpack.c.bf16 %v247_v5, %v243_v3  ;;  %v249_v13 = vld [vmem:[%s13700_s1 + $0x180] sm:$0xff] }
  0x16   : > { %6122 = vmatpush1.bf16.msra.mxu0 %v6121_v50  ;;  %v254_v7 = vld [vmem:[%s13700_s1 + $0x1a8] sm:$0xff]  ;;  %v256_v9 = vld [vmem:[%s13700_s1 + $0x1b8] sm:$0xff]  ;;  %v253_v14 = vld [vmem:[%s13700_s1 + $0x1a0] sm:$0xff] }
  0x17   : > { %6250 = vmatpush1.bf16.msra.mxu1 %v6249_v51  ;;  %6124 = vmatprep.subr.bf16.mxu0 %v6123_v52  ;;  %v6131_v12 = vpack.c.bf16 %v254_v7, %v250_v6  ;;  %v251_v15 = vld [vmem:[%s13700_s1 + $0x190] sm:$0xff]  ;;  %v6259_v16 = vpack.c.bf16 %v256_v9, %v252_v8  ;;  %v258_v18 = vld [vmem:[%s13700_s1 + $0x1c8] sm:$0xff]  ;;  %v260_v20 = vld [vmem:[%s13700_s1 + $0x1d8] sm:$0xff]  ;;  %v6133_v22 = vpack.c.bf16 %v253_v14, %v249_v13 }
  0x18   : > { %6252 = vmatprep.subr.bf16.mxu1 %v6251_v56  ;;  %v255_v17 = vld [vmem:[%s13700_s1 + $0x1b0] sm:$0xff]  ;;  %v262_v19 = vld [vmem:[%s13700_s1 + $0x1e8] sm:$0xff]  ;;  %v264_v21 = vld [vmem:[%s13700_s1 + $0x1f8] sm:$0xff] }
  0x19   : > { %v6261_v23 = vpack.c.bf16 %v255_v17, %v251_v15  ;;  %v6135_v24 = vpack.c.bf16 %v262_v19, %v258_v18  ;;  %v257_v25 = vld [vmem:[%s13700_s1 + $0x1c0] sm:$0xff]  ;;  %v259_v27 = vld [vmem:[%s13700_s1 + $0x1d0] sm:$0xff]  ;;  %v6263_v28 = vpack.c.bf16 %v264_v21, %v260_v20  ;;  %v266_v30 = vld [vmem:[%s13700_s1 + $0x208] sm:$0xff] }
  0x1a   : > { %6126 = vmatpush1.bf16.msra.mxu0 %v6125_v62  ;;  %v261_v26 = vld [vmem:[%s13700_s1 + $0x1e0] sm:$0xff]  ;;  %v263_v29 = vld [vmem:[%s13700_s1 + $0x1f0] sm:$0xff]  ;;  %v270_v31 = vld [vmem:[%s13700_s1 + $0x228] sm:$0xff] }
  0x1b   : > { %6254 = vmatpush1.bf16.msra.mxu1 %v6253_v63  ;;  %6128 = vmatprep.subr.bf16.mxu0 %v6127_v0  ;;  %v268_v32 = vld [vmem:[%s13700_s1 + $0x218] sm:$0xff]  ;;  %v6137_v34 = vpack.c.bf16 %v261_v26, %v257_v25  ;;  %v6265_v35 = vpack.c.bf16 %v263_v29, %v259_v27  ;;  %v6139_v36 = vpack.c.bf16 %v270_v31, %v266_v30  ;;  %v265_v37 = vld [vmem:[%s13700_s1 + $0x200] sm:$0xff]  ;;  %v267_v39 = vld [vmem:[%s13700_s1 + $0x210] sm:$0xff] }
  0x1c   : > { %6256 = vmatprep.subr.bf16.mxu1 %v6255_v4  ;;  %v272_v33 = vld [vmem:[%s13700_s1 + $0x238] sm:$0xff]  ;;  %v269_v38 = vld [vmem:[%s13700_s1 + $0x220] sm:$0xff]  ;;  %v271_v41 = vld [vmem:[%s13700_s1 + $0x230] sm:$0xff] }
  0x1d   : > { %v6267_v40 = vpack.c.bf16 %v272_v33, %v268_v32  ;;  %v274_v42 = vld [vmem:[%s13700_s1 + $0x248] sm:$0xff]  ;;  %v276_v44 = vld [vmem:[%s13700_s1 + $0x258] sm:$0xff]  ;;  %v6141_v46 = vpack.c.bf16 %v269_v38, %v265_v37  ;;  %v6269_v47 = vpack.c.bf16 %v271_v41, %v267_v39  ;;  %v273_v49 = vld [vmem:[%s13700_s1 + $0x240] sm:$0xff] }
  0x1e   : > { %6130 = vmatpush1.bf16.msra.mxu0 %v6129_v10  ;;  %v278_v43 = vld [vmem:[%s13700_s1 + $0x268] sm:$0xff]  ;;  %v280_v45 = vld [vmem:[%s13700_s1 + $0x278] sm:$0xff]  ;;  %v277_v50 = vld [vmem:[%s13700_s1 + $0x260] sm:$0xff] }
  0x1f   : > { %6258 = vmatpush1.bf16.msra.mxu1 %v6257_v11  ;;  %6132 = vmatprep.subr.bf16.mxu0 %v6131_v12  ;;  %v6143_v48 = vpack.c.bf16 %v278_v43, %v274_v42  ;;  %v275_v51 = vld [vmem:[%s13700_s1 + $0x250] sm:$0xff]  ;;  %v6271_v52 = vpack.c.bf16 %v280_v45, %v276_v44  ;;  %v282_v54 = vld [vmem:[%s13700_s1 + $0x288] sm:$0xff]  ;;  %v284_v56 = vld [vmem:[%s13700_s1 + $0x298] sm:$0xff]  ;;  %v6145_v58 = vpack.c.bf16 %v277_v50, %v273_v49 }
  0x20   : > { %6260 = vmatprep.subr.bf16.mxu1 %v6259_v16  ;;  %v279_v53 = vld [vmem:[%s13700_s1 + $0x270] sm:$0xff]  ;;  %v286_v55 = vld [vmem:[%s13700_s1 + $0x2a8] sm:$0xff]  ;;  %v288_v57 = vld [vmem:[%s13700_s1 + $0x2b8] sm:$0xff] }
  0x21   : > { %v6273_v59 = vpack.c.bf16 %v279_v53, %v275_v51  ;;  %v6147_v60 = vpack.c.bf16 %v286_v55, %v282_v54  ;;  %v281_v61 = vld [vmem:[%s13700_s1 + $0x280] sm:$0xff]  ;;  %v283_v63 = vld [vmem:[%s13700_s1 + $0x290] sm:$0xff]  ;;  %v6275_v0 = vpack.c.bf16 %v288_v57, %v284_v56  ;;  %v290_v2 = vld [vmem:[%s13700_s1 + $0x2c8] sm:$0xff] }
  0x22   : > { %6134 = vmatpush1.bf16.msra.mxu0 %v6133_v22  ;;  %v285_v62 = vld [vmem:[%s13700_s1 + $0x2a0] sm:$0xff]  ;;  %v287_v1 = vld [vmem:[%s13700_s1 + $0x2b0] sm:$0xff]  ;;  %v294_v3 = vld [vmem:[%s13700_s1 + $0x2e8] sm:$0xff] }
  0x23   : > { %6262 = vmatpush1.bf16.msra.mxu1 %v6261_v23  ;;  %6136 = vmatprep.subr.bf16.mxu0 %v6135_v24  ;;  %v292_v4 = vld [vmem:[%s13700_s1 + $0x2d8] sm:$0xff]  ;;  %v6149_v6 = vpack.c.bf16 %v285_v62, %v281_v61  ;;  %v289_v7 = vld [vmem:[%s13700_s1 + $0x2c0] sm:$0xff]  ;;  %v6277_v8 = vpack.c.bf16 %v287_v1, %v283_v63  ;;  %v6151_v9 = vpack.c.bf16 %v294_v3, %v290_v2  ;;  %v291_v11 = vld [vmem:[%s13700_s1 + $0x2d0] sm:$0xff] }
  0x24   : > { %6264 = vmatprep.subr.bf16.mxu1 %v6263_v28  ;;  %v296_v5 = vld [vmem:[%s13700_s1 + $0x2f8] sm:$0xff]  ;;  %v293_v10 = vld [vmem:[%s13700_s1 + $0x2e0] sm:$0xff]  ;;  %v295_v12 = vld [vmem:[%s13700_s1 + $0x2f0] sm:$0xff] }
  0x25   : > { %v6279_v13 = vpack.c.bf16 %v296_v5, %v292_v4  ;;  %v298_v14 = vld [vmem:[%s13700_s1 + $0x308] sm:$0xff]  ;;  %v300_v17 = vld [vmem:[%s13700_s1 + $0x318] sm:$0xff]  ;;  %v6153_v19 = vpack.c.bf16 %v293_v10, %v289_v7  ;;  %v6281_v20 = vpack.c.bf16 %v295_v12, %v291_v11  ;;  %v297_v22 = vld [vmem:[%s13700_s1 + $0x300] sm:$0xff] }
  0x26   : > { %6138 = vmatpush1.bf16.msra.mxu0 %v6137_v34  ;;  %v302_v15 = vld [vmem:[%s13700_s1 + $0x328] sm:$0xff]  ;;  %v304_v18 = vld [vmem:[%s13700_s1 + $0x338] sm:$0xff]  ;;  %v301_v23 = vld [vmem:[%s13700_s1 + $0x320] sm:$0xff] }
  0x27   : > { %6266 = vmatpush1.bf16.msra.mxu1 %v6265_v35  ;;  %6140 = vmatprep.subr.bf16.mxu0 %v6139_v36  ;;  %v194_v16 = vld [vmem:[%s8369_s27 + $0x8] sm:$0xff]  ;;  %v6155_v21 = vpack.c.bf16 %v302_v15, %v298_v14  ;;  %v299_v24 = vld [vmem:[%s13700_s1 + $0x310] sm:$0xff]  ;;  %v6283_v25 = vpack.c.bf16 %v304_v18, %v300_v17  ;;  %v308_v29 = vld [vmem:[%s13700_s1 + $0x358] sm:$0xff]  ;;  %v6157_v31 = vpack.c.bf16 %v301_v23, %v297_v22 }
  0x28   : > { %6268 = vmatprep.subr.bf16.mxu1 %v6267_v40  ;;  %521 = vmatprep.mubr.f32.mxu0 %v194_v16  ;;  %v303_v26 = vld [vmem:[%s13700_s1 + $0x330] sm:$0xff]  ;;  %v306_v27 = vld [vmem:[%s13700_s1 + $0x348] sm:$0xff]  ;;  %v312_v30 = vld [vmem:[%s13700_s1 + $0x378] sm:$0xff] }
  0x29   : > { %675 = vmatprep.mubr.f32.mxu1 %v194_v16  ;;  %v310_v28 = vld [vmem:[%s13700_s1 + $0x368] sm:$0xff]  ;;  %v6285_v32 = vpack.c.bf16 %v303_v26, %v299_v24  ;;  %v305_v34 = vld [vmem:[%s13700_s1 + $0x340] sm:$0xff]  ;;  %v307_v36 = vld [vmem:[%s13700_s1 + $0x350] sm:$0xff]  ;;  %v6287_v37 = vpack.c.bf16 %v312_v30, %v308_v29 }
  0x2a   : > { %6142 = vmatpush1.bf16.msra.mxu0 %v6141_v46  ;;  %v6159_v33 = vpack.c.bf16 %v310_v28, %v306_v27  ;;  %v309_v35 = vld [vmem:[%s13700_s1 + $0x360] sm:$0xff]  ;;  %v311_v38 = vld [vmem:[%s13700_s1 + $0x370] sm:$0xff]  ;;  %v314_v39 = vld [vmem:[%s13700_s1 + $0x388] sm:$0xff] }
  0x2b   : > { %6270 = vmatpush1.bf16.msra.mxu1 %v6269_v47  ;;  %6144 = vmatprep.subr.bf16.mxu0 %v6143_v48  ;;  %v318_v40 = vld [vmem:[%s13700_s1 + $0x3a8] sm:$0xff]  ;;  %v316_v41 = vld [vmem:[%s13700_s1 + $0x398] sm:$0xff]  ;;  %v6161_v43 = vpack.c.bf16 %v309_v35, %v305_v34  ;;  %v6289_v44 = vpack.c.bf16 %v311_v38, %v307_v36  ;;  %v313_v46 = vld [vmem:[%s13700_s1 + $0x380] sm:$0xff] }
  0x2c   : > { %6272 = vmatprep.subr.bf16.mxu1 %v6271_v52  ;;  %v320_v42 = vld [vmem:[%s13700_s1 + $0x3b8] sm:$0xff]  ;;  %v6163_v45 = vpack.c.bf16 %v318_v40, %v314_v39  ;;  %v317_v47 = vld [vmem:[%s13700_s1 + $0x3a0] sm:$0xff]  ;;  %v315_v48 = vld [vmem:[%s13700_s1 + $0x390] sm:$0xff] }
  0x2d   : > { %v6291_v49 = vpack.c.bf16 %v320_v42, %v316_v41  ;;  %v319_v50 = vld [vmem:[%s13700_s1 + $0x3b0] sm:$0xff]  ;;  %v322_v51 = vld [vmem:[%s13700_s1 + $0x3c8] sm:$0xff]  ;;  %v324_v53 = vld [vmem:[%s13700_s1 + $0x3d8] sm:$0xff]  ;;  %v6165_v55 = vpack.c.bf16 %v317_v47, %v313_v46 }
  0x2e   : > { %6146 = vmatpush1.bf16.msra.mxu0 %v6145_v58  ;;  %v326_v52 = vld [vmem:[%s13700_s1 + $0x3e8] sm:$0xff]  ;;  %v328_v54 = vld [vmem:[%s13700_s1 + $0x3f8] sm:$0xff]  ;;  %v6293_v56 = vpack.c.bf16 %v319_v50, %v315_v48  ;;  %v321_v58 = vld [vmem:[%s13700_s1 + $0x3c0] sm:$0xff] }
  0x2f   : > { %6274 = vmatpush1.bf16.msra.mxu1 %v6273_v59  ;;  %6148 = vmatprep.subr.bf16.mxu0 %v6147_v60  ;;  %v6167_v57 = vpack.c.bf16 %v326_v52, %v322_v51  ;;  %v325_v59 = vld [vmem:[%s13700_s1 + $0x3e0] sm:$0xff]  ;;  %v323_v60 = vld [vmem:[%s13700_s1 + $0x3d0] sm:$0xff]  ;;  %v6295_v61 = vpack.c.bf16 %v328_v54, %v324_v53  ;;  %v330_v63 = vld [vmem:[%s13700_s1 + $0x408] sm:$0xff] }
  0x30   : > { %6276 = vmatprep.subr.bf16.mxu1 %v6275_v0  ;;  %v327_v62 = vld [vmem:[%s13700_s1 + $0x3f0] sm:$0xff]  ;;  %v334_v0 = vld [vmem:[%s13700_s1 + $0x428] sm:$0xff]  ;;  %v332_v1 = vld [vmem:[%s13700_s1 + $0x418] sm:$0xff]  ;;  %v6169_v3 = vpack.c.bf16 %v325_v59, %v321_v58 }
  0x31   : > { %v336_v2 = vld [vmem:[%s13700_s1 + $0x438] sm:$0xff]  ;;  %v6297_v4 = vpack.c.bf16 %v327_v62, %v323_v60  ;;  %v6171_v5 = vpack.c.bf16 %v334_v0, %v330_v63  ;;  %v333_v7 = vld [vmem:[%s13700_s1 + $0x420] sm:$0xff]  ;;  %v335_v10 = vld [vmem:[%s13700_s1 + $0x430] sm:$0xff] }
  0x32   : > { %6150 = vmatpush1.bf16.msra.mxu0 %v6149_v6  ;;  %v329_v6 = vld [vmem:[%s13700_s1 + $0x400] sm:$0xff]  ;;  %v338_v11 = vld [vmem:[%s13700_s1 + $0x448] sm:$0xff]  ;;  %v344_v14 = vld [vmem:[%s13700_s1 + $0x478] sm:$0xff] }
  0x33   : > { %6278 = vmatpush1.bf16.msra.mxu1 %v6277_v8  ;;  %6152 = vmatprep.subr.bf16.mxu0 %v6151_v9  ;;  %v331_v8 = vld [vmem:[%s13700_s1 + $0x410] sm:$0xff]  ;;  %v6299_v9 = vpack.c.bf16 %v336_v2, %v332_v1  ;;  %v342_v12 = vld [vmem:[%s13700_s1 + $0x468] sm:$0xff]  ;;  %v193_v15 = vld [vmem:[%s8369_s27] sm:$0xff]  ;;  %v6173_v16 = vpack.c.bf16 %v333_v7, %v329_v6 }
  0x34   : > { %6280 = vmatprep.subr.bf16.mxu1 %v6279_v13  ;;  %v340_v13 = vld [vmem:[%s13700_s1 + $0x458] sm:$0xff]  ;;  %v6301_v17 = vpack.c.bf16 %v335_v10, %v331_v8  ;;  %v6175_v18 = vpack.c.bf16 %v342_v12, %v338_v11  ;;  %v343_v23 = vld [vmem:[%s13700_s1 + $0x470] sm:$0xff]  ;;  %v346_v24 = vld [vmem:[%s13700_s1 + $0x488] sm:$0xff] }
  0x35   : > { %v6303_v22 = vpack.c.bf16 %v344_v14, %v340_v13  ;;  %v348_v26 = vld [vmem:[%s13700_s1 + $0x498] sm:$0xff]  ;;  %v351_v35 = vld [vmem:[%s13700_s1 + $0x4b0] sm:$0xff]  ;;  %v354_v36 = vld [vmem:[%s13700_s1 + $0x4c8] sm:$0xff] }
  0x36   : > { %6154 = vmatpush1.bf16.msra.mxu0 %v6153_v19  ;;  %v337_v19 = vld [vmem:[%s13700_s1 + $0x440] sm:$0xff]  ;;  %v352_v27 = vld [vmem:[%s13700_s1 + $0x4b8] sm:$0xff]  ;;  %v359_v47 = vld [vmem:[%s13700_s1 + $0x4f0] sm:$0xff] }
  0x37   : > { %6282 = vmatpush1.bf16.msra.mxu1 %v6281_v20  ;;  %6156 = vmatprep.subr.bf16.mxu0 %v6155_v21  ;;  %v341_v20 = vld [vmem:[%s13700_s1 + $0x460] sm:$0xff]  ;;  %v339_v21 = vld [vmem:[%s13700_s1 + $0x450] sm:$0xff]  ;;  %v6307_v34 = vpack.c.bf16 %v352_v27, %v348_v26  ;;  %v356_v38 = vld [vmem:[%s13700_s1 + $0x4d8] sm:$0xff] }
  0x38   : > { %6284 = vmatprep.subr.bf16.mxu1 %v6283_v25  ;;  %v350_v25 = vld [vmem:[%s13700_s1 + $0x4a8] sm:$0xff]  ;;  %v6177_v28 = vpack.c.bf16 %v341_v20, %v337_v19  ;;  %v6305_v29 = vpack.c.bf16 %v343_v23, %v339_v21  ;;  %v360_v39 = vld [vmem:[%s13700_s1 + $0x4f8] sm:$0xff]  ;;  %v367_v59 = vld [vmem:[%s13700_s1 + $0x530] sm:$0xff] }
  0x39   : > { %v6179_v30 = vpack.c.bf16 %v350_v25, %v346_v24  ;;  %v6311_v46 = vpack.c.bf16 %v360_v39, %v356_v38  ;;  %v362_v48 = vld [vmem:[%s13700_s1 + $0x508] sm:$0xff]  ;;  %v364_v50 = vld [vmem:[%s13700_s1 + $0x518] sm:$0xff]  ;;  %v375_v7 = vld [vmem:[%s13700_s1 + $0x570] sm:$0xff] }
  0x3a   : > { %6158 = vmatpush1.bf16.msra.mxu0 %v6157_v31  ;;  %v345_v31 = vld [vmem:[%s13700_s1 + $0x480] sm:$0xff]  ;;  %v368_v51 = vld [vmem:[%s13700_s1 + $0x538] sm:$0xff]  ;;  %v370_v60 = vld [vmem:[%s13700_s1 + $0x548] sm:$0xff] }
  0x3b   : > { %6286 = vmatpush1.bf16.msra.mxu1 %v6285_v32  ;;  %6160 = vmatprep.subr.bf16.mxu0 %v6159_v33  ;;  %v349_v32 = vld [vmem:[%s13700_s1 + $0x4a0] sm:$0xff]  ;;  %v347_v33 = vld [vmem:[%s13700_s1 + $0x490] sm:$0xff]  ;;  %v6315_v58 = vpack.c.bf16 %v368_v51, %v364_v50  ;;  %v372_v62 = vld [vmem:[%s13700_s1 + $0x558] sm:$0xff] }
  0x3c   : > { %6288 = vmatprep.subr.bf16.mxu1 %v6287_v37  ;;  %v358_v37 = vld [vmem:[%s13700_s1 + $0x4e8] sm:$0xff]  ;;  %v6181_v40 = vpack.c.bf16 %v349_v32, %v345_v31  ;;  %v6309_v41 = vpack.c.bf16 %v351_v35, %v347_v33  ;;  %v376_v63 = vld [vmem:[%s13700_s1 + $0x578] sm:$0xff]  ;;  %v377_v14 = vld [vmem:[%s13700_s1 + $0x580] sm:$0xff] }
  0x3d   : > { %v6183_v42 = vpack.c.bf16 %v358_v37, %v354_v36  ;;  %v6319_v6 = vpack.c.bf16 %v376_v63, %v372_v62  ;;  %v378_v8 = vld [vmem:[%s13700_s1 + $0x588] sm:$0xff]  ;;  %v380_v10 = vld [vmem:[%s13700_s1 + $0x598] sm:$0xff]  ;;  %v383_v19 = vld [vmem:[%s13700_s1 + $0x5b0] sm:$0xff] }
  0x3e   : > { %6162 = vmatpush1.bf16.msra.mxu0 %v6161_v43  ;;  %v353_v43 = vld [vmem:[%s13700_s1 + $0x4c0] sm:$0xff]  ;;  %v384_v11 = vld [vmem:[%s13700_s1 + $0x5b8] sm:$0xff]  ;;  %v8638_v12 = vld [vmem:[%s8369_s27 + $0x28] sm:$0xff] }
  0x3f   : > { %6290 = vmatpush1.bf16.msra.mxu1 %v6289_v44  ;;  %6164 = vmatprep.subr.bf16.mxu0 %v6163_v45  ;;  %v357_v44 = vld [vmem:[%s13700_s1 + $0x4e0] sm:$0xff]  ;;  %v355_v45 = vld [vmem:[%s13700_s1 + $0x4d0] sm:$0xff]  ;;  %v6323_v21 = vpack.c.bf16 %v384_v11, %v380_v10  ;;  %v390_v23 = vld [vmem:[%s13700_s1 + $0x5e8] sm:$0xff] }
  0x40   : > { %6292 = vmatprep.subr.bf16.mxu1 %v6291_v49  ;;  %v366_v49 = vld [vmem:[%s13700_s1 + $0x528] sm:$0xff]  ;;  %v6185_v52 = vpack.c.bf16 %v357_v44, %v353_v43  ;;  %v6313_v53 = vpack.c.bf16 %v359_v47, %v355_v45  ;;  %v8654_v20 = vld [vmem:[%s8369_s27 + $0x20] sm:$0xff]  ;;  %v196_v24 = vld [vmem:[%s8369_s27 + $0x18] sm:$0xff] }
  0x41   : > { %v6187_v54 = vpack.c.bf16 %v366_v49, %v362_v48  ;;  %v388_v25 = vld [vmem:[%s13700_s1 + $0x5d8] sm:$0xff]  ;;  %v389_v31 = vld [vmem:[%s13700_s1 + $0x5e0] sm:$0xff]  ;;  %v387_v32 = vld [vmem:[%s13700_s1 + $0x5d0] sm:$0xff] }
  0x42   : > { %6166 = vmatpush1.bf16.msra.mxu0 %v6165_v55  ;;  %v361_v55 = vld [vmem:[%s13700_s1 + $0x500] sm:$0xff]  ;;  %v392_v26 = vld [vmem:[%s13700_s1 + $0x5f8] sm:$0xff]  ;;  %v394_v35 = vld [vmem:[%s13700_s1 + $0x608] sm:$0xff] }
  0x43   : > { %6294 = vmatpush1.bf16.msra.mxu1 %v6293_v56  ;;  %6168 = vmatprep.subr.bf16.mxu0 %v6167_v57  ;;  %v365_v56 = vld [vmem:[%s13700_s1 + $0x520] sm:$0xff]  ;;  %v363_v57 = vld [vmem:[%s13700_s1 + $0x510] sm:$0xff]  ;;  %v6327_v33 = vpack.c.bf16 %v392_v26, %v388_v25  ;;  %v398_v36 = vld [vmem:[%s13700_s1 + $0x628] sm:$0xff] }
  0x44   : > { %6296 = vmatprep.subr.bf16.mxu1 %v6295_v61  ;;  %v374_v61 = vld [vmem:[%s13700_s1 + $0x568] sm:$0xff]  ;;  %v6189_v0 = vpack.c.bf16 %v365_v56, %v361_v55  ;;  %v6317_v1 = vpack.c.bf16 %v367_v59, %v363_v57  ;;  %v396_v37 = vld [vmem:[%s13700_s1 + $0x618] sm:$0xff]  ;;  %v397_v43 = vld [vmem:[%s13700_s1 + $0x620] sm:$0xff] }
  0x45   : > { %v6191_v2 = vpack.c.bf16 %v374_v61, %v370_v60  ;;  %v400_v38 = vld [vmem:[%s13700_s1 + $0x638] sm:$0xff]  ;;  %v395_v44 = vld [vmem:[%s13700_s1 + $0x610] sm:$0xff]  ;;  %v402_v47 = vld [vmem:[%s13700_s1 + $0x648] sm:$0xff] }
  0x46   : > { %6170 = vmatpush1.bf16.msra.mxu0 %v6169_v3  ;;  %v369_v3 = vld [vmem:[%s13700_s1 + $0x540] sm:$0xff]  ;;  %v6331_v45 = vpack.c.bf16 %v400_v38, %v396_v37  ;;  %v406_v48 = vld [vmem:[%s13700_s1 + $0x668] sm:$0xff]  ;;  %v404_v49 = vld [vmem:[%s13700_s1 + $0x658] sm:$0xff] }
  0x47   : > { %6298 = vmatpush1.bf16.msra.mxu1 %v6297_v4  ;;  %6172 = vmatprep.subr.bf16.mxu0 %v6171_v5  ;;  %v373_v4 = vld [vmem:[%s13700_s1 + $0x560] sm:$0xff]  ;;  %v371_v5 = vld [vmem:[%s13700_s1 + $0x550] sm:$0xff]  ;;  %v408_v50 = vld [vmem:[%s13700_s1 + $0x678] sm:$0xff] }
  0x48   : > { %6300 = vmatprep.subr.bf16.mxu1 %v6299_v9  ;;  %v382_v9 = vld [vmem:[%s13700_s1 + $0x5a8] sm:$0xff]  ;;  %v6193_v13 = vpack.c.bf16 %v373_v4, %v369_v3  ;;  %v405_v55 = vld [vmem:[%s13700_s1 + $0x660] sm:$0xff]  ;;  %v403_v56 = vld [vmem:[%s13700_s1 + $0x650] sm:$0xff]  ;;  %v6335_v57 = vpack.c.bf16 %v408_v50, %v404_v49 }
  0x49   : > { %522 = vmatmul.mubr.f32.vlgmr.msra.gmra.mrb[0].mxu0 %v193_v15  ;;  %v410_v59 = vld [vmem:[%s13700_s1 + $0x688] sm:$0xff]  ;;  %v412_v61 = vld [vmem:[%s13700_s1 + $0x698] sm:$0xff]  ;;  %v413_v3 = vld [vmem:[%s13700_s1 + $0x6a0] sm:$0xff] }
  0x4a   : > { %6174 = vmatpush1.bf16.msra.mxu0 %v6173_v16  ;;  %676 = vmatmul.mubr.f32.vlgmr.msra.gmra.mrb[0].mxu1 %v193_v15  ;;  %v381_v15 = vld [vmem:[%s13700_s1 + $0x5a0] sm:$0xff]  ;;  %v6321_v16 = vpack.c.bf16 %v375_v7, %v371_v5  ;;  %v414_v60 = vld [vmem:[%s13700_s1 + $0x6a8] sm:$0xff]  ;;  %v416_v62 = vld [vmem:[%s13700_s1 + $0x6b8] sm:$0xff] }
  0x4b   : > { %6302 = vmatpush1.bf16.msra.mxu1 %v6301_v17  ;;  %6176 = vmatprep.subr.bf16.mxu0 %v6175_v18  ;;  %v6195_v17 = vpack.c.bf16 %v382_v9, %v378_v8  ;;  %v379_v18 = vld [vmem:[%s13700_s1 + $0x590] sm:$0xff]  ;;  %v6197_v27 = vpack.c.bf16 %v381_v15, %v377_v14  ;;  %v6339_v5 = vpack.c.bf16 %v416_v62, %v412_v61  ;;  %v418_v7 = vld [vmem:[%s13700_s1 + $0x6c8] sm:$0xff]  ;;  %v420_v9 = vld [vmem:[%s13700_s1 + $0x6d8] sm:$0xff] }
  0x4c   : > { %6304 = vmatprep.subr.bf16.mxu1 %v6303_v22  ;;  %527 = vmatprep.mubr.f32.mxu0 %v8638_v12  ;;  %v386_v22 = vld [vmem:[%s13700_s1 + $0x5c8] sm:$0xff]  ;;  %v411_v4 = vld [vmem:[%s13700_s1 + $0x690] sm:$0xff]  ;;  %v424_v10 = vld [vmem:[%s13700_s1 + $0x6f8] sm:$0xff] }
  0x4d   : > { %681 = vmatprep.mubr.f32.mxu1 %v8638_v12  ;;  %528 = vmatmul.mubr.f32.gmra.mrb[2].mxu0 %v8654_v20  ;;  %v422_v8 = vld [vmem:[%s13700_s1 + $0x6e8] sm:$0xff]  ;;  %v417_v15 = vld [vmem:[%s13700_s1 + $0x6c0] sm:$0xff] }
  0x4e   : > { %6178 = vmatpush1.bf16.msra.mxu0 %v6177_v28  ;;  %682 = vmatmul.mubr.f32.gmra.mrb[2].mxu1 %v8654_v20  ;;  %v6325_v28 = vpack.c.bf16 %v383_v19, %v379_v18  ;;  %v6215_v14 = vpack.c.bf16 %v422_v8, %v418_v7  ;;  %v6343_v18 = vpack.c.bf16 %v424_v10, %v420_v9  ;;  %v423_v19 = vld [vmem:[%s13700_s1 + $0x6f0] sm:$0xff]  ;;  %v4571_v7 = vld [vmem:[%s13700_s1 + $0x818] sm:$0xff] }
  0x4f   : > { %6306 = vmatpush1.bf16.msra.mxu1 %v6305_v29  ;;  %6180 = vmatprep.subr.bf16.mxu0 %v6179_v30  ;;  %v6199_v29 = vpack.c.bf16 %v390_v23, %v386_v22  ;;  %v385_v30 = vld [vmem:[%s13700_s1 + $0x5c0] sm:$0xff]  ;;  %v430_v22 = vld [vmem:[%s13700_s1 + $0x728] sm:$0xff]  ;;  %v428_v23 = vld [vmem:[%s13700_s1 + $0x718] sm:$0xff] }
  0x50   : > { %6308 = vmatprep.subr.bf16.mxu1 %v6307_v34  ;;  %598 = vmatprep.mubr.f32.mxu0 %v196_v24  ;;  %v391_v34 = vld [vmem:[%s13700_s1 + $0x5f0] sm:$0xff]  ;;  %v6201_v39 = vpack.c.bf16 %v389_v31, %v385_v30  ;;  %v4575_v8 = vld [vmem:[%s13700_s1 + $0x838] sm:$0xff] }
  0x51   : > { %752 = vmatprep.mubr.f32.mxu1 %v196_v24  ;;  %v432_v24 = vld [vmem:[%s13700_s1 + $0x738] sm:$0xff]  ;;  %v427_v30 = vld [vmem:[%s13700_s1 + $0x710] sm:$0xff] }
  0x52   : > { %6182 = vmatpush1.bf16.msra.mxu0 %v6181_v40  ;;  %v6329_v40 = vpack.c.bf16 %v391_v34, %v387_v32  ;;  %v6347_v31 = vpack.c.bf16 %v432_v24, %v428_v23  ;;  %v431_v32 = vld [vmem:[%s13700_s1 + $0x730] sm:$0xff]  ;;  %v438_v34 = vld [vmem:[%s13700_s1 + $0x768] sm:$0xff] }
  0x53   : > { %6310 = vmatpush1.bf16.msra.mxu1 %v6309_v41  ;;  %6184 = vmatprep.subr.bf16.mxu0 %v6183_v42  ;;  %v6203_v41 = vpack.c.bf16 %v398_v36, %v394_v35  ;;  %v393_v42 = vld [vmem:[%s13700_s1 + $0x600] sm:$0xff]  ;;  %v436_v35 = vld [vmem:[%s13700_s1 + $0x758] sm:$0xff]  ;;  %v6349_v38 = vpack.c.bf16 %v431_v32, %v427_v30  ;;  %v195_v23 = vld [vmem:[%s8369_s27 + $0x10] sm:$0xff] }
  0x54   : > { %6312 = vmatprep.subr.bf16.mxu1 %v6311_v46  ;;  %v399_v46 = vld [vmem:[%s13700_s1 + $0x630] sm:$0xff]  ;;  %v6205_v51 = vpack.c.bf16 %v397_v43, %v393_v42  ;;  %v440_v36 = vld [vmem:[%s13700_s1 + $0x778] sm:$0xff]  ;;  %v4585_v32 = vld [vmem:[%s13700_s1 + $0x888] sm:$0xff] }
  0x55   : > { %v435_v42 = vld [vmem:[%s13700_s1 + $0x750] sm:$0xff]  ;;  %v6351_v43 = vpack.c.bf16 %v440_v36, %v436_v35  ;;  %v4587_v35 = vld [vmem:[%s13700_s1 + $0x898] sm:$0xff] }
  0x56   : > { %6186 = vmatpush1.bf16.msra.mxu0 %v6185_v52  ;;  %v6333_v52 = vpack.c.bf16 %v399_v46, %v395_v44  ;;  %v439_v44 = vld [vmem:[%s13700_s1 + $0x770] sm:$0xff]  ;;  %v446_v46 = vld [vmem:[%s13700_s1 + $0x7a8] sm:$0xff]  ;;  %v4591_v36 = vld [vmem:[%s13700_s1 + $0x8b8] sm:$0xff] }
  0x57   : > { %6314 = vmatpush1.bf16.msra.mxu1 %v6313_v53  ;;  %6188 = vmatprep.subr.bf16.mxu0 %v6187_v54  ;;  %v6207_v53 = vpack.c.bf16 %v406_v48, %v402_v47  ;;  %v401_v54 = vld [vmem:[%s13700_s1 + $0x640] sm:$0xff]  ;;  %v444_v47 = vld [vmem:[%s13700_s1 + $0x798] sm:$0xff]  ;;  %v6353_v50 = vpack.c.bf16 %v439_v44, %v435_v42  ;;  %v4582_v30 = vld [vmem:[%s13700_s1 + $0x870] sm:$0xff] }
  0x58   : > { %6316 = vmatprep.subr.bf16.mxu1 %v6315_v58  ;;  %v407_v58 = vld [vmem:[%s13700_s1 + $0x670] sm:$0xff]  ;;  %v6209_v63 = vpack.c.bf16 %v405_v55, %v401_v54  ;;  %v448_v48 = vld [vmem:[%s13700_s1 + $0x7b8] sm:$0xff]  ;;  %v4584_v44 = vld [vmem:[%s13700_s1 + $0x880] sm:$0xff] }
  0x59   : > { %v443_v54 = vld [vmem:[%s13700_s1 + $0x790] sm:$0xff]  ;;  %v6355_v55 = vpack.c.bf16 %v448_v48, %v444_v47  ;;  %v6499_v47 = vpack.c.bf16 %v4591_v36, %v4587_v35  ;;  %v4625_v36 = vld [vmem:[%s13700_s1 + $0x9c8] sm:$0xff] }
  0x5a   : > { %6190 = vmatpush1.bf16.msra.mxu0 %v6189_v0  ;;  %v6337_v0 = vpack.c.bf16 %v407_v58, %v403_v56  ;;  %v447_v56 = vld [vmem:[%s13700_s1 + $0x7b0] sm:$0xff]  ;;  %v454_v58 = vld [vmem:[%s13700_s1 + $0x7e8] sm:$0xff] }
  0x5b   : > { %6318 = vmatpush1.bf16.msra.mxu1 %v6317_v1  ;;  %6192 = vmatprep.subr.bf16.mxu0 %v6191_v2  ;;  %v6211_v1 = vpack.c.bf16 %v414_v60, %v410_v59  ;;  %v409_v2 = vld [vmem:[%s13700_s1 + $0x680] sm:$0xff]  ;;  %v452_v59 = vld [vmem:[%s13700_s1 + $0x7d8] sm:$0xff]  ;;  %v6357_v62 = vpack.c.bf16 %v447_v56, %v443_v54  ;;  %v4590_v48 = vld [vmem:[%s13700_s1 + $0x8b0] sm:$0xff] }
  0x5c   : > { %6320 = vmatprep.subr.bf16.mxu1 %v6319_v6  ;;  %v415_v6 = vld [vmem:[%s13700_s1 + $0x6b0] sm:$0xff]  ;;  %v6213_v11 = vpack.c.bf16 %v413_v3, %v409_v2  ;;  %v456_v60 = vld [vmem:[%s13700_s1 + $0x7f8] sm:$0xff] }
  0x5d   : > { %v451_v2 = vld [vmem:[%s13700_s1 + $0x7d0] sm:$0xff]  ;;  %v6359_v3 = vpack.c.bf16 %v456_v60, %v452_v59 }
  0x5e   : > { %6194 = vmatpush1.bf16.msra.mxu0 %v6193_v13  ;;  %v6341_v13 = vpack.c.bf16 %v415_v6, %v411_v4  ;;  %v455_v4 = vld [vmem:[%s13700_s1 + $0x7f0] sm:$0xff]  ;;  %v4573_v6 = vld [vmem:[%s13700_s1 + $0x828] sm:$0xff] }
  0x5f   : > { %6322 = vmatpush1.bf16.msra.mxu1 %v6321_v16  ;;  %6196 = vmatprep.subr.bf16.mxu0 %v6195_v17  ;;  %v421_v16 = vld [vmem:[%s13700_s1 + $0x6e0] sm:$0xff]  ;;  %v419_v17 = vld [vmem:[%s13700_s1 + $0x6d0] sm:$0xff]  ;;  %v6361_v10 = vpack.c.bf16 %v455_v4, %v451_v2 }
  0x60   : > { %6324 = vmatprep.subr.bf16.mxu1 %v6323_v21  ;;  %v426_v21 = vld [vmem:[%s13700_s1 + $0x708] sm:$0xff]  ;;  %v6217_v25 = vpack.c.bf16 %v421_v16, %v417_v15  ;;  %v6345_v26 = vpack.c.bf16 %v423_v19, %v419_v17  ;;  %v4570_v15 = vld [vmem:[%s13700_s1 + $0x810] sm:$0xff]  ;;  %v6491_v16 = vpack.c.bf16 %v4575_v8, %v4571_v7 }
  0x61   : > { %v4574_v17 = vld [vmem:[%s13700_s1 + $0x830] sm:$0xff]  ;;  %v4581_v19 = vld [vmem:[%s13700_s1 + $0x868] sm:$0xff] }
  0x62   : > { %6198 = vmatpush1.bf16.msra.mxu0 %v6197_v27  ;;  %v6219_v27 = vpack.c.bf16 %v430_v22, %v426_v21  ;;  %v4579_v21 = vld [vmem:[%s13700_s1 + $0x858] sm:$0xff]  ;;  %v4594_v59 = vld [vmem:[%s13700_s1 + $0x8d0] sm:$0xff] }
  0x63   : > { %6326 = vmatpush1.bf16.msra.mxu1 %v6325_v28  ;;  %6200 = vmatprep.subr.bf16.mxu0 %v6199_v29  ;;  %v425_v28 = vld [vmem:[%s13700_s1 + $0x700] sm:$0xff]  ;;  %v4583_v22 = vld [vmem:[%s13700_s1 + $0x878] sm:$0xff]  ;;  %v4602_v7 = vld [vmem:[%s13700_s1 + $0x910] sm:$0xff] }
  0x64   : > { %6328 = vmatprep.subr.bf16.mxu1 %v6327_v33  ;;  %v429_v29 = vld [vmem:[%s13700_s1 + $0x720] sm:$0xff]  ;;  %v434_v33 = vld [vmem:[%s13700_s1 + $0x748] sm:$0xff]  ;;  %v4622_v35 = vld [vmem:[%s13700_s1 + $0x9b0] sm:$0xff] }
  0x65   : > { %v6221_v37 = vpack.c.bf16 %v429_v29, %v425_v28  ;;  %v4580_v28 = vld [vmem:[%s13700_s1 + $0x860] sm:$0xff]  ;;  %v4578_v29 = vld [vmem:[%s13700_s1 + $0x850] sm:$0xff] }
  0x66   : > { %6202 = vmatpush1.bf16.msra.mxu0 %v6201_v39  ;;  %v6223_v39 = vpack.c.bf16 %v438_v34, %v434_v33  ;;  %v4589_v33 = vld [vmem:[%s13700_s1 + $0x8a8] sm:$0xff]  ;;  %v6497_v42 = vpack.c.bf16 %v4582_v30, %v4578_v29 }
  0x67   : > { %6330 = vmatpush1.bf16.msra.mxu1 %v6329_v40  ;;  %6204 = vmatprep.subr.bf16.mxu0 %v6203_v41  ;;  %v433_v40 = vld [vmem:[%s13700_s1 + $0x740] sm:$0xff]  ;;  %v774_v34 = vld [vmem:[%s8369_s27 + $0x8] sm:$0xfe] }
  0x68   : > { %6332 = vmatprep.subr.bf16.mxu1 %v6331_v45  ;;  %v437_v41 = vld [vmem:[%s13700_s1 + $0x760] sm:$0xff]  ;;  %v442_v45 = vld [vmem:[%s13700_s1 + $0x788] sm:$0xff] }
  0x69   : > { %v6225_v49 = vpack.c.bf16 %v437_v41, %v433_v40  ;;  %v199_v41 = vld [vmem:[%s8369_s27 + $0x30] sm:$0xff] }
  0x6a   : > { %6206 = vmatpush1.bf16.msra.mxu0 %v6205_v51  ;;  %v6227_v51 = vpack.c.bf16 %v446_v46, %v442_v45  ;;  %v4588_v45 = vld [vmem:[%s13700_s1 + $0x8a0] sm:$0xff]  ;;  %v4586_v46 = vld [vmem:[%s13700_s1 + $0x890] sm:$0xff] }
  0x6b   : > { %6334 = vmatpush1.bf16.msra.mxu1 %v6333_v52  ;;  %6208 = vmatprep.subr.bf16.mxu0 %v6207_v53  ;;  %v441_v52 = vld [vmem:[%s13700_s1 + $0x780] sm:$0xff]  ;;  %v6373_v54 = vpack.c.bf16 %v4588_v45, %v4584_v44 }
  0x6c   : > { %6336 = vmatprep.subr.bf16.mxu1 %v6335_v57  ;;  %v445_v53 = vld [vmem:[%s13700_s1 + $0x7a0] sm:$0xff]  ;;  %v450_v57 = vld [vmem:[%s13700_s1 + $0x7c8] sm:$0xff] }
  0x6d   : > { %v6229_v61 = vpack.c.bf16 %v445_v53, %v441_v52  ;;  %v4599_v52 = vld [vmem:[%s13700_s1 + $0x8f8] sm:$0xff]  ;;  %v4624_v45 = vld [vmem:[%s13700_s1 + $0x9c0] sm:$0xff] }
  0x6e   : > { %6210 = vmatpush1.bf16.msra.mxu0 %v6209_v63  ;;  %v6231_v63 = vpack.c.bf16 %v454_v58, %v450_v57  ;;  %v4592_v57 = vld [vmem:[%s13700_s1 + $0x8c0] sm:$0xff] }
  0x6f   : > { %6338 = vmatpush1.bf16.msra.mxu1 %v6337_v0  ;;  %6212 = vmatprep.subr.bf16.mxu0 %v6211_v1  ;;  %v449_v0 = vld [vmem:[%s13700_s1 + $0x7c0] sm:$0xff] }
  0x70   : > { %6340 = vmatprep.subr.bf16.mxu1 %v6339_v5  ;;  %v453_v1 = vld [vmem:[%s13700_s1 + $0x7e0] sm:$0xff]  ;;  %v4569_v5 = vld [vmem:[%s13700_s1 + $0x808] sm:$0xff] }
  0x71   : > { %v6233_v9 = vpack.c.bf16 %v453_v1, %v449_v0  ;;  %v4596_v58 = vld [vmem:[%s13700_s1 + $0x8e0] sm:$0xff]  ;;  %v4603_v0 = vld [vmem:[%s13700_s1 + $0x918] sm:$0xff] }
  0x72   : > { %6214 = vmatpush1.bf16.msra.mxu0 %v6213_v11  ;;  %v6363_v11 = vpack.c.bf16 %v4573_v6, %v4569_v5  ;;  %v4607_v1 = vld [vmem:[%s13700_s1 + $0x938] sm:$0xff]  ;;  %v6377_v2 = vpack.c.bf16 %v4596_v58, %v4592_v57  ;;  %v4600_v5 = vld [vmem:[%s13700_s1 + $0x900] sm:$0xff] }
  0x73   : > { %6342 = vmatpush1.bf16.msra.mxu1 %v6341_v13  ;;  %6216 = vmatprep.subr.bf16.mxu0 %v6215_v14  ;;  %v4568_v13 = vld [vmem:[%s13700_s1 + $0x800] sm:$0xff]  ;;  %v6507_v8 = vpack.c.bf16 %v4607_v1, %v4603_v0  ;;  %v4643_v0 = vld [vmem:[%s13700_s1 + $0xa58] sm:$0xff] }
  0x74   : > { %6344 = vmatprep.subr.bf16.mxu1 %v6343_v18  ;;  %v4572_v14 = vld [vmem:[%s13700_s1 + $0x820] sm:$0xff]  ;;  %v4577_v18 = vld [vmem:[%s13700_s1 + $0x848] sm:$0xff]  ;;  %v4647_v1 = vld [vmem:[%s13700_s1 + $0xa78] sm:$0xff] }
  0x75   : > { %v6365_v24 = vpack.c.bf16 %v4572_v14, %v4568_v13  ;;  %v4604_v6 = vld [vmem:[%s13700_s1 + $0x920] sm:$0xff]  ;;  %v4611_v13 = vld [vmem:[%s13700_s1 + $0x958] sm:$0xff] }
  0x76   : > { %6218 = vmatpush1.bf16.msra.mxu0 %v6217_v25  ;;  %v4576_v25 = vld [vmem:[%s13700_s1 + $0x840] sm:$0xff]  ;;  %v4615_v14 = vld [vmem:[%s13700_s1 + $0x978] sm:$0xff] }
  0x77   : > { %6346 = vmatpush1.bf16.msra.mxu1 %v6345_v26  ;;  %6220 = vmatprep.subr.bf16.mxu0 %v6219_v27  ;;  %v6493_v26 = vpack.c.bf16 %v4574_v17, %v4570_v15  ;;  %v6367_v27 = vpack.c.bf16 %v4581_v19, %v4577_v18  ;;  %v6369_v40 = vpack.c.bf16 %v4580_v28, %v4576_v25  ;;  %v4608_v18 = vld [vmem:[%s13700_s1 + $0x940] sm:$0xff]  ;;  %v4621_v25 = vld [vmem:[%s13700_s1 + $0x9a8] sm:$0xff] }
  0x78   : > { %6348 = vmatprep.subr.bf16.mxu1 %v6347_v31  ;;  %v6495_v31 = vpack.c.bf16 %v4583_v22, %v4579_v21  ;;  %v6381_v15 = vpack.c.bf16 %v4604_v6, %v4600_v5  ;;  %v4612_v19 = vld [vmem:[%s13700_s1 + $0x960] sm:$0xff]  ;;  %v4610_v21 = vld [vmem:[%s13700_s1 + $0x950] sm:$0xff]  ;;  %v6511_v22 = vpack.c.bf16 %v4615_v14, %v4611_v13  ;;  %v4651_v13 = vld [vmem:[%s13700_s1 + $0xa98] sm:$0xff] }
  0x79   : > { %v6385_v28 = vpack.c.bf16 %v4612_v19, %v4608_v18  ;;  %v4632_v57 = vld [vmem:[%s13700_s1 + $0xa00] sm:$0xff]  ;;  %v4655_v14 = vld [vmem:[%s13700_s1 + $0xab8] sm:$0xff] }
  0x7a   : > { %6222 = vmatpush1.bf16.msra.mxu0 %v6221_v37  ;;  %v8939_v37 = vld [vmem:[%s8369_s27 + $0x38] sm:$0xff]  ;;  %v4636_v58 = vld [vmem:[%s13700_s1 + $0xa20] sm:$0xff] }
  0x7b   : > { %6350 = vmatpush1.bf16.msra.mxu1 %v6349_v38  ;;  %6224 = vmatprep.subr.bf16.mxu0 %v6223_v39  ;;  %v1058_v38 = vrot.slane %v774_v34, 1  ;;  %v1059_v39 = vrot.slane %v8638_v12, 1  ;;  %v4640_v5 = vld [vmem:[%s13700_s1 + $0xa40] sm:$0xff] }
  0x7c   : > { %6352 = vmatprep.subr.bf16.mxu1 %v6351_v43  ;;  %v6371_v43 = vpack.c.bf16 %v4589_v33, %v4585_v32  ;;  %v4620_v32 = vld [vmem:[%s13700_s1 + $0x9a0] sm:$0xff]  ;;  %v4618_v33 = vld [vmem:[%s13700_s1 + $0x990] sm:$0xff] }
  0x7d   : > { %v1060_v53 = vsel %vm1054_vm0, %v1058_v38, %v1059_v39  ;;  %v4629_v38 = vld [vmem:[%s13700_s1 + $0x9e8] sm:$0xff]  ;;  %v4644_v6 = vld [vmem:[%s13700_s1 + $0xa60] sm:$0xff] }
  0x7e   : > { %6226 = vmatpush1.bf16.msra.mxu0 %v6225_v49  ;;  %v4593_v49 = vld [vmem:[%s13700_s1 + $0x8c8] sm:$0xff]  ;;  %v6391_v44 = vpack.c.bf16 %v4629_v38, %v4625_v36  ;;  %v4648_v18 = vld [vmem:[%s13700_s1 + $0xa80] sm:$0xff] }
  0x7f   : > { %6354 = vmatpush1.bf16.msra.mxu1 %v6353_v50  ;;  %6228 = vmatprep.subr.bf16.mxu0 %v6227_v51  ;;  %v4597_v50 = vld [vmem:[%s13700_s1 + $0x8e8] sm:$0xff]  ;;  %v4595_v51 = vld [vmem:[%s13700_s1 + $0x8d8] sm:$0xff]  ;;  %v4652_v19 = vld [vmem:[%s13700_s1 + $0xaa0] sm:$0xff] }
  0x80   : > { %6356 = vmatprep.subr.bf16.mxu1 %v6355_v55  ;;  %v6501_v55 = vpack.c.bf16 %v4590_v48, %v4586_v46  ;;  %v6375_v56 = vpack.c.bf16 %v4597_v50, %v4593_v49  ;;  %v6503_v60 = vpack.c.bf16 %v4599_v52, %v4595_v51  ;;  %v4628_v46 = vld [vmem:[%s13700_s1 + $0x9e0] sm:$0xff]  ;;  %v4630_v49 = vld [vmem:[%s13700_s1 + $0x9f0] sm:$0xff]  ;;  %v4633_v50 = vld [vmem:[%s13700_s1 + $0xa08] sm:$0xff] }
  0x81   : > { %v4637_v51 = vld [vmem:[%s13700_s1 + $0xa28] sm:$0xff]  ;;  %v4635_v52 = vld [vmem:[%s13700_s1 + $0xa18] sm:$0xff]  ;;  %v4716_v12 = vld [vmem:[%s13700_s1 + $0xca0] sm:$0xff] }
  0x82   : > { %6230 = vmatpush1.bf16.msra.mxu0 %v6229_v61  ;;  %v4598_v61 = vld [vmem:[%s13700_s1 + $0x8f0] sm:$0xff]  ;;  %v4665_v36 = vld [vmem:[%s13700_s1 + $0xb08] sm:$0xff] }
  0x83   : > { %6358 = vmatpush1.bf16.msra.mxu1 %v6357_v62  ;;  %6232 = vmatprep.subr.bf16.mxu0 %v6231_v63  ;;  %v4601_v62 = vld [vmem:[%s13700_s1 + $0x908] sm:$0xff] }
  0x84   : > { %6360 = vmatprep.subr.bf16.mxu1 %v6359_v3  ;;  %v4605_v63 = vld [vmem:[%s13700_s1 + $0x928] sm:$0xff]  ;;  %v6505_v3 = vpack.c.bf16 %v4598_v61, %v4594_v59  ;;  %v4634_v59 = vld [vmem:[%s13700_s1 + $0xa10] sm:$0xff] }
  0x85   : > { %v6379_v4 = vpack.c.bf16 %v4605_v63, %v4601_v62  ;;  %v4638_v61 = vld [vmem:[%s13700_s1 + $0xa30] sm:$0xff]  ;;  %v4641_v62 = vld [vmem:[%s13700_s1 + $0xa48] sm:$0xff] }
  0x86   : > { %6234 = vmatpush1.bf16.msra.mxu0 %v6233_v9  ;;  %v4606_v9 = vld [vmem:[%s13700_s1 + $0x930] sm:$0xff]  ;;  %v4645_v63 = vld [vmem:[%s13700_s1 + $0xa68] sm:$0xff] }
  0x87   : > { %6362 = vmatpush1.bf16.msra.mxu1 %v6361_v10  ;;  %6364 = vmatprep.subr.bf16.mxu0 %v6363_v11  ;;  %v4609_v10 = vld [vmem:[%s13700_s1 + $0x948] sm:$0xff] }
  0x88   : > { %6492 = vmatprep.subr.bf16.mxu1 %v6491_v16  ;;  %v4613_v11 = vld [vmem:[%s13700_s1 + $0x968] sm:$0xff]  ;;  %v6509_v16 = vpack.c.bf16 %v4606_v9, %v4602_v7  ;;  %v4642_v7 = vld [vmem:[%s13700_s1 + $0xa50] sm:$0xff] }
  0x89   : > { %599 = vmatmul.mubr.f32.vlgmr.msra.gmra.mrb[0].mxu0 %v195_v23  ;;  %v6383_v17 = vpack.c.bf16 %v4613_v11, %v4609_v10  ;;  %v4646_v9 = vld [vmem:[%s13700_s1 + $0xa70] sm:$0xff]  ;;  %v4649_v10 = vld [vmem:[%s13700_s1 + $0xa88] sm:$0xff] }
  0x8a   : > { %753 = vmatmul.mubr.f32.vlgmr.msra.gmra.mrb[0].mxu1 %v195_v23  ;;  %6366 = vmatpush1.bf16.msra.mxu0 %v6365_v24  ;;  %v4614_v23 = vld [vmem:[%s13700_s1 + $0x970] sm:$0xff]  ;;  %v4617_v24 = vld [vmem:[%s13700_s1 + $0x988] sm:$0xff] }
  0x8b   : > { %6494 = vmatpush1.bf16.msra.mxu1 %v6493_v26  ;;  %6368 = vmatprep.subr.bf16.mxu0 %v6367_v27  ;;  %v4619_v26 = vld [vmem:[%s13700_s1 + $0x998] sm:$0xff]  ;;  %v6513_v29 = vpack.c.bf16 %v4614_v23, %v4610_v21  ;;  %v6387_v30 = vpack.c.bf16 %v4621_v25, %v4617_v24  ;;  %v4653_v11 = vld [vmem:[%s13700_s1 + $0xaa8] sm:$0xff]  ;;  %v4650_v21 = vld [vmem:[%s13700_s1 + $0xa90] sm:$0xff] }
  0x8c   : > { %6496 = vmatprep.subr.bf16.mxu1 %v6495_v31  ;;  %604 = vmatprep.mubr.f32.mxu0 %v8939_v37  ;;  %v4623_v27 = vld [vmem:[%s13700_s1 + $0x9b8] sm:$0xff]  ;;  %v4616_v31 = vld [vmem:[%s13700_s1 + $0x980] sm:$0xff]  ;;  %v4654_v23 = vld [vmem:[%s13700_s1 + $0xab0] sm:$0xff] }
  0x8d   : > { %758 = vmatprep.mubr.f32.mxu1 %v8939_v37  ;;  %605 = vmatmul.mubr.f32.gmra.mrb[2].mxu0 %v199_v41  ;;  %v6515_v34 = vpack.c.bf16 %v4623_v27, %v4619_v26  ;;  %v4657_v24 = vld [vmem:[%s13700_s1 + $0xac8] sm:$0xff]  ;;  %v4659_v26 = vld [vmem:[%s13700_s1 + $0xad8] sm:$0xff] }
  0x8e   : > { %6370 = vmatpush1.bf16.msra.mxu0 %v6369_v40  ;;  %759 = vmatmul.mubr.f32.gmra.mrb[2].mxu1 %v199_v41  ;;  %v4627_v40 = vld [vmem:[%s13700_s1 + $0x9d8] sm:$0xff]  ;;  %v4661_v25 = vld [vmem:[%s13700_s1 + $0xae8] sm:$0xff] }
  0x8f   : > { %6498 = vmatpush1.bf16.msra.mxu1 %v6497_v42  ;;  %6372 = vmatprep.subr.bf16.mxu0 %v6371_v43  ;;  %v4631_v41 = vld [vmem:[%s13700_s1 + $0x9f8] sm:$0xff]  ;;  %v6389_v42 = vpack.c.bf16 %v4620_v32, %v4616_v31  ;;  %v6517_v43 = vpack.c.bf16 %v4622_v35, %v4618_v33  ;;  %v4656_v31 = vld [vmem:[%s13700_s1 + $0xac0] sm:$0xff]  ;;  %v4658_v33 = vld [vmem:[%s13700_s1 + $0xad0] sm:$0xff] }
  0x90   : > { %6500 = vmatprep.subr.bf16.mxu1 %v6499_v47  ;;  %1147 = vmatprep.mubr.f32.mxu0 %v1060_v53  ;;  %v4626_v47 = vld [vmem:[%s13700_s1 + $0x9d0] sm:$0xff]  ;;  %v6519_v48 = vpack.c.bf16 %v4631_v41, %v4627_v40  ;;  %v4663_v27 = vld [vmem:[%s13700_s1 + $0xaf8] sm:$0xff]  ;;  %v4660_v32 = vld [vmem:[%s13700_s1 + $0xae0] sm:$0xff] }
  0x91   : > { %1301 = vmatprep.mubr.f32.mxu1 %v1060_v53  ;;  %v4639_v53 = vld [vmem:[%s13700_s1 + $0xa38] sm:$0xff]  ;;  %v4662_v35 = vld [vmem:[%s13700_s1 + $0xaf0] sm:$0xff]  ;;  %v4669_v38 = vld [vmem:[%s13700_s1 + $0xb28] sm:$0xff] }
  0x92   : > { %6374 = vmatpush1.bf16.msra.mxu0 %v6373_v54  ;;  %v6393_v54 = vpack.c.bf16 %v4628_v46, %v4624_v45  ;;  %v4667_v40 = vld [vmem:[%s13700_s1 + $0xb18] sm:$0xff]  ;;  %v4664_v45 = vld [vmem:[%s13700_s1 + $0xb00] sm:$0xff] }
  0x93   : > { %6502 = vmatpush1.bf16.msra.mxu1 %v6501_v55  ;;  %6376 = vmatprep.subr.bf16.mxu0 %v6375_v56  ;;  %v6521_v55 = vpack.c.bf16 %v4630_v49, %v4626_v47  ;;  %v6395_v56 = vpack.c.bf16 %v4637_v51, %v4633_v50  ;;  %v4671_v41 = vld [vmem:[%s13700_s1 + $0xb38] sm:$0xff]  ;;  %v4668_v46 = vld [vmem:[%s13700_s1 + $0xb20] sm:$0xff]  ;;  %v4666_v47 = vld [vmem:[%s13700_s1 + $0xb10] sm:$0xff] }
  0x94   : > { %6504 = vmatprep.subr.bf16.mxu1 %v6503_v60  ;;  %v6523_v60 = vpack.c.bf16 %v4639_v53, %v4635_v52  ;;  %v4670_v49 = vld [vmem:[%s13700_s1 + $0xb30] sm:$0xff]  ;;  %v4673_v50 = vld [vmem:[%s13700_s1 + $0xb48] sm:$0xff]  ;;  %v4675_v52 = vld [vmem:[%s13700_s1 + $0xb58] sm:$0xff] }
  0x95   : > { %v4677_v51 = vld [vmem:[%s13700_s1 + $0xb68] sm:$0xff]  ;;  %v4679_v53 = vld [vmem:[%s13700_s1 + $0xb78] sm:$0xff] }
  0x96   : > { %6378 = vmatpush1.bf16.msra.mxu0 %v6377_v2  ;;  %v6397_v2 = vpack.c.bf16 %v4636_v58, %v4632_v57  ;;  %v4672_v57 = vld [vmem:[%s13700_s1 + $0xb40] sm:$0xff] }
  0x97   : > { %6506 = vmatpush1.bf16.msra.mxu1 %v6505_v3  ;;  %6380 = vmatprep.subr.bf16.mxu0 %v6379_v4  ;;  %v6525_v3 = vpack.c.bf16 %v4638_v61, %v4634_v59  ;;  %v6399_v4 = vpack.c.bf16 %v4645_v63, %v4641_v62  ;;  %v4676_v58 = vld [vmem:[%s13700_s1 + $0xb60] sm:$0xff]  ;;  %v4674_v59 = vld [vmem:[%s13700_s1 + $0xb50] sm:$0xff]  ;;  %v4681_v62 = vld [vmem:[%s13700_s1 + $0xb88] sm:$0xff] }
  0x98   : > { %6508 = vmatprep.subr.bf16.mxu1 %v6507_v8  ;;  %v6527_v8 = vpack.c.bf16 %v4647_v1, %v4643_v0  ;;  %v4678_v61 = vld [vmem:[%s13700_s1 + $0xb70] sm:$0xff]  ;;  %v4685_v63 = vld [vmem:[%s13700_s1 + $0xba8] sm:$0xff]  ;;  %v4683_v0 = vld [vmem:[%s13700_s1 + $0xb98] sm:$0xff] }
  0x99   : > { %v4687_v1 = vld [vmem:[%s13700_s1 + $0xbb8] sm:$0xff] }
  0x9a   : > { %6382 = vmatpush1.bf16.msra.mxu0 %v6381_v15  ;;  %v6401_v15 = vpack.c.bf16 %v4644_v6, %v4640_v5  ;;  %v4680_v5 = vld [vmem:[%s13700_s1 + $0xb80] sm:$0xff] }
  0x9b   : > { %6510 = vmatpush1.bf16.msra.mxu1 %v6509_v16  ;;  %6384 = vmatprep.subr.bf16.mxu0 %v6383_v17  ;;  %v6529_v16 = vpack.c.bf16 %v4646_v9, %v4642_v7  ;;  %v6403_v17 = vpack.c.bf16 %v4653_v11, %v4649_v10  ;;  %v4684_v6 = vld [vmem:[%s13700_s1 + $0xba0] sm:$0xff]  ;;  %v4682_v7 = vld [vmem:[%s13700_s1 + $0xb90] sm:$0xff]  ;;  %v4689_v10 = vld [vmem:[%s13700_s1 + $0xbc8] sm:$0xff] }
  0x9c   : > { %6512 = vmatprep.subr.bf16.mxu1 %v6511_v22  ;;  %v6531_v22 = vpack.c.bf16 %v4655_v14, %v4651_v13  ;;  %v4686_v9 = vld [vmem:[%s13700_s1 + $0xbb0] sm:$0xff]  ;;  %v4693_v11 = vld [vmem:[%s13700_s1 + $0xbe8] sm:$0xff]  ;;  %v4691_v13 = vld [vmem:[%s13700_s1 + $0xbd8] sm:$0xff] }
  0x9d   : > { %v4695_v14 = vld [vmem:[%s13700_s1 + $0xbf8] sm:$0xff] }
  0x9e   : > { %6386 = vmatpush1.bf16.msra.mxu0 %v6385_v28  ;;  %v6405_v28 = vpack.c.bf16 %v4652_v19, %v4648_v18  ;;  %v6423_v18 = vpack.c.bf16 %v4693_v11, %v4689_v10  ;;  %v4692_v19 = vld [vmem:[%s13700_s1 + $0xbe0] sm:$0xff]  ;;  %v4723_v10 = vld [vmem:[%s13700_s1 + $0xcd8] sm:$0xff] }
  0x9f   : > { %6514 = vmatpush1.bf16.msra.mxu1 %v6513_v29  ;;  %6388 = vmatprep.subr.bf16.mxu0 %v6387_v30  ;;  %v6533_v29 = vpack.c.bf16 %v4654_v23, %v4650_v21  ;;  %v6407_v30 = vpack.c.bf16 %v4661_v25, %v4657_v24  ;;  %v4690_v21 = vld [vmem:[%s13700_s1 + $0xbd0] sm:$0xff]  ;;  %v6551_v23 = vpack.c.bf16 %v4695_v14, %v4691_v13  ;;  %v4697_v25 = vld [vmem:[%s13700_s1 + $0xc08] sm:$0xff]  ;;  %v4727_v11 = vld [vmem:[%s13700_s1 + $0xcf8] sm:$0xff] }
  0xa0   : > { %6516 = vmatprep.subr.bf16.mxu1 %v6515_v34  ;;  %v6535_v34 = vpack.c.bf16 %v4663_v27, %v4659_v26  ;;  %v4694_v24 = vld [vmem:[%s13700_s1 + $0xbf0] sm:$0xff]  ;;  %v4701_v26 = vld [vmem:[%s13700_s1 + $0xc28] sm:$0xff]  ;;  %v4699_v27 = vld [vmem:[%s13700_s1 + $0xc18] sm:$0xff] }
  0xa2   : > { %6390 = vmatpush1.bf16.msra.mxu0 %v6389_v42  ;;  %v6409_v42 = vpack.c.bf16 %v4660_v32, %v4656_v31  ;;  %v1056_v31 = vrot.slane %v8654_v20, 1  ;;  %v4696_v32 = vld [vmem:[%s13700_s1 + $0xc00] sm:$0xff] }
  0xa3   : > { %6518 = vmatpush1.bf16.msra.mxu1 %v6517_v43  ;;  %6392 = vmatprep.subr.bf16.mxu0 %v6391_v44  ;;  %v6537_v43 = vpack.c.bf16 %v4662_v35, %v4658_v33  ;;  %v6411_v44 = vpack.c.bf16 %v4669_v38, %v4665_v36  ;;  %v782_v33 = vld [vmem:[%s8369_s27 + $0x48] sm:$0x1]  ;;  %v6427_v35 = vpack.c.bf16 %v4701_v26, %v4697_v25  ;;  %v4700_v36 = vld [vmem:[%s13700_s1 + $0xc20] sm:$0xff]  ;;  %v4698_v38 = vld [vmem:[%s13700_s1 + $0xc10] sm:$0xff] }
  0xa4   : > { %6520 = vmatprep.subr.bf16.mxu1 %v6519_v48  ;;  %v6539_v48 = vpack.c.bf16 %v4671_v41, %v4667_v40  ;;  %v781_v40 = vld [vmem:[%s8369_s27 + $0x40] sm:$0x1]  ;;  %v4702_v41 = vld [vmem:[%s13700_s1 + $0xc30] sm:$0xff]  ;;  %v4731_v25 = vld [vmem:[%s13700_s1 + $0xd18] sm:$0xff] }
  0xa5   : > { %v4735_v26 = vld [vmem:[%s13700_s1 + $0xd38] sm:$0xff] }
  0xa6   : > { %6394 = vmatpush1.bf16.msra.mxu0 %v6393_v54  ;;  %v6413_v54 = vpack.c.bf16 %v4668_v46, %v4664_v45  ;;  %v4711_v45 = vld [vmem:[%s13700_s1 + $0xc78] sm:$0xff]  ;;  %v1069_v46 = vrot.slane %v782_v33, 1  ;;  %v6571_v33 = vpack.c.bf16 %v4735_v26, %v4731_v25 }
  0xa7   : > { %6522 = vmatpush1.bf16.msra.mxu1 %v6521_v55  ;;  %6396 = vmatprep.subr.bf16.mxu0 %v6395_v56  ;;  %v6541_v55 = vpack.c.bf16 %v4670_v49, %v4666_v47  ;;  %v6415_v56 = vpack.c.bf16 %v4677_v51, %v4673_v50  ;;  %v1067_v49 = vrot.slane %v781_v40, 1  ;;  %v776_v50 = vld [vmem:[%s8369_s27 + $0x18] sm:$0xfe]  ;;  %v6557_v51 = vpack.c.bf16 %v4702_v41, %v4698_v38 }
  0xa8   : > { %6524 = vmatprep.subr.bf16.mxu1 %v6523_v60  ;;  %v6543_v60 = vpack.c.bf16 %v4679_v53, %v4675_v52  ;;  %v4704_v53 = vld [vmem:[%s13700_s1 + $0xc40] sm:$0xff]  ;;  %v4739_v38 = vld [vmem:[%s13700_s1 + $0xd58] sm:$0xff] }
  0xa9   : > { %v4743_v40 = vld [vmem:[%s13700_s1 + $0xd78] sm:$0xff] }
  0xaa   : > { %6398 = vmatpush1.bf16.msra.mxu0 %v6397_v2  ;;  %v6417_v2 = vpack.c.bf16 %v4676_v58, %v4672_v57  ;;  %v4710_v57 = vld [vmem:[%s13700_s1 + $0xc70] sm:$0xff]  ;;  %v4713_v58 = vld [vmem:[%s13700_s1 + $0xc88] sm:$0xff] }
  0xab   : > { %6526 = vmatpush1.bf16.msra.mxu1 %v6525_v3  ;;  %6400 = vmatprep.subr.bf16.mxu0 %v6399_v4  ;;  %v6545_v3 = vpack.c.bf16 %v4678_v61, %v4674_v59  ;;  %v6419_v4 = vpack.c.bf16 %v4685_v63, %v4681_v62  ;;  %v4717_v59 = vld [vmem:[%s13700_s1 + $0xca8] sm:$0xff]  ;;  %v4719_v61 = vld [vmem:[%s13700_s1 + $0xcb8] sm:$0xff]  ;;  %v1070_v62 = vsel %vm1054_vm0, %v1059_v39, %v1069_v46  ;;  %v1064_v63 = vrot.slane %v776_v50, 1  ;;  %v4714_v39 = vld [vmem:[%s13700_s1 + $0xc90] sm:$0xff] }
  0xac   : > { %6528 = vmatprep.subr.bf16.mxu1 %v6527_v8  ;;  %v6547_v8 = vpack.c.bf16 %v4687_v1, %v4683_v0  ;;  %v1065_v0 = vrot.slane %v8939_v37, 1  ;;  %v6575_v46 = vpack.c.bf16 %v4743_v40, %v4739_v38  ;;  %v4747_v50 = vld [vmem:[%s13700_s1 + $0xd98] sm:$0xff]  ;;  %v4840_v37 = vld [vmem:[%s13700_s1 + $0x1080] sm:$0xff] }
  0xae   : > { %6402 = vmatpush1.bf16.msra.mxu0 %v6401_v15  ;;  %v6421_v15 = vpack.c.bf16 %v4684_v6, %v4680_v5  ;;  %v4712_v5 = vld [vmem:[%s13700_s1 + $0xc80] sm:$0xff]  ;;  %v1066_v13 = vsel %vm1054_vm0, %v1064_v63, %v1065_v0  ;;  %v4759_v63 = vld [vmem:[%s13700_s1 + $0xdf8] sm:$0xff] }
  0xaf   : > { %6530 = vmatpush1.bf16.msra.mxu1 %v6529_v16  ;;  %6404 = vmatprep.subr.bf16.mxu0 %v6403_v17  ;;  %v4688_v16 = vld [vmem:[%s13700_s1 + $0xbc0] sm:$0xff]  ;;  %v6549_v17 = vpack.c.bf16 %v4686_v9, %v4682_v7  ;;  %v4718_v7 = vld [vmem:[%s13700_s1 + $0xcb0] sm:$0xff]  ;;  %v4725_v9 = vld [vmem:[%s13700_s1 + $0xce8] sm:$0xff]  ;;  %v6437_v14 = vpack.c.bf16 %v4716_v12, %v4712_v5 }
  0xb0   : > { %6532 = vmatprep.subr.bf16.mxu1 %v6531_v22  ;;  %v773_v22 = vld [vmem:[%s8369_s27] sm:$0xfe]  ;;  %v4754_v12 = vld [vmem:[%s13700_s1 + $0xdd0] sm:$0xff] }
  0xb1   : > { %v4756_v5 = vld [vmem:[%s13700_s1 + $0xde0] sm:$0xff] }
  0xb2   : > { %6406 = vmatpush1.bf16.msra.mxu0 %v6405_v28  ;;  %v4703_v28 = vld [vmem:[%s13700_s1 + $0xc38] sm:$0xff] }
  0xb3   : > { %6534 = vmatpush1.bf16.msra.mxu1 %v6533_v29  ;;  %6408 = vmatprep.subr.bf16.mxu0 %v6407_v30  ;;  %v6425_v29 = vpack.c.bf16 %v4692_v19, %v4688_v16  ;;  %v1055_v30 = vrot.slane %v773_v22, 1  ;;  %v6555_v20 = vpack.c.bf16 %v4703_v28, %v4699_v27  ;;  %v4722_v19 = vld [vmem:[%s13700_s1 + $0xcd0] sm:$0xff] }
  0xb4   : > { %6536 = vmatprep.subr.bf16.mxu1 %v6535_v34  ;;  %v6553_v34 = vpack.c.bf16 %v4694_v24, %v4690_v21  ;;  %v6567_v21 = vpack.c.bf16 %v4727_v11, %v4723_v10  ;;  %v4726_v22 = vld [vmem:[%s13700_s1 + $0xcf0] sm:$0xff]  ;;  %v4733_v24 = vld [vmem:[%s13700_s1 + $0xd28] sm:$0xff]  ;;  %v4767_v10 = vld [vmem:[%s13700_s1 + $0xe38] sm:$0xff] }
  0xb5   : > { %v1057_v47 = vsel %vm1054_vm0, %v1055_v30, %v1056_v31  ;;  %v6569_v28 = vpack.c.bf16 %v4726_v22, %v4722_v19  ;;  %v4728_v30 = vld [vmem:[%s13700_s1 + $0xd00] sm:$0xff]  ;;  %v4766_v19 = vld [vmem:[%s13700_s1 + $0xe30] sm:$0xff]  ;;  %v4773_v22 = vld [vmem:[%s13700_s1 + $0xe68] sm:$0xff] }
  0xb6   : > { %6410 = vmatpush1.bf16.msra.mxu0 %v6409_v42  ;;  %v4705_v42 = vld [vmem:[%s13700_s1 + $0xc48] sm:$0xff] }
  0xb7   : > { %6538 = vmatpush1.bf16.msra.mxu1 %v6537_v43  ;;  %6412 = vmatprep.subr.bf16.mxu0 %v6411_v44  ;;  %v4709_v43 = vld [vmem:[%s13700_s1 + $0xc68] sm:$0xff]  ;;  %v4707_v44 = vld [vmem:[%s13700_s1 + $0xc58] sm:$0xff] }
  0xb8   : > { %6540 = vmatprep.subr.bf16.mxu1 %v6539_v48  ;;  %v6429_v48 = vpack.c.bf16 %v4700_v36, %v4696_v32  ;;  %v6431_v52 = vpack.c.bf16 %v4709_v43, %v4705_v42  ;;  %v4730_v32 = vld [vmem:[%s13700_s1 + $0xd10] sm:$0xff]  ;;  %v4741_v36 = vld [vmem:[%s13700_s1 + $0xd68] sm:$0xff]  ;;  %v4736_v43 = vld [vmem:[%s13700_s1 + $0xd40] sm:$0xff] }
  0xba   : > { %6414 = vmatpush1.bf16.msra.mxu0 %v6413_v54  ;;  %v4708_v54 = vld [vmem:[%s13700_s1 + $0xc60] sm:$0xff] }
  0xbb   : > { %6542 = vmatpush1.bf16.msra.mxu1 %v6541_v55  ;;  %6416 = vmatprep.subr.bf16.mxu0 %v6415_v56  ;;  %v4706_v55 = vld [vmem:[%s13700_s1 + $0xc50] sm:$0xff]  ;;  %v6559_v56 = vpack.c.bf16 %v4711_v45, %v4707_v44  ;;  %v6433_v1 = vpack.c.bf16 %v4708_v54, %v4704_v53  ;;  %v4740_v44 = vld [vmem:[%s13700_s1 + $0xd60] sm:$0xff] }
  0xbc   : > { %6544 = vmatprep.subr.bf16.mxu1 %v6543_v60  ;;  %v4715_v60 = vld [vmem:[%s13700_s1 + $0xc98] sm:$0xff]  ;;  %v4738_v45 = vld [vmem:[%s13700_s1 + $0xd50] sm:$0xff] }
  0xbd   : > { %v6563_v6 = vpack.c.bf16 %v4719_v61, %v4715_v60  ;;  %v4753_v60 = vld [vmem:[%s13700_s1 + $0xdc8] sm:$0xff] }
  0xbe   : > { %6418 = vmatpush1.bf16.msra.mxu0 %v6417_v2  ;;  %v1068_v2 = vsel %vm1054_vm0, %v1056_v31, %v1067_v49  ;;  %v4732_v31 = vld [vmem:[%s13700_s1 + $0xd20] sm:$0xff]  ;;  %v4749_v49 = vld [vmem:[%s13700_s1 + $0xda8] sm:$0xff] }
  0xbf   : > { %6546 = vmatpush1.bf16.msra.mxu1 %v6545_v3  ;;  %6420 = vmatprep.subr.bf16.mxu0 %v6419_v4  ;;  %v6561_v3 = vpack.c.bf16 %v4710_v57, %v4706_v55  ;;  %v6435_v4 = vpack.c.bf16 %v4717_v59, %v4713_v58  ;;  %v4744_v55 = vld [vmem:[%s13700_s1 + $0xd80] sm:$0xff]  ;;  %v4746_v57 = vld [vmem:[%s13700_s1 + $0xd90] sm:$0xff]  ;;  %v4757_v61 = vld [vmem:[%s13700_s1 + $0xde8] sm:$0xff] }
  0xc0   : > { %6548 = vmatprep.subr.bf16.mxu1 %v6547_v8  ;;  %v4721_v8 = vld [vmem:[%s13700_s1 + $0xcc8] sm:$0xff]  ;;  %v4750_v59 = vld [vmem:[%s13700_s1 + $0xdb0] sm:$0xff] }
  0xc1   : > { %v6439_v16 = vpack.c.bf16 %v4725_v9, %v4721_v8  ;;  %v4765_v8 = vld [vmem:[%s13700_s1 + $0xe28] sm:$0xff]  ;;  %v4763_v9 = vld [vmem:[%s13700_s1 + $0xe18] sm:$0xff] }
  0xc2   : > { %6422 = vmatpush1.bf16.msra.mxu0 %v6421_v15  ;;  %v6565_v15 = vpack.c.bf16 %v4718_v7, %v4714_v39  ;;  %v4761_v7 = vld [vmem:[%s13700_s1 + $0xe08] sm:$0xff] }
  0xc3   : > { %6550 = vmatpush1.bf16.msra.mxu1 %v6549_v17  ;;  %6424 = vmatprep.subr.bf16.mxu0 %v6423_v18  ;;  %v4720_v17 = vld [vmem:[%s13700_s1 + $0xcc0] sm:$0xff] }
  0xc4   : > { %6552 = vmatprep.subr.bf16.mxu1 %v6551_v23  ;;  %v4724_v18 = vld [vmem:[%s13700_s1 + $0xce0] sm:$0xff]  ;;  %v4729_v23 = vld [vmem:[%s13700_s1 + $0xd08] sm:$0xff] }
  0xc5   : > { %v6441_v27 = vpack.c.bf16 %v4724_v18, %v4720_v17  ;;  %v4762_v17 = vld [vmem:[%s13700_s1 + $0xe10] sm:$0xff]  ;;  %v6587_v18 = vpack.c.bf16 %v4767_v10, %v4763_v9 }
  0xc6   : > { %6426 = vmatpush1.bf16.msra.mxu0 %v6425_v29  ;;  %v6443_v29 = vpack.c.bf16 %v4733_v24, %v4729_v23  ;;  %v4771_v23 = vld [vmem:[%s13700_s1 + $0xe58] sm:$0xff]  ;;  %v6589_v26 = vpack.c.bf16 %v4766_v19, %v4762_v17  ;;  %v4806_v17 = vld [vmem:[%s13700_s1 + $0xf70] sm:$0xff]  ;;  %v4813_v19 = vld [vmem:[%s13700_s1 + $0xfa8] sm:$0xff] }
  0xc7   : > { %6554 = vmatpush1.bf16.msra.mxu1 %v6553_v34  ;;  %6428 = vmatprep.subr.bf16.mxu0 %v6427_v35  ;;  %v4734_v34 = vld [vmem:[%s13700_s1 + $0xd30] sm:$0xff]  ;;  %v4737_v35 = vld [vmem:[%s13700_s1 + $0xd48] sm:$0xff]  ;;  %v4775_v24 = vld [vmem:[%s13700_s1 + $0xe78] sm:$0xff] }
  0xc8   : > { %6556 = vmatprep.subr.bf16.mxu1 %v6555_v20  ;;  %v6445_v20 = vpack.c.bf16 %v4732_v31, %v4728_v30  ;;  %v6573_v41 = vpack.c.bf16 %v4734_v34, %v4730_v32  ;;  %v6447_v42 = vpack.c.bf16 %v4741_v36, %v4737_v35  ;;  %v4770_v30 = vld [vmem:[%s13700_s1 + $0xe50] sm:$0xff]  ;;  %v6591_v31 = vpack.c.bf16 %v4775_v24, %v4771_v23  ;;  %v4781_v34 = vld [vmem:[%s13700_s1 + $0xea8] sm:$0xff]  ;;  %v4779_v35 = vld [vmem:[%s13700_s1 + $0xe98] sm:$0xff] }
  0xc9   : > { %1148 = vmatmul.mubr.f32.vlgmr.msra.gmra.mrb[0].mxu0 %v1057_v47  ;;  %v4774_v32 = vld [vmem:[%s13700_s1 + $0xe70] sm:$0xff]  ;;  %v4783_v36 = vld [vmem:[%s13700_s1 + $0xeb8] sm:$0xff] }
  0xca   : > { %6430 = vmatpush1.bf16.msra.mxu0 %v6429_v48  ;;  %1302 = vmatmul.mubr.f32.vlgmr.msra.gmra.mrb[0].mxu1 %v1057_v47  ;;  %v4742_v47 = vld [vmem:[%s13700_s1 + $0xd70] sm:$0xff]  ;;  %v4745_v48 = vld [vmem:[%s13700_s1 + $0xd88] sm:$0xff]  ;;  %v6593_v40 = vpack.c.bf16 %v4774_v32, %v4770_v30 }
  0xcb   : > { %6558 = vmatpush1.bf16.msra.mxu1 %v6557_v51  ;;  %6432 = vmatprep.subr.bf16.mxu0 %v6431_v52  ;;  %v4751_v51 = vld [vmem:[%s13700_s1 + $0xdb8] sm:$0xff]  ;;  %v6449_v52 = vpack.c.bf16 %v4740_v44, %v4736_v43  ;;  %v6577_v53 = vpack.c.bf16 %v4742_v47, %v4738_v45  ;;  %v6451_v54 = vpack.c.bf16 %v4749_v49, %v4745_v48  ;;  %v4778_v43 = vld [vmem:[%s13700_s1 + $0xe90] sm:$0xff]  ;;  %v4789_v47 = vld [vmem:[%s13700_s1 + $0xee8] sm:$0xff] }
  0xcc   : > { %6560 = vmatprep.subr.bf16.mxu1 %v6559_v56  ;;  %1153 = vmatprep.mubr.f32.mxu0 %v1070_v62  ;;  %v4748_v56 = vld [vmem:[%s13700_s1 + $0xda0] sm:$0xff]  ;;  %v6579_v58 = vpack.c.bf16 %v4751_v51, %v4747_v50  ;;  %v6595_v44 = vpack.c.bf16 %v4783_v36, %v4779_v35  ;;  %v4782_v45 = vld [vmem:[%s13700_s1 + $0xeb0] sm:$0xff]  ;;  %v4787_v48 = vld [vmem:[%s13700_s1 + $0xed8] sm:$0xff] }
  0xcd   : > { %1307 = vmatprep.mubr.f32.mxu1 %v1070_v62  ;;  %1154 = vmatmul.mubr.f32.gmra.mrb[2].mxu0 %v1068_v2  ;;  %v4755_v62 = vld [vmem:[%s13700_s1 + $0xdd8] sm:$0xff]  ;;  %v6597_v51 = vpack.c.bf16 %v4782_v45, %v4778_v43  ;;  %v4814_v30 = vld [vmem:[%s13700_s1 + $0xfb0] sm:$0xff]  ;;  %v4821_v32 = vld [vmem:[%s13700_s1 + $0xfe8] sm:$0xff] }
  0xce   : > { %6434 = vmatpush1.bf16.msra.mxu0 %v6433_v1  ;;  %1308 = vmatmul.mubr.f32.gmra.mrb[2].mxu1 %v1068_v2  ;;  %v6453_v1 = vpack.c.bf16 %v4748_v56, %v4744_v55  ;;  %v6581_v2 = vpack.c.bf16 %v4750_v59, %v4746_v57  ;;  %v6583_v39 = vpack.c.bf16 %v4759_v63, %v4755_v62  ;;  %v4791_v49 = vld [vmem:[%s13700_s1 + $0xef8] sm:$0xff]  ;;  %v4786_v55 = vld [vmem:[%s13700_s1 + $0xed0] sm:$0xff]  ;;  %v4797_v59 = vld [vmem:[%s13700_s1 + $0xf28] sm:$0xff] }
  0xcf   : > { %6562 = vmatpush1.bf16.msra.mxu1 %v6561_v3  ;;  %6436 = vmatprep.subr.bf16.mxu0 %v6435_v4  ;;  %v6455_v3 = vpack.c.bf16 %v4757_v61, %v4753_v60  ;;  %v4752_v4 = vld [vmem:[%s13700_s1 + $0xdc0] sm:$0xff]  ;;  %v6599_v56 = vpack.c.bf16 %v4791_v49, %v4787_v48  ;;  %v4790_v57 = vld [vmem:[%s13700_s1 + $0xef0] sm:$0xff]  ;;  %v4795_v60 = vld [vmem:[%s13700_s1 + $0xf18] sm:$0xff] }
  0xd0   : > { %6564 = vmatprep.subr.bf16.mxu1 %v6563_v6  ;;  %1224 = vmatprep.mubr.f32.mxu0 %v1066_v13  ;;  %v4758_v6 = vld [vmem:[%s13700_s1 + $0xdf0] sm:$0xff]  ;;  %v6457_v11 = vpack.c.bf16 %v4756_v5, %v4752_v4  ;;  %v4799_v61 = vld [vmem:[%s13700_s1 + $0xf38] sm:$0xff]  ;;  %v6601_v63 = vpack.c.bf16 %v4790_v57, %v4786_v55  ;;  %v4816_v36 = vld [vmem:[%s13700_s1 + $0xfc0] sm:$0xff] }
  0xd1   : > { %1378 = vmatprep.mubr.f32.mxu1 %v1066_v13  ;;  %v6585_v13 = vpack.c.bf16 %v4758_v6, %v4754_v12  ;;  %v4794_v4 = vld [vmem:[%s13700_s1 + $0xf10] sm:$0xff]  ;;  %v6603_v5 = vpack.c.bf16 %v4799_v61, %v4795_v60  ;;  %v4805_v6 = vld [vmem:[%s13700_s1 + $0xf68] sm:$0xff]  ;;  %v4831_v48 = vld [vmem:[%s13700_s1 + $0x1038] sm:$0xff] }
  0xd2   : > { %6438 = vmatpush1.bf16.msra.mxu0 %v6437_v14  ;;  %v6459_v14 = vpack.c.bf16 %v4765_v8, %v4761_v7  ;;  %v4798_v12 = vld [vmem:[%s13700_s1 + $0xf30] sm:$0xff]  ;;  %v4803_v7 = vld [vmem:[%s13700_s1 + $0xf58] sm:$0xff]  ;;  %v4825_v45 = vld [vmem:[%s13700_s1 + $0x1008] sm:$0xff] }
  0xd3   : > { %6566 = vmatpush1.bf16.msra.mxu1 %v6565_v15  ;;  %6440 = vmatprep.subr.bf16.mxu0 %v6439_v16  ;;  %v4760_v15 = vld [vmem:[%s13700_s1 + $0xe00] sm:$0xff]  ;;  %v4807_v8 = vld [vmem:[%s13700_s1 + $0xf78] sm:$0xff]  ;;  %v6605_v10 = vpack.c.bf16 %v4798_v12, %v4794_v4  ;;  %v4830_v61 = vld [vmem:[%s13700_s1 + $0x1030] sm:$0xff] }
  0xd4   : > { %6568 = vmatprep.subr.bf16.mxu1 %v6567_v21  ;;  %v4764_v16 = vld [vmem:[%s13700_s1 + $0xe20] sm:$0xff]  ;;  %v4769_v21 = vld [vmem:[%s13700_s1 + $0xe48] sm:$0xff] }
  0xd5   : > { %v6461_v25 = vpack.c.bf16 %v4764_v16, %v4760_v15  ;;  %v4802_v15 = vld [vmem:[%s13700_s1 + $0xf50] sm:$0xff]  ;;  %v6607_v16 = vpack.c.bf16 %v4807_v8, %v4803_v7  ;;  %v4828_v57 = vld [vmem:[%s13700_s1 + $0x1020] sm:$0xff] }
  0xd6   : > { %6442 = vmatpush1.bf16.msra.mxu0 %v6441_v27  ;;  %v6463_v27 = vpack.c.bf16 %v4773_v22, %v4769_v21  ;;  %v4811_v21 = vld [vmem:[%s13700_s1 + $0xf98] sm:$0xff]  ;;  %v6609_v24 = vpack.c.bf16 %v4806_v17, %v4802_v15  ;;  %v4832_v8 = vld [vmem:[%s13700_s1 + $0x1040] sm:$0xff]  ;;  %v4845_v15 = vld [vmem:[%s13700_s1 + $0x10a8] sm:$0xff] }
  0xd7   : > { %6570 = vmatpush1.bf16.msra.mxu1 %v6569_v28  ;;  %6444 = vmatprep.subr.bf16.mxu0 %v6443_v29  ;;  %v4768_v28 = vld [vmem:[%s13700_s1 + $0xe40] sm:$0xff]  ;;  %v4815_v22 = vld [vmem:[%s13700_s1 + $0xfb8] sm:$0xff] }
  0xd8   : > { %6572 = vmatprep.subr.bf16.mxu1 %v6571_v33  ;;  %v4772_v29 = vld [vmem:[%s13700_s1 + $0xe60] sm:$0xff]  ;;  %v4777_v33 = vld [vmem:[%s13700_s1 + $0xe88] sm:$0xff]  ;;  %v4847_v17 = vld [vmem:[%s13700_s1 + $0x10b8] sm:$0xff] }
  0xd9   : > { %v6465_v38 = vpack.c.bf16 %v4772_v29, %v4768_v28  ;;  %v4810_v28 = vld [vmem:[%s13700_s1 + $0xf90] sm:$0xff]  ;;  %v6611_v29 = vpack.c.bf16 %v4815_v22, %v4811_v21  ;;  %v9740_v21 = vld [vmem:[%s8369_s27 + $0x28] sm:$0xff] }
  0xda   : > { %6446 = vmatpush1.bf16.msra.mxu0 %v6445_v20  ;;  %v6467_v20 = vpack.c.bf16 %v4781_v34, %v4777_v33  ;;  %v4819_v33 = vld [vmem:[%s13700_s1 + $0xfd8] sm:$0xff]  ;;  %v1677_v22 = vrot.slane %v9740_v21, 2  ;;  %v4968_v21 = vld [vmem:[%s13700_s1 + $0x1480] sm:$0xff] }
  0xdb   : > { %6574 = vmatpush1.bf16.msra.mxu1 %v6573_v41  ;;  %6448 = vmatprep.subr.bf16.mxu0 %v6447_v42  ;;  %v4776_v41 = vld [vmem:[%s13700_s1 + $0xe80] sm:$0xff]  ;;  %v4823_v34 = vld [vmem:[%s13700_s1 + $0xff8] sm:$0xff] }
  0xdc   : > { %6576 = vmatprep.subr.bf16.mxu1 %v6575_v46  ;;  %v4780_v42 = vld [vmem:[%s13700_s1 + $0xea0] sm:$0xff]  ;;  %v4785_v46 = vld [vmem:[%s13700_s1 + $0xec8] sm:$0xff]  ;;  %v6615_v43 = vpack.c.bf16 %v4823_v34, %v4819_v33  ;;  %v4855_v33 = vld [vmem:[%s13700_s1 + $0x10f8] sm:$0xff] }
  0xdd   : > { %v6469_v50 = vpack.c.bf16 %v4780_v42, %v4776_v41  ;;  %v4818_v41 = vld [vmem:[%s13700_s1 + $0xfd0] sm:$0xff] }
  0xde   : > { %6450 = vmatpush1.bf16.msra.mxu0 %v6449_v52  ;;  %v6471_v52 = vpack.c.bf16 %v4789_v47, %v4785_v46  ;;  %v775_v42 = vld [vmem:[%s8369_s27 + $0x10] sm:$0xfe]  ;;  %v4829_v46 = vld [vmem:[%s13700_s1 + $0x1028] sm:$0xff]  ;;  %v4827_v47 = vld [vmem:[%s13700_s1 + $0x1018] sm:$0xff] }
  0xdf   : > { %6578 = vmatpush1.bf16.msra.mxu1 %v6577_v53  ;;  %6452 = vmatprep.subr.bf16.mxu0 %v6451_v54  ;;  %v4784_v53 = vld [vmem:[%s13700_s1 + $0xec0] sm:$0xff]  ;;  %v6747_v60 = vpack.c.bf16 %v4831_v48, %v4827_v47  ;;  %v4863_v47 = vld [vmem:[%s13700_s1 + $0x1138] sm:$0xff] }
  0xe0   : > { %6580 = vmatprep.subr.bf16.mxu1 %v6579_v58  ;;  %v4788_v54 = vld [vmem:[%s13700_s1 + $0xee0] sm:$0xff]  ;;  %v4793_v58 = vld [vmem:[%s13700_s1 + $0xf08] sm:$0xff] }
  0xe1   : > { %v6473_v62 = vpack.c.bf16 %v4788_v54, %v4784_v53  ;;  %v4824_v53 = vld [vmem:[%s13700_s1 + $0x1000] sm:$0xff]  ;;  %v784_v54 = vld [vmem:[%s8369_s27 + $0x58] sm:$0x1] }
  0xe2   : > { %6454 = vmatpush1.bf16.msra.mxu0 %v6453_v1  ;;  %v6475_v1 = vpack.c.bf16 %v4797_v59, %v4793_v58  ;;  %v4826_v58 = vld [vmem:[%s13700_s1 + $0x1010] sm:$0xff] }
  0xe3   : > { %6582 = vmatpush1.bf16.msra.mxu1 %v6581_v2  ;;  %6456 = vmatprep.subr.bf16.mxu0 %v6455_v3  ;;  %v4792_v2 = vld [vmem:[%s13700_s1 + $0xf00] sm:$0xff]  ;;  %v783_v59 = vld [vmem:[%s8369_s27 + $0x50] sm:$0x1] }
  0xe4   : > { %6584 = vmatprep.subr.bf16.mxu1 %v6583_v39  ;;  %v4796_v3 = vld [vmem:[%s13700_s1 + $0xf20] sm:$0xff]  ;;  %v4801_v39 = vld [vmem:[%s13700_s1 + $0xf48] sm:$0xff]  ;;  %v1071_v12 = vrot.slane %v783_v59, 1  ;;  %v4871_v59 = vld [vmem:[%s13700_s1 + $0x1178] sm:$0xff] }
  0xe5   : > { %v6477_v9 = vpack.c.bf16 %v4796_v3, %v4792_v2  ;;  %v4839_v2 = vld [vmem:[%s13700_s1 + $0x1078] sm:$0xff]  ;;  %v1073_v3 = vrot.slane %v784_v54, 1 }
  0xe6   : > { %6458 = vmatpush1.bf16.msra.mxu0 %v6457_v11  ;;  %v6479_v11 = vpack.c.bf16 %v4805_v6, %v4801_v39  ;;  %v1400_v39 = vld [vmem:[%s8369_s27 + $0x8] sm:$0xfc]  ;;  %v6749_v6 = vpack.c.bf16 %v4830_v61, %v4826_v58  ;;  %v4867_v58 = vld [vmem:[%s13700_s1 + $0x1158] sm:$0xff] }
  0xe7   : > { %6586 = vmatpush1.bf16.msra.mxu1 %v6585_v13  ;;  %6460 = vmatprep.subr.bf16.mxu0 %v6459_v14  ;;  %v4800_v13 = vld [vmem:[%s13700_s1 + $0xf40] sm:$0xff] }
  0xe8   : > { %6588 = vmatprep.subr.bf16.mxu1 %v6587_v18  ;;  %v4804_v14 = vld [vmem:[%s13700_s1 + $0xf60] sm:$0xff]  ;;  %v4809_v18 = vld [vmem:[%s13700_s1 + $0xf88] sm:$0xff] }
  0xe9   : > { %v6481_v23 = vpack.c.bf16 %v4804_v14, %v4800_v13  ;;  %v4838_v13 = vld [vmem:[%s13700_s1 + $0x1070] sm:$0xff]  ;;  %v4841_v14 = vld [vmem:[%s13700_s1 + $0x1088] sm:$0xff] }
  0xea   : > { %6462 = vmatpush1.bf16.msra.mxu0 %v6461_v25  ;;  %v6483_v25 = vpack.c.bf16 %v4813_v19, %v4809_v18  ;;  %v1074_v18 = vsel %vm1054_vm0, %v1065_v0, %v1073_v3  ;;  %v1676_v19 = vrot.slane %v1400_v39, 2  ;;  %v4844_v0 = vld [vmem:[%s13700_s1 + $0x10a0] sm:$0xff]  ;;  %v6767_v3 = vpack.c.bf16 %v4871_v59, %v4867_v58  ;;  %v4875_v39 = vld [vmem:[%s13700_s1 + $0x1198] sm:$0xff] }
  0xeb   : > { %6590 = vmatpush1.bf16.msra.mxu1 %v6589_v26  ;;  %6464 = vmatprep.subr.bf16.mxu0 %v6463_v27  ;;  %v4808_v26 = vld [vmem:[%s13700_s1 + $0xf80] sm:$0xff] }
  0xec   : > { %6592 = vmatprep.subr.bf16.mxu1 %v6591_v31  ;;  %v4812_v27 = vld [vmem:[%s13700_s1 + $0xfa0] sm:$0xff]  ;;  %v4817_v31 = vld [vmem:[%s13700_s1 + $0xfc8] sm:$0xff]  ;;  %v1678_v34 = vsel %vm1672_vm1, %v1676_v19, %v1677_v22  ;;  %v4887_v19 = vld [vmem:[%s13700_s1 + $0x11f8] sm:$0xff] }
  0xed   : > { %v6485_v35 = vpack.c.bf16 %v4812_v27, %v4808_v26  ;;  %v6627_v26 = vpack.c.bf16 %v4845_v15, %v4841_v14  ;;  %v4842_v27 = vld [vmem:[%s13700_s1 + $0x1090] sm:$0xff] }
  0xee   : > { %6466 = vmatpush1.bf16.msra.mxu0 %v6465_v38  ;;  %v6613_v38 = vpack.c.bf16 %v4814_v30, %v4810_v28  ;;  %v4849_v30 = vld [vmem:[%s13700_s1 + $0x10c8] sm:$0xff]  ;;  %v4878_v15 = vld [vmem:[%s13700_s1 + $0x11b0] sm:$0xff] }
  0xef   : > { %6594 = vmatpush1.bf16.msra.mxu1 %v6593_v40  ;;  %6468 = vmatprep.subr.bf16.mxu0 %v6467_v20  ;;  %v6487_v40 = vpack.c.bf16 %v4821_v32, %v4817_v31  ;;  %v4820_v20 = vld [vmem:[%s13700_s1 + $0xfe0] sm:$0xff]  ;;  %v4853_v31 = vld [vmem:[%s13700_s1 + $0x10e8] sm:$0xff]  ;;  %v4851_v32 = vld [vmem:[%s13700_s1 + $0x10d8] sm:$0xff] }
  0xf0   : > { %6596 = vmatprep.subr.bf16.mxu1 %v6595_v44  ;;  %v4822_v44 = vld [vmem:[%s13700_s1 + $0xff0] sm:$0xff]  ;;  %v6489_v49 = vpack.c.bf16 %v4820_v20, %v4816_v36  ;;  %v4852_v20 = vld [vmem:[%s13700_s1 + $0x10e0] sm:$0xff] }
  0xf1   : > { %v6617_v55 = vpack.c.bf16 %v4822_v44, %v4818_v41  ;;  %v4850_v41 = vld [vmem:[%s13700_s1 + $0x10d0] sm:$0xff]  ;;  %v4857_v44 = vld [vmem:[%s13700_s1 + $0x1108] sm:$0xff] }
  0xf2   : > { %6470 = vmatpush1.bf16.msra.mxu0 %v6469_v50  ;;  %v1061_v50 = vrot.slane %v775_v42, 1  ;;  %v6759_v42 = vpack.c.bf16 %v4855_v33, %v4851_v32  ;;  %v4895_v32 = vld [vmem:[%s13700_s1 + $0x1238] sm:$0xff] }
  0xf3   : > { %6598 = vmatpush1.bf16.msra.mxu1 %v6597_v51  ;;  %6472 = vmatprep.subr.bf16.mxu0 %v6471_v52  ;;  %v8020_v51 = vld [vmem:[%s8369_s27 + $0x30] sm:$0xff] }
  0xf4   : > { %6600 = vmatprep.subr.bf16.mxu1 %v6599_v56  ;;  %v1062_v52 = vrot.slane %v8020_v51, 1  ;;  %v6619_v56 = vpack.c.bf16 %v4829_v46, %v4825_v45  ;;  %v4861_v45 = vld [vmem:[%s13700_s1 + $0x1128] sm:$0xff]  ;;  %v4859_v46 = vld [vmem:[%s13700_s1 + $0x1118] sm:$0xff]  ;;  %v4856_v51 = vld [vmem:[%s13700_s1 + $0x1100] sm:$0xff] }
  0xf5   : > { %v6763_v54 = vpack.c.bf16 %v4863_v47, %v4859_v46 }
  0xf6   : > { %6474 = vmatpush1.bf16.msra.mxu0 %v6473_v62  ;;  %v4833_v62 = vld [vmem:[%s13700_s1 + $0x1048] sm:$0xff]  ;;  %v1063_v4 = vsel %vm1054_vm0, %v1061_v50, %v1062_v52  ;;  %v6635_v50 = vpack.c.bf16 %v4861_v45, %v4857_v44  ;;  %v4899_v44 = vld [vmem:[%s13700_s1 + $0x1258] sm:$0xff] }
  0xf7   : > { %6602 = vmatpush1.bf16.msra.mxu1 %v6601_v63  ;;  %6476 = vmatprep.subr.bf16.mxu0 %v6475_v1  ;;  %v4837_v63 = vld [vmem:[%s13700_s1 + $0x1068] sm:$0xff]  ;;  %v4835_v1 = vld [vmem:[%s13700_s1 + $0x1058] sm:$0xff] }
  0xf8   : > { %6604 = vmatprep.subr.bf16.mxu1 %v6603_v5  ;;  %v6621_v5 = vpack.c.bf16 %v4828_v57, %v4824_v53  ;;  %v6623_v7 = vpack.c.bf16 %v4837_v63, %v4833_v62  ;;  %v4858_v53 = vld [vmem:[%s13700_s1 + $0x1110] sm:$0xff]  ;;  %v4869_v57 = vld [vmem:[%s13700_s1 + $0x1168] sm:$0xff]  ;;  %v4864_v63 = vld [vmem:[%s13700_s1 + $0x1140] sm:$0xff] }
  0xf9   : > { %v4903_v45 = vld [vmem:[%s13700_s1 + $0x1278] sm:$0xff] }
  0xfa   : > { %6478 = vmatpush1.bf16.msra.mxu0 %v6477_v9  ;;  %v4836_v9 = vld [vmem:[%s13700_s1 + $0x1060] sm:$0xff] }
  0xfb   : > { %6606 = vmatpush1.bf16.msra.mxu1 %v6605_v10  ;;  %6480 = vmatprep.subr.bf16.mxu0 %v6479_v11  ;;  %v4834_v10 = vld [vmem:[%s13700_s1 + $0x1050] sm:$0xff]  ;;  %v6751_v11 = vpack.c.bf16 %v4839_v2, %v4835_v1  ;;  %v4868_v1 = vld [vmem:[%s13700_s1 + $0x1160] sm:$0xff] }
  0xfc   : > { %6608 = vmatprep.subr.bf16.mxu1 %v6607_v16  ;;  %v4843_v16 = vld [vmem:[%s13700_s1 + $0x1098] sm:$0xff]  ;;  %v4866_v2 = vld [vmem:[%s13700_s1 + $0x1150] sm:$0xff] }
  0xfd   : > { %v6755_v28 = vpack.c.bf16 %v4847_v17, %v4843_v16  ;;  %v4881_v16 = vld [vmem:[%s13700_s1 + $0x11c8] sm:$0xff] }
  0xfe   : > { %6482 = vmatpush1.bf16.msra.mxu0 %v6481_v23  ;;  %v6625_v23 = vpack.c.bf16 %v4836_v9, %v4832_v8  ;;  %v4885_v17 = vld [vmem:[%s13700_s1 + $0x11e8] sm:$0xff] }
  0xff   : > { %6610 = vmatpush1.bf16.msra.mxu1 %v6609_v24  ;;  %6484 = vmatprep.subr.bf16.mxu0 %v6483_v25  ;;  %v1072_v24 = vsel %vm1054_vm0, %v1062_v52, %v1071_v12  ;;  %v6753_v25 = vpack.c.bf16 %v4838_v13, %v4834_v10  ;;  %v4860_v52 = vld [vmem:[%s13700_s1 + $0x1120] sm:$0xff]  ;;  %v4877_v12 = vld [vmem:[%s13700_s1 + $0x11a8] sm:$0xff]  ;;  %v4874_v13 = vld [vmem:[%s13700_s1 + $0x1190] sm:$0xff] }
 0x100   : > { %6612 = vmatprep.subr.bf16.mxu1 %v6611_v29  ;;  %v4846_v29 = vld [vmem:[%s13700_s1 + $0x10b0] sm:$0xff]  ;;  %v4872_v10 = vld [vmem:[%s13700_s1 + $0x1180] sm:$0xff] }
 0x101   : > { %v6757_v36 = vpack.c.bf16 %v4846_v29, %v4842_v27  ;;  %v4889_v29 = vld [vmem:[%s13700_s1 + $0x1208] sm:$0xff] }
 0x102   : > { %6486 = vmatpush1.bf16.msra.mxu0 %v6485_v35  ;;  %v6629_v35 = vpack.c.bf16 %v4844_v0, %v4840_v37  ;;  %v4884_v37 = vld [vmem:[%s13700_s1 + $0x11e0] sm:$0xff]  ;;  %v4882_v0 = vld [vmem:[%s13700_s1 + $0x11d0] sm:$0xff] }
 0x103   : > { %6614 = vmatpush1.bf16.msra.mxu1 %v6613_v38  ;;  %6488 = vmatprep.subr.bf16.mxu0 %v6487_v40  ;;  %v6631_v38 = vpack.c.bf16 %v4853_v31, %v4849_v30  ;;  %v4848_v40 = vld [vmem:[%s13700_s1 + $0x10c0] sm:$0xff]  ;;  %v4893_v30 = vld [vmem:[%s13700_s1 + $0x1228] sm:$0xff]  ;;  %v4891_v31 = vld [vmem:[%s13700_s1 + $0x1218] sm:$0xff] }
 0x104   : > { %6616 = vmatprep.subr.bf16.mxu1 %v6615_v43  ;;  %v4854_v43 = vld [vmem:[%s13700_s1 + $0x10f0] sm:$0xff]  ;;  %v6633_v48 = vpack.c.bf16 %v4852_v20, %v4848_v40  ;;  %v6779_v20 = vpack.c.bf16 %v4895_v32, %v4891_v31 }
 0x105   : > { %v4890_v40 = vld [vmem:[%s13700_s1 + $0x1210] sm:$0xff] }
 0x106   : > { %6490 = vmatpush1.bf16.msra.mxu0 %v6489_v49  ;;  %v6761_v49 = vpack.c.bf16 %v4854_v43, %v4850_v41  ;;  %v4894_v41 = vld [vmem:[%s13700_s1 + $0x1230] sm:$0xff]  ;;  %v4901_v43 = vld [vmem:[%s13700_s1 + $0x1268] sm:$0xff] }
 0x107   : > { %6618 = vmatpush1.bf16.msra.mxu1 %v6617_v55  ;;  %6620 = vmatprep.subr.bf16.mxu0 %v6619_v56  ;;  %v4862_v55 = vld [vmem:[%s13700_s1 + $0x1130] sm:$0xff]  ;;  %v4865_v56 = vld [vmem:[%s13700_s1 + $0x1148] sm:$0xff]  ;;  %v6781_v47 = vpack.c.bf16 %v4894_v41, %v4890_v40 }
 0x108   : > { %6748 = vmatprep.subr.bf16.mxu1 %v6747_v60  ;;  %v6637_v60 = vpack.c.bf16 %v4860_v52, %v4856_v51  ;;  %v6765_v61 = vpack.c.bf16 %v4862_v55, %v4858_v53  ;;  %v6639_v62 = vpack.c.bf16 %v4869_v57, %v4865_v56  ;;  %v4898_v51 = vld [vmem:[%s13700_s1 + $0x1250] sm:$0xff]  ;;  %v6783_v52 = vpack.c.bf16 %v4903_v45, %v4899_v44  ;;  %v4909_v55 = vld [vmem:[%s13700_s1 + $0x12a8] sm:$0xff]  ;;  %v4907_v56 = vld [vmem:[%s13700_s1 + $0x1298] sm:$0xff] }
 0x109   : > { %1225 = vmatmul.mubr.f32.vlgmr.msra.gmra.mrb[0].mxu0 %v1063_v4  ;;  %v4902_v53 = vld [vmem:[%s13700_s1 + $0x1270] sm:$0xff]  ;;  %v4911_v57 = vld [vmem:[%s13700_s1 + $0x12b8] sm:$0xff]  ;;  %v4941_v41 = vld [vmem:[%s13700_s1 + $0x13a8] sm:$0xff] }
 0x10a   : > { %1379 = vmatmul.mubr.f32.vlgmr.msra.gmra.mrb[0].mxu1 %v1063_v4  ;;  %6622 = vmatpush1.bf16.msra.mxu0 %v6621_v5  ;;  %v4870_v4 = vld [vmem:[%s13700_s1 + $0x1170] sm:$0xff]  ;;  %v4873_v5 = vld [vmem:[%s13700_s1 + $0x1188] sm:$0xff]  ;;  %v6785_v59 = vpack.c.bf16 %v4902_v53, %v4898_v51 }
 0x10b   : > { %6750 = vmatpush1.bf16.msra.mxu1 %v6749_v6  ;;  %6624 = vmatprep.subr.bf16.mxu0 %v6623_v7  ;;  %v4879_v6 = vld [vmem:[%s13700_s1 + $0x11b8] sm:$0xff]  ;;  %v6641_v7 = vpack.c.bf16 %v4868_v1, %v4864_v63  ;;  %v6769_v8 = vpack.c.bf16 %v4870_v4, %v4866_v2  ;;  %v6643_v9 = vpack.c.bf16 %v4877_v12, %v4873_v5  ;;  %v4906_v63 = vld [vmem:[%s13700_s1 + $0x1290] sm:$0xff]  ;;  %v4917_v4 = vld [vmem:[%s13700_s1 + $0x12e8] sm:$0xff] }
 0x10c   : > { %6752 = vmatprep.subr.bf16.mxu1 %v6751_v11  ;;  %1230 = vmatprep.mubr.f32.mxu0 %v1074_v18  ;;  %v4876_v11 = vld [vmem:[%s13700_s1 + $0x11a0] sm:$0xff]  ;;  %v6771_v14 = vpack.c.bf16 %v4879_v6, %v4875_v39  ;;  %v6787_v1 = vpack.c.bf16 %v4911_v57, %v4907_v56  ;;  %v4910_v2 = vld [vmem:[%s13700_s1 + $0x12b0] sm:$0xff]  ;;  %v4915_v5 = vld [vmem:[%s13700_s1 + $0x12d8] sm:$0xff] }
 0x10d   : > { %1384 = vmatprep.mubr.f32.mxu1 %v1074_v18  ;;  %1231 = vmatmul.mubr.f32.gmra.mrb[2].mxu0 %v1072_v24  ;;  %v4883_v18 = vld [vmem:[%s13700_s1 + $0x11d8] sm:$0xff]  ;;  %v6789_v6 = vpack.c.bf16 %v4910_v2, %v4906_v63  ;;  %v4934_v40 = vld [vmem:[%s13700_s1 + $0x1370] sm:$0xff]  ;;  %v4949_v53 = vld [vmem:[%s13700_s1 + $0x13e8] sm:$0xff] }
 0x10e   : > { %6626 = vmatpush1.bf16.msra.mxu0 %v6625_v23  ;;  %1385 = vmatmul.mubr.f32.gmra.mrb[2].mxu1 %v1072_v24  ;;  %v6645_v23 = vpack.c.bf16 %v4876_v11, %v4872_v10  ;;  %v6773_v24 = vpack.c.bf16 %v4878_v15, %v4874_v13  ;;  %v6775_v27 = vpack.c.bf16 %v4887_v19, %v4883_v18  ;;  %v4919_v12 = vld [vmem:[%s13700_s1 + $0x12f8] sm:$0xff]  ;;  %v4914_v10 = vld [vmem:[%s13700_s1 + $0x12d0] sm:$0xff]  ;;  %v4925_v15 = vld [vmem:[%s13700_s1 + $0x1328] sm:$0xff] }
 0x10f   : > { %6754 = vmatpush1.bf16.msra.mxu1 %v6753_v25  ;;  %6628 = vmatprep.subr.bf16.mxu0 %v6627_v26  ;;  %v6647_v25 = vpack.c.bf16 %v4885_v17, %v4881_v16  ;;  %v4880_v26 = vld [vmem:[%s13700_s1 + $0x11c0] sm:$0xff]  ;;  %v6791_v11 = vpack.c.bf16 %v4919_v12, %v4915_v5  ;;  %v4918_v13 = vld [vmem:[%s13700_s1 + $0x12f0] sm:$0xff]  ;;  %v4923_v16 = vld [vmem:[%s13700_s1 + $0x1318] sm:$0xff] }
 0x110   : > { %6756 = vmatprep.subr.bf16.mxu1 %v6755_v28  ;;  %1765 = vmatprep.mubr.f32.mxu0 %v1678_v34  ;;  %v4886_v28 = vld [vmem:[%s13700_s1 + $0x11f0] sm:$0xff]  ;;  %v6649_v33 = vpack.c.bf16 %v4884_v37, %v4880_v26  ;;  %v4927_v17 = vld [vmem:[%s13700_s1 + $0x1338] sm:$0xff]  ;;  %v6793_v19 = vpack.c.bf16 %v4918_v13, %v4914_v10  ;;  %v4944_v57 = vld [vmem:[%s13700_s1 + $0x13c0] sm:$0xff] }
 0x111   : > { %1919 = vmatprep.mubr.f32.mxu1 %v1678_v34  ;;  %v6777_v34 = vpack.c.bf16 %v4886_v28, %v4882_v0  ;;  %v4922_v26 = vld [vmem:[%s13700_s1 + $0x1310] sm:$0xff]  ;;  %v6795_v37 = vpack.c.bf16 %v4927_v17, %v4923_v16  ;;  %v4933_v28 = vld [vmem:[%s13700_s1 + $0x1368] sm:$0xff]  ;;  %v4959_v5 = vld [vmem:[%s13700_s1 + $0x1438] sm:$0xff] }
 0x112   : > { %6630 = vmatpush1.bf16.msra.mxu0 %v6629_v35  ;;  %v6651_v35 = vpack.c.bf16 %v4893_v30, %v4889_v29  ;;  %v4926_v0 = vld [vmem:[%s13700_s1 + $0x1330] sm:$0xff]  ;;  %v4931_v29 = vld [vmem:[%s13700_s1 + $0x1358] sm:$0xff]  ;;  %v4953_v2 = vld [vmem:[%s13700_s1 + $0x1408] sm:$0xff] }
 0x113   : > { %6758 = vmatpush1.bf16.msra.mxu1 %v6757_v36  ;;  %6632 = vmatprep.subr.bf16.mxu0 %v6631_v38  ;;  %v4888_v36 = vld [vmem:[%s13700_s1 + $0x1200] sm:$0xff]  ;;  %v4935_v30 = vld [vmem:[%s13700_s1 + $0x1378] sm:$0xff]  ;;  %v6797_v32 = vpack.c.bf16 %v4926_v0, %v4922_v26  ;;  %v4942_v51 = vld [vmem:[%s13700_s1 + $0x13b0] sm:$0xff] }
 0x114   : > { %6760 = vmatprep.subr.bf16.mxu1 %v6759_v42  ;;  %v4892_v38 = vld [vmem:[%s13700_s1 + $0x1220] sm:$0xff]  ;;  %v4897_v42 = vld [vmem:[%s13700_s1 + $0x1248] sm:$0xff]  ;;  %v4958_v17 = vld [vmem:[%s13700_s1 + $0x1430] sm:$0xff] }
 0x115   : > { %v6653_v46 = vpack.c.bf16 %v4892_v38, %v4888_v36  ;;  %v4930_v36 = vld [vmem:[%s13700_s1 + $0x1350] sm:$0xff]  ;;  %v6799_v38 = vpack.c.bf16 %v4935_v30, %v4931_v29  ;;  %v4956_v13 = vld [vmem:[%s13700_s1 + $0x1420] sm:$0xff] }
 0x116   : > { %6634 = vmatpush1.bf16.msra.mxu0 %v6633_v48  ;;  %v6655_v48 = vpack.c.bf16 %v4901_v43, %v4897_v42  ;;  %v4939_v42 = vld [vmem:[%s13700_s1 + $0x1398] sm:$0xff]  ;;  %v6801_v45 = vpack.c.bf16 %v4934_v40, %v4930_v36  ;;  %v4960_v30 = vld [vmem:[%s13700_s1 + $0x1440] sm:$0xff]  ;;  %v4973_v36 = vld [vmem:[%s13700_s1 + $0x14a8] sm:$0xff] }
 0x117   : > { %6762 = vmatpush1.bf16.msra.mxu1 %v6761_v49  ;;  %6636 = vmatprep.subr.bf16.mxu0 %v6635_v50  ;;  %v4896_v49 = vld [vmem:[%s13700_s1 + $0x1240] sm:$0xff]  ;;  %v4943_v43 = vld [vmem:[%s13700_s1 + $0x13b8] sm:$0xff] }
 0x118   : > { %6764 = vmatprep.subr.bf16.mxu1 %v6763_v54  ;;  %v4900_v50 = vld [vmem:[%s13700_s1 + $0x1260] sm:$0xff]  ;;  %v4905_v54 = vld [vmem:[%s13700_s1 + $0x1288] sm:$0xff]  ;;  %v4975_v40 = vld [vmem:[%s13700_s1 + $0x14b8] sm:$0xff] }
 0x119   : > { %v6657_v58 = vpack.c.bf16 %v4900_v50, %v4896_v49  ;;  %v4938_v49 = vld [vmem:[%s13700_s1 + $0x1390] sm:$0xff]  ;;  %v6803_v50 = vpack.c.bf16 %v4943_v43, %v4939_v42  ;;  %v10141_v42 = vld [vmem:[%s8369_s27 + $0x38] sm:$0xff] }
 0x11a   : > { %6638 = vmatpush1.bf16.msra.mxu0 %v6637_v60  ;;  %v6659_v60 = vpack.c.bf16 %v4909_v55, %v4905_v54  ;;  %v4947_v54 = vld [vmem:[%s13700_s1 + $0x13d8] sm:$0xff]  ;;  %v1683_v43 = vrot.slane %v10141_v42, 2  ;;  %v5096_v42 = vld [vmem:[%s13700_s1 + $0x1880] sm:$0xff] }
 0x11b   : > { %6766 = vmatpush1.bf16.msra.mxu1 %v6765_v61  ;;  %6640 = vmatprep.subr.bf16.mxu0 %v6639_v62  ;;  %v4904_v61 = vld [vmem:[%s13700_s1 + $0x1280] sm:$0xff]  ;;  %v4951_v55 = vld [vmem:[%s13700_s1 + $0x13f8] sm:$0xff] }
 0x11c   : > { %6768 = vmatprep.subr.bf16.mxu1 %v6767_v3  ;;  %v4908_v62 = vld [vmem:[%s13700_s1 + $0x12a0] sm:$0xff]  ;;  %v4913_v3 = vld [vmem:[%s13700_s1 + $0x12c8] sm:$0xff]  ;;  %v6807_v63 = vpack.c.bf16 %v4951_v55, %v4947_v54  ;;  %v4983_v54 = vld [vmem:[%s13700_s1 + $0x14f8] sm:$0xff] }
 0x11d   : > { %v6661_v39 = vpack.c.bf16 %v4908_v62, %v4904_v61  ;;  %v4946_v61 = vld [vmem:[%s13700_s1 + $0x13d0] sm:$0xff]  ;;  %v1399_v62 = vld [vmem:[%s8369_s27] sm:$0xfc] }
 0x11e   : > { %6642 = vmatpush1.bf16.msra.mxu0 %v6641_v7  ;;  %v6663_v7 = vpack.c.bf16 %v4917_v4, %v4913_v3  ;;  %v4957_v3 = vld [vmem:[%s13700_s1 + $0x1428] sm:$0xff]  ;;  %v4955_v4 = vld [vmem:[%s13700_s1 + $0x1418] sm:$0xff] }
 0x11f   : > { %6770 = vmatpush1.bf16.msra.mxu1 %v6769_v8  ;;  %6644 = vmatprep.subr.bf16.mxu0 %v6643_v9  ;;  %v4912_v8 = vld [vmem:[%s13700_s1 + $0x12c0] sm:$0xff]  ;;  %v6811_v16 = vpack.c.bf16 %v4959_v5, %v4955_v4  ;;  %v4991_v4 = vld [vmem:[%s13700_s1 + $0x1538] sm:$0xff] }
 0x120   : > { %6772 = vmatprep.subr.bf16.mxu1 %v6771_v14  ;;  %v4916_v9 = vld [vmem:[%s13700_s1 + $0x12e0] sm:$0xff]  ;;  %v4921_v14 = vld [vmem:[%s13700_s1 + $0x1308] sm:$0xff] }
 0x121   : > { %v6665_v18 = vpack.c.bf16 %v4916_v9, %v4912_v8  ;;  %v4952_v8 = vld [vmem:[%s13700_s1 + $0x1400] sm:$0xff]  ;;  %v1404_v9 = vld [vmem:[%s8369_s27 + $0x48] sm:$0x3] }
 0x122   : > { %6646 = vmatpush1.bf16.msra.mxu0 %v6645_v23  ;;  %v6667_v23 = vpack.c.bf16 %v4925_v15, %v4921_v14  ;;  %v4954_v14 = vld [vmem:[%s13700_s1 + $0x1410] sm:$0xff]  ;;  %v1403_v15 = vld [vmem:[%s8369_s27 + $0x40] sm:$0x3] }
 0x123   : > { %6774 = vmatpush1.bf16.msra.mxu1 %v6773_v24  ;;  %6648 = vmatprep.subr.bf16.mxu0 %v6647_v25  ;;  %v4920_v24 = vld [vmem:[%s13700_s1 + $0x1300] sm:$0xff]  ;;  %v1685_v0 = vrot.slane %v1403_v15, 2  ;;  %v4999_v15 = vld [vmem:[%s13700_s1 + $0x1578] sm:$0xff] }
 0x124   : > { %6776 = vmatprep.subr.bf16.mxu1 %v6775_v27  ;;  %v4924_v25 = vld [vmem:[%s13700_s1 + $0x1320] sm:$0xff]  ;;  %v4929_v27 = vld [vmem:[%s13700_s1 + $0x1348] sm:$0xff] }
 0x125   : > { %v6669_v31 = vpack.c.bf16 %v4924_v25, %v4920_v24  ;;  %v4967_v24 = vld [vmem:[%s13700_s1 + $0x1478] sm:$0xff]  ;;  %v1687_v25 = vrot.slane %v1404_v9, 2 }
 0x126   : > { %6650 = vmatpush1.bf16.msra.mxu0 %v6649_v33  ;;  %v6671_v33 = vpack.c.bf16 %v4933_v28, %v4929_v27  ;;  %v1402_v27 = vld [vmem:[%s8369_s27 + $0x18] sm:$0xfc]  ;;  %v6813_v28 = vpack.c.bf16 %v4958_v17, %v4954_v14 }
 0x127   : > { %6778 = vmatpush1.bf16.msra.mxu1 %v6777_v34  ;;  %6652 = vmatprep.subr.bf16.mxu0 %v6651_v35  ;;  %v4928_v34 = vld [vmem:[%s13700_s1 + $0x1340] sm:$0xff]  ;;  %v4995_v14 = vld [vmem:[%s13700_s1 + $0x1558] sm:$0xff] }
 0x128   : > { %6780 = vmatprep.subr.bf16.mxu1 %v6779_v20  ;;  %v4932_v35 = vld [vmem:[%s13700_s1 + $0x1360] sm:$0xff]  ;;  %v4937_v20 = vld [vmem:[%s13700_s1 + $0x1388] sm:$0xff] }
 0x129   : > { %v6673_v44 = vpack.c.bf16 %v4932_v35, %v4928_v34  ;;  %v4966_v34 = vld [vmem:[%s13700_s1 + $0x1470] sm:$0xff]  ;;  %v4969_v35 = vld [vmem:[%s13700_s1 + $0x1488] sm:$0xff] }
 0x12a   : > { %6654 = vmatpush1.bf16.msra.mxu0 %v6653_v46  ;;  %v6675_v46 = vpack.c.bf16 %v4941_v41, %v4937_v20  ;;  %v1688_v20 = vsel %vm1672_vm1, %v1677_v22, %v1687_v25  ;;  %v1682_v41 = vrot.slane %v1402_v27, 2  ;;  %v4972_v22 = vld [vmem:[%s13700_s1 + $0x14a0] sm:$0xff]  ;;  %v6831_v25 = vpack.c.bf16 %v4999_v15, %v4995_v14  ;;  %v5003_v27 = vld [vmem:[%s13700_s1 + $0x1598] sm:$0xff] }
 0x12b   : > { %6782 = vmatpush1.bf16.msra.mxu1 %v6781_v47  ;;  %6656 = vmatprep.subr.bf16.mxu0 %v6655_v48  ;;  %v4936_v47 = vld [vmem:[%s13700_s1 + $0x1380] sm:$0xff] }
 0x12c   : > { %6784 = vmatprep.subr.bf16.mxu1 %v6783_v52  ;;  %v4940_v48 = vld [vmem:[%s13700_s1 + $0x13a0] sm:$0xff]  ;;  %v4945_v52 = vld [vmem:[%s13700_s1 + $0x13c8] sm:$0xff]  ;;  %v1684_v55 = vsel %vm1672_vm1, %v1682_v41, %v1683_v43  ;;  %v5015_v41 = vld [vmem:[%s13700_s1 + $0x15f8] sm:$0xff] }
 0x12d   : > { %v6677_v56 = vpack.c.bf16 %v4940_v48, %v4936_v47  ;;  %v6691_v47 = vpack.c.bf16 %v4973_v36, %v4969_v35  ;;  %v4970_v48 = vld [vmem:[%s13700_s1 + $0x1490] sm:$0xff] }
 0x12e   : > { %6658 = vmatpush1.bf16.msra.mxu0 %v6657_v58  ;;  %v6805_v58 = vpack.c.bf16 %v4942_v51, %v4938_v49  ;;  %v4977_v51 = vld [vmem:[%s13700_s1 + $0x14c8] sm:$0xff]  ;;  %v5006_v36 = vld [vmem:[%s13700_s1 + $0x15b0] sm:$0xff] }
 0x12f   : > { %6786 = vmatpush1.bf16.msra.mxu1 %v6785_v59  ;;  %6660 = vmatprep.subr.bf16.mxu0 %v6659_v60  ;;  %v6679_v59 = vpack.c.bf16 %v4949_v53, %v4945_v52  ;;  %v4948_v60 = vld [vmem:[%s13700_s1 + $0x13e0] sm:$0xff]  ;;  %v4981_v52 = vld [vmem:[%s13700_s1 + $0x14e8] sm:$0xff]  ;;  %v4979_v53 = vld [vmem:[%s13700_s1 + $0x14d8] sm:$0xff] }
 0x130   : > { %6788 = vmatprep.subr.bf16.mxu1 %v6787_v1  ;;  %v4950_v1 = vld [vmem:[%s13700_s1 + $0x13f0] sm:$0xff]  ;;  %v6681_v12 = vpack.c.bf16 %v4948_v60, %v4944_v57  ;;  %v4980_v60 = vld [vmem:[%s13700_s1 + $0x14e0] sm:$0xff] }
 0x131   : > { %v6809_v10 = vpack.c.bf16 %v4950_v1, %v4946_v61  ;;  %v4978_v61 = vld [vmem:[%s13700_s1 + $0x14d0] sm:$0xff]  ;;  %v4985_v1 = vld [vmem:[%s13700_s1 + $0x1508] sm:$0xff] }
 0x132   : > { %6662 = vmatpush1.bf16.msra.mxu0 %v6661_v39  ;;  %v1673_v39 = vrot.slane %v1399_v62, 2  ;;  %v6823_v62 = vpack.c.bf16 %v4983_v54, %v4979_v53  ;;  %v5023_v53 = vld [vmem:[%s13700_s1 + $0x1638] sm:$0xff] }
 0x133   : > { %6790 = vmatpush1.bf16.msra.mxu1 %v6789_v6  ;;  %6664 = vmatprep.subr.bf16.mxu0 %v6663_v7  ;;  %v8022_v6 = vld [vmem:[%s8369_s27 + $0x20] sm:$0xff] }
 0x134   : > { %6792 = vmatprep.subr.bf16.mxu1 %v6791_v11  ;;  %v1674_v7 = vrot.slane %v8022_v6, 2  ;;  %v6683_v11 = vpack.c.bf16 %v4957_v3, %v4953_v2  ;;  %v4989_v2 = vld [vmem:[%s13700_s1 + $0x1528] sm:$0xff]  ;;  %v4987_v3 = vld [vmem:[%s13700_s1 + $0x1518] sm:$0xff]  ;;  %v4984_v6 = vld [vmem:[%s13700_s1 + $0x1500] sm:$0xff] }
 0x135   : > { %v6827_v9 = vpack.c.bf16 %v4991_v4, %v4987_v3 }
 0x136   : > { %6666 = vmatpush1.bf16.msra.mxu0 %v6665_v18  ;;  %v4961_v18 = vld [vmem:[%s13700_s1 + $0x1448] sm:$0xff]  ;;  %v1675_v26 = vsel %vm1672_vm1, %v1673_v39, %v1674_v7  ;;  %v6699_v39 = vpack.c.bf16 %v4989_v2, %v4985_v1  ;;  %v5027_v1 = vld [vmem:[%s13700_s1 + $0x1658] sm:$0xff] }
 0x137   : > { %6794 = vmatpush1.bf16.msra.mxu1 %v6793_v19  ;;  %6668 = vmatprep.subr.bf16.mxu0 %v6667_v23  ;;  %v4965_v19 = vld [vmem:[%s13700_s1 + $0x1468] sm:$0xff]  ;;  %v4963_v23 = vld [vmem:[%s13700_s1 + $0x1458] sm:$0xff] }
 0x138   : > { %6796 = vmatprep.subr.bf16.mxu1 %v6795_v37  ;;  %v6685_v37 = vpack.c.bf16 %v4956_v13, %v4952_v8  ;;  %v6687_v29 = vpack.c.bf16 %v4965_v19, %v4961_v18  ;;  %v4986_v8 = vld [vmem:[%s13700_s1 + $0x1510] sm:$0xff]  ;;  %v4997_v13 = vld [vmem:[%s13700_s1 + $0x1568] sm:$0xff]  ;;  %v4992_v19 = vld [vmem:[%s13700_s1 + $0x1540] sm:$0xff] }
 0x139   : > { %v5031_v2 = vld [vmem:[%s13700_s1 + $0x1678] sm:$0xff] }
 0x13a   : > { %6670 = vmatpush1.bf16.msra.mxu0 %v6669_v31  ;;  %v4964_v31 = vld [vmem:[%s13700_s1 + $0x1460] sm:$0xff] }
 0x13b   : > { %6798 = vmatpush1.bf16.msra.mxu1 %v6797_v32  ;;  %6672 = vmatprep.subr.bf16.mxu0 %v6671_v33  ;;  %v4962_v32 = vld [vmem:[%s13700_s1 + $0x1450] sm:$0xff]  ;;  %v6815_v33 = vpack.c.bf16 %v4967_v24, %v4963_v23  ;;  %v4996_v23 = vld [vmem:[%s13700_s1 + $0x1560] sm:$0xff] }
 0x13c   : > { %6800 = vmatprep.subr.bf16.mxu1 %v6799_v38  ;;  %v4971_v38 = vld [vmem:[%s13700_s1 + $0x1498] sm:$0xff]  ;;  %v4994_v24 = vld [vmem:[%s13700_s1 + $0x1550] sm:$0xff] }
 0x13d   : > { %v6819_v49 = vpack.c.bf16 %v4975_v40, %v4971_v38  ;;  %v5009_v38 = vld [vmem:[%s13700_s1 + $0x15c8] sm:$0xff] }
 0x13e   : > { %6674 = vmatpush1.bf16.msra.mxu0 %v6673_v44  ;;  %v6689_v44 = vpack.c.bf16 %v4964_v31, %v4960_v30  ;;  %v5013_v40 = vld [vmem:[%s13700_s1 + $0x15e8] sm:$0xff] }
 0x13f   : > { %6802 = vmatpush1.bf16.msra.mxu1 %v6801_v45  ;;  %6676 = vmatprep.subr.bf16.mxu0 %v6675_v46  ;;  %v1686_v45 = vsel %vm1672_vm1, %v1674_v7, %v1685_v0  ;;  %v6817_v46 = vpack.c.bf16 %v4966_v34, %v4962_v32  ;;  %v4988_v7 = vld [vmem:[%s13700_s1 + $0x1520] sm:$0xff]  ;;  %v5005_v0 = vld [vmem:[%s13700_s1 + $0x15a8] sm:$0xff]  ;;  %v5002_v34 = vld [vmem:[%s13700_s1 + $0x1590] sm:$0xff] }
 0x140   : > { %6804 = vmatprep.subr.bf16.mxu1 %v6803_v50  ;;  %v4974_v50 = vld [vmem:[%s13700_s1 + $0x14b0] sm:$0xff]  ;;  %v5000_v32 = vld [vmem:[%s13700_s1 + $0x1580] sm:$0xff] }
 0x141   : > { %v6821_v57 = vpack.c.bf16 %v4974_v50, %v4970_v48  ;;  %v5017_v50 = vld [vmem:[%s13700_s1 + $0x1608] sm:$0xff] }
 0x142   : > { %6678 = vmatpush1.bf16.msra.mxu0 %v6677_v56  ;;  %v6693_v56 = vpack.c.bf16 %v4972_v22, %v4968_v21  ;;  %v5012_v21 = vld [vmem:[%s13700_s1 + $0x15e0] sm:$0xff]  ;;  %v5010_v22 = vld [vmem:[%s13700_s1 + $0x15d0] sm:$0xff] }
 0x143   : > { %6806 = vmatpush1.bf16.msra.mxu1 %v6805_v58  ;;  %6680 = vmatprep.subr.bf16.mxu0 %v6679_v59  ;;  %v6695_v58 = vpack.c.bf16 %v4981_v52, %v4977_v51  ;;  %v4976_v59 = vld [vmem:[%s13700_s1 + $0x14c0] sm:$0xff]  ;;  %v5021_v51 = vld [vmem:[%s13700_s1 + $0x1628] sm:$0xff]  ;;  %v5019_v52 = vld [vmem:[%s13700_s1 + $0x1618] sm:$0xff] }
 0x144   : > { %6808 = vmatprep.subr.bf16.mxu1 %v6807_v63  ;;  %v4982_v63 = vld [vmem:[%s13700_s1 + $0x14f0] sm:$0xff]  ;;  %v6697_v5 = vpack.c.bf16 %v4980_v60, %v4976_v59  ;;  %v6843_v60 = vpack.c.bf16 %v5023_v53, %v5019_v52 }
 0x145   : > { %v5018_v59 = vld [vmem:[%s13700_s1 + $0x1610] sm:$0xff] }
 0x146   : > { %6682 = vmatpush1.bf16.msra.mxu0 %v6681_v12  ;;  %v6825_v12 = vpack.c.bf16 %v4982_v63, %v4978_v61  ;;  %v5022_v61 = vld [vmem:[%s13700_s1 + $0x1630] sm:$0xff]  ;;  %v5029_v63 = vld [vmem:[%s13700_s1 + $0x1668] sm:$0xff] }
 0x147   : > { %6810 = vmatpush1.bf16.msra.mxu1 %v6809_v10  ;;  %6684 = vmatprep.subr.bf16.mxu0 %v6683_v11  ;;  %v4990_v10 = vld [vmem:[%s13700_s1 + $0x1530] sm:$0xff]  ;;  %v4993_v11 = vld [vmem:[%s13700_s1 + $0x1548] sm:$0xff]  ;;  %v6845_v4 = vpack.c.bf16 %v5022_v61, %v5018_v59 }
 0x148   : > { %6812 = vmatprep.subr.bf16.mxu1 %v6811_v16  ;;  %v6701_v16 = vpack.c.bf16 %v4988_v7, %v4984_v6  ;;  %v6829_v17 = vpack.c.bf16 %v4990_v10, %v4986_v8  ;;  %v6703_v18 = vpack.c.bf16 %v4997_v13, %v4993_v11  ;;  %v5026_v6 = vld [vmem:[%s13700_s1 + $0x1650] sm:$0xff]  ;;  %v6847_v7 = vpack.c.bf16 %v5031_v2, %v5027_v1  ;;  %v5037_v10 = vld [vmem:[%s13700_s1 + $0x16a8] sm:$0xff]  ;;  %v5035_v11 = vld [vmem:[%s13700_s1 + $0x1698] sm:$0xff] }
 0x149   : > { %1766 = vmatmul.mubr.f32.vlgmr.msra.gmra.mrb[0].mxu0 %v1675_v26  ;;  %v5030_v8 = vld [vmem:[%s13700_s1 + $0x1670] sm:$0xff]  ;;  %v5039_v13 = vld [vmem:[%s13700_s1 + $0x16b8] sm:$0xff]  ;;  %v5069_v61 = vld [vmem:[%s13700_s1 + $0x17a8] sm:$0xff] }
 0x14a   : > { %6686 = vmatpush1.bf16.msra.mxu0 %v6685_v37  ;;  %1920 = vmatmul.mubr.f32.vlgmr.msra.gmra.mrb[0].mxu1 %v1675_v26  ;;  %v4998_v26 = vld [vmem:[%s13700_s1 + $0x1570] sm:$0xff]  ;;  %v5001_v37 = vld [vmem:[%s13700_s1 + $0x1588] sm:$0xff]  ;;  %v6849_v15 = vpack.c.bf16 %v5030_v8, %v5026_v6 }
 0x14b   : > { %6814 = vmatpush1.bf16.msra.mxu1 %v6813_v28  ;;  %6688 = vmatprep.subr.bf16.mxu0 %v6687_v29  ;;  %v5007_v28 = vld [vmem:[%s13700_s1 + $0x15b8] sm:$0xff]  ;;  %v6705_v29 = vpack.c.bf16 %v4996_v23, %v4992_v19  ;;  %v6833_v30 = vpack.c.bf16 %v4998_v26, %v4994_v24  ;;  %v6707_v31 = vpack.c.bf16 %v5005_v0, %v5001_v37  ;;  %v5034_v19 = vld [vmem:[%s13700_s1 + $0x1690] sm:$0xff]  ;;  %v5045_v26 = vld [vmem:[%s13700_s1 + $0x16e8] sm:$0xff] }
 0x14c   : > { %6816 = vmatprep.subr.bf16.mxu1 %v6815_v33  ;;  %1771 = vmatprep.mubr.f32.mxu0 %v1688_v20  ;;  %v5004_v33 = vld [vmem:[%s13700_s1 + $0x15a0] sm:$0xff]  ;;  %v6835_v35 = vpack.c.bf16 %v5007_v28, %v5003_v27  ;;  %v6851_v23 = vpack.c.bf16 %v5039_v13, %v5035_v11  ;;  %v5038_v24 = vld [vmem:[%s13700_s1 + $0x16b0] sm:$0xff]  ;;  %v5043_v37 = vld [vmem:[%s13700_s1 + $0x16d8] sm:$0xff] }
 0x14d   : > { %1925 = vmatprep.mubr.f32.mxu1 %v1688_v20  ;;  %1772 = vmatmul.mubr.f32.gmra.mrb[2].mxu0 %v1686_v45  ;;  %v5011_v20 = vld [vmem:[%s13700_s1 + $0x15d8] sm:$0xff]  ;;  %v6853_v28 = vpack.c.bf16 %v5038_v24, %v5034_v19  ;;  %v5062_v59 = vld [vmem:[%s13700_s1 + $0x1770] sm:$0xff]  ;;  %v5077_v8 = vld [vmem:[%s13700_s1 + $0x17e8] sm:$0xff] }
 0x14e   : > { %6690 = vmatpush1.bf16.msra.mxu0 %v6689_v44  ;;  %1926 = vmatmul.mubr.f32.gmra.mrb[2].mxu1 %v1686_v45  ;;  %v6709_v44 = vpack.c.bf16 %v5004_v33, %v5000_v32  ;;  %v6837_v45 = vpack.c.bf16 %v5006_v36, %v5002_v34  ;;  %v6839_v48 = vpack.c.bf16 %v5015_v41, %v5011_v20  ;;  %v5047_v0 = vld [vmem:[%s13700_s1 + $0x16f8] sm:$0xff]  ;;  %v5042_v32 = vld [vmem:[%s13700_s1 + $0x16d0] sm:$0xff]  ;;  %v5053_v36 = vld [vmem:[%s13700_s1 + $0x1728] sm:$0xff] }
 0x14f   : > { %6818 = vmatpush1.bf16.msra.mxu1 %v6817_v46  ;;  %6692 = vmatprep.subr.bf16.mxu0 %v6691_v47  ;;  %v6711_v46 = vpack.c.bf16 %v5013_v40, %v5009_v38  ;;  %v5008_v47 = vld [vmem:[%s13700_s1 + $0x15c0] sm:$0xff]  ;;  %v6855_v33 = vpack.c.bf16 %v5047_v0, %v5043_v37  ;;  %v5046_v34 = vld [vmem:[%s13700_s1 + $0x16f0] sm:$0xff]  ;;  %v5051_v38 = vld [vmem:[%s13700_s1 + $0x1718] sm:$0xff] }
 0x150   : > { %6820 = vmatprep.subr.bf16.mxu1 %v6819_v49  ;;  %1842 = vmatprep.mubr.f32.mxu0 %v1684_v55  ;;  %v5014_v49 = vld [vmem:[%s13700_s1 + $0x15f0] sm:$0xff]  ;;  %v6713_v54 = vpack.c.bf16 %v5012_v21, %v5008_v47  ;;  %v5055_v40 = vld [vmem:[%s13700_s1 + $0x1738] sm:$0xff]  ;;  %v6857_v41 = vpack.c.bf16 %v5046_v34, %v5042_v32  ;;  %v5072_v13 = vld [vmem:[%s13700_s1 + $0x17c0] sm:$0xff] }
 0x151   : > { %1996 = vmatprep.mubr.f32.mxu1 %v1684_v55  ;;  %v6841_v55 = vpack.c.bf16 %v5014_v49, %v5010_v22  ;;  %v5050_v47 = vld [vmem:[%s13700_s1 + $0x1710] sm:$0xff]  ;;  %v6859_v21 = vpack.c.bf16 %v5055_v40, %v5051_v38  ;;  %v5061_v49 = vld [vmem:[%s13700_s1 + $0x1768] sm:$0xff]  ;;  %v5087_v37 = vld [vmem:[%s13700_s1 + $0x1838] sm:$0xff] }
 0x152   : > { %6694 = vmatpush1.bf16.msra.mxu0 %v6693_v56  ;;  %v6715_v56 = vpack.c.bf16 %v5021_v51, %v5017_v50  ;;  %v5054_v22 = vld [vmem:[%s13700_s1 + $0x1730] sm:$0xff]  ;;  %v5059_v50 = vld [vmem:[%s13700_s1 + $0x1758] sm:$0xff]  ;;  %v5081_v24 = vld [vmem:[%s13700_s1 + $0x1808] sm:$0xff] }
 0x153   : > { %6822 = vmatpush1.bf16.msra.mxu1 %v6821_v57  ;;  %6696 = vmatprep.subr.bf16.mxu0 %v6695_v58  ;;  %v5016_v57 = vld [vmem:[%s13700_s1 + $0x1600] sm:$0xff]  ;;  %v5063_v51 = vld [vmem:[%s13700_s1 + $0x1778] sm:$0xff]  ;;  %v6861_v53 = vpack.c.bf16 %v5054_v22, %v5050_v47  ;;  %v5070_v6 = vld [vmem:[%s13700_s1 + $0x17b0] sm:$0xff] }
 0x154   : > { %6824 = vmatprep.subr.bf16.mxu1 %v6823_v62  ;;  %v5020_v58 = vld [vmem:[%s13700_s1 + $0x1620] sm:$0xff]  ;;  %v5025_v62 = vld [vmem:[%s13700_s1 + $0x1648] sm:$0xff]  ;;  %v5086_v40 = vld [vmem:[%s13700_s1 + $0x1830] sm:$0xff] }
 0x155   : > { %v6717_v3 = vpack.c.bf16 %v5020_v58, %v5016_v57  ;;  %v5058_v57 = vld [vmem:[%s13700_s1 + $0x1750] sm:$0xff]  ;;  %v6863_v58 = vpack.c.bf16 %v5063_v51, %v5059_v50  ;;  %v5084_v34 = vld [vmem:[%s13700_s1 + $0x1820] sm:$0xff] }
 0x156   : > { %6698 = vmatpush1.bf16.msra.mxu0 %v6697_v5  ;;  %v6719_v5 = vpack.c.bf16 %v5029_v63, %v5025_v62  ;;  %v5067_v62 = vld [vmem:[%s13700_s1 + $0x1798] sm:$0xff]  ;;  %v6865_v2 = vpack.c.bf16 %v5062_v59, %v5058_v57  ;;  %v5088_v51 = vld [vmem:[%s13700_s1 + $0x1840] sm:$0xff]  ;;  %v5101_v57 = vld [vmem:[%s13700_s1 + $0x18a8] sm:$0xff] }
 0x157   : > { %6826 = vmatpush1.bf16.msra.mxu1 %v6825_v12  ;;  %6700 = vmatprep.subr.bf16.mxu0 %v6699_v39  ;;  %v5024_v12 = vld [vmem:[%s13700_s1 + $0x1640] sm:$0xff]  ;;  %v5071_v63 = vld [vmem:[%s13700_s1 + $0x17b8] sm:$0xff] }
 0x158   : > { %6828 = vmatprep.subr.bf16.mxu1 %v6827_v9  ;;  %v5028_v39 = vld [vmem:[%s13700_s1 + $0x1660] sm:$0xff]  ;;  %v5033_v9 = vld [vmem:[%s13700_s1 + $0x1688] sm:$0xff]  ;;  %v5103_v59 = vld [vmem:[%s13700_s1 + $0x18b8] sm:$0xff] }
 0x159   : > { %v6721_v14 = vpack.c.bf16 %v5028_v39, %v5024_v12  ;;  %v5066_v12 = vld [vmem:[%s13700_s1 + $0x1790] sm:$0xff]  ;;  %v6867_v39 = vpack.c.bf16 %v5071_v63, %v5067_v62  ;;  %v10542_v62 = vld [vmem:[%s8369_s27 + $0x28] sm:$0xff] }
 0x15a   : > { %6702 = vmatpush1.bf16.msra.mxu0 %v6701_v16  ;;  %v6723_v16 = vpack.c.bf16 %v5037_v10, %v5033_v9  ;;  %v5075_v9 = vld [vmem:[%s13700_s1 + $0x17d8] sm:$0xff]  ;;  %v2295_v63 = vrot.slane %v10542_v62, 3  ;;  %v5224_v62 = vld [vmem:[%s13700_s1 + $0x1c80] sm:$0xff] }
 0x15b   : > { %6830 = vmatpush1.bf16.msra.mxu1 %v6829_v17  ;;  %6704 = vmatprep.subr.bf16.mxu0 %v6703_v18  ;;  %v5032_v17 = vld [vmem:[%s13700_s1 + $0x1680] sm:$0xff]  ;;  %v5079_v10 = vld [vmem:[%s13700_s1 + $0x17f8] sm:$0xff] }
 0x15c   : > { %6832 = vmatprep.subr.bf16.mxu1 %v6831_v25  ;;  %v5036_v18 = vld [vmem:[%s13700_s1 + $0x16a0] sm:$0xff]  ;;  %v5041_v25 = vld [vmem:[%s13700_s1 + $0x16c8] sm:$0xff]  ;;  %v6871_v19 = vpack.c.bf16 %v5079_v10, %v5075_v9  ;;  %v5111_v9 = vld [vmem:[%s13700_s1 + $0x18f8] sm:$0xff] }
 0x15d   : > { %v6725_v27 = vpack.c.bf16 %v5036_v18, %v5032_v17  ;;  %v5074_v17 = vld [vmem:[%s13700_s1 + $0x17d0] sm:$0xff] }
 0x15e   : > { %6706 = vmatpush1.bf16.msra.mxu0 %v6705_v29  ;;  %v6727_v29 = vpack.c.bf16 %v5045_v26, %v5041_v25  ;;  %v1401_v18 = vld [vmem:[%s8369_s27 + $0x10] sm:$0xfc]  ;;  %v5085_v25 = vld [vmem:[%s13700_s1 + $0x1828] sm:$0xff]  ;;  %v5083_v26 = vld [vmem:[%s13700_s1 + $0x1818] sm:$0xff] }
 0x15f   : > { %6834 = vmatpush1.bf16.msra.mxu1 %v6833_v30  ;;  %6708 = vmatprep.subr.bf16.mxu0 %v6707_v31  ;;  %v5040_v30 = vld [vmem:[%s13700_s1 + $0x16c0] sm:$0xff]  ;;  %v7003_v38 = vpack.c.bf16 %v5087_v37, %v5083_v26  ;;  %v5119_v26 = vld [vmem:[%s13700_s1 + $0x1938] sm:$0xff] }
 0x160   : > { %6836 = vmatprep.subr.bf16.mxu1 %v6835_v35  ;;  %v5044_v31 = vld [vmem:[%s13700_s1 + $0x16e0] sm:$0xff]  ;;  %v5049_v35 = vld [vmem:[%s13700_s1 + $0x1708] sm:$0xff] }
 0x161   : > { %v6729_v20 = vpack.c.bf16 %v5044_v31, %v5040_v30  ;;  %v5080_v30 = vld [vmem:[%s13700_s1 + $0x1800] sm:$0xff]  ;;  %v1406_v31 = vld [vmem:[%s8369_s27 + $0x58] sm:$0x3] }
 0x162   : > { %6710 = vmatpush1.bf16.msra.mxu0 %v6709_v44  ;;  %v6731_v44 = vpack.c.bf16 %v5053_v36, %v5049_v35  ;;  %v5082_v35 = vld [vmem:[%s13700_s1 + $0x1810] sm:$0xff] }
 0x163   : > { %6838 = vmatpush1.bf16.msra.mxu1 %v6837_v45  ;;  %6712 = vmatprep.subr.bf16.mxu0 %v6711_v46  ;;  %v5048_v45 = vld [vmem:[%s13700_s1 + $0x1700] sm:$0xff]  ;;  %v1405_v36 = vld [vmem:[%s8369_s27 + $0x50] sm:$0x3] }
 0x164   : > { %6840 = vmatprep.subr.bf16.mxu1 %v6839_v48  ;;  %v5052_v46 = vld [vmem:[%s13700_s1 + $0x1720] sm:$0xff]  ;;  %v5057_v48 = vld [vmem:[%s13700_s1 + $0x1748] sm:$0xff]  ;;  %v1689_v22 = vrot.slane %v1405_v36, 2  ;;  %v5127_v36 = vld [vmem:[%s13700_s1 + $0x1978] sm:$0xff] }
 0x165   : > { %v6733_v52 = vpack.c.bf16 %v5052_v46, %v5048_v45  ;;  %v5095_v45 = vld [vmem:[%s13700_s1 + $0x1878] sm:$0xff]  ;;  %v1691_v46 = vrot.slane %v1406_v31, 2 }
 0x166   : > { %6714 = vmatpush1.bf16.msra.mxu0 %v6713_v54  ;;  %v6735_v54 = vpack.c.bf16 %v5061_v49, %v5057_v48  ;;  %v2018_v48 = vld [vmem:[%s8369_s27 + $0x8] sm:$0xf8]  ;;  %v7005_v49 = vpack.c.bf16 %v5086_v40, %v5082_v35  ;;  %v5123_v35 = vld [vmem:[%s13700_s1 + $0x1958] sm:$0xff] }
 0x167   : > { %6842 = vmatpush1.bf16.msra.mxu1 %v6841_v55  ;;  %6716 = vmatprep.subr.bf16.mxu0 %v6715_v56  ;;  %v5056_v55 = vld [vmem:[%s13700_s1 + $0x1740] sm:$0xff] }
 0x168   : > { %6844 = vmatprep.subr.bf16.mxu1 %v6843_v60  ;;  %v5060_v56 = vld [vmem:[%s13700_s1 + $0x1760] sm:$0xff]  ;;  %v5065_v60 = vld [vmem:[%s13700_s1 + $0x1788] sm:$0xff] }
 0x169   : > { %v6737_v1 = vpack.c.bf16 %v5060_v56, %v5056_v55  ;;  %v5094_v55 = vld [vmem:[%s13700_s1 + $0x1870] sm:$0xff]  ;;  %v5097_v56 = vld [vmem:[%s13700_s1 + $0x1888] sm:$0xff] }
 0x16a   : > { %6718 = vmatpush1.bf16.msra.mxu0 %v6717_v3  ;;  %v6739_v3 = vpack.c.bf16 %v5069_v61, %v5065_v60  ;;  %v1692_v60 = vsel %vm1672_vm1, %v1683_v43, %v1691_v46  ;;  %v2294_v61 = vrot.slane %v2018_v48, 3  ;;  %v5100_v43 = vld [vmem:[%s13700_s1 + $0x18a0] sm:$0xff]  ;;  %v7023_v46 = vpack.c.bf16 %v5127_v36, %v5123_v35  ;;  %v5131_v48 = vld [vmem:[%s13700_s1 + $0x1998] sm:$0xff] }
 0x16b   : > { %6846 = vmatpush1.bf16.msra.mxu1 %v6845_v4  ;;  %6720 = vmatprep.subr.bf16.mxu0 %v6719_v5  ;;  %v5064_v4 = vld [vmem:[%s13700_s1 + $0x1780] sm:$0xff] }
 0x16c   : > { %6848 = vmatprep.subr.bf16.mxu1 %v6847_v7  ;;  %v5068_v5 = vld [vmem:[%s13700_s1 + $0x17a0] sm:$0xff]  ;;  %v5073_v7 = vld [vmem:[%s13700_s1 + $0x17c8] sm:$0xff]  ;;  %v2296_v10 = vsel %vm2290_vm2, %v2294_v61, %v2295_v63  ;;  %v5143_v61 = vld [vmem:[%s13700_s1 + $0x19f8] sm:$0xff] }
 0x16d   : > { %v6741_v11 = vpack.c.bf16 %v5068_v5, %v5064_v4  ;;  %v6883_v4 = vpack.c.bf16 %v5101_v57, %v5097_v56  ;;  %v5098_v5 = vld [vmem:[%s13700_s1 + $0x1890] sm:$0xff] }
 0x16e   : > { %6722 = vmatpush1.bf16.msra.mxu0 %v6721_v14  ;;  %v6869_v14 = vpack.c.bf16 %v5070_v6, %v5066_v12  ;;  %v5105_v6 = vld [vmem:[%s13700_s1 + $0x18c8] sm:$0xff]  ;;  %v5134_v57 = vld [vmem:[%s13700_s1 + $0x19b0] sm:$0xff] }
 0x16f   : > { %6850 = vmatpush1.bf16.msra.mxu1 %v6849_v15  ;;  %6724 = vmatprep.subr.bf16.mxu0 %v6723_v16  ;;  %v6743_v15 = vpack.c.bf16 %v5077_v8, %v5073_v7  ;;  %v5076_v16 = vld [vmem:[%s13700_s1 + $0x17e0] sm:$0xff]  ;;  %v5109_v7 = vld [vmem:[%s13700_s1 + $0x18e8] sm:$0xff]  ;;  %v5107_v8 = vld [vmem:[%s13700_s1 + $0x18d8] sm:$0xff] }
 0x170   : > { %6852 = vmatprep.subr.bf16.mxu1 %v6851_v23  ;;  %v5078_v23 = vld [vmem:[%s13700_s1 + $0x17f0] sm:$0xff]  ;;  %v6745_v0 = vpack.c.bf16 %v5076_v16, %v5072_v13  ;;  %v5108_v16 = vld [vmem:[%s13700_s1 + $0x18e0] sm:$0xff] }
 0x171   : > { %v6873_v32 = vpack.c.bf16 %v5078_v23, %v5074_v17  ;;  %v5106_v17 = vld [vmem:[%s13700_s1 + $0x18d0] sm:$0xff]  ;;  %v5113_v23 = vld [vmem:[%s13700_s1 + $0x1908] sm:$0xff] }
 0x172   : > { %6726 = vmatpush1.bf16.msra.mxu0 %v6725_v27  ;;  %v1679_v27 = vrot.slane %v1401_v18, 2  ;;  %v7015_v18 = vpack.c.bf16 %v5111_v9, %v5107_v8  ;;  %v5151_v8 = vld [vmem:[%s13700_s1 + $0x1a38] sm:$0xff] }
 0x173   : > { %6854 = vmatpush1.bf16.msra.mxu1 %v6853_v28  ;;  %6728 = vmatprep.subr.bf16.mxu0 %v6727_v29  ;;  %v8024_v28 = vld [vmem:[%s8369_s27 + $0x30] sm:$0xff] }
 0x174   : > { %6856 = vmatprep.subr.bf16.mxu1 %v6855_v33  ;;  %v1680_v29 = vrot.slane %v8024_v28, 2  ;;  %v6875_v33 = vpack.c.bf16 %v5085_v25, %v5081_v24  ;;  %v5117_v24 = vld [vmem:[%s13700_s1 + $0x1928] sm:$0xff]  ;;  %v5115_v25 = vld [vmem:[%s13700_s1 + $0x1918] sm:$0xff]  ;;  %v5112_v28 = vld [vmem:[%s13700_s1 + $0x1900] sm:$0xff] }
 0x175   : > { %v7019_v31 = vpack.c.bf16 %v5119_v26, %v5115_v25 }
 0x176   : > { %6730 = vmatpush1.bf16.msra.mxu0 %v6729_v20  ;;  %v5089_v20 = vld [vmem:[%s13700_s1 + $0x1848] sm:$0xff]  ;;  %v1681_v47 = vsel %vm1672_vm1, %v1679_v27, %v1680_v29  ;;  %v6891_v27 = vpack.c.bf16 %v5117_v24, %v5113_v23  ;;  %v5155_v23 = vld [vmem:[%s13700_s1 + $0x1a58] sm:$0xff] }
 0x177   : > { %6858 = vmatpush1.bf16.msra.mxu1 %v6857_v41  ;;  %6732 = vmatprep.subr.bf16.mxu0 %v6731_v44  ;;  %v5093_v41 = vld [vmem:[%s13700_s1 + $0x1868] sm:$0xff]  ;;  %v5091_v44 = vld [vmem:[%s13700_s1 + $0x1858] sm:$0xff] }
 0x178   : > { %6860 = vmatprep.subr.bf16.mxu1 %v6859_v21  ;;  %v6877_v21 = vpack.c.bf16 %v5084_v34, %v5080_v30  ;;  %v6879_v50 = vpack.c.bf16 %v5093_v41, %v5089_v20  ;;  %v5114_v30 = vld [vmem:[%s13700_s1 + $0x1910] sm:$0xff]  ;;  %v5125_v34 = vld [vmem:[%s13700_s1 + $0x1968] sm:$0xff]  ;;  %v5120_v41 = vld [vmem:[%s13700_s1 + $0x1940] sm:$0xff] }
 0x179   : > { %v5159_v24 = vld [vmem:[%s13700_s1 + $0x1a78] sm:$0xff] }
 0x17a   : > { %6734 = vmatpush1.bf16.msra.mxu0 %v6733_v52  ;;  %v5092_v52 = vld [vmem:[%s13700_s1 + $0x1860] sm:$0xff] }
 0x17b   : > { %6862 = vmatpush1.bf16.msra.mxu1 %v6861_v53  ;;  %6736 = vmatprep.subr.bf16.mxu0 %v6735_v54  ;;  %v5090_v53 = vld [vmem:[%s13700_s1 + $0x1850] sm:$0xff]  ;;  %v7007_v54 = vpack.c.bf16 %v5095_v45, %v5091_v44  ;;  %v5124_v44 = vld [vmem:[%s13700_s1 + $0x1960] sm:$0xff] }
 0x17c   : > { %6864 = vmatprep.subr.bf16.mxu1 %v6863_v58  ;;  %v5099_v58 = vld [vmem:[%s13700_s1 + $0x1898] sm:$0xff]  ;;  %v5122_v45 = vld [vmem:[%s13700_s1 + $0x1950] sm:$0xff] }
 0x17d   : > { %v7011_v12 = vpack.c.bf16 %v5103_v59, %v5099_v58  ;;  %v5137_v58 = vld [vmem:[%s13700_s1 + $0x19c8] sm:$0xff] }
 0x17e   : > { %6738 = vmatpush1.bf16.msra.mxu0 %v6737_v1  ;;  %v6881_v1 = vpack.c.bf16 %v5092_v52, %v5088_v51  ;;  %v5141_v59 = vld [vmem:[%s13700_s1 + $0x19e8] sm:$0xff] }
 0x17f   : > { %6866 = vmatpush1.bf16.msra.mxu1 %v6865_v2  ;;  %6740 = vmatprep.subr.bf16.mxu0 %v6739_v3  ;;  %v1690_v2 = vsel %vm1672_vm1, %v1680_v29, %v1689_v22  ;;  %v7009_v3 = vpack.c.bf16 %v5094_v55, %v5090_v53  ;;  %v5116_v29 = vld [vmem:[%s13700_s1 + $0x1920] sm:$0xff]  ;;  %v5133_v22 = vld [vmem:[%s13700_s1 + $0x19a8] sm:$0xff]  ;;  %v5130_v55 = vld [vmem:[%s13700_s1 + $0x1990] sm:$0xff] }
 0x180   : > { %6868 = vmatprep.subr.bf16.mxu1 %v6867_v39  ;;  %v5102_v39 = vld [vmem:[%s13700_s1 + $0x18b0] sm:$0xff]  ;;  %v5128_v53 = vld [vmem:[%s13700_s1 + $0x1980] sm:$0xff] }
 0x181   : > { %v7013_v13 = vpack.c.bf16 %v5102_v39, %v5098_v5  ;;  %v5145_v39 = vld [vmem:[%s13700_s1 + $0x1a08] sm:$0xff] }
 0x182   : > { %6742 = vmatpush1.bf16.msra.mxu0 %v6741_v11  ;;  %v6885_v11 = vpack.c.bf16 %v5100_v43, %v5096_v42  ;;  %v5140_v42 = vld [vmem:[%s13700_s1 + $0x19e0] sm:$0xff]  ;;  %v5138_v43 = vld [vmem:[%s13700_s1 + $0x19d0] sm:$0xff] }
 0x183   : > { %6870 = vmatpush1.bf16.msra.mxu1 %v6869_v14  ;;  %6744 = vmatprep.subr.bf16.mxu0 %v6743_v15  ;;  %v6887_v14 = vpack.c.bf16 %v5109_v7, %v5105_v6  ;;  %v5104_v15 = vld [vmem:[%s13700_s1 + $0x18c0] sm:$0xff]  ;;  %v5149_v6 = vld [vmem:[%s13700_s1 + $0x1a28] sm:$0xff]  ;;  %v5147_v7 = vld [vmem:[%s13700_s1 + $0x1a18] sm:$0xff] }
 0x184   : > { %6872 = vmatprep.subr.bf16.mxu1 %v6871_v19  ;;  %v5110_v19 = vld [vmem:[%s13700_s1 + $0x18f0] sm:$0xff]  ;;  %v6889_v37 = vpack.c.bf16 %v5108_v16, %v5104_v15  ;;  %v7035_v16 = vpack.c.bf16 %v5151_v8, %v5147_v7 }
 0x185   : > { %v5146_v15 = vld [vmem:[%s13700_s1 + $0x1a10] sm:$0xff] }
 0x186   : > { %6746 = vmatpush1.bf16.msra.mxu0 %v6745_v0  ;;  %v7017_v0 = vpack.c.bf16 %v5110_v19, %v5106_v17  ;;  %v5150_v17 = vld [vmem:[%s13700_s1 + $0x1a30] sm:$0xff]  ;;  %v5157_v19 = vld [vmem:[%s13700_s1 + $0x1a68] sm:$0xff] }
 0x187   : > { %6874 = vmatpush1.bf16.msra.mxu1 %v6873_v32  ;;  %6876 = vmatprep.subr.bf16.mxu0 %v6875_v33  ;;  %v5118_v32 = vld [vmem:[%s13700_s1 + $0x1930] sm:$0xff]  ;;  %v5121_v33 = vld [vmem:[%s13700_s1 + $0x1948] sm:$0xff]  ;;  %v7037_v26 = vpack.c.bf16 %v5150_v17, %v5146_v15 }
 0x188   : > { %7004 = vmatprep.subr.bf16.mxu1 %v7003_v38  ;;  %v6893_v38 = vpack.c.bf16 %v5116_v29, %v5112_v28  ;;  %v7021_v40 = vpack.c.bf16 %v5118_v32, %v5114_v30  ;;  %v6895_v20 = vpack.c.bf16 %v5125_v34, %v5121_v33  ;;  %v5154_v28 = vld [vmem:[%s13700_s1 + $0x1a50] sm:$0xff]  ;;  %v7039_v29 = vpack.c.bf16 %v5159_v24, %v5155_v23  ;;  %v5165_v32 = vld [vmem:[%s13700_s1 + $0x1aa8] sm:$0xff]  ;;  %v5163_v33 = vld [vmem:[%s13700_s1 + $0x1a98] sm:$0xff] }
 0x189   : > { %1843 = vmatmul.mubr.f32.vlgmr.msra.gmra.mrb[0].mxu0 %v1681_v47  ;;  %v5158_v30 = vld [vmem:[%s13700_s1 + $0x1a70] sm:$0xff]  ;;  %v5167_v34 = vld [vmem:[%s13700_s1 + $0x1ab8] sm:$0xff]  ;;  %v5197_v17 = vld [vmem:[%s13700_s1 + $0x1ba8] sm:$0xff] }
 0x18a   : > { %1997 = vmatmul.mubr.f32.vlgmr.msra.gmra.mrb[0].mxu1 %v1681_v47  ;;  %6878 = vmatpush1.bf16.msra.mxu0 %v6877_v21  ;;  %v5126_v47 = vld [vmem:[%s13700_s1 + $0x1970] sm:$0xff]  ;;  %v5129_v21 = vld [vmem:[%s13700_s1 + $0x1988] sm:$0xff]  ;;  %v7041_v36 = vpack.c.bf16 %v5158_v30, %v5154_v28 }
 0x18b   : > { %7006 = vmatpush1.bf16.msra.mxu1 %v7005_v49  ;;  %6880 = vmatprep.subr.bf16.mxu0 %v6879_v50  ;;  %v5135_v49 = vld [vmem:[%s13700_s1 + $0x19b8] sm:$0xff]  ;;  %v6897_v50 = vpack.c.bf16 %v5124_v44, %v5120_v41  ;;  %v7025_v51 = vpack.c.bf16 %v5126_v47, %v5122_v45  ;;  %v6899_v52 = vpack.c.bf16 %v5133_v22, %v5129_v21  ;;  %v5162_v41 = vld [vmem:[%s13700_s1 + $0x1a90] sm:$0xff]  ;;  %v5173_v47 = vld [vmem:[%s13700_s1 + $0x1ae8] sm:$0xff] }
 0x18c   : > { %7008 = vmatprep.subr.bf16.mxu1 %v7007_v54  ;;  %1848 = vmatprep.mubr.f32.mxu0 %v1692_v60  ;;  %v5132_v54 = vld [vmem:[%s13700_s1 + $0x19a0] sm:$0xff]  ;;  %v7027_v56 = vpack.c.bf16 %v5135_v49, %v5131_v48  ;;  %v7043_v44 = vpack.c.bf16 %v5167_v34, %v5163_v33  ;;  %v5166_v45 = vld [vmem:[%s13700_s1 + $0x1ab0] sm:$0xff]  ;;  %v5171_v21 = vld [vmem:[%s13700_s1 + $0x1ad8] sm:$0xff] }
 0x18d   : > { %2002 = vmatprep.mubr.f32.mxu1 %v1692_v60  ;;  %1849 = vmatmul.mubr.f32.gmra.mrb[2].mxu0 %v1690_v2  ;;  %v5139_v60 = vld [vmem:[%s13700_s1 + $0x19d8] sm:$0xff]  ;;  %v7045_v49 = vpack.c.bf16 %v5166_v45, %v5162_v41  ;;  %v5190_v15 = vld [vmem:[%s13700_s1 + $0x1b70] sm:$0xff]  ;;  %v5205_v30 = vld [vmem:[%s13700_s1 + $0x1be8] sm:$0xff] }
 0x18e   : > { %6882 = vmatpush1.bf16.msra.mxu0 %v6881_v1  ;;  %2003 = vmatmul.mubr.f32.gmra.mrb[2].mxu1 %v1690_v2  ;;  %v6901_v1 = vpack.c.bf16 %v5132_v54, %v5128_v53  ;;  %v7029_v2 = vpack.c.bf16 %v5134_v57, %v5130_v55  ;;  %v7031_v5 = vpack.c.bf16 %v5143_v61, %v5139_v60  ;;  %v5175_v22 = vld [vmem:[%s13700_s1 + $0x1af8] sm:$0xff]  ;;  %v5170_v53 = vld [vmem:[%s13700_s1 + $0x1ad0] sm:$0xff]  ;;  %v5181_v57 = vld [vmem:[%s13700_s1 + $0x1b28] sm:$0xff] }
 0x18f   : > { %7010 = vmatpush1.bf16.msra.mxu1 %v7009_v3  ;;  %6884 = vmatprep.subr.bf16.mxu0 %v6883_v4  ;;  %v6903_v3 = vpack.c.bf16 %v5141_v59, %v5137_v58  ;;  %v5136_v4 = vld [vmem:[%s13700_s1 + $0x19c0] sm:$0xff]  ;;  %v7047_v54 = vpack.c.bf16 %v5175_v22, %v5171_v21  ;;  %v5174_v55 = vld [vmem:[%s13700_s1 + $0x1af0] sm:$0xff]  ;;  %v5179_v58 = vld [vmem:[%s13700_s1 + $0x1b18] sm:$0xff] }
 0x190   : > { %7012 = vmatprep.subr.bf16.mxu1 %v7011_v12  ;;  %2383 = vmatprep.mubr.f32.mxu0 %v2296_v10  ;;  %v5142_v12 = vld [vmem:[%s13700_s1 + $0x19f0] sm:$0xff]  ;;  %v6905_v9 = vpack.c.bf16 %v5140_v42, %v5136_v4  ;;  %v5183_v59 = vld [vmem:[%s13700_s1 + $0x1b38] sm:$0xff]  ;;  %v7049_v61 = vpack.c.bf16 %v5174_v55, %v5170_v53  ;;  %v5200_v34 = vld [vmem:[%s13700_s1 + $0x1bc0] sm:$0xff] }
 0x191   : > { %2537 = vmatprep.mubr.f32.mxu1 %v2296_v10  ;;  %v7033_v10 = vpack.c.bf16 %v5142_v12, %v5138_v43  ;;  %v5178_v4 = vld [vmem:[%s13700_s1 + $0x1b10] sm:$0xff]  ;;  %v7051_v42 = vpack.c.bf16 %v5183_v59, %v5179_v58  ;;  %v5189_v12 = vld [vmem:[%s13700_s1 + $0x1b68] sm:$0xff]  ;;  %v5215_v21 = vld [vmem:[%s13700_s1 + $0x1c38] sm:$0xff] }
 0x192   : > { %6886 = vmatpush1.bf16.msra.mxu0 %v6885_v11  ;;  %v6907_v11 = vpack.c.bf16 %v5149_v6, %v5145_v39  ;;  %v5182_v43 = vld [vmem:[%s13700_s1 + $0x1b30] sm:$0xff]  ;;  %v5187_v39 = vld [vmem:[%s13700_s1 + $0x1b58] sm:$0xff]  ;;  %v5209_v45 = vld [vmem:[%s13700_s1 + $0x1c08] sm:$0xff] }
 0x193   : > { %7014 = vmatpush1.bf16.msra.mxu1 %v7013_v13  ;;  %6888 = vmatprep.subr.bf16.mxu0 %v6887_v14  ;;  %v5144_v13 = vld [vmem:[%s13700_s1 + $0x1a00] sm:$0xff]  ;;  %v5191_v6 = vld [vmem:[%s13700_s1 + $0x1b78] sm:$0xff]  ;;  %v7053_v8 = vpack.c.bf16 %v5182_v43, %v5178_v4  ;;  %v5198_v28 = vld [vmem:[%s13700_s1 + $0x1bb0] sm:$0xff] }
 0x194   : > { %7016 = vmatprep.subr.bf16.mxu1 %v7015_v18  ;;  %v5148_v14 = vld [vmem:[%s13700_s1 + $0x1a20] sm:$0xff]  ;;  %v5153_v18 = vld [vmem:[%s13700_s1 + $0x1a48] sm:$0xff]  ;;  %v5214_v59 = vld [vmem:[%s13700_s1 + $0x1c30] sm:$0xff] }
 0x195   : > { %v6909_v25 = vpack.c.bf16 %v5148_v14, %v5144_v13  ;;  %v5186_v13 = vld [vmem:[%s13700_s1 + $0x1b50] sm:$0xff]  ;;  %v7055_v14 = vpack.c.bf16 %v5191_v6, %v5187_v39  ;;  %v5212_v55 = vld [vmem:[%s13700_s1 + $0x1c20] sm:$0xff] }
 0x196   : > { %6890 = vmatpush1.bf16.msra.mxu0 %v6889_v37  ;;  %v6911_v37 = vpack.c.bf16 %v5157_v19, %v5153_v18  ;;  %v5195_v18 = vld [vmem:[%s13700_s1 + $0x1b98] sm:$0xff]  ;;  %v7057_v24 = vpack.c.bf16 %v5190_v15, %v5186_v13  ;;  %v5216_v6 = vld [vmem:[%s13700_s1 + $0x1c40] sm:$0xff]  ;;  %v5229_v13 = vld [vmem:[%s13700_s1 + $0x1ca8] sm:$0xff] }
 0x197   : > { %7018 = vmatpush1.bf16.msra.mxu1 %v7017_v0  ;;  %6892 = vmatprep.subr.bf16.mxu0 %v6891_v27  ;;  %v5152_v0 = vld [vmem:[%s13700_s1 + $0x1a40] sm:$0xff]  ;;  %v5199_v19 = vld [vmem:[%s13700_s1 + $0x1bb8] sm:$0xff] }
 0x198   : > { %7020 = vmatprep.subr.bf16.mxu1 %v7019_v31  ;;  %v5156_v27 = vld [vmem:[%s13700_s1 + $0x1a60] sm:$0xff]  ;;  %v5161_v31 = vld [vmem:[%s13700_s1 + $0x1a88] sm:$0xff]  ;;  %v5231_v15 = vld [vmem:[%s13700_s1 + $0x1cb8] sm:$0xff] }
 0x199   : > { %v6913_v35 = vpack.c.bf16 %v5156_v27, %v5152_v0  ;;  %v5194_v0 = vld [vmem:[%s13700_s1 + $0x1b90] sm:$0xff]  ;;  %v7059_v27 = vpack.c.bf16 %v5199_v19, %v5195_v18  ;;  %v10943_v18 = vld [vmem:[%s8369_s27 + $0x38] sm:$0xff] }
 0x19a   : > { %6894 = vmatpush1.bf16.msra.mxu0 %v6893_v38  ;;  %v6915_v38 = vpack.c.bf16 %v5165_v32, %v5161_v31  ;;  %v5203_v31 = vld [vmem:[%s13700_s1 + $0x1bd8] sm:$0xff]  ;;  %v2301_v19 = vrot.slane %v10943_v18, 3  ;;  %v5352_v18 = vld [vmem:[%s13700_s1 + $0x2080] sm:$0xff] }
 0x19b   : > { %7022 = vmatpush1.bf16.msra.mxu1 %v7021_v40  ;;  %6896 = vmatprep.subr.bf16.mxu0 %v6895_v20  ;;  %v5160_v40 = vld [vmem:[%s13700_s1 + $0x1a80] sm:$0xff]  ;;  %v5207_v32 = vld [vmem:[%s13700_s1 + $0x1bf8] sm:$0xff] }
 0x19c   : > { %7024 = vmatprep.subr.bf16.mxu1 %v7023_v46  ;;  %v5164_v20 = vld [vmem:[%s13700_s1 + $0x1aa0] sm:$0xff]  ;;  %v5169_v46 = vld [vmem:[%s13700_s1 + $0x1ac8] sm:$0xff]  ;;  %v7063_v41 = vpack.c.bf16 %v5207_v32, %v5203_v31  ;;  %v5239_v31 = vld [vmem:[%s13700_s1 + $0x1cf8] sm:$0xff] }
 0x19d   : > { %v6917_v48 = vpack.c.bf16 %v5164_v20, %v5160_v40  ;;  %v5202_v40 = vld [vmem:[%s13700_s1 + $0x1bd0] sm:$0xff]  ;;  %v2017_v20 = vld [vmem:[%s8369_s27] sm:$0xf8] }
 0x19e   : > { %6898 = vmatpush1.bf16.msra.mxu0 %v6897_v50  ;;  %v6919_v50 = vpack.c.bf16 %v5173_v47, %v5169_v46  ;;  %v5213_v46 = vld [vmem:[%s13700_s1 + $0x1c28] sm:$0xff]  ;;  %v5211_v47 = vld [vmem:[%s13700_s1 + $0x1c18] sm:$0xff] }
 0x19f   : > { %7026 = vmatpush1.bf16.msra.mxu1 %v7025_v51  ;;  %6900 = vmatprep.subr.bf16.mxu0 %v6899_v52  ;;  %v5168_v51 = vld [vmem:[%s13700_s1 + $0x1ac0] sm:$0xff]  ;;  %v7067_v58 = vpack.c.bf16 %v5215_v21, %v5211_v47  ;;  %v5247_v47 = vld [vmem:[%s13700_s1 + $0x1d38] sm:$0xff] }
 0x1a0   : > { %7028 = vmatprep.subr.bf16.mxu1 %v7027_v56  ;;  %v5172_v52 = vld [vmem:[%s13700_s1 + $0x1ae0] sm:$0xff]  ;;  %v5177_v56 = vld [vmem:[%s13700_s1 + $0x1b08] sm:$0xff] }
 0x1a1   : > { %v6921_v60 = vpack.c.bf16 %v5172_v52, %v5168_v51  ;;  %v5208_v51 = vld [vmem:[%s13700_s1 + $0x1c00] sm:$0xff]  ;;  %v2022_v52 = vld [vmem:[%s8369_s27 + $0x48] sm:$0x7] }
 0x1a2   : > { %6902 = vmatpush1.bf16.msra.mxu0 %v6901_v1  ;;  %v6923_v1 = vpack.c.bf16 %v5181_v57, %v5177_v56  ;;  %v5210_v56 = vld [vmem:[%s13700_s1 + $0x1c10] sm:$0xff]  ;;  %v2021_v57 = vld [vmem:[%s8369_s27 + $0x40] sm:$0x7] }
 0x1a3   : > { %7030 = vmatpush1.bf16.msra.mxu1 %v7029_v2  ;;  %6904 = vmatprep.subr.bf16.mxu0 %v6903_v3  ;;  %v5176_v2 = vld [vmem:[%s13700_s1 + $0x1b00] sm:$0xff]  ;;  %v2303_v43 = vrot.slane %v2021_v57, 3  ;;  %v5255_v57 = vld [vmem:[%s13700_s1 + $0x1d78] sm:$0xff] }
 0x1a4   : > { %7032 = vmatprep.subr.bf16.mxu1 %v7031_v5  ;;  %v5180_v3 = vld [vmem:[%s13700_s1 + $0x1b20] sm:$0xff]  ;;  %v5185_v5 = vld [vmem:[%s13700_s1 + $0x1b48] sm:$0xff] }
 0x1a5   : > { %v6925_v7 = vpack.c.bf16 %v5180_v3, %v5176_v2  ;;  %v5223_v2 = vld [vmem:[%s13700_s1 + $0x1c78] sm:$0xff]  ;;  %v2305_v3 = vrot.slane %v2022_v52, 3 }
 0x1a6   : > { %6906 = vmatpush1.bf16.msra.mxu0 %v6905_v9  ;;  %v6927_v9 = vpack.c.bf16 %v5189_v12, %v5185_v5  ;;  %v2020_v5 = vld [vmem:[%s8369_s27 + $0x18] sm:$0xf8]  ;;  %v7069_v12 = vpack.c.bf16 %v5214_v59, %v5210_v56 }
 0x1a7   : > { %7034 = vmatpush1.bf16.msra.mxu1 %v7033_v10  ;;  %6908 = vmatprep.subr.bf16.mxu0 %v6907_v11  ;;  %v5184_v10 = vld [vmem:[%s13700_s1 + $0x1b40] sm:$0xff]  ;;  %v5251_v56 = vld [vmem:[%s13700_s1 + $0x1d58] sm:$0xff] }
 0x1a8   : > { %7036 = vmatprep.subr.bf16.mxu1 %v7035_v16  ;;  %v5188_v11 = vld [vmem:[%s13700_s1 + $0x1b60] sm:$0xff]  ;;  %v5193_v16 = vld [vmem:[%s13700_s1 + $0x1b88] sm:$0xff] }
 0x1a9   : > { %v6929_v23 = vpack.c.bf16 %v5188_v11, %v5184_v10  ;;  %v5222_v10 = vld [vmem:[%s13700_s1 + $0x1c70] sm:$0xff]  ;;  %v5225_v11 = vld [vmem:[%s13700_s1 + $0x1c88] sm:$0xff] }
 0x1aa   : > { %6910 = vmatpush1.bf16.msra.mxu0 %v6909_v25  ;;  %v6931_v25 = vpack.c.bf16 %v5197_v17, %v5193_v16  ;;  %v2306_v16 = vsel %vm2290_vm2, %v2295_v63, %v2305_v3  ;;  %v2300_v17 = vrot.slane %v2020_v5, 3  ;;  %v5228_v63 = vld [vmem:[%s13700_s1 + $0x1ca0] sm:$0xff]  ;;  %v7087_v3 = vpack.c.bf16 %v5255_v57, %v5251_v56  ;;  %v5259_v5 = vld [vmem:[%s13700_s1 + $0x1d98] sm:$0xff] }
 0x1ab   : > { %7038 = vmatpush1.bf16.msra.mxu1 %v7037_v26  ;;  %6912 = vmatprep.subr.bf16.mxu0 %v6911_v37  ;;  %v5192_v26 = vld [vmem:[%s13700_s1 + $0x1b80] sm:$0xff] }
 0x1ac   : > { %7040 = vmatprep.subr.bf16.mxu1 %v7039_v29  ;;  %v5196_v37 = vld [vmem:[%s13700_s1 + $0x1ba0] sm:$0xff]  ;;  %v5201_v29 = vld [vmem:[%s13700_s1 + $0x1bc8] sm:$0xff]  ;;  %v2302_v32 = vsel %vm2290_vm2, %v2300_v17, %v2301_v19  ;;  %v5271_v17 = vld [vmem:[%s13700_s1 + $0x1df8] sm:$0xff] }
 0x1ad   : > { %v6933_v33 = vpack.c.bf16 %v5196_v37, %v5192_v26  ;;  %v6947_v26 = vpack.c.bf16 %v5229_v13, %v5225_v11  ;;  %v5226_v37 = vld [vmem:[%s13700_s1 + $0x1c90] sm:$0xff] }
 0x1ae   : > { %6914 = vmatpush1.bf16.msra.mxu0 %v6913_v35  ;;  %v7061_v35 = vpack.c.bf16 %v5198_v28, %v5194_v0  ;;  %v5233_v28 = vld [vmem:[%s13700_s1 + $0x1cc8] sm:$0xff]  ;;  %v5262_v13 = vld [vmem:[%s13700_s1 + $0x1db0] sm:$0xff] }
 0x1af   : > { %7042 = vmatpush1.bf16.msra.mxu1 %v7041_v36  ;;  %6916 = vmatprep.subr.bf16.mxu0 %v6915_v38  ;;  %v6935_v36 = vpack.c.bf16 %v5205_v30, %v5201_v29  ;;  %v5204_v38 = vld [vmem:[%s13700_s1 + $0x1be0] sm:$0xff]  ;;  %v5237_v29 = vld [vmem:[%s13700_s1 + $0x1ce8] sm:$0xff]  ;;  %v5235_v30 = vld [vmem:[%s13700_s1 + $0x1cd8] sm:$0xff] }
 0x1b0   : > { %7044 = vmatprep.subr.bf16.mxu1 %v7043_v44  ;;  %v5206_v44 = vld [vmem:[%s13700_s1 + $0x1bf0] sm:$0xff]  ;;  %v6937_v22 = vpack.c.bf16 %v5204_v38, %v5200_v34  ;;  %v5236_v38 = vld [vmem:[%s13700_s1 + $0x1ce0] sm:$0xff] }
 0x1b1   : > { %v7065_v53 = vpack.c.bf16 %v5206_v44, %v5202_v40  ;;  %v5234_v40 = vld [vmem:[%s13700_s1 + $0x1cd0] sm:$0xff]  ;;  %v5241_v44 = vld [vmem:[%s13700_s1 + $0x1d08] sm:$0xff] }
 0x1b2   : > { %6918 = vmatpush1.bf16.msra.mxu0 %v6917_v48  ;;  %v2291_v48 = vrot.slane %v2017_v20, 3  ;;  %v7079_v20 = vpack.c.bf16 %v5239_v31, %v5235_v30  ;;  %v5279_v30 = vld [vmem:[%s13700_s1 + $0x1e38] sm:$0xff] }
 0x1b3   : > { %7046 = vmatpush1.bf16.msra.mxu1 %v7045_v49  ;;  %6920 = vmatprep.subr.bf16.mxu0 %v6919_v50  ;;  %v8026_v49 = vld [vmem:[%s8369_s27 + $0x20] sm:$0xff] }
 0x1b4   : > { %7048 = vmatprep.subr.bf16.mxu1 %v7047_v54  ;;  %v2292_v50 = vrot.slane %v8026_v49, 3  ;;  %v6939_v54 = vpack.c.bf16 %v5213_v46, %v5209_v45  ;;  %v5245_v45 = vld [vmem:[%s13700_s1 + $0x1d28] sm:$0xff]  ;;  %v5243_v46 = vld [vmem:[%s13700_s1 + $0x1d18] sm:$0xff]  ;;  %v5240_v49 = vld [vmem:[%s13700_s1 + $0x1d00] sm:$0xff] }
 0x1b5   : > { %v7083_v52 = vpack.c.bf16 %v5247_v47, %v5243_v46 }
 0x1b6   : > { %6922 = vmatpush1.bf16.msra.mxu0 %v6921_v60  ;;  %v5217_v60 = vld [vmem:[%s13700_s1 + $0x1c48] sm:$0xff]  ;;  %v2293_v4 = vsel %vm2290_vm2, %v2291_v48, %v2292_v50  ;;  %v6955_v48 = vpack.c.bf16 %v5245_v45, %v5241_v44  ;;  %v5283_v44 = vld [vmem:[%s13700_s1 + $0x1e58] sm:$0xff] }
 0x1b7   : > { %7050 = vmatpush1.bf16.msra.mxu1 %v7049_v61  ;;  %6924 = vmatprep.subr.bf16.mxu0 %v6923_v1  ;;  %v5221_v61 = vld [vmem:[%s13700_s1 + $0x1c68] sm:$0xff]  ;;  %v5219_v1 = vld [vmem:[%s13700_s1 + $0x1c58] sm:$0xff] }
 0x1b8   : > { %7052 = vmatprep.subr.bf16.mxu1 %v7051_v42  ;;  %v6941_v42 = vpack.c.bf16 %v5212_v55, %v5208_v51  ;;  %v6943_v39 = vpack.c.bf16 %v5221_v61, %v5217_v60  ;;  %v5242_v51 = vld [vmem:[%s13700_s1 + $0x1d10] sm:$0xff]  ;;  %v5253_v55 = vld [vmem:[%s13700_s1 + $0x1d68] sm:$0xff]  ;;  %v5248_v61 = vld [vmem:[%s13700_s1 + $0x1d40] sm:$0xff] }
 0x1b9   : > { %v5287_v45 = vld [vmem:[%s13700_s1 + $0x1e78] sm:$0xff] }
 0x1ba   : > { %6926 = vmatpush1.bf16.msra.mxu0 %v6925_v7  ;;  %v5220_v7 = vld [vmem:[%s13700_s1 + $0x1c60] sm:$0xff] }
 0x1bb   : > { %7054 = vmatpush1.bf16.msra.mxu1 %v7053_v8  ;;  %6928 = vmatprep.subr.bf16.mxu0 %v6927_v9  ;;  %v5218_v8 = vld [vmem:[%s13700_s1 + $0x1c50] sm:$0xff]  ;;  %v7071_v9 = vpack.c.bf16 %v5223_v2, %v5219_v1  ;;  %v5252_v1 = vld [vmem:[%s13700_s1 + $0x1d60] sm:$0xff] }
 0x1bc   : > { %7056 = vmatprep.subr.bf16.mxu1 %v7055_v14  ;;  %v5227_v14 = vld [vmem:[%s13700_s1 + $0x1c98] sm:$0xff]  ;;  %v5250_v2 = vld [vmem:[%s13700_s1 + $0x1d50] sm:$0xff] }
 0x1bd   : > { %v7075_v0 = vpack.c.bf16 %v5231_v15, %v5227_v14  ;;  %v5265_v14 = vld [vmem:[%s13700_s1 + $0x1dc8] sm:$0xff] }
 0x1be   : > { %6930 = vmatpush1.bf16.msra.mxu0 %v6929_v23  ;;  %v6945_v23 = vpack.c.bf16 %v5220_v7, %v5216_v6  ;;  %v5269_v15 = vld [vmem:[%s13700_s1 + $0x1de8] sm:$0xff] }
 0x1bf   : > { %7058 = vmatpush1.bf16.msra.mxu1 %v7057_v24  ;;  %6932 = vmatprep.subr.bf16.mxu0 %v6931_v25  ;;  %v2304_v24 = vsel %vm2290_vm2, %v2292_v50, %v2303_v43  ;;  %v7073_v25 = vpack.c.bf16 %v5222_v10, %v5218_v8  ;;  %v5244_v50 = vld [vmem:[%s13700_s1 + $0x1d20] sm:$0xff]  ;;  %v5261_v43 = vld [vmem:[%s13700_s1 + $0x1da8] sm:$0xff]  ;;  %v5258_v10 = vld [vmem:[%s13700_s1 + $0x1d90] sm:$0xff] }
 0x1c0   : > { %7060 = vmatprep.subr.bf16.mxu1 %v7059_v27  ;;  %v5230_v27 = vld [vmem:[%s13700_s1 + $0x1cb0] sm:$0xff]  ;;  %v5256_v8 = vld [vmem:[%s13700_s1 + $0x1d80] sm:$0xff] }
 0x1c1   : > { %v7077_v34 = vpack.c.bf16 %v5230_v27, %v5226_v37  ;;  %v5273_v27 = vld [vmem:[%s13700_s1 + $0x1e08] sm:$0xff] }
 0x1c2   : > { %6934 = vmatpush1.bf16.msra.mxu0 %v6933_v33  ;;  %v6949_v33 = vpack.c.bf16 %v5228_v63, %v5224_v62  ;;  %v5268_v62 = vld [vmem:[%s13700_s1 + $0x1de0] sm:$0xff]  ;;  %v5266_v63 = vld [vmem:[%s13700_s1 + $0x1dd0] sm:$0xff] }
 0x1c3   : > { %7062 = vmatpush1.bf16.msra.mxu1 %v7061_v35  ;;  %6936 = vmatprep.subr.bf16.mxu0 %v6935_v36  ;;  %v6951_v35 = vpack.c.bf16 %v5237_v29, %v5233_v28  ;;  %v5232_v36 = vld [vmem:[%s13700_s1 + $0x1cc0] sm:$0xff]  ;;  %v5277_v28 = vld [vmem:[%s13700_s1 + $0x1e28] sm:$0xff]  ;;  %v5275_v29 = vld [vmem:[%s13700_s1 + $0x1e18] sm:$0xff] }
 0x1c4   : > { %7064 = vmatprep.subr.bf16.mxu1 %v7063_v41  ;;  %v5238_v41 = vld [vmem:[%s13700_s1 + $0x1cf0] sm:$0xff]  ;;  %v6953_v21 = vpack.c.bf16 %v5236_v38, %v5232_v36  ;;  %v7099_v38 = vpack.c.bf16 %v5279_v30, %v5275_v29 }
 0x1c5   : > { %v5274_v36 = vld [vmem:[%s13700_s1 + $0x1e10] sm:$0xff] }
 0x1c6   : > { %6938 = vmatpush1.bf16.msra.mxu0 %v6937_v22  ;;  %v7081_v22 = vpack.c.bf16 %v5238_v41, %v5234_v40  ;;  %v5278_v40 = vld [vmem:[%s13700_s1 + $0x1e30] sm:$0xff]  ;;  %v5285_v41 = vld [vmem:[%s13700_s1 + $0x1e68] sm:$0xff] }
 0x1c7   : > { %7066 = vmatpush1.bf16.msra.mxu1 %v7065_v53  ;;  %6940 = vmatprep.subr.bf16.mxu0 %v6939_v54  ;;  %v5246_v53 = vld [vmem:[%s13700_s1 + $0x1d30] sm:$0xff]  ;;  %v5249_v54 = vld [vmem:[%s13700_s1 + $0x1d48] sm:$0xff]  ;;  %v7101_v47 = vpack.c.bf16 %v5278_v40, %v5274_v36 }
 0x1c8   : > { %7068 = vmatprep.subr.bf16.mxu1 %v7067_v58  ;;  %v6957_v58 = vpack.c.bf16 %v5244_v50, %v5240_v49  ;;  %v7085_v59 = vpack.c.bf16 %v5246_v53, %v5242_v51  ;;  %v6959_v60 = vpack.c.bf16 %v5253_v55, %v5249_v54  ;;  %v5282_v49 = vld [vmem:[%s13700_s1 + $0x1e50] sm:$0xff]  ;;  %v7103_v50 = vpack.c.bf16 %v5287_v45, %v5283_v44  ;;  %v5293_v53 = vld [vmem:[%s13700_s1 + $0x1ea8] sm:$0xff]  ;;  %v5291_v54 = vld [vmem:[%s13700_s1 + $0x1e98] sm:$0xff] }
 0x1c9   : > { %2384 = vmatmul.mubr.f32.vlgmr.msra.gmra.mrb[0].mxu0 %v2293_v4  ;;  %v5286_v51 = vld [vmem:[%s13700_s1 + $0x1e70] sm:$0xff]  ;;  %v5295_v55 = vld [vmem:[%s13700_s1 + $0x1eb8] sm:$0xff]  ;;  %v5325_v40 = vld [vmem:[%s13700_s1 + $0x1fa8] sm:$0xff] }
 0x1ca   : > { %6942 = vmatpush1.bf16.msra.mxu0 %v6941_v42  ;;  %2538 = vmatmul.mubr.f32.vlgmr.msra.gmra.mrb[0].mxu1 %v2293_v4  ;;  %v5254_v4 = vld [vmem:[%s13700_s1 + $0x1d70] sm:$0xff]  ;;  %v5257_v42 = vld [vmem:[%s13700_s1 + $0x1d88] sm:$0xff]  ;;  %v7105_v57 = vpack.c.bf16 %v5286_v51, %v5282_v49 }
 0x1cb   : > { %7070 = vmatpush1.bf16.msra.mxu1 %v7069_v12  ;;  %6944 = vmatprep.subr.bf16.mxu0 %v6943_v39  ;;  %v5263_v12 = vld [vmem:[%s13700_s1 + $0x1db8] sm:$0xff]  ;;  %v6961_v39 = vpack.c.bf16 %v5252_v1, %v5248_v61  ;;  %v7089_v6 = vpack.c.bf16 %v5254_v4, %v5250_v2  ;;  %v6963_v7 = vpack.c.bf16 %v5261_v43, %v5257_v42  ;;  %v5290_v61 = vld [vmem:[%s13700_s1 + $0x1e90] sm:$0xff]  ;;  %v5301_v4 = vld [vmem:[%s13700_s1 + $0x1ee8] sm:$0xff] }
 0x1cc   : > { %7072 = vmatprep.subr.bf16.mxu1 %v7071_v9  ;;  %2389 = vmatprep.mubr.f32.mxu0 %v2306_v16  ;;  %v5260_v9 = vld [vmem:[%s13700_s1 + $0x1da0] sm:$0xff]  ;;  %v7091_v11 = vpack.c.bf16 %v5263_v12, %v5259_v5  ;;  %v7107_v1 = vpack.c.bf16 %v5295_v55, %v5291_v54  ;;  %v5294_v2 = vld [vmem:[%s13700_s1 + $0x1eb0] sm:$0xff]  ;;  %v5299_v42 = vld [vmem:[%s13700_s1 + $0x1ed8] sm:$0xff] }
 0x1cd   : > { %2543 = vmatprep.mubr.f32.mxu1 %v2306_v16  ;;  %2390 = vmatmul.mubr.f32.gmra.mrb[2].mxu0 %v2304_v24  ;;  %v5267_v16 = vld [vmem:[%s13700_s1 + $0x1dd8] sm:$0xff]  ;;  %v7109_v12 = vpack.c.bf16 %v5294_v2, %v5290_v61  ;;  %v5318_v36 = vld [vmem:[%s13700_s1 + $0x1f70] sm:$0xff]  ;;  %v5333_v51 = vld [vmem:[%s13700_s1 + $0x1fe8] sm:$0xff] }
 0x1ce   : > { %6946 = vmatpush1.bf16.msra.mxu0 %v6945_v23  ;;  %2544 = vmatmul.mubr.f32.gmra.mrb[2].mxu1 %v2304_v24  ;;  %v6965_v23 = vpack.c.bf16 %v5260_v9, %v5256_v8  ;;  %v7093_v24 = vpack.c.bf16 %v5262_v13, %v5258_v10  ;;  %v7095_v37 = vpack.c.bf16 %v5271_v17, %v5267_v16  ;;  %v5303_v43 = vld [vmem:[%s13700_s1 + $0x1ef8] sm:$0xff]  ;;  %v5298_v8 = vld [vmem:[%s13700_s1 + $0x1ed0] sm:$0xff]  ;;  %v5309_v13 = vld [vmem:[%s13700_s1 + $0x1f28] sm:$0xff] }
 0x1cf   : > { %7074 = vmatpush1.bf16.msra.mxu1 %v7073_v25  ;;  %6948 = vmatprep.subr.bf16.mxu0 %v6947_v26  ;;  %v6967_v25 = vpack.c.bf16 %v5269_v15, %v5265_v14  ;;  %v5264_v26 = vld [vmem:[%s13700_s1 + $0x1dc0] sm:$0xff]  ;;  %v7111_v9 = vpack.c.bf16 %v5303_v43, %v5299_v42  ;;  %v5302_v10 = vld [vmem:[%s13700_s1 + $0x1ef0] sm:$0xff]  ;;  %v5307_v14 = vld [vmem:[%s13700_s1 + $0x1f18] sm:$0xff] }
 0x1d0   : > { %7076 = vmatprep.subr.bf16.mxu1 %v7075_v0  ;;  %2460 = vmatprep.mubr.f32.mxu0 %v2302_v32  ;;  %v5270_v0 = vld [vmem:[%s13700_s1 + $0x1df0] sm:$0xff]  ;;  %v6969_v31 = vpack.c.bf16 %v5268_v62, %v5264_v26  ;;  %v5311_v15 = vld [vmem:[%s13700_s1 + $0x1f38] sm:$0xff]  ;;  %v7113_v17 = vpack.c.bf16 %v5302_v10, %v5298_v8  ;;  %v5328_v55 = vld [vmem:[%s13700_s1 + $0x1fc0] sm:$0xff] }
 0x1d1   : > { %2614 = vmatprep.mubr.f32.mxu1 %v2302_v32  ;;  %v7097_v32 = vpack.c.bf16 %v5270_v0, %v5266_v63  ;;  %v5306_v26 = vld [vmem:[%s13700_s1 + $0x1f10] sm:$0xff]  ;;  %v7115_v62 = vpack.c.bf16 %v5311_v15, %v5307_v14  ;;  %v5317_v0 = vld [vmem:[%s13700_s1 + $0x1f68] sm:$0xff]  ;;  %v5343_v42 = vld [vmem:[%s13700_s1 + $0x2038] sm:$0xff] }
 0x1d2   : > { %6950 = vmatpush1.bf16.msra.mxu0 %v6949_v33  ;;  %v6971_v33 = vpack.c.bf16 %v5277_v28, %v5273_v27  ;;  %v5310_v63 = vld [vmem:[%s13700_s1 + $0x1f30] sm:$0xff]  ;;  %v5315_v27 = vld [vmem:[%s13700_s1 + $0x1f58] sm:$0xff]  ;;  %v5337_v2 = vld [vmem:[%s13700_s1 + $0x2008] sm:$0xff] }
 0x1d3   : > { %7078 = vmatpush1.bf16.msra.mxu1 %v7077_v34  ;;  %6952 = vmatprep.subr.bf16.mxu0 %v6951_v35  ;;  %v5272_v34 = vld [vmem:[%s13700_s1 + $0x1e00] sm:$0xff]  ;;  %v5319_v28 = vld [vmem:[%s13700_s1 + $0x1f78] sm:$0xff]  ;;  %v7117_v30 = vpack.c.bf16 %v5310_v63, %v5306_v26  ;;  %v5326_v49 = vld [vmem:[%s13700_s1 + $0x1fb0] sm:$0xff] }
 0x1d4   : > { %7080 = vmatprep.subr.bf16.mxu1 %v7079_v20  ;;  %v5276_v35 = vld [vmem:[%s13700_s1 + $0x1e20] sm:$0xff]  ;;  %v5281_v20 = vld [vmem:[%s13700_s1 + $0x1e48] sm:$0xff]  ;;  %v5342_v15 = vld [vmem:[%s13700_s1 + $0x2030] sm:$0xff] }
 0x1d5   : > { %v6973_v46 = vpack.c.bf16 %v5276_v35, %v5272_v34  ;;  %v5314_v34 = vld [vmem:[%s13700_s1 + $0x1f50] sm:$0xff]  ;;  %v7119_v35 = vpack.c.bf16 %v5319_v28, %v5315_v27  ;;  %v5340_v10 = vld [vmem:[%s13700_s1 + $0x2020] sm:$0xff] }
 0x1d6   : > { %6954 = vmatpush1.bf16.msra.mxu0 %v6953_v21  ;;  %v6975_v21 = vpack.c.bf16 %v5285_v41, %v5281_v20  ;;  %v5323_v20 = vld [vmem:[%s13700_s1 + $0x1f98] sm:$0xff]  ;;  %v7121_v45 = vpack.c.bf16 %v5318_v36, %v5314_v34  ;;  %v5344_v28 = vld [vmem:[%s13700_s1 + $0x2040] sm:$0xff]  ;;  %v5357_v34 = vld [vmem:[%s13700_s1 + $0x20a8] sm:$0xff] }
 0x1d7   : > { %7082 = vmatpush1.bf16.msra.mxu1 %v7081_v22  ;;  %6956 = vmatprep.subr.bf16.mxu0 %v6955_v48  ;;  %v5280_v22 = vld [vmem:[%s13700_s1 + $0x1e40] sm:$0xff]  ;;  %v5327_v41 = vld [vmem:[%s13700_s1 + $0x1fb8] sm:$0xff] }
 0x1d8   : > { %7084 = vmatprep.subr.bf16.mxu1 %v7083_v52  ;;  %v5284_v48 = vld [vmem:[%s13700_s1 + $0x1e60] sm:$0xff]  ;;  %v5289_v52 = vld [vmem:[%s13700_s1 + $0x1e88] sm:$0xff]  ;;  %v5359_v36 = vld [vmem:[%s13700_s1 + $0x20b8] sm:$0xff] }
 0x1d9   : > { %v6977_v56 = vpack.c.bf16 %v5284_v48, %v5280_v22  ;;  %v5322_v22 = vld [vmem:[%s13700_s1 + $0x1f90] sm:$0xff]  ;;  %v7123_v48 = vpack.c.bf16 %v5327_v41, %v5323_v20  ;;  %v11344_v20 = vld [vmem:[%s8369_s27 + $0x28] sm:$0xff] }
 0x1da   : > { %6958 = vmatpush1.bf16.msra.mxu0 %v6957_v58  ;;  %v6979_v58 = vpack.c.bf16 %v5293_v53, %v5289_v52  ;;  %v5331_v52 = vld [vmem:[%s13700_s1 + $0x1fd8] sm:$0xff]  ;;  %v2913_v41 = vrot.slane %v11344_v20, 4  ;;  %v5480_v20 = vld [vmem:[%s13700_s1 + $0x2480] sm:$0xff] }
 0x1db   : > { %7086 = vmatpush1.bf16.msra.mxu1 %v7085_v59  ;;  %6960 = vmatprep.subr.bf16.mxu0 %v6959_v60  ;;  %v5288_v59 = vld [vmem:[%s13700_s1 + $0x1e80] sm:$0xff]  ;;  %v5335_v53 = vld [vmem:[%s13700_s1 + $0x1ff8] sm:$0xff] }
 0x1dc   : > { %7088 = vmatprep.subr.bf16.mxu1 %v7087_v3  ;;  %v5292_v60 = vld [vmem:[%s13700_s1 + $0x1ea0] sm:$0xff]  ;;  %v5297_v3 = vld [vmem:[%s13700_s1 + $0x1ec8] sm:$0xff]  ;;  %v7127_v61 = vpack.c.bf16 %v5335_v53, %v5331_v52  ;;  %v5367_v52 = vld [vmem:[%s13700_s1 + $0x20f8] sm:$0xff] }
 0x1dd   : > { %v6981_v5 = vpack.c.bf16 %v5292_v60, %v5288_v59  ;;  %v5330_v59 = vld [vmem:[%s13700_s1 + $0x1fd0] sm:$0xff] }
 0x1de   : > { %6962 = vmatpush1.bf16.msra.mxu0 %v6961_v39  ;;  %v6983_v39 = vpack.c.bf16 %v5301_v4, %v5297_v3  ;;  %v2019_v60 = vld [vmem:[%s8369_s27 + $0x10] sm:$0xf8]  ;;  %v5341_v3 = vld [vmem:[%s13700_s1 + $0x2028] sm:$0xff]  ;;  %v5339_v4 = vld [vmem:[%s13700_s1 + $0x2018] sm:$0xff] }
 0x1df   : > { %7090 = vmatpush1.bf16.msra.mxu1 %v7089_v6  ;;  %6964 = vmatprep.subr.bf16.mxu0 %v6963_v7  ;;  %v5296_v6 = vld [vmem:[%s13700_s1 + $0x1ec0] sm:$0xff]  ;;  %v7259_v14 = vpack.c.bf16 %v5343_v42, %v5339_v4  ;;  %v5375_v4 = vld [vmem:[%s13700_s1 + $0x2138] sm:$0xff] }
 0x1e0   : > { %7092 = vmatprep.subr.bf16.mxu1 %v7091_v11  ;;  %v5300_v7 = vld [vmem:[%s13700_s1 + $0x1ee0] sm:$0xff]  ;;  %v5305_v11 = vld [vmem:[%s13700_s1 + $0x1f08] sm:$0xff] }
 0x1e1   : > { %v6985_v16 = vpack.c.bf16 %v5300_v7, %v5296_v6  ;;  %v5336_v6 = vld [vmem:[%s13700_s1 + $0x2000] sm:$0xff]  ;;  %v2024_v7 = vld [vmem:[%s8369_s27 + $0x58] sm:$0x7] }
 0x1e2   : > { %6966 = vmatpush1.bf16.msra.mxu0 %v6965_v23  ;;  %v6987_v23 = vpack.c.bf16 %v5309_v13, %v5305_v11  ;;  %v5338_v11 = vld [vmem:[%s13700_s1 + $0x2010] sm:$0xff] }
 0x1e3   : > { %7094 = vmatpush1.bf16.msra.mxu1 %v7093_v24  ;;  %6968 = vmatprep.subr.bf16.mxu0 %v6967_v25  ;;  %v5304_v24 = vld [vmem:[%s13700_s1 + $0x1f00] sm:$0xff]  ;;  %v2023_v13 = vld [vmem:[%s8369_s27 + $0x50] sm:$0x7] }
 0x1e4   : > { %7096 = vmatprep.subr.bf16.mxu1 %v7095_v37  ;;  %v5308_v25 = vld [vmem:[%s13700_s1 + $0x1f20] sm:$0xff]  ;;  %v5313_v37 = vld [vmem:[%s13700_s1 + $0x1f48] sm:$0xff]  ;;  %v2307_v63 = vrot.slane %v2023_v13, 3  ;;  %v5383_v13 = vld [vmem:[%s13700_s1 + $0x2178] sm:$0xff] }
 0x1e5   : > { %v6989_v29 = vpack.c.bf16 %v5308_v25, %v5304_v24  ;;  %v5351_v24 = vld [vmem:[%s13700_s1 + $0x2078] sm:$0xff]  ;;  %v2309_v25 = vrot.slane %v2024_v7, 3 }
 0x1e6   : > { %6970 = vmatpush1.bf16.msra.mxu0 %v6969_v31  ;;  %v6991_v31 = vpack.c.bf16 %v5317_v0, %v5313_v37  ;;  %v2636_v37 = vld [vmem:[%s8369_s27 + $0x8] sm:$0xf0]  ;;  %v7261_v0 = vpack.c.bf16 %v5342_v15, %v5338_v11  ;;  %v5379_v11 = vld [vmem:[%s13700_s1 + $0x2158] sm:$0xff] }
 0x1e7   : > { %7098 = vmatpush1.bf16.msra.mxu1 %v7097_v32  ;;  %6972 = vmatprep.subr.bf16.mxu0 %v6971_v33  ;;  %v5312_v32 = vld [vmem:[%s13700_s1 + $0x1f40] sm:$0xff] }
 0x1e8   : > { %7100 = vmatprep.subr.bf16.mxu1 %v7099_v38  ;;  %v5316_v33 = vld [vmem:[%s13700_s1 + $0x1f60] sm:$0xff]  ;;  %v5321_v38 = vld [vmem:[%s13700_s1 + $0x1f88] sm:$0xff] }
 0x1e9   : > { %v6993_v44 = vpack.c.bf16 %v5316_v33, %v5312_v32  ;;  %v5350_v32 = vld [vmem:[%s13700_s1 + $0x2070] sm:$0xff]  ;;  %v5353_v33 = vld [vmem:[%s13700_s1 + $0x2088] sm:$0xff] }
 0x1ea   : > { %6974 = vmatpush1.bf16.msra.mxu0 %v6973_v46  ;;  %v6995_v46 = vpack.c.bf16 %v5325_v40, %v5321_v38  ;;  %v2310_v38 = vsel %vm2290_vm2, %v2301_v19, %v2309_v25  ;;  %v2912_v40 = vrot.slane %v2636_v37, 4  ;;  %v5356_v19 = vld [vmem:[%s13700_s1 + $0x20a0] sm:$0xff]  ;;  %v7279_v25 = vpack.c.bf16 %v5383_v13, %v5379_v11  ;;  %v5387_v37 = vld [vmem:[%s13700_s1 + $0x2198] sm:$0xff] }
 0x1eb   : > { %7102 = vmatpush1.bf16.msra.mxu1 %v7101_v47  ;;  %6976 = vmatprep.subr.bf16.mxu0 %v6975_v21  ;;  %v5320_v47 = vld [vmem:[%s13700_s1 + $0x1f80] sm:$0xff] }
 0x1ec   : > { %7104 = vmatprep.subr.bf16.mxu1 %v7103_v50  ;;  %v5324_v21 = vld [vmem:[%s13700_s1 + $0x1fa0] sm:$0xff]  ;;  %v5329_v50 = vld [vmem:[%s13700_s1 + $0x1fc8] sm:$0xff]  ;;  %v2914_v53 = vsel %vm2908_vm3, %v2912_v40, %v2913_v41  ;;  %v5399_v40 = vld [vmem:[%s13700_s1 + $0x21f8] sm:$0xff] }
 0x1ed   : > { %v6997_v54 = vpack.c.bf16 %v5324_v21, %v5320_v47  ;;  %v7139_v47 = vpack.c.bf16 %v5357_v34, %v5353_v33  ;;  %v5354_v21 = vld [vmem:[%s13700_s1 + $0x2090] sm:$0xff] }
 0x1ee   : > { %6978 = vmatpush1.bf16.msra.mxu0 %v6977_v56  ;;  %v7125_v56 = vpack.c.bf16 %v5326_v49, %v5322_v22  ;;  %v5361_v49 = vld [vmem:[%s13700_s1 + $0x20c8] sm:$0xff]  ;;  %v5390_v34 = vld [vmem:[%s13700_s1 + $0x21b0] sm:$0xff] }
 0x1ef   : > { %7106 = vmatpush1.bf16.msra.mxu1 %v7105_v57  ;;  %6980 = vmatprep.subr.bf16.mxu0 %v6979_v58  ;;  %v6999_v57 = vpack.c.bf16 %v5333_v51, %v5329_v50  ;;  %v5332_v58 = vld [vmem:[%s13700_s1 + $0x1fe0] sm:$0xff]  ;;  %v5365_v50 = vld [vmem:[%s13700_s1 + $0x20e8] sm:$0xff]  ;;  %v5363_v51 = vld [vmem:[%s13700_s1 + $0x20d8] sm:$0xff] }
 0x1f0   : > { %7108 = vmatprep.subr.bf16.mxu1 %v7107_v1  ;;  %v5334_v1 = vld [vmem:[%s13700_s1 + $0x1ff0] sm:$0xff]  ;;  %v7001_v43 = vpack.c.bf16 %v5332_v58, %v5328_v55  ;;  %v5364_v58 = vld [vmem:[%s13700_s1 + $0x20e0] sm:$0xff] }
 0x1f1   : > { %v7129_v8 = vpack.c.bf16 %v5334_v1, %v5330_v59  ;;  %v5362_v59 = vld [vmem:[%s13700_s1 + $0x20d0] sm:$0xff]  ;;  %v5369_v1 = vld [vmem:[%s13700_s1 + $0x2108] sm:$0xff] }
 0x1f2   : > { %6982 = vmatpush1.bf16.msra.mxu0 %v6981_v5  ;;  %v2297_v5 = vrot.slane %v2019_v60, 3  ;;  %v7271_v60 = vpack.c.bf16 %v5367_v52, %v5363_v51  ;;  %v5407_v51 = vld [vmem:[%s13700_s1 + $0x2238] sm:$0xff] }
 0x1f3   : > { %7110 = vmatpush1.bf16.msra.mxu1 %v7109_v12  ;;  %6984 = vmatprep.subr.bf16.mxu0 %v6983_v39  ;;  %v8028_v12 = vld [vmem:[%s8369_s27 + $0x30] sm:$0xff] }
 0x1f4   : > { %7112 = vmatprep.subr.bf16.mxu1 %v7111_v9  ;;  %v2298_v39 = vrot.slane %v8028_v12, 3  ;;  %v7131_v9 = vpack.c.bf16 %v5341_v3, %v5337_v2  ;;  %v5373_v2 = vld [vmem:[%s13700_s1 + $0x2128] sm:$0xff]  ;;  %v5371_v3 = vld [vmem:[%s13700_s1 + $0x2118] sm:$0xff]  ;;  %v5368_v12 = vld [vmem:[%s13700_s1 + $0x2100] sm:$0xff] }
 0x1f5   : > { %v7275_v7 = vpack.c.bf16 %v5375_v4, %v5371_v3 }
 0x1f6   : > { %6986 = vmatpush1.bf16.msra.mxu0 %v6985_v16  ;;  %v5345_v16 = vld [vmem:[%s13700_s1 + $0x2048] sm:$0xff]  ;;  %v2299_v26 = vsel %vm2290_vm2, %v2297_v5, %v2298_v39  ;;  %v7147_v5 = vpack.c.bf16 %v5373_v2, %v5369_v1  ;;  %v5411_v1 = vld [vmem:[%s13700_s1 + $0x2258] sm:$0xff] }
 0x1f7   : > { %7114 = vmatpush1.bf16.msra.mxu1 %v7113_v17  ;;  %6988 = vmatprep.subr.bf16.mxu0 %v6987_v23  ;;  %v5349_v17 = vld [vmem:[%s13700_s1 + $0x2068] sm:$0xff]  ;;  %v5347_v23 = vld [vmem:[%s13700_s1 + $0x2058] sm:$0xff] }
 0x1f8   : > { %7116 = vmatprep.subr.bf16.mxu1 %v7115_v62  ;;  %v7133_v62 = vpack.c.bf16 %v5340_v10, %v5336_v6  ;;  %v7135_v27 = vpack.c.bf16 %v5349_v17, %v5345_v16  ;;  %v5370_v6 = vld [vmem:[%s13700_s1 + $0x2110] sm:$0xff]  ;;  %v5381_v10 = vld [vmem:[%s13700_s1 + $0x2168] sm:$0xff]  ;;  %v5376_v17 = vld [vmem:[%s13700_s1 + $0x2140] sm:$0xff] }
 0x1f9   : > { %v5415_v2 = vld [vmem:[%s13700_s1 + $0x2278] sm:$0xff] }
 0x1fa   : > { %6990 = vmatpush1.bf16.msra.mxu0 %v6989_v29  ;;  %v5348_v29 = vld [vmem:[%s13700_s1 + $0x2060] sm:$0xff] }
 0x1fb   : > { %7118 = vmatpush1.bf16.msra.mxu1 %v7117_v30  ;;  %6992 = vmatprep.subr.bf16.mxu0 %v6991_v31  ;;  %v5346_v30 = vld [vmem:[%s13700_s1 + $0x2050] sm:$0xff]  ;;  %v7263_v31 = vpack.c.bf16 %v5351_v24, %v5347_v23  ;;  %v5380_v23 = vld [vmem:[%s13700_s1 + $0x2160] sm:$0xff] }
 0x1fc   : > { %7120 = vmatprep.subr.bf16.mxu1 %v7119_v35  ;;  %v5355_v35 = vld [vmem:[%s13700_s1 + $0x2098] sm:$0xff]  ;;  %v5378_v24 = vld [vmem:[%s13700_s1 + $0x2150] sm:$0xff] }
 0x1fd   : > { %v7267_v22 = vpack.c.bf16 %v5359_v36, %v5355_v35  ;;  %v5393_v35 = vld [vmem:[%s13700_s1 + $0x21c8] sm:$0xff] }
 0x1fe   : > { %6994 = vmatpush1.bf16.msra.mxu0 %v6993_v44  ;;  %v7137_v44 = vpack.c.bf16 %v5348_v29, %v5344_v28  ;;  %v5397_v36 = vld [vmem:[%s13700_s1 + $0x21e8] sm:$0xff] }
 0x1ff   : > { %7122 = vmatpush1.bf16.msra.mxu1 %v7121_v45  ;;  %6996 = vmatprep.subr.bf16.mxu0 %v6995_v46  ;;  %v2308_v45 = vsel %vm2290_vm2, %v2298_v39, %v2307_v63  ;;  %v7265_v46 = vpack.c.bf16 %v5350_v32, %v5346_v30  ;;  %v5372_v39 = vld [vmem:[%s13700_s1 + $0x2120] sm:$0xff]  ;;  %v5389_v63 = vld [vmem:[%s13700_s1 + $0x21a8] sm:$0xff]  ;;  %v5386_v32 = vld [vmem:[%s13700_s1 + $0x2190] sm:$0xff] }
 0x200   : > { %7124 = vmatprep.subr.bf16.mxu1 %v7123_v48  ;;  %v5358_v48 = vld [vmem:[%s13700_s1 + $0x20b0] sm:$0xff]  ;;  %v5384_v30 = vld [vmem:[%s13700_s1 + $0x2180] sm:$0xff] }
 0x201   : > { %v7269_v55 = vpack.c.bf16 %v5358_v48, %v5354_v21  ;;  %v5401_v48 = vld [vmem:[%s13700_s1 + $0x2208] sm:$0xff] }
 0x202   : > { %6998 = vmatpush1.bf16.msra.mxu0 %v6997_v54  ;;  %v7141_v54 = vpack.c.bf16 %v5356_v19, %v5352_v18  ;;  %v5396_v18 = vld [vmem:[%s13700_s1 + $0x21e0] sm:$0xff]  ;;  %v5394_v19 = vld [vmem:[%s13700_s1 + $0x21d0] sm:$0xff] }
 0x203   : > { %7126 = vmatpush1.bf16.msra.mxu1 %v7125_v56  ;;  %7000 = vmatprep.subr.bf16.mxu0 %v6999_v57  ;;  %v7143_v56 = vpack.c.bf16 %v5365_v50, %v5361_v49  ;;  %v5360_v57 = vld [vmem:[%s13700_s1 + $0x20c0] sm:$0xff]  ;;  %v5405_v49 = vld [vmem:[%s13700_s1 + $0x2228] sm:$0xff]  ;;  %v5403_v50 = vld [vmem:[%s13700_s1 + $0x2218] sm:$0xff] }
 0x204   : > { %7128 = vmatprep.subr.bf16.mxu1 %v7127_v61  ;;  %v5366_v61 = vld [vmem:[%s13700_s1 + $0x20f0] sm:$0xff]  ;;  %v7145_v42 = vpack.c.bf16 %v5364_v58, %v5360_v57  ;;  %v7291_v58 = vpack.c.bf16 %v5407_v51, %v5403_v50 }
 0x205   : > { %v5402_v57 = vld [vmem:[%s13700_s1 + $0x2210] sm:$0xff] }
 0x206   : > { %7002 = vmatpush1.bf16.msra.mxu0 %v7001_v43  ;;  %v7273_v43 = vpack.c.bf16 %v5366_v61, %v5362_v59  ;;  %v5406_v59 = vld [vmem:[%s13700_s1 + $0x2230] sm:$0xff]  ;;  %v5413_v61 = vld [vmem:[%s13700_s1 + $0x2268] sm:$0xff] }
 0x207   : > { %7130 = vmatpush1.bf16.msra.mxu1 %v7129_v8  ;;  %7132 = vmatprep.subr.bf16.mxu0 %v7131_v9  ;;  %v5374_v8 = vld [vmem:[%s13700_s1 + $0x2130] sm:$0xff]  ;;  %v5377_v9 = vld [vmem:[%s13700_s1 + $0x2148] sm:$0xff]  ;;  %v7293_v4 = vpack.c.bf16 %v5406_v59, %v5402_v57 }
 0x208   : > { %7260 = vmatprep.subr.bf16.mxu1 %v7259_v14  ;;  %v7149_v14 = vpack.c.bf16 %v5372_v39, %v5368_v12  ;;  %v7277_v15 = vpack.c.bf16 %v5374_v8, %v5370_v6  ;;  %v7151_v16 = vpack.c.bf16 %v5381_v10, %v5377_v9  ;;  %v5410_v12 = vld [vmem:[%s13700_s1 + $0x2250] sm:$0xff]  ;;  %v7295_v39 = vpack.c.bf16 %v5415_v2, %v5411_v1  ;;  %v5421_v8 = vld [vmem:[%s13700_s1 + $0x22a8] sm:$0xff]  ;;  %v5419_v9 = vld [vmem:[%s13700_s1 + $0x2298] sm:$0xff] }
 0x209   : > { %2461 = vmatmul.mubr.f32.vlgmr.msra.gmra.mrb[0].mxu0 %v2299_v26  ;;  %v5414_v6 = vld [vmem:[%s13700_s1 + $0x2270] sm:$0xff]  ;;  %v5423_v10 = vld [vmem:[%s13700_s1 + $0x22b8] sm:$0xff]  ;;  %v5453_v59 = vld [vmem:[%s13700_s1 + $0x23a8] sm:$0xff] }
 0x20a   : > { %2615 = vmatmul.mubr.f32.vlgmr.msra.gmra.mrb[0].mxu1 %v2299_v26  ;;  %7134 = vmatpush1.bf16.msra.mxu0 %v7133_v62  ;;  %v5382_v26 = vld [vmem:[%s13700_s1 + $0x2170] sm:$0xff]  ;;  %v5385_v62 = vld [vmem:[%s13700_s1 + $0x2188] sm:$0xff]  ;;  %v7297_v13 = vpack.c.bf16 %v5414_v6, %v5410_v12 }
 0x20b   : > { %7262 = vmatpush1.bf16.msra.mxu1 %v7261_v0  ;;  %7136 = vmatprep.subr.bf16.mxu0 %v7135_v27  ;;  %v5391_v0 = vld [vmem:[%s13700_s1 + $0x21b8] sm:$0xff]  ;;  %v7153_v27 = vpack.c.bf16 %v5380_v23, %v5376_v17  ;;  %v7281_v28 = vpack.c.bf16 %v5382_v26, %v5378_v24  ;;  %v7155_v29 = vpack.c.bf16 %v5389_v63, %v5385_v62  ;;  %v5418_v17 = vld [vmem:[%s13700_s1 + $0x2290] sm:$0xff]  ;;  %v5429_v26 = vld [vmem:[%s13700_s1 + $0x22e8] sm:$0xff] }
 0x20c   : > { %7264 = vmatprep.subr.bf16.mxu1 %v7263_v31  ;;  %2466 = vmatprep.mubr.f32.mxu0 %v2310_v38  ;;  %v5388_v31 = vld [vmem:[%s13700_s1 + $0x21a0] sm:$0xff]  ;;  %v7283_v33 = vpack.c.bf16 %v5391_v0, %v5387_v37  ;;  %v7299_v23 = vpack.c.bf16 %v5423_v10, %v5419_v9  ;;  %v5422_v24 = vld [vmem:[%s13700_s1 + $0x22b0] sm:$0xff]  ;;  %v5427_v62 = vld [vmem:[%s13700_s1 + $0x22d8] sm:$0xff] }
 0x20d   : > { %2620 = vmatprep.mubr.f32.mxu1 %v2310_v38  ;;  %2467 = vmatmul.mubr.f32.gmra.mrb[2].mxu0 %v2308_v45  ;;  %v5395_v38 = vld [vmem:[%s13700_s1 + $0x21d8] sm:$0xff]  ;;  %v7301_v0 = vpack.c.bf16 %v5422_v24, %v5418_v17  ;;  %v5446_v57 = vld [vmem:[%s13700_s1 + $0x2370] sm:$0xff]  ;;  %v5461_v6 = vld [vmem:[%s13700_s1 + $0x23e8] sm:$0xff] }
 0x20e   : > { %7138 = vmatpush1.bf16.msra.mxu0 %v7137_v44  ;;  %2621 = vmatmul.mubr.f32.gmra.mrb[2].mxu1 %v2308_v45  ;;  %v7157_v44 = vpack.c.bf16 %v5388_v31, %v5384_v30  ;;  %v7285_v45 = vpack.c.bf16 %v5390_v34, %v5386_v32  ;;  %v7287_v21 = vpack.c.bf16 %v5399_v40, %v5395_v38  ;;  %v5431_v63 = vld [vmem:[%s13700_s1 + $0x22f8] sm:$0xff]  ;;  %v5426_v30 = vld [vmem:[%s13700_s1 + $0x22d0] sm:$0xff]  ;;  %v5437_v34 = vld [vmem:[%s13700_s1 + $0x2328] sm:$0xff] }
 0x20f   : > { %7266 = vmatpush1.bf16.msra.mxu1 %v7265_v46  ;;  %7140 = vmatprep.subr.bf16.mxu0 %v7139_v47  ;;  %v7159_v46 = vpack.c.bf16 %v5397_v36, %v5393_v35  ;;  %v5392_v47 = vld [vmem:[%s13700_s1 + $0x21c0] sm:$0xff]  ;;  %v7303_v31 = vpack.c.bf16 %v5431_v63, %v5427_v62  ;;  %v5430_v32 = vld [vmem:[%s13700_s1 + $0x22f0] sm:$0xff]  ;;  %v5435_v35 = vld [vmem:[%s13700_s1 + $0x2318] sm:$0xff] }
 0x210   : > { %7268 = vmatprep.subr.bf16.mxu1 %v7267_v22  ;;  %3001 = vmatprep.mubr.f32.mxu0 %v2914_v53  ;;  %v5398_v22 = vld [vmem:[%s13700_s1 + $0x21f0] sm:$0xff]  ;;  %v7161_v52 = vpack.c.bf16 %v5396_v18, %v5392_v47  ;;  %v5439_v36 = vld [vmem:[%s13700_s1 + $0x2338] sm:$0xff]  ;;  %v7305_v40 = vpack.c.bf16 %v5430_v32, %v5426_v30  ;;  %v5456_v10 = vld [vmem:[%s13700_s1 + $0x23c0] sm:$0xff] }
 0x211   : > { %3155 = vmatprep.mubr.f32.mxu1 %v2914_v53  ;;  %v7289_v53 = vpack.c.bf16 %v5398_v22, %v5394_v19  ;;  %v5434_v47 = vld [vmem:[%s13700_s1 + $0x2310] sm:$0xff]  ;;  %v7307_v18 = vpack.c.bf16 %v5439_v36, %v5435_v35  ;;  %v5445_v22 = vld [vmem:[%s13700_s1 + $0x2368] sm:$0xff]  ;;  %v5471_v62 = vld [vmem:[%s13700_s1 + $0x2438] sm:$0xff] }
 0x212   : > { %7142 = vmatpush1.bf16.msra.mxu0 %v7141_v54  ;;  %v7163_v54 = vpack.c.bf16 %v5405_v49, %v5401_v48  ;;  %v5438_v19 = vld [vmem:[%s13700_s1 + $0x2330] sm:$0xff]  ;;  %v5443_v48 = vld [vmem:[%s13700_s1 + $0x2358] sm:$0xff]  ;;  %v5465_v24 = vld [vmem:[%s13700_s1 + $0x2408] sm:$0xff] }
 0x213   : > { %7270 = vmatpush1.bf16.msra.mxu1 %v7269_v55  ;;  %7144 = vmatprep.subr.bf16.mxu0 %v7143_v56  ;;  %v5400_v55 = vld [vmem:[%s13700_s1 + $0x2200] sm:$0xff]  ;;  %v5447_v49 = vld [vmem:[%s13700_s1 + $0x2378] sm:$0xff]  ;;  %v7309_v51 = vpack.c.bf16 %v5438_v19, %v5434_v47  ;;  %v5454_v12 = vld [vmem:[%s13700_s1 + $0x23b0] sm:$0xff] }
 0x214   : > { %7272 = vmatprep.subr.bf16.mxu1 %v7271_v60  ;;  %v5404_v56 = vld [vmem:[%s13700_s1 + $0x2220] sm:$0xff]  ;;  %v5409_v60 = vld [vmem:[%s13700_s1 + $0x2248] sm:$0xff]  ;;  %v5470_v36 = vld [vmem:[%s13700_s1 + $0x2430] sm:$0xff] }
 0x215   : > { %v7165_v3 = vpack.c.bf16 %v5404_v56, %v5400_v55  ;;  %v5442_v55 = vld [vmem:[%s13700_s1 + $0x2350] sm:$0xff]  ;;  %v7311_v56 = vpack.c.bf16 %v5447_v49, %v5443_v48  ;;  %v5468_v32 = vld [vmem:[%s13700_s1 + $0x2420] sm:$0xff] }
 0x216   : > { %7146 = vmatpush1.bf16.msra.mxu0 %v7145_v42  ;;  %v7167_v42 = vpack.c.bf16 %v5413_v61, %v5409_v60  ;;  %v5451_v60 = vld [vmem:[%s13700_s1 + $0x2398] sm:$0xff]  ;;  %v7313_v2 = vpack.c.bf16 %v5446_v57, %v5442_v55  ;;  %v5472_v49 = vld [vmem:[%s13700_s1 + $0x2440] sm:$0xff]  ;;  %v5485_v55 = vld [vmem:[%s13700_s1 + $0x24a8] sm:$0xff] }
 0x217   : > { %7274 = vmatpush1.bf16.msra.mxu1 %v7273_v43  ;;  %7148 = vmatprep.subr.bf16.mxu0 %v7147_v5  ;;  %v5408_v43 = vld [vmem:[%s13700_s1 + $0x2240] sm:$0xff]  ;;  %v5455_v61 = vld [vmem:[%s13700_s1 + $0x23b8] sm:$0xff] }
 0x218   : > { %7276 = vmatprep.subr.bf16.mxu1 %v7275_v7  ;;  %v5412_v5 = vld [vmem:[%s13700_s1 + $0x2260] sm:$0xff]  ;;  %v5417_v7 = vld [vmem:[%s13700_s1 + $0x2288] sm:$0xff]  ;;  %v5487_v57 = vld [vmem:[%s13700_s1 + $0x24b8] sm:$0xff] }
 0x219   : > { %v7169_v11 = vpack.c.bf16 %v5412_v5, %v5408_v43  ;;  %v5450_v43 = vld [vmem:[%s13700_s1 + $0x2390] sm:$0xff]  ;;  %v7315_v5 = vpack.c.bf16 %v5455_v61, %v5451_v60  ;;  %v11745_v60 = vld [vmem:[%s8369_s27 + $0x38] sm:$0xff] }
 0x21a   : > { %7150 = vmatpush1.bf16.msra.mxu0 %v7149_v14  ;;  %v7171_v14 = vpack.c.bf16 %v5421_v8, %v5417_v7  ;;  %v5459_v7 = vld [vmem:[%s13700_s1 + $0x23d8] sm:$0xff]  ;;  %v2919_v61 = vrot.slane %v11745_v60, 4  ;;  %v5608_v60 = vld [vmem:[%s13700_s1 + $0x2880] sm:$0xff] }
 0x21b   : > { %7278 = vmatpush1.bf16.msra.mxu1 %v7277_v15  ;;  %7152 = vmatprep.subr.bf16.mxu0 %v7151_v16  ;;  %v5416_v15 = vld [vmem:[%s13700_s1 + $0x2280] sm:$0xff]  ;;  %v5463_v8 = vld [vmem:[%s13700_s1 + $0x23f8] sm:$0xff] }
 0x21c   : > { %7280 = vmatprep.subr.bf16.mxu1 %v7279_v25  ;;  %v5420_v16 = vld [vmem:[%s13700_s1 + $0x22a0] sm:$0xff]  ;;  %v5425_v25 = vld [vmem:[%s13700_s1 + $0x22c8] sm:$0xff]  ;;  %v7319_v17 = vpack.c.bf16 %v5463_v8, %v5459_v7  ;;  %v5495_v7 = vld [vmem:[%s13700_s1 + $0x24f8] sm:$0xff] }
 0x21d   : > { %v7173_v37 = vpack.c.bf16 %v5420_v16, %v5416_v15  ;;  %v5458_v15 = vld [vmem:[%s13700_s1 + $0x23d0] sm:$0xff]  ;;  %v2635_v16 = vld [vmem:[%s8369_s27] sm:$0xf0] }
 0x21e   : > { %7154 = vmatpush1.bf16.msra.mxu0 %v7153_v27  ;;  %v7175_v27 = vpack.c.bf16 %v5429_v26, %v5425_v25  ;;  %v5469_v25 = vld [vmem:[%s13700_s1 + $0x2428] sm:$0xff]  ;;  %v5467_v26 = vld [vmem:[%s13700_s1 + $0x2418] sm:$0xff] }
 0x21f   : > { %7282 = vmatpush1.bf16.msra.mxu1 %v7281_v28  ;;  %7156 = vmatprep.subr.bf16.mxu0 %v7155_v29  ;;  %v5424_v28 = vld [vmem:[%s13700_s1 + $0x22c0] sm:$0xff]  ;;  %v7323_v35 = vpack.c.bf16 %v5471_v62, %v5467_v26  ;;  %v5503_v26 = vld [vmem:[%s13700_s1 + $0x2538] sm:$0xff] }
 0x220   : > { %7284 = vmatprep.subr.bf16.mxu1 %v7283_v33  ;;  %v5428_v29 = vld [vmem:[%s13700_s1 + $0x22e0] sm:$0xff]  ;;  %v5433_v33 = vld [vmem:[%s13700_s1 + $0x2308] sm:$0xff] }
 0x221   : > { %v7177_v38 = vpack.c.bf16 %v5428_v29, %v5424_v28  ;;  %v5464_v28 = vld [vmem:[%s13700_s1 + $0x2400] sm:$0xff]  ;;  %v2640_v29 = vld [vmem:[%s8369_s27 + $0x48] sm:$0xf] }
 0x222   : > { %7158 = vmatpush1.bf16.msra.mxu0 %v7157_v44  ;;  %v7179_v44 = vpack.c.bf16 %v5437_v34, %v5433_v33  ;;  %v5466_v33 = vld [vmem:[%s13700_s1 + $0x2410] sm:$0xff]  ;;  %v2639_v34 = vld [vmem:[%s8369_s27 + $0x40] sm:$0xf] }
 0x223   : > { %7286 = vmatpush1.bf16.msra.mxu1 %v7285_v45  ;;  %7160 = vmatprep.subr.bf16.mxu0 %v7159_v46  ;;  %v5432_v45 = vld [vmem:[%s13700_s1 + $0x2300] sm:$0xff]  ;;  %v2921_v19 = vrot.slane %v2639_v34, 4  ;;  %v5511_v34 = vld [vmem:[%s13700_s1 + $0x2578] sm:$0xff] }
 0x224   : > { %7288 = vmatprep.subr.bf16.mxu1 %v7287_v21  ;;  %v5436_v46 = vld [vmem:[%s13700_s1 + $0x2320] sm:$0xff]  ;;  %v5441_v21 = vld [vmem:[%s13700_s1 + $0x2348] sm:$0xff] }
 0x225   : > { %v7181_v50 = vpack.c.bf16 %v5436_v46, %v5432_v45  ;;  %v5479_v45 = vld [vmem:[%s13700_s1 + $0x2478] sm:$0xff]  ;;  %v2923_v46 = vrot.slane %v2640_v29, 4 }
 0x226   : > { %7162 = vmatpush1.bf16.msra.mxu0 %v7161_v52  ;;  %v7183_v52 = vpack.c.bf16 %v5445_v22, %v5441_v21  ;;  %v2638_v21 = vld [vmem:[%s8369_s27 + $0x18] sm:$0xf0]  ;;  %v7325_v22 = vpack.c.bf16 %v5470_v36, %v5466_v33 }
 0x227   : > { %7290 = vmatpush1.bf16.msra.mxu1 %v7289_v53  ;;  %7164 = vmatprep.subr.bf16.mxu0 %v7163_v54  ;;  %v5440_v53 = vld [vmem:[%s13700_s1 + $0x2340] sm:$0xff]  ;;  %v5507_v33 = vld [vmem:[%s13700_s1 + $0x2558] sm:$0xff] }
 0x228   : > { %7292 = vmatprep.subr.bf16.mxu1 %v7291_v58  ;;  %v5444_v54 = vld [vmem:[%s13700_s1 + $0x2360] sm:$0xff]  ;;  %v5449_v58 = vld [vmem:[%s13700_s1 + $0x2388] sm:$0xff] }
 0x229   : > { %v7185_v1 = vpack.c.bf16 %v5444_v54, %v5440_v53  ;;  %v5478_v53 = vld [vmem:[%s13700_s1 + $0x2470] sm:$0xff]  ;;  %v5481_v54 = vld [vmem:[%s13700_s1 + $0x2488] sm:$0xff] }
 0x22a   : > { %7166 = vmatpush1.bf16.msra.mxu0 %v7165_v3  ;;  %v7187_v3 = vpack.c.bf16 %v5453_v59, %v5449_v58  ;;  %v2924_v58 = vsel %vm2908_vm3, %v2913_v41, %v2923_v46  ;;  %v2918_v59 = vrot.slane %v2638_v21, 4  ;;  %v5484_v41 = vld [vmem:[%s13700_s1 + $0x24a0] sm:$0xff]  ;;  %v7343_v46 = vpack.c.bf16 %v5511_v34, %v5507_v33  ;;  %v5515_v21 = vld [vmem:[%s13700_s1 + $0x2598] sm:$0xff] }
 0x22b   : > { %7294 = vmatpush1.bf16.msra.mxu1 %v7293_v4  ;;  %7168 = vmatprep.subr.bf16.mxu0 %v7167_v42  ;;  %v5448_v4 = vld [vmem:[%s13700_s1 + $0x2380] sm:$0xff] }
 0x22c   : > { %7296 = vmatprep.subr.bf16.mxu1 %v7295_v39  ;;  %v5452_v42 = vld [vmem:[%s13700_s1 + $0x23a0] sm:$0xff]  ;;  %v5457_v39 = vld [vmem:[%s13700_s1 + $0x23c8] sm:$0xff]  ;;  %v2920_v8 = vsel %vm2908_vm3, %v2918_v59, %v2919_v61  ;;  %v5527_v59 = vld [vmem:[%s13700_s1 + $0x25f8] sm:$0xff] }
 0x22d   : > { %v7189_v9 = vpack.c.bf16 %v5452_v42, %v5448_v4  ;;  %v7203_v4 = vpack.c.bf16 %v5485_v55, %v5481_v54  ;;  %v5482_v42 = vld [vmem:[%s13700_s1 + $0x2490] sm:$0xff] }
 0x22e   : > { %7170 = vmatpush1.bf16.msra.mxu0 %v7169_v11  ;;  %v7317_v11 = vpack.c.bf16 %v5454_v12, %v5450_v43  ;;  %v5489_v12 = vld [vmem:[%s13700_s1 + $0x24c8] sm:$0xff]  ;;  %v5518_v55 = vld [vmem:[%s13700_s1 + $0x25b0] sm:$0xff] }
 0x22f   : > { %7298 = vmatpush1.bf16.msra.mxu1 %v7297_v13  ;;  %7172 = vmatprep.subr.bf16.mxu0 %v7171_v14  ;;  %v7191_v13 = vpack.c.bf16 %v5461_v6, %v5457_v39  ;;  %v5460_v14 = vld [vmem:[%s13700_s1 + $0x23e0] sm:$0xff]  ;;  %v5493_v39 = vld [vmem:[%s13700_s1 + $0x24e8] sm:$0xff]  ;;  %v5491_v6 = vld [vmem:[%s13700_s1 + $0x24d8] sm:$0xff] }
 0x230   : > { %7300 = vmatprep.subr.bf16.mxu1 %v7299_v23  ;;  %v5462_v23 = vld [vmem:[%s13700_s1 + $0x23f0] sm:$0xff]  ;;  %v7193_v63 = vpack.c.bf16 %v5460_v14, %v5456_v10  ;;  %v5492_v14 = vld [vmem:[%s13700_s1 + $0x24e0] sm:$0xff] }
 0x231   : > { %v7321_v30 = vpack.c.bf16 %v5462_v23, %v5458_v15  ;;  %v5490_v15 = vld [vmem:[%s13700_s1 + $0x24d0] sm:$0xff]  ;;  %v5497_v23 = vld [vmem:[%s13700_s1 + $0x2508] sm:$0xff] }
 0x232   : > { %7174 = vmatpush1.bf16.msra.mxu0 %v7173_v37  ;;  %v2909_v37 = vrot.slane %v2635_v16, 4  ;;  %v7335_v16 = vpack.c.bf16 %v5495_v7, %v5491_v6  ;;  %v5535_v6 = vld [vmem:[%s13700_s1 + $0x2638] sm:$0xff] }
 0x233   : > { %7302 = vmatpush1.bf16.msra.mxu1 %v7301_v0  ;;  %7176 = vmatprep.subr.bf16.mxu0 %v7175_v27  ;;  %v8030_v0 = vld [vmem:[%s8369_s27 + $0x20] sm:$0xff] }
 0x234   : > { %7304 = vmatprep.subr.bf16.mxu1 %v7303_v31  ;;  %v2910_v27 = vrot.slane %v8030_v0, 4  ;;  %v7195_v31 = vpack.c.bf16 %v5469_v25, %v5465_v24  ;;  %v5501_v24 = vld [vmem:[%s13700_s1 + $0x2528] sm:$0xff]  ;;  %v5499_v25 = vld [vmem:[%s13700_s1 + $0x2518] sm:$0xff]  ;;  %v5496_v0 = vld [vmem:[%s13700_s1 + $0x2500] sm:$0xff] }
 0x235   : > { %v7339_v29 = vpack.c.bf16 %v5503_v26, %v5499_v25 }
 0x236   : > { %7178 = vmatpush1.bf16.msra.mxu0 %v7177_v38  ;;  %v5473_v38 = vld [vmem:[%s13700_s1 + $0x2448] sm:$0xff]  ;;  %v2911_v47 = vsel %vm2908_vm3, %v2909_v37, %v2910_v27  ;;  %v7211_v37 = vpack.c.bf16 %v5501_v24, %v5497_v23  ;;  %v5539_v23 = vld [vmem:[%s13700_s1 + $0x2658] sm:$0xff] }
 0x237   : > { %7306 = vmatpush1.bf16.msra.mxu1 %v7305_v40  ;;  %7180 = vmatprep.subr.bf16.mxu0 %v7179_v44  ;;  %v5477_v40 = vld [vmem:[%s13700_s1 + $0x2468] sm:$0xff]  ;;  %v5475_v44 = vld [vmem:[%s13700_s1 + $0x2458] sm:$0xff] }
 0x238   : > { %7308 = vmatprep.subr.bf16.mxu1 %v7307_v18  ;;  %v7197_v18 = vpack.c.bf16 %v5468_v32, %v5464_v28  ;;  %v7199_v48 = vpack.c.bf16 %v5477_v40, %v5473_v38  ;;  %v5498_v28 = vld [vmem:[%s13700_s1 + $0x2510] sm:$0xff]  ;;  %v5509_v32 = vld [vmem:[%s13700_s1 + $0x2568] sm:$0xff]  ;;  %v5504_v40 = vld [vmem:[%s13700_s1 + $0x2540] sm:$0xff] }
 0x239   : > { %v5543_v24 = vld [vmem:[%s13700_s1 + $0x2678] sm:$0xff] }
 0x23a   : > { %7182 = vmatpush1.bf16.msra.mxu0 %v7181_v50  ;;  %v5476_v50 = vld [vmem:[%s13700_s1 + $0x2460] sm:$0xff] }
 0x23b   : > { %7310 = vmatpush1.bf16.msra.mxu1 %v7309_v51  ;;  %7184 = vmatprep.subr.bf16.mxu0 %v7183_v52  ;;  %v5474_v51 = vld [vmem:[%s13700_s1 + $0x2450] sm:$0xff]  ;;  %v7327_v52 = vpack.c.bf16 %v5479_v45, %v5475_v44  ;;  %v5508_v44 = vld [vmem:[%s13700_s1 + $0x2560] sm:$0xff] }
 0x23c   : > { %7312 = vmatprep.subr.bf16.mxu1 %v7311_v56  ;;  %v5483_v56 = vld [vmem:[%s13700_s1 + $0x2498] sm:$0xff]  ;;  %v5506_v45 = vld [vmem:[%s13700_s1 + $0x2550] sm:$0xff] }
 0x23d   : > { %v7331_v43 = vpack.c.bf16 %v5487_v57, %v5483_v56  ;;  %v5521_v56 = vld [vmem:[%s13700_s1 + $0x25c8] sm:$0xff] }
 0x23e   : > { %7186 = vmatpush1.bf16.msra.mxu0 %v7185_v1  ;;  %v7201_v1 = vpack.c.bf16 %v5476_v50, %v5472_v49  ;;  %v5525_v57 = vld [vmem:[%s13700_s1 + $0x25e8] sm:$0xff] }
 0x23f   : > { %7314 = vmatpush1.bf16.msra.mxu1 %v7313_v2  ;;  %7188 = vmatprep.subr.bf16.mxu0 %v7187_v3  ;;  %v2922_v2 = vsel %vm2908_vm3, %v2910_v27, %v2921_v19  ;;  %v7329_v3 = vpack.c.bf16 %v5478_v53, %v5474_v51  ;;  %v5500_v27 = vld [vmem:[%s13700_s1 + $0x2520] sm:$0xff]  ;;  %v5517_v19 = vld [vmem:[%s13700_s1 + $0x25a8] sm:$0xff]  ;;  %v5514_v53 = vld [vmem:[%s13700_s1 + $0x2590] sm:$0xff] }
 0x240   : > { %7316 = vmatprep.subr.bf16.mxu1 %v7315_v5  ;;  %v5486_v5 = vld [vmem:[%s13700_s1 + $0x24b0] sm:$0xff]  ;;  %v5512_v51 = vld [vmem:[%s13700_s1 + $0x2580] sm:$0xff] }
 0x241   : > { %v7333_v10 = vpack.c.bf16 %v5486_v5, %v5482_v42  ;;  %v5529_v5 = vld [vmem:[%s13700_s1 + $0x2608] sm:$0xff] }
 0x242   : > { %7190 = vmatpush1.bf16.msra.mxu0 %v7189_v9  ;;  %v7205_v9 = vpack.c.bf16 %v5484_v41, %v5480_v20  ;;  %v5524_v20 = vld [vmem:[%s13700_s1 + $0x25e0] sm:$0xff]  ;;  %v5522_v41 = vld [vmem:[%s13700_s1 + $0x25d0] sm:$0xff] }
 0x243   : > { %7318 = vmatpush1.bf16.msra.mxu1 %v7317_v11  ;;  %7192 = vmatprep.subr.bf16.mxu0 %v7191_v13  ;;  %v7207_v11 = vpack.c.bf16 %v5493_v39, %v5489_v12  ;;  %v5488_v13 = vld [vmem:[%s13700_s1 + $0x24c0] sm:$0xff]  ;;  %v5533_v12 = vld [vmem:[%s13700_s1 + $0x2628] sm:$0xff]  ;;  %v5531_v39 = vld [vmem:[%s13700_s1 + $0x2618] sm:$0xff] }
 0x244   : > { %7320 = vmatprep.subr.bf16.mxu1 %v7319_v17  ;;  %v5494_v17 = vld [vmem:[%s13700_s1 + $0x24f0] sm:$0xff]  ;;  %v7209_v62 = vpack.c.bf16 %v5492_v14, %v5488_v13  ;;  %v7355_v14 = vpack.c.bf16 %v5535_v6, %v5531_v39 }
 0x245   : > { %v5530_v13 = vld [vmem:[%s13700_s1 + $0x2610] sm:$0xff] }
 0x246   : > { %7194 = vmatpush1.bf16.msra.mxu0 %v7193_v63  ;;  %v7337_v63 = vpack.c.bf16 %v5494_v17, %v5490_v15  ;;  %v5534_v15 = vld [vmem:[%s13700_s1 + $0x2630] sm:$0xff]  ;;  %v5541_v17 = vld [vmem:[%s13700_s1 + $0x2668] sm:$0xff] }
 0x247   : > { %7322 = vmatpush1.bf16.msra.mxu1 %v7321_v30  ;;  %7196 = vmatprep.subr.bf16.mxu0 %v7195_v31  ;;  %v5502_v30 = vld [vmem:[%s13700_s1 + $0x2530] sm:$0xff]  ;;  %v5505_v31 = vld [vmem:[%s13700_s1 + $0x2548] sm:$0xff]  ;;  %v7357_v26 = vpack.c.bf16 %v5534_v15, %v5530_v13 }
 0x248   : > { %7324 = vmatprep.subr.bf16.mxu1 %v7323_v35  ;;  %v7213_v35 = vpack.c.bf16 %v5500_v27, %v5496_v0  ;;  %v7341_v36 = vpack.c.bf16 %v5502_v30, %v5498_v28  ;;  %v7215_v38 = vpack.c.bf16 %v5509_v32, %v5505_v31  ;;  %v5538_v0 = vld [vmem:[%s13700_s1 + $0x2650] sm:$0xff]  ;;  %v7359_v27 = vpack.c.bf16 %v5543_v24, %v5539_v23  ;;  %v5549_v30 = vld [vmem:[%s13700_s1 + $0x26a8] sm:$0xff]  ;;  %v5547_v31 = vld [vmem:[%s13700_s1 + $0x2698] sm:$0xff] }
 0x249   : > { %3002 = vmatmul.mubr.f32.vlgmr.msra.gmra.mrb[0].mxu0 %v2911_v47  ;;  %v5542_v28 = vld [vmem:[%s13700_s1 + $0x2670] sm:$0xff]  ;;  %v5551_v32 = vld [vmem:[%s13700_s1 + $0x26b8] sm:$0xff]  ;;  %v5581_v15 = vld [vmem:[%s13700_s1 + $0x27a8] sm:$0xff] }
 0x24a   : > { %7198 = vmatpush1.bf16.msra.mxu0 %v7197_v18  ;;  %3156 = vmatmul.mubr.f32.vlgmr.msra.gmra.mrb[0].mxu1 %v2911_v47  ;;  %v5510_v47 = vld [vmem:[%s13700_s1 + $0x2570] sm:$0xff]  ;;  %v5513_v18 = vld [vmem:[%s13700_s1 + $0x2588] sm:$0xff]  ;;  %v7361_v34 = vpack.c.bf16 %v5542_v28, %v5538_v0 }
 0x24b   : > { %7326 = vmatpush1.bf16.msra.mxu1 %v7325_v22  ;;  %7200 = vmatprep.subr.bf16.mxu0 %v7199_v48  ;;  %v5519_v22 = vld [vmem:[%s13700_s1 + $0x25b8] sm:$0xff]  ;;  %v7217_v48 = vpack.c.bf16 %v5508_v44, %v5504_v40  ;;  %v7345_v49 = vpack.c.bf16 %v5510_v47, %v5506_v45  ;;  %v7219_v50 = vpack.c.bf16 %v5517_v19, %v5513_v18  ;;  %v5546_v40 = vld [vmem:[%s13700_s1 + $0x2690] sm:$0xff]  ;;  %v5557_v47 = vld [vmem:[%s13700_s1 + $0x26e8] sm:$0xff] }
 0x24c   : > { %7328 = vmatprep.subr.bf16.mxu1 %v7327_v52  ;;  %3007 = vmatprep.mubr.f32.mxu0 %v2924_v58  ;;  %v5516_v52 = vld [vmem:[%s13700_s1 + $0x25a0] sm:$0xff]  ;;  %v7347_v54 = vpack.c.bf16 %v5519_v22, %v5515_v21  ;;  %v7363_v44 = vpack.c.bf16 %v5551_v32, %v5547_v31  ;;  %v5550_v45 = vld [vmem:[%s13700_s1 + $0x26b0] sm:$0xff]  ;;  %v5555_v18 = vld [vmem:[%s13700_s1 + $0x26d8] sm:$0xff] }
 0x24d   : > { %3161 = vmatprep.mubr.f32.mxu1 %v2924_v58  ;;  %3008 = vmatmul.mubr.f32.gmra.mrb[2].mxu0 %v2922_v2  ;;  %v5523_v58 = vld [vmem:[%s13700_s1 + $0x25d8] sm:$0xff]  ;;  %v7365_v22 = vpack.c.bf16 %v5550_v45, %v5546_v40  ;;  %v5574_v13 = vld [vmem:[%s13700_s1 + $0x2770] sm:$0xff]  ;;  %v5589_v28 = vld [vmem:[%s13700_s1 + $0x27e8] sm:$0xff] }
 0x24e   : > { %7202 = vmatpush1.bf16.msra.mxu0 %v7201_v1  ;;  %3162 = vmatmul.mubr.f32.gmra.mrb[2].mxu1 %v2922_v2  ;;  %v7221_v1 = vpack.c.bf16 %v5516_v52, %v5512_v51  ;;  %v7349_v2 = vpack.c.bf16 %v5518_v55, %v5514_v53  ;;  %v7351_v42 = vpack.c.bf16 %v5527_v59, %v5523_v58  ;;  %v5559_v19 = vld [vmem:[%s13700_s1 + $0x26f8] sm:$0xff]  ;;  %v5554_v51 = vld [vmem:[%s13700_s1 + $0x26d0] sm:$0xff]  ;;  %v5565_v55 = vld [vmem:[%s13700_s1 + $0x2728] sm:$0xff] }
 0x24f   : > { %7330 = vmatpush1.bf16.msra.mxu1 %v7329_v3  ;;  %7204 = vmatprep.subr.bf16.mxu0 %v7203_v4  ;;  %v7223_v3 = vpack.c.bf16 %v5525_v57, %v5521_v56  ;;  %v5520_v4 = vld [vmem:[%s13700_s1 + $0x25c0] sm:$0xff]  ;;  %v7367_v52 = vpack.c.bf16 %v5559_v19, %v5555_v18  ;;  %v5558_v53 = vld [vmem:[%s13700_s1 + $0x26f0] sm:$0xff]  ;;  %v5563_v56 = vld [vmem:[%s13700_s1 + $0x2718] sm:$0xff] }
 0x250   : > { %7332 = vmatprep.subr.bf16.mxu1 %v7331_v43  ;;  %3078 = vmatprep.mubr.f32.mxu0 %v2920_v8  ;;  %v5526_v43 = vld [vmem:[%s13700_s1 + $0x25f0] sm:$0xff]  ;;  %v7225_v7 = vpack.c.bf16 %v5524_v20, %v5520_v4  ;;  %v5567_v57 = vld [vmem:[%s13700_s1 + $0x2738] sm:$0xff]  ;;  %v7369_v59 = vpack.c.bf16 %v5558_v53, %v5554_v51  ;;  %v5584_v32 = vld [vmem:[%s13700_s1 + $0x27c0] sm:$0xff] }
 0x251   : > { %3232 = vmatprep.mubr.f32.mxu1 %v2920_v8  ;;  %v7353_v8 = vpack.c.bf16 %v5526_v43, %v5522_v41  ;;  %v5562_v4 = vld [vmem:[%s13700_s1 + $0x2710] sm:$0xff]  ;;  %v7371_v20 = vpack.c.bf16 %v5567_v57, %v5563_v56  ;;  %v5573_v43 = vld [vmem:[%s13700_s1 + $0x2768] sm:$0xff]  ;;  %v5599_v18 = vld [vmem:[%s13700_s1 + $0x2838] sm:$0xff] }
 0x252   : > { %7206 = vmatpush1.bf16.msra.mxu0 %v7205_v9  ;;  %v7227_v9 = vpack.c.bf16 %v5533_v12, %v5529_v5  ;;  %v5566_v41 = vld [vmem:[%s13700_s1 + $0x2730] sm:$0xff]  ;;  %v5571_v5 = vld [vmem:[%s13700_s1 + $0x2758] sm:$0xff]  ;;  %v5593_v45 = vld [vmem:[%s13700_s1 + $0x2808] sm:$0xff] }
 0x253   : > { %7334 = vmatpush1.bf16.msra.mxu1 %v7333_v10  ;;  %7208 = vmatprep.subr.bf16.mxu0 %v7207_v11  ;;  %v5528_v10 = vld [vmem:[%s13700_s1 + $0x2600] sm:$0xff]  ;;  %v5575_v12 = vld [vmem:[%s13700_s1 + $0x2778] sm:$0xff]  ;;  %v7373_v6 = vpack.c.bf16 %v5566_v41, %v5562_v4  ;;  %v5582_v0 = vld [vmem:[%s13700_s1 + $0x27b0] sm:$0xff] }
 0x254   : > { %7336 = vmatprep.subr.bf16.mxu1 %v7335_v16  ;;  %v5532_v11 = vld [vmem:[%s13700_s1 + $0x2620] sm:$0xff]  ;;  %v5537_v16 = vld [vmem:[%s13700_s1 + $0x2648] sm:$0xff]  ;;  %v5598_v57 = vld [vmem:[%s13700_s1 + $0x2830] sm:$0xff] }
 0x255   : > { %v7229_v25 = vpack.c.bf16 %v5532_v11, %v5528_v10  ;;  %v5570_v10 = vld [vmem:[%s13700_s1 + $0x2750] sm:$0xff]  ;;  %v7375_v11 = vpack.c.bf16 %v5575_v12, %v5571_v5  ;;  %v5596_v53 = vld [vmem:[%s13700_s1 + $0x2820] sm:$0xff] }
 0x256   : > { %7210 = vmatpush1.bf16.msra.mxu0 %v7209_v62  ;;  %v7231_v62 = vpack.c.bf16 %v5541_v17, %v5537_v16  ;;  %v5579_v16 = vld [vmem:[%s13700_s1 + $0x2798] sm:$0xff]  ;;  %v7377_v24 = vpack.c.bf16 %v5574_v13, %v5570_v10  ;;  %v5600_v12 = vld [vmem:[%s13700_s1 + $0x2840] sm:$0xff]  ;;  %v5613_v10 = vld [vmem:[%s13700_s1 + $0x28a8] sm:$0xff] }
 0x257   : > { %7338 = vmatpush1.bf16.msra.mxu1 %v7337_v63  ;;  %7212 = vmatprep.subr.bf16.mxu0 %v7211_v37  ;;  %v5536_v63 = vld [vmem:[%s13700_s1 + $0x2640] sm:$0xff]  ;;  %v5583_v17 = vld [vmem:[%s13700_s1 + $0x27b8] sm:$0xff] }
 0x258   : > { %7340 = vmatprep.subr.bf16.mxu1 %v7339_v29  ;;  %v5540_v37 = vld [vmem:[%s13700_s1 + $0x2660] sm:$0xff]  ;;  %v5545_v29 = vld [vmem:[%s13700_s1 + $0x2688] sm:$0xff]  ;;  %v5615_v13 = vld [vmem:[%s13700_s1 + $0x28b8] sm:$0xff] }
 0x259   : > { %v7233_v33 = vpack.c.bf16 %v5540_v37, %v5536_v63  ;;  %v5578_v63 = vld [vmem:[%s13700_s1 + $0x2790] sm:$0xff]  ;;  %v7379_v37 = vpack.c.bf16 %v5583_v17, %v5579_v16  ;;  %v12146_v16 = vld [vmem:[%s8369_s27 + $0x28] sm:$0xff] }
 0x25a   : > { %7214 = vmatpush1.bf16.msra.mxu0 %v7213_v35  ;;  %v7235_v35 = vpack.c.bf16 %v5549_v30, %v5545_v29  ;;  %v5587_v29 = vld [vmem:[%s13700_s1 + $0x27d8] sm:$0xff]  ;;  %v3531_v17 = vrot.slane %v12146_v16, 5  ;;  %v5736_v16 = vld [vmem:[%s13700_s1 + $0x2c80] sm:$0xff] }
 0x25b   : > { %7342 = vmatpush1.bf16.msra.mxu1 %v7341_v36  ;;  %7216 = vmatprep.subr.bf16.mxu0 %v7215_v38  ;;  %v5544_v36 = vld [vmem:[%s13700_s1 + $0x2680] sm:$0xff]  ;;  %v5591_v30 = vld [vmem:[%s13700_s1 + $0x27f8] sm:$0xff] }
 0x25c   : > { %7344 = vmatprep.subr.bf16.mxu1 %v7343_v46  ;;  %v5548_v38 = vld [vmem:[%s13700_s1 + $0x26a0] sm:$0xff]  ;;  %v5553_v46 = vld [vmem:[%s13700_s1 + $0x26c8] sm:$0xff]  ;;  %v7383_v40 = vpack.c.bf16 %v5591_v30, %v5587_v29  ;;  %v5623_v29 = vld [vmem:[%s13700_s1 + $0x28f8] sm:$0xff] }
 0x25d   : > { %v7237_v21 = vpack.c.bf16 %v5548_v38, %v5544_v36  ;;  %v5586_v36 = vld [vmem:[%s13700_s1 + $0x27d0] sm:$0xff] }
 0x25e   : > { %7218 = vmatpush1.bf16.msra.mxu0 %v7217_v48  ;;  %v7239_v48 = vpack.c.bf16 %v5557_v47, %v5553_v46  ;;  %v2637_v38 = vld [vmem:[%s8369_s27 + $0x10] sm:$0xf0]  ;;  %v5597_v46 = vld [vmem:[%s13700_s1 + $0x2828] sm:$0xff]  ;;  %v5595_v47 = vld [vmem:[%s13700_s1 + $0x2818] sm:$0xff] }
 0x25f   : > { %7346 = vmatpush1.bf16.msra.mxu1 %v7345_v49  ;;  %7220 = vmatprep.subr.bf16.mxu0 %v7219_v50  ;;  %v5552_v49 = vld [vmem:[%s13700_s1 + $0x26c0] sm:$0xff]  ;;  %v7515_v56 = vpack.c.bf16 %v5599_v18, %v5595_v47  ;;  %v5631_v47 = vld [vmem:[%s13700_s1 + $0x2938] sm:$0xff] }
 0x260   : > { %7348 = vmatprep.subr.bf16.mxu1 %v7347_v54  ;;  %v5556_v50 = vld [vmem:[%s13700_s1 + $0x26e0] sm:$0xff]  ;;  %v5561_v54 = vld [vmem:[%s13700_s1 + $0x2708] sm:$0xff] }
 0x261   : > { %v7241_v58 = vpack.c.bf16 %v5556_v50, %v5552_v49  ;;  %v5592_v49 = vld [vmem:[%s13700_s1 + $0x2800] sm:$0xff]  ;;  %v2642_v50 = vld [vmem:[%s8369_s27 + $0x58] sm:$0xf] }
 0x262   : > { %7222 = vmatpush1.bf16.msra.mxu0 %v7221_v1  ;;  %v7243_v1 = vpack.c.bf16 %v5565_v55, %v5561_v54  ;;  %v5594_v54 = vld [vmem:[%s13700_s1 + $0x2810] sm:$0xff] }
 0x263   : > { %7350 = vmatpush1.bf16.msra.mxu1 %v7349_v2  ;;  %7224 = vmatprep.subr.bf16.mxu0 %v7223_v3  ;;  %v5560_v2 = vld [vmem:[%s13700_s1 + $0x2700] sm:$0xff]  ;;  %v2641_v55 = vld [vmem:[%s8369_s27 + $0x50] sm:$0xf] }
 0x264   : > { %7352 = vmatprep.subr.bf16.mxu1 %v7351_v42  ;;  %v5564_v3 = vld [vmem:[%s13700_s1 + $0x2720] sm:$0xff]  ;;  %v5569_v42 = vld [vmem:[%s13700_s1 + $0x2748] sm:$0xff]  ;;  %v2925_v41 = vrot.slane %v2641_v55, 4  ;;  %v5639_v55 = vld [vmem:[%s13700_s1 + $0x2978] sm:$0xff] }
 0x265   : > { %v7245_v39 = vpack.c.bf16 %v5564_v3, %v5560_v2  ;;  %v5607_v2 = vld [vmem:[%s13700_s1 + $0x2878] sm:$0xff]  ;;  %v2927_v3 = vrot.slane %v2642_v50, 4 }
 0x266   : > { %7226 = vmatpush1.bf16.msra.mxu0 %v7225_v7  ;;  %v7247_v7 = vpack.c.bf16 %v5573_v43, %v5569_v42  ;;  %v3254_v42 = vld [vmem:[%s8369_s27 + $0x8] sm:$0xe0]  ;;  %v7517_v43 = vpack.c.bf16 %v5598_v57, %v5594_v54  ;;  %v5635_v54 = vld [vmem:[%s13700_s1 + $0x2958] sm:$0xff] }
 0x267   : > { %7354 = vmatpush1.bf16.msra.mxu1 %v7353_v8  ;;  %7228 = vmatprep.subr.bf16.mxu0 %v7227_v9  ;;  %v5568_v8 = vld [vmem:[%s13700_s1 + $0x2740] sm:$0xff] }
 0x268   : > { %7356 = vmatprep.subr.bf16.mxu1 %v7355_v14  ;;  %v5572_v9 = vld [vmem:[%s13700_s1 + $0x2760] sm:$0xff]  ;;  %v5577_v14 = vld [vmem:[%s13700_s1 + $0x2788] sm:$0xff] }
 0x269   : > { %v7249_v23 = vpack.c.bf16 %v5572_v9, %v5568_v8  ;;  %v5606_v8 = vld [vmem:[%s13700_s1 + $0x2870] sm:$0xff]  ;;  %v5609_v9 = vld [vmem:[%s13700_s1 + $0x2888] sm:$0xff] }
 0x26a   : > { %7230 = vmatpush1.bf16.msra.mxu0 %v7229_v25  ;;  %v7251_v25 = vpack.c.bf16 %v5581_v15, %v5577_v14  ;;  %v2928_v14 = vsel %vm2908_vm3, %v2919_v61, %v2927_v3  ;;  %v3530_v15 = vrot.slane %v3254_v42, 5  ;;  %v5612_v61 = vld [vmem:[%s13700_s1 + $0x28a0] sm:$0xff]  ;;  %v7535_v3 = vpack.c.bf16 %v5639_v55, %v5635_v54  ;;  %v5643_v42 = vld [vmem:[%s13700_s1 + $0x2998] sm:$0xff] }
 0x26b   : > { %7358 = vmatpush1.bf16.msra.mxu1 %v7357_v26  ;;  %7232 = vmatprep.subr.bf16.mxu0 %v7231_v62  ;;  %v5576_v26 = vld [vmem:[%s13700_s1 + $0x2780] sm:$0xff] }
 0x26c   : > { %7360 = vmatprep.subr.bf16.mxu1 %v7359_v27  ;;  %v5580_v62 = vld [vmem:[%s13700_s1 + $0x27a0] sm:$0xff]  ;;  %v5585_v27 = vld [vmem:[%s13700_s1 + $0x27c8] sm:$0xff]  ;;  %v3532_v30 = vsel %vm3526_vm4, %v3530_v15, %v3531_v17  ;;  %v5655_v15 = vld [vmem:[%s13700_s1 + $0x29f8] sm:$0xff] }
 0x26d   : > { %v7253_v31 = vpack.c.bf16 %v5580_v62, %v5576_v26  ;;  %v7395_v26 = vpack.c.bf16 %v5613_v10, %v5609_v9  ;;  %v5610_v62 = vld [vmem:[%s13700_s1 + $0x2890] sm:$0xff] }
 0x26e   : > { %7234 = vmatpush1.bf16.msra.mxu0 %v7233_v33  ;;  %v7381_v33 = vpack.c.bf16 %v5582_v0, %v5578_v63  ;;  %v5617_v0 = vld [vmem:[%s13700_s1 + $0x28c8] sm:$0xff]  ;;  %v5646_v10 = vld [vmem:[%s13700_s1 + $0x29b0] sm:$0xff] }
 0x26f   : > { %7362 = vmatpush1.bf16.msra.mxu1 %v7361_v34  ;;  %7236 = vmatprep.subr.bf16.mxu0 %v7235_v35  ;;  %v7255_v34 = vpack.c.bf16 %v5589_v28, %v5585_v27  ;;  %v5588_v35 = vld [vmem:[%s13700_s1 + $0x27e0] sm:$0xff]  ;;  %v5621_v27 = vld [vmem:[%s13700_s1 + $0x28e8] sm:$0xff]  ;;  %v5619_v28 = vld [vmem:[%s13700_s1 + $0x28d8] sm:$0xff] }
 0x270   : > { %7364 = vmatprep.subr.bf16.mxu1 %v7363_v44  ;;  %v5590_v44 = vld [vmem:[%s13700_s1 + $0x27f0] sm:$0xff]  ;;  %v7257_v19 = vpack.c.bf16 %v5588_v35, %v5584_v32  ;;  %v5620_v35 = vld [vmem:[%s13700_s1 + $0x28e0] sm:$0xff] }
 0x271   : > { %v7385_v51 = vpack.c.bf16 %v5590_v44, %v5586_v36  ;;  %v5618_v36 = vld [vmem:[%s13700_s1 + $0x28d0] sm:$0xff]  ;;  %v5625_v44 = vld [vmem:[%s13700_s1 + $0x2908] sm:$0xff] }
 0x272   : > { %7238 = vmatpush1.bf16.msra.mxu0 %v7237_v21  ;;  %v2915_v21 = vrot.slane %v2637_v38, 4  ;;  %v7527_v38 = vpack.c.bf16 %v5623_v29, %v5619_v28  ;;  %v5663_v28 = vld [vmem:[%s13700_s1 + $0x2a38] sm:$0xff] }
 0x273   : > { %7366 = vmatpush1.bf16.msra.mxu1 %v7365_v22  ;;  %7240 = vmatprep.subr.bf16.mxu0 %v7239_v48  ;;  %v8032_v22 = vld [vmem:[%s8369_s27 + $0x30] sm:$0xff] }
 0x274   : > { %7368 = vmatprep.subr.bf16.mxu1 %v7367_v52  ;;  %v2916_v48 = vrot.slane %v8032_v22, 4  ;;  %v7387_v52 = vpack.c.bf16 %v5597_v46, %v5593_v45  ;;  %v5629_v45 = vld [vmem:[%s13700_s1 + $0x2928] sm:$0xff]  ;;  %v5627_v46 = vld [vmem:[%s13700_s1 + $0x2918] sm:$0xff]  ;;  %v5624_v22 = vld [vmem:[%s13700_s1 + $0x2900] sm:$0xff] }
 0x275   : > { %v7531_v50 = vpack.c.bf16 %v5631_v47, %v5627_v46 }
 0x276   : > { %7242 = vmatpush1.bf16.msra.mxu0 %v7241_v58  ;;  %v5601_v58 = vld [vmem:[%s13700_s1 + $0x2848] sm:$0xff]  ;;  %v2917_v4 = vsel %vm2908_vm3, %v2915_v21, %v2916_v48  ;;  %v7403_v21 = vpack.c.bf16 %v5629_v45, %v5625_v44  ;;  %v5667_v44 = vld [vmem:[%s13700_s1 + $0x2a58] sm:$0xff] }
 0x277   : > { %7370 = vmatpush1.bf16.msra.mxu1 %v7369_v59  ;;  %7244 = vmatprep.subr.bf16.mxu0 %v7243_v1  ;;  %v5605_v59 = vld [vmem:[%s13700_s1 + $0x2868] sm:$0xff]  ;;  %v5603_v1 = vld [vmem:[%s13700_s1 + $0x2858] sm:$0xff] }
 0x278   : > { %7372 = vmatprep.subr.bf16.mxu1 %v7371_v20  ;;  %v7389_v20 = vpack.c.bf16 %v5596_v53, %v5592_v49  ;;  %v7391_v5 = vpack.c.bf16 %v5605_v59, %v5601_v58  ;;  %v5626_v49 = vld [vmem:[%s13700_s1 + $0x2910] sm:$0xff]  ;;  %v5637_v53 = vld [vmem:[%s13700_s1 + $0x2968] sm:$0xff]  ;;  %v5632_v59 = vld [vmem:[%s13700_s1 + $0x2940] sm:$0xff] }
 0x279   : > { %v5671_v45 = vld [vmem:[%s13700_s1 + $0x2a78] sm:$0xff] }
 0x27a   : > { %7246 = vmatpush1.bf16.msra.mxu0 %v7245_v39  ;;  %v5604_v39 = vld [vmem:[%s13700_s1 + $0x2860] sm:$0xff] }
 0x27b   : > { %7374 = vmatpush1.bf16.msra.mxu1 %v7373_v6  ;;  %7248 = vmatprep.subr.bf16.mxu0 %v7247_v7  ;;  %v5602_v6 = vld [vmem:[%s13700_s1 + $0x2850] sm:$0xff]  ;;  %v7519_v7 = vpack.c.bf16 %v5607_v2, %v5603_v1  ;;  %v5636_v1 = vld [vmem:[%s13700_s1 + $0x2960] sm:$0xff] }
 0x27c   : > { %7376 = vmatprep.subr.bf16.mxu1 %v7375_v11  ;;  %v5611_v11 = vld [vmem:[%s13700_s1 + $0x2898] sm:$0xff]  ;;  %v5634_v2 = vld [vmem:[%s13700_s1 + $0x2950] sm:$0xff] }
 0x27d   : > { %v7523_v63 = vpack.c.bf16 %v5615_v13, %v5611_v11  ;;  %v5649_v11 = vld [vmem:[%s13700_s1 + $0x29c8] sm:$0xff] }
 0x27e   : > { %7250 = vmatpush1.bf16.msra.mxu0 %v7249_v23  ;;  %v7393_v23 = vpack.c.bf16 %v5604_v39, %v5600_v12  ;;  %v5653_v13 = vld [vmem:[%s13700_s1 + $0x29e8] sm:$0xff] }
 0x27f   : > { %7378 = vmatpush1.bf16.msra.mxu1 %v7377_v24  ;;  %7252 = vmatprep.subr.bf16.mxu0 %v7251_v25  ;;  %v2926_v24 = vsel %vm2908_vm3, %v2916_v48, %v2925_v41  ;;  %v7521_v25 = vpack.c.bf16 %v5606_v8, %v5602_v6  ;;  %v5628_v48 = vld [vmem:[%s13700_s1 + $0x2920] sm:$0xff]  ;;  %v5645_v41 = vld [vmem:[%s13700_s1 + $0x29a8] sm:$0xff]  ;;  %v5642_v8 = vld [vmem:[%s13700_s1 + $0x2990] sm:$0xff] }
 0x280   : > { %7380 = vmatprep.subr.bf16.mxu1 %v7379_v37  ;;  %v5614_v37 = vld [vmem:[%s13700_s1 + $0x28b0] sm:$0xff]  ;;  %v5640_v6 = vld [vmem:[%s13700_s1 + $0x2980] sm:$0xff] }
 0x281   : > { %v7525_v32 = vpack.c.bf16 %v5614_v37, %v5610_v62  ;;  %v5657_v37 = vld [vmem:[%s13700_s1 + $0x2a08] sm:$0xff] }
 0x282   : > { %7254 = vmatpush1.bf16.msra.mxu0 %v7253_v31  ;;  %v7397_v31 = vpack.c.bf16 %v5612_v61, %v5608_v60  ;;  %v5652_v60 = vld [vmem:[%s13700_s1 + $0x29e0] sm:$0xff]  ;;  %v5650_v61 = vld [vmem:[%s13700_s1 + $0x29d0] sm:$0xff] }
 0x283   : > { %7382 = vmatpush1.bf16.msra.mxu1 %v7381_v33  ;;  %7256 = vmatprep.subr.bf16.mxu0 %v7255_v34  ;;  %v7399_v33 = vpack.c.bf16 %v5621_v27, %v5617_v0  ;;  %v5616_v34 = vld [vmem:[%s13700_s1 + $0x28c0] sm:$0xff]  ;;  %v5661_v0 = vld [vmem:[%s13700_s1 + $0x2a28] sm:$0xff]  ;;  %v5659_v27 = vld [vmem:[%s13700_s1 + $0x2a18] sm:$0xff] }
 0x284   : > { %7384 = vmatprep.subr.bf16.mxu1 %v7383_v40  ;;  %v5622_v40 = vld [vmem:[%s13700_s1 + $0x28f0] sm:$0xff]  ;;  %v7401_v18 = vpack.c.bf16 %v5620_v35, %v5616_v34  ;;  %v7547_v35 = vpack.c.bf16 %v5663_v28, %v5659_v27 }
 0x285   : > { %v5658_v34 = vld [vmem:[%s13700_s1 + $0x2a10] sm:$0xff] }
 0x286   : > { %7258 = vmatpush1.bf16.msra.mxu0 %v7257_v19  ;;  %v7529_v19 = vpack.c.bf16 %v5622_v40, %v5618_v36  ;;  %v5662_v36 = vld [vmem:[%s13700_s1 + $0x2a30] sm:$0xff]  ;;  %v5669_v40 = vld [vmem:[%s13700_s1 + $0x2a68] sm:$0xff] }
 0x287   : > { %7386 = vmatpush1.bf16.msra.mxu1 %v7385_v51  ;;  %7388 = vmatprep.subr.bf16.mxu0 %v7387_v52  ;;  %v5630_v51 = vld [vmem:[%s13700_s1 + $0x2930] sm:$0xff]  ;;  %v5633_v52 = vld [vmem:[%s13700_s1 + $0x2948] sm:$0xff]  ;;  %v7549_v47 = vpack.c.bf16 %v5662_v36, %v5658_v34 }
 0x288   : > { %7516 = vmatprep.subr.bf16.mxu1 %v7515_v56  ;;  %v7405_v56 = vpack.c.bf16 %v5628_v48, %v5624_v22  ;;  %v7533_v57 = vpack.c.bf16 %v5630_v51, %v5626_v49  ;;  %v7407_v58 = vpack.c.bf16 %v5637_v53, %v5633_v52  ;;  %v5666_v22 = vld [vmem:[%s13700_s1 + $0x2a50] sm:$0xff]  ;;  %v7551_v48 = vpack.c.bf16 %v5671_v45, %v5667_v44  ;;  %v5677_v51 = vld [vmem:[%s13700_s1 + $0x2aa8] sm:$0xff]  ;;  %v5675_v52 = vld [vmem:[%s13700_s1 + $0x2a98] sm:$0xff] }
 0x289   : > { %3079 = vmatmul.mubr.f32.vlgmr.msra.gmra.mrb[0].mxu0 %v2917_v4  ;;  %v5670_v49 = vld [vmem:[%s13700_s1 + $0x2a70] sm:$0xff]  ;;  %v5679_v53 = vld [vmem:[%s13700_s1 + $0x2ab8] sm:$0xff]  ;;  %v5709_v36 = vld [vmem:[%s13700_s1 + $0x2ba8] sm:$0xff] }
 0x28a   : > { %3233 = vmatmul.mubr.f32.vlgmr.msra.gmra.mrb[0].mxu1 %v2917_v4  ;;  %7390 = vmatpush1.bf16.msra.mxu0 %v7389_v20  ;;  %v5638_v4 = vld [vmem:[%s13700_s1 + $0x2970] sm:$0xff]  ;;  %v5641_v20 = vld [vmem:[%s13700_s1 + $0x2988] sm:$0xff]  ;;  %v7553_v55 = vpack.c.bf16 %v5670_v49, %v5666_v22 }
 0x28b   : > { %7518 = vmatpush1.bf16.msra.mxu1 %v7517_v43  ;;  %7392 = vmatprep.subr.bf16.mxu0 %v7391_v5  ;;  %v5647_v43 = vld [vmem:[%s13700_s1 + $0x29b8] sm:$0xff]  ;;  %v7409_v5 = vpack.c.bf16 %v5636_v1, %v5632_v59  ;;  %v7537_v12 = vpack.c.bf16 %v5638_v4, %v5634_v2  ;;  %v7411_v39 = vpack.c.bf16 %v5645_v41, %v5641_v20  ;;  %v5674_v59 = vld [vmem:[%s13700_s1 + $0x2a90] sm:$0xff]  ;;  %v5685_v4 = vld [vmem:[%s13700_s1 + $0x2ae8] sm:$0xff] }
 0x28c   : > { %7520 = vmatprep.subr.bf16.mxu1 %v7519_v7  ;;  %3084 = vmatprep.mubr.f32.mxu0 %v2928_v14  ;;  %v5644_v7 = vld [vmem:[%s13700_s1 + $0x29a0] sm:$0xff]  ;;  %v7539_v9 = vpack.c.bf16 %v5647_v43, %v5643_v42  ;;  %v7555_v1 = vpack.c.bf16 %v5679_v53, %v5675_v52  ;;  %v5678_v2 = vld [vmem:[%s13700_s1 + $0x2ab0] sm:$0xff]  ;;  %v5683_v20 = vld [vmem:[%s13700_s1 + $0x2ad8] sm:$0xff] }
 0x28d   : > { %3238 = vmatprep.mubr.f32.mxu1 %v2928_v14  ;;  %3085 = vmatmul.mubr.f32.gmra.mrb[2].mxu0 %v2926_v24  ;;  %v5651_v14 = vld [vmem:[%s13700_s1 + $0x29d8] sm:$0xff]  ;;  %v7557_v43 = vpack.c.bf16 %v5678_v2, %v5674_v59  ;;  %v5702_v34 = vld [vmem:[%s13700_s1 + $0x2b70] sm:$0xff]  ;;  %v5717_v49 = vld [vmem:[%s13700_s1 + $0x2be8] sm:$0xff] }
 0x28e   : > { %7394 = vmatpush1.bf16.msra.mxu0 %v7393_v23  ;;  %3239 = vmatmul.mubr.f32.gmra.mrb[2].mxu1 %v2926_v24  ;;  %v7413_v23 = vpack.c.bf16 %v5644_v7, %v5640_v6  ;;  %v7541_v24 = vpack.c.bf16 %v5646_v10, %v5642_v8  ;;  %v7543_v62 = vpack.c.bf16 %v5655_v15, %v5651_v14  ;;  %v5687_v41 = vld [vmem:[%s13700_s1 + $0x2af8] sm:$0xff]  ;;  %v5682_v6 = vld [vmem:[%s13700_s1 + $0x2ad0] sm:$0xff]  ;;  %v5693_v10 = vld [vmem:[%s13700_s1 + $0x2b28] sm:$0xff] }
 0x28f   : > { %7522 = vmatpush1.bf16.msra.mxu1 %v7521_v25  ;;  %7396 = vmatprep.subr.bf16.mxu0 %v7395_v26  ;;  %v7415_v25 = vpack.c.bf16 %v5653_v13, %v5649_v11  ;;  %v5648_v26 = vld [vmem:[%s13700_s1 + $0x29c0] sm:$0xff]  ;;  %v7559_v7 = vpack.c.bf16 %v5687_v41, %v5683_v20  ;;  %v5686_v8 = vld [vmem:[%s13700_s1 + $0x2af0] sm:$0xff]  ;;  %v5691_v11 = vld [vmem:[%s13700_s1 + $0x2b18] sm:$0xff] }
 0x290   : > { %7524 = vmatprep.subr.bf16.mxu1 %v7523_v63  ;;  %3619 = vmatprep.mubr.f32.mxu0 %v3532_v30  ;;  %v5654_v63 = vld [vmem:[%s13700_s1 + $0x29f0] sm:$0xff]  ;;  %v7417_v29 = vpack.c.bf16 %v5652_v60, %v5648_v26  ;;  %v5695_v13 = vld [vmem:[%s13700_s1 + $0x2b38] sm:$0xff]  ;;  %v7561_v15 = vpack.c.bf16 %v5686_v8, %v5682_v6  ;;  %v5712_v53 = vld [vmem:[%s13700_s1 + $0x2bc0] sm:$0xff] }
 0x291   : > { %3773 = vmatprep.mubr.f32.mxu1 %v3532_v30  ;;  %v7545_v30 = vpack.c.bf16 %v5654_v63, %v5650_v61  ;;  %v5690_v26 = vld [vmem:[%s13700_s1 + $0x2b10] sm:$0xff]  ;;  %v7563_v60 = vpack.c.bf16 %v5695_v13, %v5691_v11  ;;  %v5701_v63 = vld [vmem:[%s13700_s1 + $0x2b68] sm:$0xff]  ;;  %v5727_v20 = vld [vmem:[%s13700_s1 + $0x2c38] sm:$0xff] }
 0x292   : > { %7398 = vmatpush1.bf16.msra.mxu0 %v7397_v31  ;;  %v7419_v31 = vpack.c.bf16 %v5661_v0, %v5657_v37  ;;  %v5694_v61 = vld [vmem:[%s13700_s1 + $0x2b30] sm:$0xff]  ;;  %v5699_v37 = vld [vmem:[%s13700_s1 + $0x2b58] sm:$0xff]  ;;  %v5721_v2 = vld [vmem:[%s13700_s1 + $0x2c08] sm:$0xff] }
 0x293   : > { %7526 = vmatpush1.bf16.msra.mxu1 %v7525_v32  ;;  %7400 = vmatprep.subr.bf16.mxu0 %v7399_v33  ;;  %v5656_v32 = vld [vmem:[%s13700_s1 + $0x2a00] sm:$0xff]  ;;  %v5703_v0 = vld [vmem:[%s13700_s1 + $0x2b78] sm:$0xff]  ;;  %v7565_v28 = vpack.c.bf16 %v5694_v61, %v5690_v26  ;;  %v5710_v22 = vld [vmem:[%s13700_s1 + $0x2bb0] sm:$0xff] }
 0x294   : > { %7528 = vmatprep.subr.bf16.mxu1 %v7527_v38  ;;  %v5660_v33 = vld [vmem:[%s13700_s1 + $0x2a20] sm:$0xff]  ;;  %v5665_v38 = vld [vmem:[%s13700_s1 + $0x2a48] sm:$0xff]  ;;  %v5726_v13 = vld [vmem:[%s13700_s1 + $0x2c30] sm:$0xff] }
 0x295   : > { %v7421_v46 = vpack.c.bf16 %v5660_v33, %v5656_v32  ;;  %v5698_v32 = vld [vmem:[%s13700_s1 + $0x2b50] sm:$0xff]  ;;  %v7567_v33 = vpack.c.bf16 %v5703_v0, %v5699_v37  ;;  %v5724_v8 = vld [vmem:[%s13700_s1 + $0x2c20] sm:$0xff] }
 0x296   : > { %7402 = vmatpush1.bf16.msra.mxu0 %v7401_v18  ;;  %v7423_v18 = vpack.c.bf16 %v5669_v40, %v5665_v38  ;;  %v5707_v38 = vld [vmem:[%s13700_s1 + $0x2b98] sm:$0xff]  ;;  %v7569_v45 = vpack.c.bf16 %v5702_v34, %v5698_v32  ;;  %v5728_v0 = vld [vmem:[%s13700_s1 + $0x2c40] sm:$0xff]  ;;  %v5741_v32 = vld [vmem:[%s13700_s1 + $0x2ca8] sm:$0xff] }
 0x297   : > { %7530 = vmatpush1.bf16.msra.mxu1 %v7529_v19  ;;  %7404 = vmatprep.subr.bf16.mxu0 %v7403_v21  ;;  %v5664_v19 = vld [vmem:[%s13700_s1 + $0x2a40] sm:$0xff]  ;;  %v5711_v40 = vld [vmem:[%s13700_s1 + $0x2bb8] sm:$0xff] }
 0x298   : > { %7532 = vmatprep.subr.bf16.mxu1 %v7531_v50  ;;  %v5668_v21 = vld [vmem:[%s13700_s1 + $0x2a60] sm:$0xff]  ;;  %v5673_v50 = vld [vmem:[%s13700_s1 + $0x2a88] sm:$0xff]  ;;  %v5743_v34 = vld [vmem:[%s13700_s1 + $0x2cb8] sm:$0xff] }
 0x299   : > { %v7425_v54 = vpack.c.bf16 %v5668_v21, %v5664_v19  ;;  %v5706_v19 = vld [vmem:[%s13700_s1 + $0x2b90] sm:$0xff]  ;;  %v7571_v21 = vpack.c.bf16 %v5711_v40, %v5707_v38  ;;  %v12547_v38 = vld [vmem:[%s8369_s27 + $0x38] sm:$0xff] }
 0x29a   : > { %7406 = vmatpush1.bf16.msra.mxu0 %v7405_v56  ;;  %v7427_v56 = vpack.c.bf16 %v5677_v51, %v5673_v50  ;;  %v5715_v50 = vld [vmem:[%s13700_s1 + $0x2bd8] sm:$0xff]  ;;  %v3537_v40 = vrot.slane %v12547_v38, 5  ;;  %v5864_v38 = vld [vmem:[%s13700_s1 + $0x3080] sm:$0xff] }
 0x29b   : > { %7534 = vmatpush1.bf16.msra.mxu1 %v7533_v57  ;;  %7408 = vmatprep.subr.bf16.mxu0 %v7407_v58  ;;  %v5672_v57 = vld [vmem:[%s13700_s1 + $0x2a80] sm:$0xff]  ;;  %v5719_v51 = vld [vmem:[%s13700_s1 + $0x2bf8] sm:$0xff] }
 0x29c   : > { %7536 = vmatprep.subr.bf16.mxu1 %v7535_v3  ;;  %v5676_v58 = vld [vmem:[%s13700_s1 + $0x2aa0] sm:$0xff]  ;;  %v5681_v3 = vld [vmem:[%s13700_s1 + $0x2ac8] sm:$0xff]  ;;  %v7575_v59 = vpack.c.bf16 %v5719_v51, %v5715_v50  ;;  %v5751_v50 = vld [vmem:[%s13700_s1 + $0x2cf8] sm:$0xff] }
 0x29d   : > { %v7429_v42 = vpack.c.bf16 %v5676_v58, %v5672_v57  ;;  %v5714_v57 = vld [vmem:[%s13700_s1 + $0x2bd0] sm:$0xff]  ;;  %v3253_v58 = vld [vmem:[%s8369_s27] sm:$0xe0] }
 0x29e   : > { %7410 = vmatpush1.bf16.msra.mxu0 %v7409_v5  ;;  %v7431_v5 = vpack.c.bf16 %v5685_v4, %v5681_v3  ;;  %v5725_v3 = vld [vmem:[%s13700_s1 + $0x2c28] sm:$0xff]  ;;  %v5723_v4 = vld [vmem:[%s13700_s1 + $0x2c18] sm:$0xff] }
 0x29f   : > { %7538 = vmatpush1.bf16.msra.mxu1 %v7537_v12  ;;  %7412 = vmatprep.subr.bf16.mxu0 %v7411_v39  ;;  %v5680_v12 = vld [vmem:[%s13700_s1 + $0x2ac0] sm:$0xff]  ;;  %v7579_v11 = vpack.c.bf16 %v5727_v20, %v5723_v4  ;;  %v5759_v4 = vld [vmem:[%s13700_s1 + $0x2d38] sm:$0xff] }
 0x2a0   : > { %7540 = vmatprep.subr.bf16.mxu1 %v7539_v9  ;;  %v5684_v39 = vld [vmem:[%s13700_s1 + $0x2ae0] sm:$0xff]  ;;  %v5689_v9 = vld [vmem:[%s13700_s1 + $0x2b08] sm:$0xff] }
 0x2a1   : > { %v7433_v14 = vpack.c.bf16 %v5684_v39, %v5680_v12  ;;  %v5720_v12 = vld [vmem:[%s13700_s1 + $0x2c00] sm:$0xff]  ;;  %v3258_v39 = vld [vmem:[%s8369_s27 + $0x48] sm:$0x1f] }
 0x2a2   : > { %7414 = vmatpush1.bf16.msra.mxu0 %v7413_v23  ;;  %v7435_v23 = vpack.c.bf16 %v5693_v10, %v5689_v9  ;;  %v5722_v9 = vld [vmem:[%s13700_s1 + $0x2c10] sm:$0xff]  ;;  %v3257_v10 = vld [vmem:[%s8369_s27 + $0x40] sm:$0x1f] }
 0x2a3   : > { %7542 = vmatpush1.bf16.msra.mxu1 %v7541_v24  ;;  %7416 = vmatprep.subr.bf16.mxu0 %v7415_v25  ;;  %v5688_v24 = vld [vmem:[%s13700_s1 + $0x2b00] sm:$0xff]  ;;  %v3539_v61 = vrot.slane %v3257_v10, 5  ;;  %v5767_v10 = vld [vmem:[%s13700_s1 + $0x2d78] sm:$0xff] }
 0x2a4   : > { %7544 = vmatprep.subr.bf16.mxu1 %v7543_v62  ;;  %v5692_v25 = vld [vmem:[%s13700_s1 + $0x2b20] sm:$0xff]  ;;  %v5697_v62 = vld [vmem:[%s13700_s1 + $0x2b48] sm:$0xff] }
 0x2a5   : > { %v7437_v27 = vpack.c.bf16 %v5692_v25, %v5688_v24  ;;  %v5735_v24 = vld [vmem:[%s13700_s1 + $0x2c78] sm:$0xff]  ;;  %v3541_v25 = vrot.slane %v3258_v39, 5 }
 0x2a6   : > { %7418 = vmatpush1.bf16.msra.mxu0 %v7417_v29  ;;  %v7439_v29 = vpack.c.bf16 %v5701_v63, %v5697_v62  ;;  %v3256_v62 = vld [vmem:[%s8369_s27 + $0x18] sm:$0xe0]  ;;  %v7581_v63 = vpack.c.bf16 %v5726_v13, %v5722_v9 }
 0x2a7   : > { %7546 = vmatpush1.bf16.msra.mxu1 %v7545_v30  ;;  %7420 = vmatprep.subr.bf16.mxu0 %v7419_v31  ;;  %v5696_v30 = vld [vmem:[%s13700_s1 + $0x2b40] sm:$0xff]  ;;  %v5763_v9 = vld [vmem:[%s13700_s1 + $0x2d58] sm:$0xff] }
 0x2a8   : > { %7548 = vmatprep.subr.bf16.mxu1 %v7547_v35  ;;  %v5700_v31 = vld [vmem:[%s13700_s1 + $0x2b60] sm:$0xff]  ;;  %v5705_v35 = vld [vmem:[%s13700_s1 + $0x2b88] sm:$0xff] }
 0x2a9   : > { %v7441_v44 = vpack.c.bf16 %v5700_v31, %v5696_v30  ;;  %v5734_v30 = vld [vmem:[%s13700_s1 + $0x2c70] sm:$0xff]  ;;  %v5737_v31 = vld [vmem:[%s13700_s1 + $0x2c88] sm:$0xff] }
 0x2aa   : > { %7422 = vmatpush1.bf16.msra.mxu0 %v7421_v46  ;;  %v7443_v46 = vpack.c.bf16 %v5709_v36, %v5705_v35  ;;  %v3542_v35 = vsel %vm3526_vm4, %v3531_v17, %v3541_v25  ;;  %v3536_v36 = vrot.slane %v3256_v62, 5  ;;  %v5740_v17 = vld [vmem:[%s13700_s1 + $0x2ca0] sm:$0xff]  ;;  %v7599_v25 = vpack.c.bf16 %v5767_v10, %v5763_v9  ;;  %v5771_v62 = vld [vmem:[%s13700_s1 + $0x2d98] sm:$0xff] }
 0x2ab   : > { %7550 = vmatpush1.bf16.msra.mxu1 %v7549_v47  ;;  %7424 = vmatprep.subr.bf16.mxu0 %v7423_v18  ;;  %v5704_v47 = vld [vmem:[%s13700_s1 + $0x2b80] sm:$0xff] }
 0x2ac   : > { %7552 = vmatprep.subr.bf16.mxu1 %v7551_v48  ;;  %v5708_v18 = vld [vmem:[%s13700_s1 + $0x2ba0] sm:$0xff]  ;;  %v5713_v48 = vld [vmem:[%s13700_s1 + $0x2bc8] sm:$0xff]  ;;  %v3538_v51 = vsel %vm3526_vm4, %v3536_v36, %v3537_v40  ;;  %v5783_v36 = vld [vmem:[%s13700_s1 + $0x2df8] sm:$0xff] }
 0x2ad   : > { %v7445_v52 = vpack.c.bf16 %v5708_v18, %v5704_v47  ;;  %v7459_v47 = vpack.c.bf16 %v5741_v32, %v5737_v31  ;;  %v5738_v18 = vld [vmem:[%s13700_s1 + $0x2c90] sm:$0xff] }
 0x2ae   : > { %7426 = vmatpush1.bf16.msra.mxu0 %v7425_v54  ;;  %v7573_v54 = vpack.c.bf16 %v5710_v22, %v5706_v19  ;;  %v5745_v22 = vld [vmem:[%s13700_s1 + $0x2cc8] sm:$0xff]  ;;  %v5774_v32 = vld [vmem:[%s13700_s1 + $0x2db0] sm:$0xff] }
 0x2af   : > { %7554 = vmatpush1.bf16.msra.mxu1 %v7553_v55  ;;  %7428 = vmatprep.subr.bf16.mxu0 %v7427_v56  ;;  %v7447_v55 = vpack.c.bf16 %v5717_v49, %v5713_v48  ;;  %v5716_v56 = vld [vmem:[%s13700_s1 + $0x2be0] sm:$0xff]  ;;  %v5749_v48 = vld [vmem:[%s13700_s1 + $0x2ce8] sm:$0xff]  ;;  %v5747_v49 = vld [vmem:[%s13700_s1 + $0x2cd8] sm:$0xff] }
 0x2b0   : > { %7556 = vmatprep.subr.bf16.mxu1 %v7555_v1  ;;  %v5718_v1 = vld [vmem:[%s13700_s1 + $0x2bf0] sm:$0xff]  ;;  %v7449_v41 = vpack.c.bf16 %v5716_v56, %v5712_v53  ;;  %v5748_v56 = vld [vmem:[%s13700_s1 + $0x2ce0] sm:$0xff] }
 0x2b1   : > { %v7577_v6 = vpack.c.bf16 %v5718_v1, %v5714_v57  ;;  %v5746_v57 = vld [vmem:[%s13700_s1 + $0x2cd0] sm:$0xff]  ;;  %v5753_v1 = vld [vmem:[%s13700_s1 + $0x2d08] sm:$0xff] }
 0x2b2   : > { %7430 = vmatpush1.bf16.msra.mxu0 %v7429_v42  ;;  %v3527_v42 = vrot.slane %v3253_v58, 5  ;;  %v7591_v58 = vpack.c.bf16 %v5751_v50, %v5747_v49  ;;  %v5791_v49 = vld [vmem:[%s13700_s1 + $0x2e38] sm:$0xff] }
 0x2b3   : > { %7558 = vmatpush1.bf16.msra.mxu1 %v7557_v43  ;;  %7432 = vmatprep.subr.bf16.mxu0 %v7431_v5  ;;  %v8034_v43 = vld [vmem:[%s8369_s27 + $0x20] sm:$0xff] }
 0x2b4   : > { %7560 = vmatprep.subr.bf16.mxu1 %v7559_v7  ;;  %v3528_v5 = vrot.slane %v8034_v43, 5  ;;  %v7451_v7 = vpack.c.bf16 %v5725_v3, %v5721_v2  ;;  %v5757_v2 = vld [vmem:[%s13700_s1 + $0x2d28] sm:$0xff]  ;;  %v5755_v3 = vld [vmem:[%s13700_s1 + $0x2d18] sm:$0xff]  ;;  %v5752_v43 = vld [vmem:[%s13700_s1 + $0x2d00] sm:$0xff] }
 0x2b5   : > { %v7595_v39 = vpack.c.bf16 %v5759_v4, %v5755_v3 }
 0x2b6   : > { %7434 = vmatpush1.bf16.msra.mxu0 %v7433_v14  ;;  %v5729_v14 = vld [vmem:[%s13700_s1 + $0x2c48] sm:$0xff]  ;;  %v3529_v26 = vsel %vm3526_vm4, %v3527_v42, %v3528_v5  ;;  %v7467_v42 = vpack.c.bf16 %v5757_v2, %v5753_v1  ;;  %v5795_v1 = vld [vmem:[%s13700_s1 + $0x2e58] sm:$0xff] }
 0x2b7   : > { %7562 = vmatpush1.bf16.msra.mxu1 %v7561_v15  ;;  %7436 = vmatprep.subr.bf16.mxu0 %v7435_v23  ;;  %v5733_v15 = vld [vmem:[%s13700_s1 + $0x2c68] sm:$0xff]  ;;  %v5731_v23 = vld [vmem:[%s13700_s1 + $0x2c58] sm:$0xff] }
 0x2b8   : > { %7564 = vmatprep.subr.bf16.mxu1 %v7563_v60  ;;  %v7453_v60 = vpack.c.bf16 %v5724_v8, %v5720_v12  ;;  %v7455_v37 = vpack.c.bf16 %v5733_v15, %v5729_v14  ;;  %v5754_v12 = vld [vmem:[%s13700_s1 + $0x2d10] sm:$0xff]  ;;  %v5765_v8 = vld [vmem:[%s13700_s1 + $0x2d68] sm:$0xff]  ;;  %v5760_v15 = vld [vmem:[%s13700_s1 + $0x2d40] sm:$0xff] }
 0x2b9   : > { %v5799_v2 = vld [vmem:[%s13700_s1 + $0x2e78] sm:$0xff] }
 0x2ba   : > { %7438 = vmatpush1.bf16.msra.mxu0 %v7437_v27  ;;  %v5732_v27 = vld [vmem:[%s13700_s1 + $0x2c60] sm:$0xff] }
 0x2bb   : > { %7566 = vmatpush1.bf16.msra.mxu1 %v7565_v28  ;;  %7440 = vmatprep.subr.bf16.mxu0 %v7439_v29  ;;  %v5730_v28 = vld [vmem:[%s13700_s1 + $0x2c50] sm:$0xff]  ;;  %v7583_v29 = vpack.c.bf16 %v5735_v24, %v5731_v23  ;;  %v5764_v23 = vld [vmem:[%s13700_s1 + $0x2d60] sm:$0xff] }
 0x2bc   : > { %7568 = vmatprep.subr.bf16.mxu1 %v7567_v33  ;;  %v5739_v33 = vld [vmem:[%s13700_s1 + $0x2c98] sm:$0xff]  ;;  %v5762_v24 = vld [vmem:[%s13700_s1 + $0x2d50] sm:$0xff] }
 0x2bd   : > { %v7587_v19 = vpack.c.bf16 %v5743_v34, %v5739_v33  ;;  %v5777_v33 = vld [vmem:[%s13700_s1 + $0x2dc8] sm:$0xff] }
 0x2be   : > { %7442 = vmatpush1.bf16.msra.mxu0 %v7441_v44  ;;  %v7457_v44 = vpack.c.bf16 %v5732_v27, %v5728_v0  ;;  %v5781_v34 = vld [vmem:[%s13700_s1 + $0x2de8] sm:$0xff] }
 0x2bf   : > { %7570 = vmatpush1.bf16.msra.mxu1 %v7569_v45  ;;  %7444 = vmatprep.subr.bf16.mxu0 %v7443_v46  ;;  %v3540_v45 = vsel %vm3526_vm4, %v3528_v5, %v3539_v61  ;;  %v7585_v46 = vpack.c.bf16 %v5734_v30, %v5730_v28  ;;  %v5756_v5 = vld [vmem:[%s13700_s1 + $0x2d20] sm:$0xff]  ;;  %v5773_v61 = vld [vmem:[%s13700_s1 + $0x2da8] sm:$0xff]  ;;  %v5770_v30 = vld [vmem:[%s13700_s1 + $0x2d90] sm:$0xff] }
 0x2c0   : > { %7572 = vmatprep.subr.bf16.mxu1 %v7571_v21  ;;  %v5742_v21 = vld [vmem:[%s13700_s1 + $0x2cb0] sm:$0xff]  ;;  %v5768_v28 = vld [vmem:[%s13700_s1 + $0x2d80] sm:$0xff] }
 0x2c1   : > { %v7589_v53 = vpack.c.bf16 %v5742_v21, %v5738_v18  ;;  %v5785_v21 = vld [vmem:[%s13700_s1 + $0x2e08] sm:$0xff] }
 0x2c2   : > { %7446 = vmatpush1.bf16.msra.mxu0 %v7445_v52  ;;  %v7461_v52 = vpack.c.bf16 %v5740_v17, %v5736_v16  ;;  %v5780_v16 = vld [vmem:[%s13700_s1 + $0x2de0] sm:$0xff]  ;;  %v5778_v17 = vld [vmem:[%s13700_s1 + $0x2dd0] sm:$0xff] }
 0x2c3   : > { %7574 = vmatpush1.bf16.msra.mxu1 %v7573_v54  ;;  %7448 = vmatprep.subr.bf16.mxu0 %v7447_v55  ;;  %v7463_v54 = vpack.c.bf16 %v5749_v48, %v5745_v22  ;;  %v5744_v55 = vld [vmem:[%s13700_s1 + $0x2cc0] sm:$0xff]  ;;  %v5789_v22 = vld [vmem:[%s13700_s1 + $0x2e28] sm:$0xff]  ;;  %v5787_v48 = vld [vmem:[%s13700_s1 + $0x2e18] sm:$0xff] }
 0x2c4   : > { %7576 = vmatprep.subr.bf16.mxu1 %v7575_v59  ;;  %v5750_v59 = vld [vmem:[%s13700_s1 + $0x2cf0] sm:$0xff]  ;;  %v7465_v20 = vpack.c.bf16 %v5748_v56, %v5744_v55  ;;  %v7611_v56 = vpack.c.bf16 %v5791_v49, %v5787_v48 }
 0x2c5   : > { %v5786_v55 = vld [vmem:[%s13700_s1 + $0x2e10] sm:$0xff] }
 0x2c6   : > { %7450 = vmatpush1.bf16.msra.mxu0 %v7449_v41  ;;  %v7593_v41 = vpack.c.bf16 %v5750_v59, %v5746_v57  ;;  %v5790_v57 = vld [vmem:[%s13700_s1 + $0x2e30] sm:$0xff]  ;;  %v5797_v59 = vld [vmem:[%s13700_s1 + $0x2e68] sm:$0xff] }
 0x2c7   : > { %7578 = vmatpush1.bf16.msra.mxu1 %v7577_v6  ;;  %7452 = vmatprep.subr.bf16.mxu0 %v7451_v7  ;;  %v5758_v6 = vld [vmem:[%s13700_s1 + $0x2d30] sm:$0xff]  ;;  %v5761_v7 = vld [vmem:[%s13700_s1 + $0x2d48] sm:$0xff]  ;;  %v7613_v4 = vpack.c.bf16 %v5790_v57, %v5786_v55 }
 0x2c8   : > { %7580 = vmatprep.subr.bf16.mxu1 %v7579_v11  ;;  %v7469_v11 = vpack.c.bf16 %v5756_v5, %v5752_v43  ;;  %v7597_v13 = vpack.c.bf16 %v5758_v6, %v5754_v12  ;;  %v7471_v14 = vpack.c.bf16 %v5765_v8, %v5761_v7  ;;  %v5794_v43 = vld [vmem:[%s13700_s1 + $0x2e50] sm:$0xff]  ;;  %v7615_v5 = vpack.c.bf16 %v5799_v2, %v5795_v1  ;;  %v5805_v6 = vld [vmem:[%s13700_s1 + $0x2ea8] sm:$0xff]  ;;  %v5803_v7 = vld [vmem:[%s13700_s1 + $0x2e98] sm:$0xff] }
 0x2c9   : > { %3620 = vmatmul.mubr.f32.vlgmr.msra.gmra.mrb[0].mxu0 %v3529_v26  ;;  %v5798_v12 = vld [vmem:[%s13700_s1 + $0x2e70] sm:$0xff]  ;;  %v5807_v8 = vld [vmem:[%s13700_s1 + $0x2eb8] sm:$0xff]  ;;  %v5837_v57 = vld [vmem:[%s13700_s1 + $0x2fa8] sm:$0xff] }
 0x2ca   : > { %7454 = vmatpush1.bf16.msra.mxu0 %v7453_v60  ;;  %3774 = vmatmul.mubr.f32.vlgmr.msra.gmra.mrb[0].mxu1 %v3529_v26  ;;  %v5766_v26 = vld [vmem:[%s13700_s1 + $0x2d70] sm:$0xff]  ;;  %v5769_v60 = vld [vmem:[%s13700_s1 + $0x2d88] sm:$0xff]  ;;  %v7617_v10 = vpack.c.bf16 %v5798_v12, %v5794_v43 }
 0x2cb   : > { %7582 = vmatpush1.bf16.msra.mxu1 %v7581_v63  ;;  %7456 = vmatprep.subr.bf16.mxu0 %v7455_v37  ;;  %v5775_v63 = vld [vmem:[%s13700_s1 + $0x2db8] sm:$0xff]  ;;  %v7473_v37 = vpack.c.bf16 %v5764_v23, %v5760_v15  ;;  %v7601_v0 = vpack.c.bf16 %v5766_v26, %v5762_v24  ;;  %v7475_v27 = vpack.c.bf16 %v5773_v61, %v5769_v60  ;;  %v5802_v15 = vld [vmem:[%s13700_s1 + $0x2e90] sm:$0xff]  ;;  %v5813_v26 = vld [vmem:[%s13700_s1 + $0x2ee8] sm:$0xff] }
 0x2cc   : > { %7584 = vmatprep.subr.bf16.mxu1 %v7583_v29  ;;  %3625 = vmatprep.mubr.f32.mxu0 %v3542_v35  ;;  %v5772_v29 = vld [vmem:[%s13700_s1 + $0x2da0] sm:$0xff]  ;;  %v7603_v31 = vpack.c.bf16 %v5775_v63, %v5771_v62  ;;  %v7619_v23 = vpack.c.bf16 %v5807_v8, %v5803_v7  ;;  %v5806_v24 = vld [vmem:[%s13700_s1 + $0x2eb0] sm:$0xff]  ;;  %v5811_v60 = vld [vmem:[%s13700_s1 + $0x2ed8] sm:$0xff] }
 0x2cd   : > { %3779 = vmatprep.mubr.f32.mxu1 %v3542_v35  ;;  %3626 = vmatmul.mubr.f32.gmra.mrb[2].mxu0 %v3540_v45  ;;  %v5779_v35 = vld [vmem:[%s13700_s1 + $0x2dd8] sm:$0xff]  ;;  %v7621_v63 = vpack.c.bf16 %v5806_v24, %v5802_v15  ;;  %v5830_v55 = vld [vmem:[%s13700_s1 + $0x2f70] sm:$0xff]  ;;  %v5845_v12 = vld [vmem:[%s13700_s1 + $0x2fe8] sm:$0xff] }
 0x2ce   : > { %7458 = vmatpush1.bf16.msra.mxu0 %v7457_v44  ;;  %3780 = vmatmul.mubr.f32.gmra.mrb[2].mxu1 %v3540_v45  ;;  %v7477_v44 = vpack.c.bf16 %v5772_v29, %v5768_v28  ;;  %v7605_v45 = vpack.c.bf16 %v5774_v32, %v5770_v30  ;;  %v7607_v18 = vpack.c.bf16 %v5783_v36, %v5779_v35  ;;  %v5815_v61 = vld [vmem:[%s13700_s1 + $0x2ef8] sm:$0xff]  ;;  %v5810_v28 = vld [vmem:[%s13700_s1 + $0x2ed0] sm:$0xff]  ;;  %v5821_v32 = vld [vmem:[%s13700_s1 + $0x2f28] sm:$0xff] }
 0x2cf   : > { %7586 = vmatpush1.bf16.msra.mxu1 %v7585_v46  ;;  %7460 = vmatprep.subr.bf16.mxu0 %v7459_v47  ;;  %v7479_v46 = vpack.c.bf16 %v5781_v34, %v5777_v33  ;;  %v5776_v47 = vld [vmem:[%s13700_s1 + $0x2dc0] sm:$0xff]  ;;  %v7623_v29 = vpack.c.bf16 %v5815_v61, %v5811_v60  ;;  %v5814_v30 = vld [vmem:[%s13700_s1 + $0x2ef0] sm:$0xff]  ;;  %v5819_v33 = vld [vmem:[%s13700_s1 + $0x2f18] sm:$0xff] }
 0x2d0   : > { %7588 = vmatprep.subr.bf16.mxu1 %v7587_v19  ;;  %3696 = vmatprep.mubr.f32.mxu0 %v3538_v51  ;;  %v5782_v19 = vld [vmem:[%s13700_s1 + $0x2df0] sm:$0xff]  ;;  %v7481_v50 = vpack.c.bf16 %v5780_v16, %v5776_v47  ;;  %v5823_v34 = vld [vmem:[%s13700_s1 + $0x2f38] sm:$0xff]  ;;  %v7625_v36 = vpack.c.bf16 %v5814_v30, %v5810_v28  ;;  %v5840_v8 = vld [vmem:[%s13700_s1 + $0x2fc0] sm:$0xff] }
 0x2d1   : > { %3850 = vmatprep.mubr.f32.mxu1 %v3538_v51  ;;  %v7609_v51 = vpack.c.bf16 %v5782_v19, %v5778_v17  ;;  %v5818_v47 = vld [vmem:[%s13700_s1 + $0x2f10] sm:$0xff]  ;;  %v7627_v16 = vpack.c.bf16 %v5823_v34, %v5819_v33  ;;  %v5829_v19 = vld [vmem:[%s13700_s1 + $0x2f68] sm:$0xff]  ;;  %v5855_v60 = vld [vmem:[%s13700_s1 + $0x3038] sm:$0xff] }
 0x2d2   : > { %7462 = vmatpush1.bf16.msra.mxu0 %v7461_v52  ;;  %v7483_v52 = vpack.c.bf16 %v5789_v22, %v5785_v21  ;;  %v5822_v17 = vld [vmem:[%s13700_s1 + $0x2f30] sm:$0xff]  ;;  %v5827_v21 = vld [vmem:[%s13700_s1 + $0x2f58] sm:$0xff]  ;;  %v5849_v24 = vld [vmem:[%s13700_s1 + $0x3008] sm:$0xff] }
 0x2d3   : > { %7590 = vmatpush1.bf16.msra.mxu1 %v7589_v53  ;;  %7464 = vmatprep.subr.bf16.mxu0 %v7463_v54  ;;  %v5784_v53 = vld [vmem:[%s13700_s1 + $0x2e00] sm:$0xff]  ;;  %v5831_v22 = vld [vmem:[%s13700_s1 + $0x2f78] sm:$0xff]  ;;  %v7629_v49 = vpack.c.bf16 %v5822_v17, %v5818_v47  ;;  %v5838_v43 = vld [vmem:[%s13700_s1 + $0x2fb0] sm:$0xff] }
 0x2d4   : > { %7592 = vmatprep.subr.bf16.mxu1 %v7591_v58  ;;  %v5788_v54 = vld [vmem:[%s13700_s1 + $0x2e20] sm:$0xff]  ;;  %v5793_v58 = vld [vmem:[%s13700_s1 + $0x2e48] sm:$0xff]  ;;  %v5854_v34 = vld [vmem:[%s13700_s1 + $0x3030] sm:$0xff] }
 0x2d5   : > { %v7485_v3 = vpack.c.bf16 %v5788_v54, %v5784_v53  ;;  %v5826_v53 = vld [vmem:[%s13700_s1 + $0x2f50] sm:$0xff]  ;;  %v7631_v54 = vpack.c.bf16 %v5831_v22, %v5827_v21  ;;  %v5852_v30 = vld [vmem:[%s13700_s1 + $0x3020] sm:$0xff] }
 0x2d6   : > { %7466 = vmatpush1.bf16.msra.mxu0 %v7465_v20  ;;  %v7487_v20 = vpack.c.bf16 %v5797_v59, %v5793_v58  ;;  %v5835_v58 = vld [vmem:[%s13700_s1 + $0x2f98] sm:$0xff]  ;;  %v7633_v2 = vpack.c.bf16 %v5830_v55, %v5826_v53  ;;  %v5856_v22 = vld [vmem:[%s13700_s1 + $0x3040] sm:$0xff]  ;;  %v5869_v53 = vld [vmem:[%s13700_s1 + $0x30a8] sm:$0xff] }
 0x2d7   : > { %7594 = vmatpush1.bf16.msra.mxu1 %v7593_v41  ;;  %7468 = vmatprep.subr.bf16.mxu0 %v7467_v42  ;;  %v5792_v41 = vld [vmem:[%s13700_s1 + $0x2e40] sm:$0xff]  ;;  %v5839_v59 = vld [vmem:[%s13700_s1 + $0x2fb8] sm:$0xff] }
 0x2d8   : > { %7596 = vmatprep.subr.bf16.mxu1 %v7595_v39  ;;  %v5796_v42 = vld [vmem:[%s13700_s1 + $0x2e60] sm:$0xff]  ;;  %v5801_v39 = vld [vmem:[%s13700_s1 + $0x2e88] sm:$0xff]  ;;  %v5871_v55 = vld [vmem:[%s13700_s1 + $0x30b8] sm:$0xff] }
 0x2d9   : > { %v7489_v9 = vpack.c.bf16 %v5796_v42, %v5792_v41  ;;  %v5834_v41 = vld [vmem:[%s13700_s1 + $0x2f90] sm:$0xff]  ;;  %v7635_v42 = vpack.c.bf16 %v5839_v59, %v5835_v58  ;;  %v12948_v58 = vld [vmem:[%s8369_s27 + $0x28] sm:$0xff] }
 0x2da   : > { %7470 = vmatpush1.bf16.msra.mxu0 %v7469_v11  ;;  %v7491_v11 = vpack.c.bf16 %v5805_v6, %v5801_v39  ;;  %v5843_v39 = vld [vmem:[%s13700_s1 + $0x2fd8] sm:$0xff]  ;;  %v4149_v59 = vrot.slane %v12948_v58, 6  ;;  %v5992_v58 = vld [vmem:[%s13700_s1 + $0x3480] sm:$0xff] }
 0x2db   : > { %7598 = vmatpush1.bf16.msra.mxu1 %v7597_v13  ;;  %7472 = vmatprep.subr.bf16.mxu0 %v7471_v14  ;;  %v5800_v13 = vld [vmem:[%s13700_s1 + $0x2e80] sm:$0xff]  ;;  %v5847_v6 = vld [vmem:[%s13700_s1 + $0x2ff8] sm:$0xff] }
 0x2dc   : > { %7600 = vmatprep.subr.bf16.mxu1 %v7599_v25  ;;  %v5804_v14 = vld [vmem:[%s13700_s1 + $0x2ea0] sm:$0xff]  ;;  %v5809_v25 = vld [vmem:[%s13700_s1 + $0x2ec8] sm:$0xff]  ;;  %v7639_v15 = vpack.c.bf16 %v5847_v6, %v5843_v39  ;;  %v5879_v39 = vld [vmem:[%s13700_s1 + $0x30f8] sm:$0xff] }
 0x2dd   : > { %v7493_v62 = vpack.c.bf16 %v5804_v14, %v5800_v13  ;;  %v5842_v13 = vld [vmem:[%s13700_s1 + $0x2fd0] sm:$0xff] }
 0x2de   : > { %7474 = vmatpush1.bf16.msra.mxu0 %v7473_v37  ;;  %v7495_v37 = vpack.c.bf16 %v5813_v26, %v5809_v25  ;;  %v3255_v14 = vld [vmem:[%s8369_s27 + $0x10] sm:$0xe0]  ;;  %v5853_v25 = vld [vmem:[%s13700_s1 + $0x3028] sm:$0xff]  ;;  %v5851_v26 = vld [vmem:[%s13700_s1 + $0x3018] sm:$0xff] }
 0x2df   : > { %7602 = vmatpush1.bf16.msra.mxu1 %v7601_v0  ;;  %7476 = vmatprep.subr.bf16.mxu0 %v7475_v27  ;;  %v5808_v0 = vld [vmem:[%s13700_s1 + $0x2ec0] sm:$0xff]  ;;  %v7771_v33 = vpack.c.bf16 %v5855_v60, %v5851_v26  ;;  %v5887_v26 = vld [vmem:[%s13700_s1 + $0x3138] sm:$0xff] }
 0x2e0   : > { %7604 = vmatprep.subr.bf16.mxu1 %v7603_v31  ;;  %v5812_v27 = vld [vmem:[%s13700_s1 + $0x2ee0] sm:$0xff]  ;;  %v5817_v31 = vld [vmem:[%s13700_s1 + $0x2f08] sm:$0xff] }
 0x2e1   : > { %v7497_v35 = vpack.c.bf16 %v5812_v27, %v5808_v0  ;;  %v5848_v0 = vld [vmem:[%s13700_s1 + $0x3000] sm:$0xff]  ;;  %v3260_v27 = vld [vmem:[%s8369_s27 + $0x58] sm:$0x1f] }
 0x2e2   : > { %7478 = vmatpush1.bf16.msra.mxu0 %v7477_v44  ;;  %v7499_v44 = vpack.c.bf16 %v5821_v32, %v5817_v31  ;;  %v5850_v31 = vld [vmem:[%s13700_s1 + $0x3010] sm:$0xff] }
 0x2e3   : > { %7606 = vmatpush1.bf16.msra.mxu1 %v7605_v45  ;;  %7480 = vmatprep.subr.bf16.mxu0 %v7479_v46  ;;  %v5816_v45 = vld [vmem:[%s13700_s1 + $0x2f00] sm:$0xff]  ;;  %v3259_v32 = vld [vmem:[%s8369_s27 + $0x50] sm:$0x1f] }
 0x2e4   : > { %7608 = vmatprep.subr.bf16.mxu1 %v7607_v18  ;;  %v5820_v46 = vld [vmem:[%s13700_s1 + $0x2f20] sm:$0xff]  ;;  %v5825_v18 = vld [vmem:[%s13700_s1 + $0x2f48] sm:$0xff]  ;;  %v3543_v17 = vrot.slane %v3259_v32, 5  ;;  %v5895_v32 = vld [vmem:[%s13700_s1 + $0x3178] sm:$0xff] }
 0x2e5   : > { %v7501_v48 = vpack.c.bf16 %v5820_v46, %v5816_v45  ;;  %v5863_v45 = vld [vmem:[%s13700_s1 + $0x3078] sm:$0xff]  ;;  %v3545_v46 = vrot.slane %v3260_v27, 5 }
 0x2e6   : > { %7482 = vmatpush1.bf16.msra.mxu0 %v7481_v50  ;;  %v7503_v50 = vpack.c.bf16 %v5829_v19, %v5825_v18  ;;  %v3872_v18 = vld [vmem:[%s8369_s27 + $0x8] sm:$0xc0]  ;;  %v7773_v19 = vpack.c.bf16 %v5854_v34, %v5850_v31  ;;  %v5891_v31 = vld [vmem:[%s13700_s1 + $0x3158] sm:$0xff] }
 0x2e7   : > { %7610 = vmatpush1.bf16.msra.mxu1 %v7609_v51  ;;  %7484 = vmatprep.subr.bf16.mxu0 %v7483_v52  ;;  %v5824_v51 = vld [vmem:[%s13700_s1 + $0x2f40] sm:$0xff] }
 0x2e8   : > { %7612 = vmatprep.subr.bf16.mxu1 %v7611_v56  ;;  %v5828_v52 = vld [vmem:[%s13700_s1 + $0x2f60] sm:$0xff]  ;;  %v5833_v56 = vld [vmem:[%s13700_s1 + $0x2f88] sm:$0xff] }
 0x2e9   : > { %v7505_v1 = vpack.c.bf16 %v5828_v52, %v5824_v51  ;;  %v5862_v51 = vld [vmem:[%s13700_s1 + $0x3070] sm:$0xff]  ;;  %v5865_v52 = vld [vmem:[%s13700_s1 + $0x3088] sm:$0xff] }
 0x2ea   : > { %7486 = vmatpush1.bf16.msra.mxu0 %v7485_v3  ;;  %v7507_v3 = vpack.c.bf16 %v5837_v57, %v5833_v56  ;;  %v3546_v56 = vsel %vm3526_vm4, %v3537_v40, %v3545_v46  ;;  %v4148_v57 = vrot.slane %v3872_v18, 6  ;;  %v5868_v40 = vld [vmem:[%s13700_s1 + $0x30a0] sm:$0xff]  ;;  %v7791_v46 = vpack.c.bf16 %v5895_v32, %v5891_v31  ;;  %v5899_v18 = vld [vmem:[%s13700_s1 + $0x3198] sm:$0xff] }
 0x2eb   : > { %7614 = vmatpush1.bf16.msra.mxu1 %v7613_v4  ;;  %7488 = vmatprep.subr.bf16.mxu0 %v7487_v20  ;;  %v5832_v4 = vld [vmem:[%s13700_s1 + $0x2f80] sm:$0xff] }
 0x2ec   : > { %7616 = vmatprep.subr.bf16.mxu1 %v7615_v5  ;;  %v5836_v20 = vld [vmem:[%s13700_s1 + $0x2fa0] sm:$0xff]  ;;  %v5841_v5 = vld [vmem:[%s13700_s1 + $0x2fc8] sm:$0xff]  ;;  %v4150_v6 = vsel %vm4144_vm5, %v4148_v57, %v4149_v59  ;;  %v5911_v57 = vld [vmem:[%s13700_s1 + $0x31f8] sm:$0xff] }
 0x2ed   : > { %v7509_v7 = vpack.c.bf16 %v5836_v20, %v5832_v4  ;;  %v7651_v4 = vpack.c.bf16 %v5869_v53, %v5865_v52  ;;  %v5866_v20 = vld [vmem:[%s13700_s1 + $0x3090] sm:$0xff] }
 0x2ee   : > { %7490 = vmatpush1.bf16.msra.mxu0 %v7489_v9  ;;  %v7637_v9 = vpack.c.bf16 %v5838_v43, %v5834_v41  ;;  %v5873_v43 = vld [vmem:[%s13700_s1 + $0x30c8] sm:$0xff]  ;;  %v5902_v53 = vld [vmem:[%s13700_s1 + $0x31b0] sm:$0xff] }
 0x2ef   : > { %7618 = vmatpush1.bf16.msra.mxu1 %v7617_v10  ;;  %7492 = vmatprep.subr.bf16.mxu0 %v7491_v11  ;;  %v7511_v10 = vpack.c.bf16 %v5845_v12, %v5841_v5  ;;  %v5844_v11 = vld [vmem:[%s13700_s1 + $0x2fe0] sm:$0xff]  ;;  %v5877_v5 = vld [vmem:[%s13700_s1 + $0x30e8] sm:$0xff]  ;;  %v5875_v12 = vld [vmem:[%s13700_s1 + $0x30d8] sm:$0xff] }
 0x2f0   : > { %7620 = vmatprep.subr.bf16.mxu1 %v7619_v23  ;;  %v5846_v23 = vld [vmem:[%s13700_s1 + $0x2ff0] sm:$0xff]  ;;  %v7513_v61 = vpack.c.bf16 %v5844_v11, %v5840_v8  ;;  %v5876_v11 = vld [vmem:[%s13700_s1 + $0x30e0] sm:$0xff] }
 0x2f1   : > { %v7641_v28 = vpack.c.bf16 %v5846_v23, %v5842_v13  ;;  %v5874_v13 = vld [vmem:[%s13700_s1 + $0x30d0] sm:$0xff]  ;;  %v5881_v23 = vld [vmem:[%s13700_s1 + $0x3108] sm:$0xff] }
 0x2f2   : > { %7494 = vmatpush1.bf16.msra.mxu0 %v7493_v62  ;;  %v3533_v62 = vrot.slane %v3255_v14, 5  ;;  %v7783_v14 = vpack.c.bf16 %v5879_v39, %v5875_v12  ;;  %v5919_v12 = vld [vmem:[%s13700_s1 + $0x3238] sm:$0xff] }
 0x2f3   : > { %7622 = vmatpush1.bf16.msra.mxu1 %v7621_v63  ;;  %7496 = vmatprep.subr.bf16.mxu0 %v7495_v37  ;;  %v8036_v63 = vld [vmem:[%s8369_s27 + $0x30] sm:$0xff] }
 0x2f4   : > { %7624 = vmatprep.subr.bf16.mxu1 %v7623_v29  ;;  %v3534_v37 = vrot.slane %v8036_v63, 5  ;;  %v7643_v29 = vpack.c.bf16 %v5853_v25, %v5849_v24  ;;  %v5885_v24 = vld [vmem:[%s13700_s1 + $0x3128] sm:$0xff]  ;;  %v5883_v25 = vld [vmem:[%s13700_s1 + $0x3118] sm:$0xff]  ;;  %v5880_v63 = vld [vmem:[%s13700_s1 + $0x3100] sm:$0xff] }
 0x2f5   : > { %v7787_v27 = vpack.c.bf16 %v5887_v26, %v5883_v25 }
 0x2f6   : > { %7498 = vmatpush1.bf16.msra.mxu0 %v7497_v35  ;;  %v5857_v35 = vld [vmem:[%s13700_s1 + $0x3048] sm:$0xff]  ;;  %v3535_v47 = vsel %vm3526_vm4, %v3533_v62, %v3534_v37  ;;  %v7659_v62 = vpack.c.bf16 %v5885_v24, %v5881_v23  ;;  %v5923_v23 = vld [vmem:[%s13700_s1 + $0x3258] sm:$0xff] }
 0x2f7   : > { %7626 = vmatpush1.bf16.msra.mxu1 %v7625_v36  ;;  %7500 = vmatprep.subr.bf16.mxu0 %v7499_v44  ;;  %v5861_v36 = vld [vmem:[%s13700_s1 + $0x3068] sm:$0xff]  ;;  %v5859_v44 = vld [vmem:[%s13700_s1 + $0x3058] sm:$0xff] }
 0x2f8   : > { %7628 = vmatprep.subr.bf16.mxu1 %v7627_v16  ;;  %v7645_v16 = vpack.c.bf16 %v5852_v30, %v5848_v0  ;;  %v7647_v21 = vpack.c.bf16 %v5861_v36, %v5857_v35  ;;  %v5882_v0 = vld [vmem:[%s13700_s1 + $0x3110] sm:$0xff]  ;;  %v5893_v30 = vld [vmem:[%s13700_s1 + $0x3168] sm:$0xff]  ;;  %v5888_v36 = vld [vmem:[%s13700_s1 + $0x3140] sm:$0xff] }
 0x2f9   : > { %v5927_v24 = vld [vmem:[%s13700_s1 + $0x3278] sm:$0xff] }
 0x2fa   : > { %7502 = vmatpush1.bf16.msra.mxu0 %v7501_v48  ;;  %v5860_v48 = vld [vmem:[%s13700_s1 + $0x3060] sm:$0xff] }
 0x2fb   : > { %7630 = vmatpush1.bf16.msra.mxu1 %v7629_v49  ;;  %7504 = vmatprep.subr.bf16.mxu0 %v7503_v50  ;;  %v5858_v49 = vld [vmem:[%s13700_s1 + $0x3050] sm:$0xff]  ;;  %v7775_v50 = vpack.c.bf16 %v5863_v45, %v5859_v44  ;;  %v5892_v44 = vld [vmem:[%s13700_s1 + $0x3160] sm:$0xff] }
 0x2fc   : > { %7632 = vmatprep.subr.bf16.mxu1 %v7631_v54  ;;  %v5867_v54 = vld [vmem:[%s13700_s1 + $0x3098] sm:$0xff]  ;;  %v5890_v45 = vld [vmem:[%s13700_s1 + $0x3150] sm:$0xff] }
 0x2fd   : > { %v7779_v41 = vpack.c.bf16 %v5871_v55, %v5867_v54  ;;  %v5905_v54 = vld [vmem:[%s13700_s1 + $0x31c8] sm:$0xff] }
 0x2fe   : > { %7506 = vmatpush1.bf16.msra.mxu0 %v7505_v1  ;;  %v7649_v1 = vpack.c.bf16 %v5860_v48, %v5856_v22  ;;  %v5909_v55 = vld [vmem:[%s13700_s1 + $0x31e8] sm:$0xff] }
 0x2ff   : > { %7634 = vmatpush1.bf16.msra.mxu1 %v7633_v2  ;;  %7508 = vmatprep.subr.bf16.mxu0 %v7507_v3  ;;  %v3544_v2 = vsel %vm3526_vm4, %v3534_v37, %v3543_v17  ;;  %v7777_v3 = vpack.c.bf16 %v5862_v51, %v5858_v49  ;;  %v5884_v37 = vld [vmem:[%s13700_s1 + $0x3120] sm:$0xff]  ;;  %v5901_v17 = vld [vmem:[%s13700_s1 + $0x31a8] sm:$0xff]  ;;  %v5898_v51 = vld [vmem:[%s13700_s1 + $0x3190] sm:$0xff] }
 0x300   : > { %7636 = vmatprep.subr.bf16.mxu1 %v7635_v42  ;;  %v5870_v42 = vld [vmem:[%s13700_s1 + $0x30b0] sm:$0xff]  ;;  %v5896_v49 = vld [vmem:[%s13700_s1 + $0x3180] sm:$0xff] }
 0x301   : > { %v7781_v8 = vpack.c.bf16 %v5870_v42, %v5866_v20  ;;  %v5913_v42 = vld [vmem:[%s13700_s1 + $0x3208] sm:$0xff] }
 0x302   : > { %7510 = vmatpush1.bf16.msra.mxu0 %v7509_v7  ;;  %v7653_v7 = vpack.c.bf16 %v5868_v40, %v5864_v38  ;;  %v5908_v38 = vld [vmem:[%s13700_s1 + $0x31e0] sm:$0xff]  ;;  %v5906_v40 = vld [vmem:[%s13700_s1 + $0x31d0] sm:$0xff] }
 0x303   : > { %7638 = vmatpush1.bf16.msra.mxu1 %v7637_v9  ;;  %7512 = vmatprep.subr.bf16.mxu0 %v7511_v10  ;;  %v7655_v9 = vpack.c.bf16 %v5877_v5, %v5873_v43  ;;  %v5872_v10 = vld [vmem:[%s13700_s1 + $0x30c0] sm:$0xff]  ;;  %v5917_v43 = vld [vmem:[%s13700_s1 + $0x3228] sm:$0xff]  ;;  %v5915_v5 = vld [vmem:[%s13700_s1 + $0x3218] sm:$0xff] }
 0x304   : > { %7640 = vmatprep.subr.bf16.mxu1 %v7639_v15  ;;  %v5878_v15 = vld [vmem:[%s13700_s1 + $0x30f0] sm:$0xff]  ;;  %v7657_v60 = vpack.c.bf16 %v5876_v11, %v5872_v10  ;;  %v7803_v11 = vpack.c.bf16 %v5919_v12, %v5915_v5 }
 0x305   : > { %v5914_v10 = vld [vmem:[%s13700_s1 + $0x3210] sm:$0xff] }
 0x306   : > { %7514 = vmatpush1.bf16.msra.mxu0 %v7513_v61  ;;  %v7785_v61 = vpack.c.bf16 %v5878_v15, %v5874_v13  ;;  %v5918_v13 = vld [vmem:[%s13700_s1 + $0x3230] sm:$0xff]  ;;  %v5925_v15 = vld [vmem:[%s13700_s1 + $0x3268] sm:$0xff] }
 0x307   : > { %7642 = vmatpush1.bf16.msra.mxu1 %v7641_v28  ;;  %7644 = vmatprep.subr.bf16.mxu0 %v7643_v29  ;;  %v5886_v28 = vld [vmem:[%s13700_s1 + $0x3130] sm:$0xff]  ;;  %v5889_v29 = vld [vmem:[%s13700_s1 + $0x3148] sm:$0xff]  ;;  %v7805_v26 = vpack.c.bf16 %v5918_v13, %v5914_v10 }
 0x308   : > { %7772 = vmatprep.subr.bf16.mxu1 %v7771_v33  ;;  %v7661_v33 = vpack.c.bf16 %v5884_v37, %v5880_v63  ;;  %v7789_v34 = vpack.c.bf16 %v5886_v28, %v5882_v0  ;;  %v7663_v35 = vpack.c.bf16 %v5893_v30, %v5889_v29  ;;  %v5922_v63 = vld [vmem:[%s13700_s1 + $0x3250] sm:$0xff]  ;;  %v7807_v37 = vpack.c.bf16 %v5927_v24, %v5923_v23  ;;  %v5933_v28 = vld [vmem:[%s13700_s1 + $0x32a8] sm:$0xff]  ;;  %v5931_v29 = vld [vmem:[%s13700_s1 + $0x3298] sm:$0xff] }
 0x309   : > { %3697 = vmatmul.mubr.f32.vlgmr.msra.gmra.mrb[0].mxu0 %v3535_v47  ;;  %v5926_v0 = vld [vmem:[%s13700_s1 + $0x3270] sm:$0xff]  ;;  %v5935_v30 = vld [vmem:[%s13700_s1 + $0x32b8] sm:$0xff]  ;;  %v5965_v13 = vld [vmem:[%s13700_s1 + $0x33a8] sm:$0xff] }
 0x30a   : > { %3851 = vmatmul.mubr.f32.vlgmr.msra.gmra.mrb[0].mxu1 %v3535_v47  ;;  %7646 = vmatpush1.bf16.msra.mxu0 %v7645_v16  ;;  %v5894_v47 = vld [vmem:[%s13700_s1 + $0x3170] sm:$0xff]  ;;  %v5897_v16 = vld [vmem:[%s13700_s1 + $0x3188] sm:$0xff]  ;;  %v7809_v32 = vpack.c.bf16 %v5926_v0, %v5922_v63 }
 0x30b   : > { %7774 = vmatpush1.bf16.msra.mxu1 %v7773_v19  ;;  %7648 = vmatprep.subr.bf16.mxu0 %v7647_v21  ;;  %v5903_v19 = vld [vmem:[%s13700_s1 + $0x31b8] sm:$0xff]  ;;  %v7665_v21 = vpack.c.bf16 %v5892_v44, %v5888_v36  ;;  %v7793_v22 = vpack.c.bf16 %v5894_v47, %v5890_v45  ;;  %v7667_v48 = vpack.c.bf16 %v5901_v17, %v5897_v16  ;;  %v5930_v36 = vld [vmem:[%s13700_s1 + $0x3290] sm:$0xff]  ;;  %v5941_v47 = vld [vmem:[%s13700_s1 + $0x32e8] sm:$0xff] }
 0x30c   : > { %7776 = vmatprep.subr.bf16.mxu1 %v7775_v50  ;;  %3702 = vmatprep.mubr.f32.mxu0 %v3546_v56  ;;  %v5900_v50 = vld [vmem:[%s13700_s1 + $0x31a0] sm:$0xff]  ;;  %v7795_v52 = vpack.c.bf16 %v5903_v19, %v5899_v18  ;;  %v7811_v44 = vpack.c.bf16 %v5935_v30, %v5931_v29  ;;  %v5934_v45 = vld [vmem:[%s13700_s1 + $0x32b0] sm:$0xff]  ;;  %v5939_v16 = vld [vmem:[%s13700_s1 + $0x32d8] sm:$0xff] }
 0x30d   : > { %3856 = vmatprep.mubr.f32.mxu1 %v3546_v56  ;;  %3703 = vmatmul.mubr.f32.gmra.mrb[2].mxu0 %v3544_v2  ;;  %v5907_v56 = vld [vmem:[%s13700_s1 + $0x31d8] sm:$0xff]  ;;  %v7813_v19 = vpack.c.bf16 %v5934_v45, %v5930_v36  ;;  %v5958_v10 = vld [vmem:[%s13700_s1 + $0x3370] sm:$0xff]  ;;  %v5973_v0 = vld [vmem:[%s13700_s1 + $0x33e8] sm:$0xff] }
 0x30e   : > { %7650 = vmatpush1.bf16.msra.mxu0 %v7649_v1  ;;  %3857 = vmatmul.mubr.f32.gmra.mrb[2].mxu1 %v3544_v2  ;;  %v7669_v1 = vpack.c.bf16 %v5900_v50, %v5896_v49  ;;  %v7797_v2 = vpack.c.bf16 %v5902_v53, %v5898_v51  ;;  %v7799_v20 = vpack.c.bf16 %v5911_v57, %v5907_v56  ;;  %v5943_v17 = vld [vmem:[%s13700_s1 + $0x32f8] sm:$0xff]  ;;  %v5938_v49 = vld [vmem:[%s13700_s1 + $0x32d0] sm:$0xff]  ;;  %v5949_v53 = vld [vmem:[%s13700_s1 + $0x3328] sm:$0xff] }
 0x30f   : > { %7778 = vmatpush1.bf16.msra.mxu1 %v7777_v3  ;;  %7652 = vmatprep.subr.bf16.mxu0 %v7651_v4  ;;  %v7671_v3 = vpack.c.bf16 %v5909_v55, %v5905_v54  ;;  %v5904_v4 = vld [vmem:[%s13700_s1 + $0x31c0] sm:$0xff]  ;;  %v7815_v50 = vpack.c.bf16 %v5943_v17, %v5939_v16  ;;  %v5942_v51 = vld [vmem:[%s13700_s1 + $0x32f0] sm:$0xff]  ;;  %v5947_v54 = vld [vmem:[%s13700_s1 + $0x3318] sm:$0xff] }
 0x310   : > { %7780 = vmatprep.subr.bf16.mxu1 %v7779_v41  ;;  %4237 = vmatprep.mubr.f32.mxu0 %v4150_v6  ;;  %v5910_v41 = vld [vmem:[%s13700_s1 + $0x31f0] sm:$0xff]  ;;  %v7673_v39 = vpack.c.bf16 %v5908_v38, %v5904_v4  ;;  %v5951_v55 = vld [vmem:[%s13700_s1 + $0x3338] sm:$0xff]  ;;  %v7817_v57 = vpack.c.bf16 %v5942_v51, %v5938_v49  ;;  %v5968_v30 = vld [vmem:[%s13700_s1 + $0x33c0] sm:$0xff] }
 0x311   : > { %4391 = vmatprep.mubr.f32.mxu1 %v4150_v6  ;;  %v7801_v6 = vpack.c.bf16 %v5910_v41, %v5906_v40  ;;  %v5946_v4 = vld [vmem:[%s13700_s1 + $0x3310] sm:$0xff]  ;;  %v7819_v38 = vpack.c.bf16 %v5951_v55, %v5947_v54  ;;  %v5957_v41 = vld [vmem:[%s13700_s1 + $0x3368] sm:$0xff]  ;;  %v5983_v16 = vld [vmem:[%s13700_s1 + $0x3438] sm:$0xff] }
 0x312   : > { %7654 = vmatpush1.bf16.msra.mxu0 %v7653_v7  ;;  %v7675_v7 = vpack.c.bf16 %v5917_v43, %v5913_v42  ;;  %v5950_v40 = vld [vmem:[%s13700_s1 + $0x3330] sm:$0xff]  ;;  %v5955_v42 = vld [vmem:[%s13700_s1 + $0x3358] sm:$0xff]  ;;  %v5977_v45 = vld [vmem:[%s13700_s1 + $0x3408] sm:$0xff] }
 0x313   : > { %7782 = vmatpush1.bf16.msra.mxu1 %v7781_v8  ;;  %7656 = vmatprep.subr.bf16.mxu0 %v7655_v9  ;;  %v5912_v8 = vld [vmem:[%s13700_s1 + $0x3200] sm:$0xff]  ;;  %v5959_v43 = vld [vmem:[%s13700_s1 + $0x3378] sm:$0xff]  ;;  %v7821_v12 = vpack.c.bf16 %v5950_v40, %v5946_v4  ;;  %v5966_v63 = vld [vmem:[%s13700_s1 + $0x33b0] sm:$0xff] }
 0x314   : > { %7784 = vmatprep.subr.bf16.mxu1 %v7783_v14  ;;  %v5916_v9 = vld [vmem:[%s13700_s1 + $0x3220] sm:$0xff]  ;;  %v5921_v14 = vld [vmem:[%s13700_s1 + $0x3248] sm:$0xff]  ;;  %v5982_v55 = vld [vmem:[%s13700_s1 + $0x3430] sm:$0xff] }
 0x315   : > { %v7677_v25 = vpack.c.bf16 %v5916_v9, %v5912_v8  ;;  %v5954_v8 = vld [vmem:[%s13700_s1 + $0x3350] sm:$0xff]  ;;  %v7823_v9 = vpack.c.bf16 %v5959_v43, %v5955_v42  ;;  %v5980_v51 = vld [vmem:[%s13700_s1 + $0x3420] sm:$0xff] }
 0x316   : > { %7658 = vmatpush1.bf16.msra.mxu0 %v7657_v60  ;;  %v7679_v60 = vpack.c.bf16 %v5925_v15, %v5921_v14  ;;  %v5963_v14 = vld [vmem:[%s13700_s1 + $0x3398] sm:$0xff]  ;;  %v7825_v24 = vpack.c.bf16 %v5958_v10, %v5954_v8  ;;  %v5984_v43 = vld [vmem:[%s13700_s1 + $0x3440] sm:$0xff]  ;;  %v5997_v8 = vld [vmem:[%s13700_s1 + $0x34a8] sm:$0xff] }
 0x317   : > { %7786 = vmatpush1.bf16.msra.mxu1 %v7785_v61  ;;  %7660 = vmatprep.subr.bf16.mxu0 %v7659_v62  ;;  %v5920_v61 = vld [vmem:[%s13700_s1 + $0x3240] sm:$0xff]  ;;  %v5967_v15 = vld [vmem:[%s13700_s1 + $0x33b8] sm:$0xff] }
 0x318   : > { %7788 = vmatprep.subr.bf16.mxu1 %v7787_v27  ;;  %v5924_v62 = vld [vmem:[%s13700_s1 + $0x3260] sm:$0xff]  ;;  %v5929_v27 = vld [vmem:[%s13700_s1 + $0x3288] sm:$0xff]  ;;  %v5999_v10 = vld [vmem:[%s13700_s1 + $0x34b8] sm:$0xff] }
 0x319   : > { %v7681_v31 = vpack.c.bf16 %v5924_v62, %v5920_v61  ;;  %v5962_v61 = vld [vmem:[%s13700_s1 + $0x3390] sm:$0xff]  ;;  %v7827_v62 = vpack.c.bf16 %v5967_v15, %v5963_v14  ;;  %v13349_v14 = vld [vmem:[%s8369_s27 + $0x38] sm:$0xff] }
 0x31a   : > { %7662 = vmatpush1.bf16.msra.mxu0 %v7661_v33  ;;  %v7683_v33 = vpack.c.bf16 %v5933_v28, %v5929_v27  ;;  %v5971_v27 = vld [vmem:[%s13700_s1 + $0x33d8] sm:$0xff]  ;;  %v4155_v15 = vrot.slane %v13349_v14, 6 }
 0x31b   : > { %7790 = vmatpush1.bf16.msra.mxu1 %v7789_v34  ;;  %7664 = vmatprep.subr.bf16.mxu0 %v7663_v35  ;;  %v5928_v34 = vld [vmem:[%s13700_s1 + $0x3280] sm:$0xff]  ;;  %v5975_v28 = vld [vmem:[%s13700_s1 + $0x33f8] sm:$0xff] }
 0x31c   : > { %7792 = vmatprep.subr.bf16.mxu1 %v7791_v46  ;;  %v5932_v35 = vld [vmem:[%s13700_s1 + $0x32a0] sm:$0xff]  ;;  %v5937_v46 = vld [vmem:[%s13700_s1 + $0x32c8] sm:$0xff]  ;;  %v7831_v36 = vpack.c.bf16 %v5975_v28, %v5971_v27  ;;  %v6007_v27 = vld [vmem:[%s13700_s1 + $0x34f8] sm:$0xff] }
 0x31d   : > { %v7685_v18 = vpack.c.bf16 %v5932_v35, %v5928_v34  ;;  %v5970_v34 = vld [vmem:[%s13700_s1 + $0x33d0] sm:$0xff]  ;;  %v3871_v35 = vld [vmem:[%s8369_s27] sm:$0xc0] }
 0x31e   : > { %7666 = vmatpush1.bf16.msra.mxu0 %v7665_v21  ;;  %v7687_v21 = vpack.c.bf16 %v5941_v47, %v5937_v46  ;;  %v5981_v46 = vld [vmem:[%s13700_s1 + $0x3428] sm:$0xff]  ;;  %v5979_v47 = vld [vmem:[%s13700_s1 + $0x3418] sm:$0xff] }
 0x31f   : > { %7794 = vmatpush1.bf16.msra.mxu1 %v7793_v22  ;;  %7668 = vmatprep.subr.bf16.mxu0 %v7667_v48  ;;  %v5936_v22 = vld [vmem:[%s13700_s1 + $0x32c0] sm:$0xff]  ;;  %v7835_v54 = vpack.c.bf16 %v5983_v16, %v5979_v47  ;;  %v6015_v47 = vld [vmem:[%s13700_s1 + $0x3538] sm:$0xff] }
 0x320   : > { %7796 = vmatprep.subr.bf16.mxu1 %v7795_v52  ;;  %v5940_v48 = vld [vmem:[%s13700_s1 + $0x32e0] sm:$0xff]  ;;  %v5945_v52 = vld [vmem:[%s13700_s1 + $0x3308] sm:$0xff] }
 0x321   : > { %v7689_v56 = vpack.c.bf16 %v5940_v48, %v5936_v22  ;;  %v5976_v22 = vld [vmem:[%s13700_s1 + $0x3400] sm:$0xff]  ;;  %v3876_v48 = vld [vmem:[%s8369_s27 + $0x48] sm:$0x3f] }
 0x322   : > { %7670 = vmatpush1.bf16.msra.mxu0 %v7669_v1  ;;  %v7691_v1 = vpack.c.bf16 %v5949_v53, %v5945_v52  ;;  %v5978_v52 = vld [vmem:[%s13700_s1 + $0x3410] sm:$0xff]  ;;  %v3875_v53 = vld [vmem:[%s8369_s27 + $0x40] sm:$0x3f] }
 0x323   : > { %7798 = vmatpush1.bf16.msra.mxu1 %v7797_v2  ;;  %7672 = vmatprep.subr.bf16.mxu0 %v7671_v3  ;;  %v5944_v2 = vld [vmem:[%s13700_s1 + $0x3300] sm:$0xff]  ;;  %v4157_v40 = vrot.slane %v3875_v53, 6  ;;  %v6023_v53 = vld [vmem:[%s13700_s1 + $0x3578] sm:$0xff] }
 0x324   : > { %7800 = vmatprep.subr.bf16.mxu1 %v7799_v20  ;;  %v5948_v3 = vld [vmem:[%s13700_s1 + $0x3320] sm:$0xff]  ;;  %v5953_v20 = vld [vmem:[%s13700_s1 + $0x3348] sm:$0xff] }
 0x325   : > { %v7693_v5 = vpack.c.bf16 %v5948_v3, %v5944_v2  ;;  %v5991_v2 = vld [vmem:[%s13700_s1 + $0x3478] sm:$0xff]  ;;  %v4159_v3 = vrot.slane %v3876_v48, 6 }
 0x326   : > { %7674 = vmatpush1.bf16.msra.mxu0 %v7673_v39  ;;  %v7695_v39 = vpack.c.bf16 %v5957_v41, %v5953_v20  ;;  %v3874_v20 = vld [vmem:[%s8369_s27 + $0x18] sm:$0xc0]  ;;  %v7837_v41 = vpack.c.bf16 %v5982_v55, %v5978_v52 }
 0x327   : > { %7802 = vmatpush1.bf16.msra.mxu1 %v7801_v6  ;;  %7676 = vmatprep.subr.bf16.mxu0 %v7675_v7  ;;  %v5952_v6 = vld [vmem:[%s13700_s1 + $0x3340] sm:$0xff]  ;;  %v6019_v52 = vld [vmem:[%s13700_s1 + $0x3558] sm:$0xff] }
 0x328   : > { %7804 = vmatprep.subr.bf16.mxu1 %v7803_v11  ;;  %v5956_v7 = vld [vmem:[%s13700_s1 + $0x3360] sm:$0xff]  ;;  %v5961_v11 = vld [vmem:[%s13700_s1 + $0x3388] sm:$0xff] }
 0x329   : > { %v7697_v23 = vpack.c.bf16 %v5956_v7, %v5952_v6  ;;  %v5990_v6 = vld [vmem:[%s13700_s1 + $0x3470] sm:$0xff]  ;;  %v5993_v7 = vld [vmem:[%s13700_s1 + $0x3488] sm:$0xff] }
 0x32a   : > { %7678 = vmatpush1.bf16.msra.mxu0 %v7677_v25  ;;  %v7699_v25 = vpack.c.bf16 %v5965_v13, %v5961_v11  ;;  %v4160_v11 = vsel %vm4144_vm5, %v4149_v59, %v4159_v3  ;;  %v4154_v13 = vrot.slane %v3874_v20, 6  ;;  %v5996_v59 = vld [vmem:[%s13700_s1 + $0x34a0] sm:$0xff]  ;;  %v7855_v3 = vpack.c.bf16 %v6023_v53, %v6019_v52  ;;  %v6027_v20 = vld [vmem:[%s13700_s1 + $0x3598] sm:$0xff] }
 0x32b   : > { %7806 = vmatpush1.bf16.msra.mxu1 %v7805_v26  ;;  %7680 = vmatprep.subr.bf16.mxu0 %v7679_v60  ;;  %v5960_v26 = vld [vmem:[%s13700_s1 + $0x3380] sm:$0xff] }
 0x32c   : > { %7808 = vmatprep.subr.bf16.mxu1 %v7807_v37  ;;  %v5964_v60 = vld [vmem:[%s13700_s1 + $0x33a0] sm:$0xff]  ;;  %v5969_v37 = vld [vmem:[%s13700_s1 + $0x33c8] sm:$0xff]  ;;  %v4156_v28 = vsel %vm4144_vm5, %v4154_v13, %v4155_v15  ;;  %v6039_v13 = vld [vmem:[%s13700_s1 + $0x35f8] sm:$0xff] }
 0x32d   : > { %v7701_v29 = vpack.c.bf16 %v5964_v60, %v5960_v26  ;;  %v7715_v26 = vpack.c.bf16 %v5997_v8, %v5993_v7  ;;  %v5994_v60 = vld [vmem:[%s13700_s1 + $0x3490] sm:$0xff] }
 0x32e   : > { %7682 = vmatpush1.bf16.msra.mxu0 %v7681_v31  ;;  %v7829_v31 = vpack.c.bf16 %v5966_v63, %v5962_v61  ;;  %v6001_v63 = vld [vmem:[%s13700_s1 + $0x34c8] sm:$0xff]  ;;  %v6030_v8 = vld [vmem:[%s13700_s1 + $0x35b0] sm:$0xff] }
 0x32f   : > { %7810 = vmatpush1.bf16.msra.mxu1 %v7809_v32  ;;  %7684 = vmatprep.subr.bf16.mxu0 %v7683_v33  ;;  %v7703_v32 = vpack.c.bf16 %v5973_v0, %v5969_v37  ;;  %v5972_v33 = vld [vmem:[%s13700_s1 + $0x33e0] sm:$0xff]  ;;  %v6005_v37 = vld [vmem:[%s13700_s1 + $0x34e8] sm:$0xff]  ;;  %v6003_v0 = vld [vmem:[%s13700_s1 + $0x34d8] sm:$0xff] }
 0x330   : > { %7812 = vmatprep.subr.bf16.mxu1 %v7811_v44  ;;  %v5974_v44 = vld [vmem:[%s13700_s1 + $0x33f0] sm:$0xff]  ;;  %v7705_v17 = vpack.c.bf16 %v5972_v33, %v5968_v30  ;;  %v6004_v33 = vld [vmem:[%s13700_s1 + $0x34e0] sm:$0xff] }
 0x331   : > { %v7833_v49 = vpack.c.bf16 %v5974_v44, %v5970_v34  ;;  %v6002_v34 = vld [vmem:[%s13700_s1 + $0x34d0] sm:$0xff]  ;;  %v6009_v44 = vld [vmem:[%s13700_s1 + $0x3508] sm:$0xff] }
 0x332   : > { %7686 = vmatpush1.bf16.msra.mxu0 %v7685_v18  ;;  %v4145_v18 = vrot.slane %v3871_v35, 6  ;;  %v7847_v35 = vpack.c.bf16 %v6007_v27, %v6003_v0  ;;  %v6047_v0 = vld [vmem:[%s13700_s1 + $0x3638] sm:$0xff] }
 0x333   : > { %7814 = vmatpush1.bf16.msra.mxu1 %v7813_v19  ;;  %7688 = vmatprep.subr.bf16.mxu0 %v7687_v21  ;;  %v8038_v19 = vld [vmem:[%s8369_s27 + $0x20] sm:$0xff] }
 0x334   : > { %7816 = vmatprep.subr.bf16.mxu1 %v7815_v50  ;;  %v4146_v21 = vrot.slane %v8038_v19, 6  ;;  %v7707_v50 = vpack.c.bf16 %v5981_v46, %v5977_v45  ;;  %v6013_v45 = vld [vmem:[%s13700_s1 + $0x3528] sm:$0xff]  ;;  %v6011_v46 = vld [vmem:[%s13700_s1 + $0x3518] sm:$0xff]  ;;  %v6008_v19 = vld [vmem:[%s13700_s1 + $0x3500] sm:$0xff] }
 0x335   : > { %v7851_v48 = vpack.c.bf16 %v6015_v47, %v6011_v46 }
 0x336   : > { %7690 = vmatpush1.bf16.msra.mxu0 %v7689_v56  ;;  %v5985_v56 = vld [vmem:[%s13700_s1 + $0x3448] sm:$0xff]  ;;  %v4147_v4 = vsel %vm4144_vm5, %v4145_v18, %v4146_v21  ;;  %v7723_v18 = vpack.c.bf16 %v6013_v45, %v6009_v44  ;;  %v6051_v44 = vld [vmem:[%s13700_s1 + $0x3658] sm:$0xff] }
 0x337   : > { %7818 = vmatpush1.bf16.msra.mxu1 %v7817_v57  ;;  %7692 = vmatprep.subr.bf16.mxu0 %v7691_v1  ;;  %v5989_v57 = vld [vmem:[%s13700_s1 + $0x3468] sm:$0xff]  ;;  %v5987_v1 = vld [vmem:[%s13700_s1 + $0x3458] sm:$0xff] }
 0x338   : > { %7820 = vmatprep.subr.bf16.mxu1 %v7819_v38  ;;  %v7709_v38 = vpack.c.bf16 %v5980_v51, %v5976_v22  ;;  %v7711_v42 = vpack.c.bf16 %v5989_v57, %v5985_v56  ;;  %v6010_v22 = vld [vmem:[%s13700_s1 + $0x3510] sm:$0xff]  ;;  %v6021_v51 = vld [vmem:[%s13700_s1 + $0x3568] sm:$0xff]  ;;  %v6016_v57 = vld [vmem:[%s13700_s1 + $0x3540] sm:$0xff] }
 0x339   : > { %v6055_v45 = vld [vmem:[%s13700_s1 + $0x3678] sm:$0xff] }
 0x33a   : > { %7694 = vmatpush1.bf16.msra.mxu0 %v7693_v5  ;;  %v5988_v5 = vld [vmem:[%s13700_s1 + $0x3460] sm:$0xff] }
 0x33b   : > { %7822 = vmatpush1.bf16.msra.mxu1 %v7821_v12  ;;  %7696 = vmatprep.subr.bf16.mxu0 %v7695_v39  ;;  %v5986_v12 = vld [vmem:[%s13700_s1 + $0x3450] sm:$0xff]  ;;  %v7839_v39 = vpack.c.bf16 %v5991_v2, %v5987_v1  ;;  %v6020_v1 = vld [vmem:[%s13700_s1 + $0x3560] sm:$0xff] }
 0x33c   : > { %7824 = vmatprep.subr.bf16.mxu1 %v7823_v9  ;;  %v5995_v9 = vld [vmem:[%s13700_s1 + $0x3498] sm:$0xff]  ;;  %v6018_v2 = vld [vmem:[%s13700_s1 + $0x3550] sm:$0xff] }
 0x33d   : > { %v7843_v61 = vpack.c.bf16 %v5999_v10, %v5995_v9  ;;  %v6033_v9 = vld [vmem:[%s13700_s1 + $0x35c8] sm:$0xff] }
 0x33e   : > { %7698 = vmatpush1.bf16.msra.mxu0 %v7697_v23  ;;  %v7713_v23 = vpack.c.bf16 %v5988_v5, %v5984_v43  ;;  %v6037_v10 = vld [vmem:[%s13700_s1 + $0x35e8] sm:$0xff] }
 0x33f   : > { %7826 = vmatpush1.bf16.msra.mxu1 %v7825_v24  ;;  %7700 = vmatprep.subr.bf16.mxu0 %v7699_v25  ;;  %v4158_v24 = vsel %vm4144_vm5, %v4146_v21, %v4157_v40  ;;  %v7841_v25 = vpack.c.bf16 %v5990_v6, %v5986_v12  ;;  %v6012_v21 = vld [vmem:[%s13700_s1 + $0x3520] sm:$0xff]  ;;  %v6029_v40 = vld [vmem:[%s13700_s1 + $0x35a8] sm:$0xff]  ;;  %v6026_v6 = vld [vmem:[%s13700_s1 + $0x3590] sm:$0xff] }
 0x340   : > { %7828 = vmatprep.subr.bf16.mxu1 %v7827_v62  ;;  %v5998_v62 = vld [vmem:[%s13700_s1 + $0x34b0] sm:$0xff]  ;;  %v6024_v12 = vld [vmem:[%s13700_s1 + $0x3580] sm:$0xff] }
 0x341   : > { %v7845_v30 = vpack.c.bf16 %v5998_v62, %v5994_v60  ;;  %v6041_v62 = vld [vmem:[%s13700_s1 + $0x3608] sm:$0xff] }
 0x342   : > { %7702 = vmatpush1.bf16.msra.mxu0 %v7701_v29  ;;  %v7717_v29 = vpack.c.bf16 %v5996_v59, %v5992_v58  ;;  %v6036_v58 = vld [vmem:[%s13700_s1 + $0x35e0] sm:$0xff]  ;;  %v6034_v59 = vld [vmem:[%s13700_s1 + $0x35d0] sm:$0xff] }
 0x343   : > { %7830 = vmatpush1.bf16.msra.mxu1 %v7829_v31  ;;  %7704 = vmatprep.subr.bf16.mxu0 %v7703_v32  ;;  %v7719_v31 = vpack.c.bf16 %v6005_v37, %v6001_v63  ;;  %v6000_v32 = vld [vmem:[%s13700_s1 + $0x34c0] sm:$0xff]  ;;  %v6045_v63 = vld [vmem:[%s13700_s1 + $0x3628] sm:$0xff]  ;;  %v6043_v37 = vld [vmem:[%s13700_s1 + $0x3618] sm:$0xff] }
 0x344   : > { %7832 = vmatprep.subr.bf16.mxu1 %v7831_v36  ;;  %v6006_v36 = vld [vmem:[%s13700_s1 + $0x34f0] sm:$0xff]  ;;  %v7721_v16 = vpack.c.bf16 %v6004_v33, %v6000_v32  ;;  %v7867_v33 = vpack.c.bf16 %v6047_v0, %v6043_v37 }
 0x345   : > { %v6042_v32 = vld [vmem:[%s13700_s1 + $0x3610] sm:$0xff] }
 0x346   : > { %7706 = vmatpush1.bf16.msra.mxu0 %v7705_v17  ;;  %v7849_v17 = vpack.c.bf16 %v6006_v36, %v6002_v34  ;;  %v6046_v34 = vld [vmem:[%s13700_s1 + $0x3630] sm:$0xff]  ;;  %v6053_v36 = vld [vmem:[%s13700_s1 + $0x3668] sm:$0xff] }
 0x347   : > { %7834 = vmatpush1.bf16.msra.mxu1 %v7833_v49  ;;  %7708 = vmatprep.subr.bf16.mxu0 %v7707_v50  ;;  %v6014_v49 = vld [vmem:[%s13700_s1 + $0x3530] sm:$0xff]  ;;  %v6017_v50 = vld [vmem:[%s13700_s1 + $0x3548] sm:$0xff]  ;;  %v7869_v47 = vpack.c.bf16 %v6046_v34, %v6042_v32 }
 0x348   : > { %7836 = vmatprep.subr.bf16.mxu1 %v7835_v54  ;;  %v7725_v54 = vpack.c.bf16 %v6012_v21, %v6008_v19  ;;  %v7853_v55 = vpack.c.bf16 %v6014_v49, %v6010_v22  ;;  %v7727_v56 = vpack.c.bf16 %v6021_v51, %v6017_v50  ;;  %v6050_v19 = vld [vmem:[%s13700_s1 + $0x3650] sm:$0xff]  ;;  %v7871_v21 = vpack.c.bf16 %v6055_v45, %v6051_v44  ;;  %v6061_v49 = vld [vmem:[%s13700_s1 + $0x36a8] sm:$0xff]  ;;  %v6059_v50 = vld [vmem:[%s13700_s1 + $0x3698] sm:$0xff] }
 0x349   : > { %4238 = vmatmul.mubr.f32.vlgmr.msra.gmra.mrb[0].mxu0 %v4147_v4  ;;  %v6054_v22 = vld [vmem:[%s13700_s1 + $0x3670] sm:$0xff]  ;;  %v6063_v51 = vld [vmem:[%s13700_s1 + $0x36b8] sm:$0xff]  ;;  %v6093_v34 = vld [vmem:[%s13700_s1 + $0x37a8] sm:$0xff] }
 0x34a   : > { %7710 = vmatpush1.bf16.msra.mxu0 %v7709_v38  ;;  %4392 = vmatmul.mubr.f32.vlgmr.msra.gmra.mrb[0].mxu1 %v4147_v4  ;;  %v6022_v4 = vld [vmem:[%s13700_s1 + $0x3570] sm:$0xff]  ;;  %v6025_v38 = vld [vmem:[%s13700_s1 + $0x3588] sm:$0xff]  ;;  %v7873_v53 = vpack.c.bf16 %v6054_v22, %v6050_v19 }
 0x34b   : > { %7838 = vmatpush1.bf16.msra.mxu1 %v7837_v41  ;;  %7712 = vmatprep.subr.bf16.mxu0 %v7711_v42  ;;  %v6031_v41 = vld [vmem:[%s13700_s1 + $0x35b8] sm:$0xff]  ;;  %v7729_v42 = vpack.c.bf16 %v6020_v1, %v6016_v57  ;;  %v7857_v43 = vpack.c.bf16 %v6022_v4, %v6018_v2  ;;  %v7731_v5 = vpack.c.bf16 %v6029_v40, %v6025_v38  ;;  %v6058_v57 = vld [vmem:[%s13700_s1 + $0x3690] sm:$0xff]  ;;  %v6069_v4 = vld [vmem:[%s13700_s1 + $0x36e8] sm:$0xff] }
 0x34c   : > { %7840 = vmatprep.subr.bf16.mxu1 %v7839_v39  ;;  %4243 = vmatprep.mubr.f32.mxu0 %v4160_v11  ;;  %v6028_v39 = vld [vmem:[%s13700_s1 + $0x35a0] sm:$0xff]  ;;  %v7859_v7 = vpack.c.bf16 %v6031_v41, %v6027_v20  ;;  %v7875_v1 = vpack.c.bf16 %v6063_v51, %v6059_v50  ;;  %v6062_v2 = vld [vmem:[%s13700_s1 + $0x36b0] sm:$0xff]  ;;  %v6067_v38 = vld [vmem:[%s13700_s1 + $0x36d8] sm:$0xff] }
 0x34d   : > { %4397 = vmatprep.mubr.f32.mxu1 %v4160_v11  ;;  %4244 = vmatmul.mubr.f32.gmra.mrb[2].mxu0 %v4158_v24  ;;  %v6035_v11 = vld [vmem:[%s13700_s1 + $0x35d8] sm:$0xff]  ;;  %v7877_v41 = vpack.c.bf16 %v6062_v2, %v6058_v57  ;;  %v6086_v32 = vld [vmem:[%s13700_s1 + $0x3770] sm:$0xff]  ;;  %v6101_v22 = vld [vmem:[%s13700_s1 + $0x37e8] sm:$0xff] }
 0x34e   : > { %7714 = vmatpush1.bf16.msra.mxu0 %v7713_v23  ;;  %4398 = vmatmul.mubr.f32.gmra.mrb[2].mxu1 %v4158_v24  ;;  %v7733_v23 = vpack.c.bf16 %v6028_v39, %v6024_v12  ;;  %v7861_v24 = vpack.c.bf16 %v6030_v8, %v6026_v6  ;;  %v7863_v60 = vpack.c.bf16 %v6039_v13, %v6035_v11  ;;  %v6071_v40 = vld [vmem:[%s13700_s1 + $0x36f8] sm:$0xff]  ;;  %v6066_v12 = vld [vmem:[%s13700_s1 + $0x36d0] sm:$0xff]  ;;  %v6077_v8 = vld [vmem:[%s13700_s1 + $0x3728] sm:$0xff] }
 0x34f   : > { %7842 = vmatpush1.bf16.msra.mxu1 %v7841_v25  ;;  %7716 = vmatprep.subr.bf16.mxu0 %v7715_v26  ;;  %v7735_v25 = vpack.c.bf16 %v6037_v10, %v6033_v9  ;;  %v6032_v26 = vld [vmem:[%s13700_s1 + $0x35c0] sm:$0xff]  ;;  %v7879_v39 = vpack.c.bf16 %v6071_v40, %v6067_v38  ;;  %v6070_v6 = vld [vmem:[%s13700_s1 + $0x36f0] sm:$0xff]  ;;  %v6075_v9 = vld [vmem:[%s13700_s1 + $0x3718] sm:$0xff] }
 0x350   : > { %7844 = vmatprep.subr.bf16.mxu1 %v7843_v61  ;;  %4314 = vmatprep.mubr.f32.mxu0 %v4156_v28  ;;  %v6038_v61 = vld [vmem:[%s13700_s1 + $0x35f0] sm:$0xff]  ;;  %v7737_v27 = vpack.c.bf16 %v6036_v58, %v6032_v26  ;;  %v6079_v10 = vld [vmem:[%s13700_s1 + $0x3738] sm:$0xff]  ;;  %v7881_v13 = vpack.c.bf16 %v6070_v6, %v6066_v12  ;;  %v173_v6 = vlaneseq }
 0x351   : > { %4468 = vmatprep.mubr.f32.mxu1 %v4156_v28  ;;  %v7865_v28 = vpack.c.bf16 %v6038_v61, %v6034_v59  ;;  %v6074_v26 = vld [vmem:[%s13700_s1 + $0x3710] sm:$0xff]  ;;  %v7883_v58 = vpack.c.bf16 %v6079_v10, %v6075_v9  ;;  %v6085_v61 = vld [vmem:[%s13700_s1 + $0x3768] sm:$0xff]  ;;  %v3878_v2 = vld [vmem:[%s8369_s27 + $0x58] sm:$0x3f] }
 0x352   : > { %7718 = vmatpush1.bf16.msra.mxu0 %v7717_v29  ;;  %v7739_v29 = vpack.c.bf16 %v6045_v63, %v6041_v62  ;;  %v6078_v59 = vld [vmem:[%s13700_s1 + $0x3730] sm:$0xff]  ;;  %v6083_v62 = vld [vmem:[%s13700_s1 + $0x3758] sm:$0xff]  ;;  %v171_v9 = vld [vmem:[%s13701_s2] sm:$0xf] }
 0x353   : > { %7846 = vmatpush1.bf16.msra.mxu1 %v7845_v30  ;;  %7720 = vmatprep.subr.bf16.mxu0 %v7719_v31  ;;  %v6040_v30 = vld [vmem:[%s13700_s1 + $0x3600] sm:$0xff]  ;;  %v6087_v63 = vld [vmem:[%s13700_s1 + $0x3778] sm:$0xff]  ;;  %v7885_v0 = vpack.c.bf16 %v6078_v59, %v6074_v26  ;;  %v6094_v19 = vld [vmem:[%s13700_s1 + $0x37b0] sm:$0xff] }
 0x354   : > { %7848 = vmatprep.subr.bf16.mxu1 %v7847_v35  ;;  %v6044_v31 = vld [vmem:[%s13700_s1 + $0x3620] sm:$0xff]  ;;  %v6049_v35 = vld [vmem:[%s13700_s1 + $0x3648] sm:$0xff]  ;;  %v6098_v57 = vld [vmem:[%s13700_s1 + $0x37d0] sm:$0xff] }
 0x355   : > { %v7741_v46 = vpack.c.bf16 %v6044_v31, %v6040_v30  ;;  %v6082_v30 = vld [vmem:[%s13700_s1 + $0x3750] sm:$0xff]  ;;  %v7887_v31 = vpack.c.bf16 %v6087_v63, %v6083_v62 }
 0x356   : > { %7722 = vmatpush1.bf16.msra.mxu0 %v7721_v16  ;;  %v7743_v16 = vpack.c.bf16 %v6053_v36, %v6049_v35  ;;  %v6091_v35 = vld [vmem:[%s13700_s1 + $0x3798] sm:$0xff]  ;;  %v7889_v45 = vpack.c.bf16 %v6086_v32, %v6082_v30  ;;  %v8040_v38 = vld [vmem:[%s8369_s27 + $0x30] sm:$0xff] }
 0x357   : > { %7850 = vmatpush1.bf16.msra.mxu1 %v7849_v17  ;;  %7724 = vmatprep.subr.bf16.mxu0 %v7723_v18  ;;  %v6048_v17 = vld [vmem:[%s13700_s1 + $0x3640] sm:$0xff]  ;;  %v6095_v36 = vld [vmem:[%s13700_s1 + $0x37b8] sm:$0xff]  ;;  %v4152_v40 = vrot.slane %v8040_v38, 6 }
 0x358   : > { %7852 = vmatprep.subr.bf16.mxu1 %v7851_v48  ;;  %v6052_v18 = vld [vmem:[%s13700_s1 + $0x3660] sm:$0xff]  ;;  %v6057_v48 = vld [vmem:[%s13700_s1 + $0x3688] sm:$0xff] }
 0x359   : > { %v7745_v52 = vpack.c.bf16 %v6052_v18, %v6048_v17  ;;  %v6090_v17 = vld [vmem:[%s13700_s1 + $0x3790] sm:$0xff]  ;;  %v7891_v18 = vpack.c.bf16 %v6095_v36, %v6091_v35 }
 0x35a   : > { %7726 = vmatpush1.bf16.msra.mxu0 %v7725_v54  ;;  %v7747_v54 = vpack.c.bf16 %v6061_v49, %v6057_v48  ;;  %v6099_v48 = vld [vmem:[%s13700_s1 + $0x37d8] sm:$0xff]  ;;  %v7893_v51 = vpack.c.bf16 %v6094_v19, %v6090_v17 }
 0x35b   : > { %7854 = vmatpush1.bf16.msra.mxu1 %v7853_v55  ;;  %7728 = vmatprep.subr.bf16.mxu0 %v7727_v56  ;;  %v6056_v55 = vld [vmem:[%s13700_s1 + $0x3680] sm:$0xff]  ;;  %v6103_v49 = vld [vmem:[%s13700_s1 + $0x37f8] sm:$0xff] }
 0x35c   : > { %7856 = vmatprep.subr.bf16.mxu1 %v7855_v3  ;;  %v6060_v56 = vld [vmem:[%s13700_s1 + $0x36a0] sm:$0xff]  ;;  %v6065_v3 = vld [vmem:[%s13700_s1 + $0x36c8] sm:$0xff] }
 0x35d   : > { %v7749_v20 = vpack.c.bf16 %v6060_v56, %v6056_v55  ;;  %v3873_v55 = vld [vmem:[%s8369_s27 + $0x10] sm:$0xc0]  ;;  %v7895_v56 = vpack.c.bf16 %v6103_v49, %v6099_v48 }
 0x35e   : > { %7730 = vmatpush1.bf16.msra.mxu0 %v7729_v42  ;;  %v7751_v42 = vpack.c.bf16 %v6069_v4, %v6065_v3  ;;  %v4151_v4 = vrot.slane %v3873_v55, 6 }
 0x35f   : > { %7858 = vmatpush1.bf16.msra.mxu1 %v7857_v43  ;;  %7732 = vmatprep.subr.bf16.mxu0 %v7731_v5  ;;  %v6064_v43 = vld [vmem:[%s13700_s1 + $0x36c0] sm:$0xff] }
 0x360   : > { %7860 = vmatprep.subr.bf16.mxu1 %v7859_v7  ;;  %v6068_v5 = vld [vmem:[%s13700_s1 + $0x36e0] sm:$0xff]  ;;  %v6073_v7 = vld [vmem:[%s13700_s1 + $0x3708] sm:$0xff] }
 0x361   : > { %v7753_v11 = vpack.c.bf16 %v6068_v5, %v6064_v43  ;;  %v4153_v43 = vsel %vm4144_vm5, %v4151_v4, %v4152_v40 }
 0x362   : > { %7734 = vmatpush1.bf16.msra.mxu0 %v7733_v23  ;;  %v7755_v23 = vpack.c.bf16 %v6077_v8, %v6073_v7  ;;  %v174_v7 = vshrl.u32 %v173_v6, 7 }
 0x363   : > { %7862 = vmatpush1.bf16.msra.mxu1 %v7861_v24  ;;  %7736 = vmatprep.subr.bf16.mxu0 %v7735_v25  ;;  %v6072_v24 = vld [vmem:[%s13700_s1 + $0x3700] sm:$0xff] }
 0x364   : > { %7864 = vmatprep.subr.bf16.mxu1 %v7863_v60  ;;  %v6076_v25 = vld [vmem:[%s13700_s1 + $0x3720] sm:$0xff]  ;;  %v6081_v60 = vld [vmem:[%s13700_s1 + $0x3748] sm:$0xff]  ;;  %v175_v8 = vsub.s32 0, %v174_v7  ;;  %v183_v10 = vsub.s32 2, %v174_v7  ;;  %v179_v14 = vsub.s32 1, %v174_v7 }
 0x365   : > { %v7757_v37 = vpack.c.bf16 %v6076_v25, %v6072_v24 }
 0x366   : > { %7738 = vmatpush1.bf16.msra.mxu0 %v7737_v27  ;;  %v7759_v27 = vpack.c.bf16 %v6085_v61, %v6081_v60 }
 0x367   : > { %7866 = vmatpush1.bf16.msra.mxu1 %v7865_v28  ;;  %7740 = vmatprep.subr.bf16.mxu0 %v7739_v29  ;;  %v6080_v28 = vld [vmem:[%s13700_s1 + $0x3740] sm:$0xff] }
 0x368   : > { %7868 = vmatprep.subr.bf16.mxu1 %v7867_v33  ;;  %v6084_v29 = vld [vmem:[%s13700_s1 + $0x3760] sm:$0xff]  ;;  %v6089_v33 = vld [vmem:[%s13700_s1 + $0x3788] sm:$0xff] }
 0x369   : > { %v7761_v44 = vpack.c.bf16 %v6084_v29, %v6080_v28 }
 0x36a   : > { %7742 = vmatpush1.bf16.msra.mxu0 %v7741_v46  ;;  %v7763_v46 = vpack.c.bf16 %v6093_v34, %v6089_v33 }
 0x36b   : > { %7870 = vmatpush1.bf16.msra.mxu1 %v7869_v47  ;;  %7744 = vmatprep.subr.bf16.mxu0 %v7743_v16  ;;  %v6088_v47 = vld [vmem:[%s13700_s1 + $0x3780] sm:$0xff] }
 0x36c   : > { %7872 = vmatprep.subr.bf16.mxu1 %v7871_v21  ;;  %v6092_v16 = vld [vmem:[%s13700_s1 + $0x37a0] sm:$0xff]  ;;  %v6097_v21 = vld [vmem:[%s13700_s1 + $0x37c8] sm:$0xff] }
 0x36d   : > { %v7765_v50 = vpack.c.bf16 %v6092_v16, %v6088_v47 }
 0x36e   : > { %7746 = vmatpush1.bf16.msra.mxu0 %v7745_v52  ;;  %v7767_v52 = vpack.c.bf16 %v6101_v22, %v6097_v21 }
 0x36f   : > { %7874 = vmatpush1.bf16.msra.mxu1 %v7873_v53  ;;  %7748 = vmatprep.subr.bf16.mxu0 %v7747_v54  ;;  %v6096_v53 = vld [vmem:[%s13700_s1 + $0x37c0] sm:$0xff] }
 0x370   : > { %7876 = vmatprep.subr.bf16.mxu1 %v7875_v1  ;;  %v6100_v54 = vld [vmem:[%s13700_s1 + $0x37e0] sm:$0xff]  ;;  %v6102_v1 = vld [vmem:[%s13700_s1 + $0x37f0] sm:$0xff] }
 0x371   : > { %v7769_v3 = vpack.c.bf16 %v6100_v54, %v6096_v53 }
 0x372   : > { %7750 = vmatpush1.bf16.msra.mxu0 %v7749_v20  ;;  %v7897_v20 = vpack.c.bf16 %v6102_v1, %v6098_v57 }
 0x373   : > { %7878 = vmatpush1.bf16.msra.mxu1 %v7877_v41  ;;  %7752 = vmatprep.subr.bf16.mxu0 %v7751_v42  ;;  %v4163_v41 = vrot.slane %v3878_v2, 6  ;;  %v3877_v42 = vld [vmem:[%s8369_s27 + $0x50] sm:$0x3f] }
 0x374   : > { %7880 = vmatprep.subr.bf16.mxu1 %v7879_v39  ;;  %v4161_v5 = vrot.slane %v3877_v42, 6 }
 0x375   : > { %v4164_v12 = vsel %vm4144_vm5, %v4155_v15, %v4163_v41  ;;  %v176_v15 = vrot.slane %v171_v9, %v175_v8 }
 0x376   : > { %7754 = vmatpush1.bf16.msra.mxu0 %v7753_v11  ;;  %v4162_v39 = vsel %vm4144_vm5, %v4152_v40, %v4161_v5  ;;  %v187_v11 = vsub.s32 3, %v174_v7 }
 0x377   : > { %7882 = vmatpush1.bf16.msra.mxu1 %v7881_v13  ;;  %7756 = vmatprep.subr.bf16.mxu0 %v7755_v23  ;;  %v184_v13 = vrot.slane %v171_v9, %v183_v10  ;;  %v180_v23 = vrot.slane %v171_v9, %v179_v14 }
 0x378   : > { %7884 = vmatprep.subr.bf16.mxu1 %v7883_v58  ;;  %v188_v24 = vrot.slane %v171_v9, %v187_v11 }
 0x37a   : > { %7758 = vmatpush1.bf16.msra.mxu0 %v7757_v37 }
 0x37b   : > { %7886 = vmatpush1.bf16.msra.mxu1 %v7885_v0  ;;  %7760 = vmatprep.subr.bf16.mxu0 %v7759_v27 }
 0x37c   : > { %7888 = vmatprep.subr.bf16.mxu1 %v7887_v31 }
 0x37e   : > { %7762 = vmatpush1.bf16.msra.mxu0 %v7761_v44 }
 0x37f   : > { %7890 = vmatpush1.bf16.msra.mxu1 %v7889_v45  ;;  %7764 = vmatprep.subr.bf16.mxu0 %v7763_v46 }
 0x380   : > { %7892 = vmatprep.subr.bf16.mxu1 %v7891_v18 }
 0x382   : > { %7766 = vmatpush1.bf16.msra.mxu0 %v7765_v50 }
 0x383   : > { %7894 = vmatpush1.bf16.msra.mxu1 %v7893_v51  ;;  %7768 = vmatprep.subr.bf16.mxu0 %v7767_v52 }
 0x384   : > { %7896 = vmatprep.subr.bf16.mxu1 %v7895_v56 }
 0x386   : > { %7770 = vmatpush1.bf16.msra.mxu0 %v7769_v3 }
 0x387   : > { %7898 = vmatpush1.bf16.msra.mxu1 %v7897_v20 }
 0x389   : > { %4315 = vmatmul.mubr.f32.vlgmr.msra.gmra.mrb[0].mxu0 %v4153_v43 }
 0x38a   : > { %4469 = vmatmul.mubr.f32.vlgmr.msra.gmra.mrb[0].mxu1 %v4153_v43  ;;  %4320 = vmatprep.mubr.f32.mxu0 %v4164_v12 }
 0x38b   : > { %4474 = vmatprep.mubr.f32.mxu1 %v4164_v12 }
 0x38d   : > { %4321 = vmatmul.mubr.f32.gmra.mrb[2].mxu0 %v4162_v39 }
 0x38e   : > { %4475 = vmatmul.mubr.f32.gmra.mrb[2].mxu1 %v4162_v39 }
 0x45c   : > { %v4316_v25 = vpop.f32.mrb[0].mxu0 }
 0x45d   : > { %v7899_v26 = vadd.f32 %v4316_v25, %v176_v15  ;;  %v4470_v58 = vpop.f32.mrb[0].mxu1  ;;  %v4318_v59 = vpop.f32.mrb[1].mxu0 }
 0x45e   : > { %v7903_v60 = vadd.f32 %v4470_v58, %v184_v13  ;;  %v7900_v61 = vadd.f32 %v4318_v59, %v180_v23  ;;  %v4472_v62 = vpop.f32.mrb[1].mxu1 }
 0x45f   : > { %v4489_v63 = vmax.f32 %v7899_v26, 0.0  ;;  %v7904_v37 = vadd.f32 %v4472_v62, %v188_v24 }
 0x460   : > { %v4491_v0 = vmax.f32 %v7903_v60, 0.0  ;;  %v4490_v27 = vmax.f32 %v7900_v61, 0.0  ;;  %v4322_v28 = vpop.f32.mrb[2].mxu0 }
 0x461   : > { %4497 = vst [vmem:[%s170_s23] sm:$0xff] %v4489_v63  ;;  %v4492_v29 = vmax.f32 %v7904_v37, 0.0  ;;  %v7901_v30 = vadd.f32 %v4322_v28, %v176_v15  ;;  %v4476_v31 = vpop.f32.mrb[2].mxu1  ;;  %v4324_v32 = vpop.f32.mrb[3].mxu0 }
 0x462   : > { %4499 = vst [vmem:[%s170_s23 + $0x10] sm:$0xff] %v4491_v0  ;;  %4498 = vst [vmem:[%s170_s23 + $0x8] sm:$0xff] %v4490_v27  ;;  %v7905_v33 = vadd.f32 %v4476_v31, %v184_v13  ;;  %v7902_v34 = vadd.f32 %v4324_v32, %v180_v23  ;;  %v4478_v35 = vpop.f32.mrb[3].mxu1 }
 0x463   : > { %4500 = vst [vmem:[%s170_s23 + $0x18] sm:$0xff] %v4492_v29  ;;  %v4493_v36 = vmax.f32 %v7901_v30, 0.0  ;;  %v7906_v44 = vadd.f32 %v4478_v35, %v188_v24 }
 0x464   : > { %v4495_v45 = vmax.f32 %v7905_v33, 0.0  ;;  %v4494_v46 = vmax.f32 %v7902_v34, 0.0 }
 0x465   : > { %4501 = vst [vmem:[%s170_s23 + $0x20] sm:$0xff] %v4493_v36  ;;  %v4496_v47 = vmax.f32 %v7906_v44, 0.0 }
 0x466   : > { %4503 = vst [vmem:[%s170_s23 + $0x30] sm:$0xff] %v4495_v45  ;;  %4502 = vst [vmem:[%s170_s23 + $0x28] sm:$0xff] %v4494_v46 }
 0x467   : > { %4504 = vst [vmem:[%s170_s23 + $0x38] sm:$0xff] %v4496_v47 }
 0x468 PF: > { %s13_s12 = sadd.s32 1, %s8047_s12  }
 0x469   : > { %p10_p4 = scmp.ge.s32.totalorder %s13_s12, 4  }
 0x46b   :  { %12 = sbr.rel (!%p10_p4) target bundleno = 1 (0x1), region = 68 }

</bundles_post_ra>
